<compile_context>
chip_gen: v7x
topology: tpu7x:2x2x1
jax: 0.10.0
libtpu: 0.0.40
codegen_flags: <defaults>
</compile_context>

<pallas_src>
import functools
import math

import jax
import jax.numpy as jnp
from jax import lax
from jax.experimental import pallas as pl
from jax.experimental.pallas import tpu as pltpu


# ----------------------------------------------------------------------------
# small helpers
# ----------------------------------------------------------------------------
def _dot(a, b):
    return jnp.dot(a, b, preferred_element_type=jnp.float32)


def _relu(x):
    return jnp.maximum(x, 0.0)


def _maxabs(x):
    # max |x_ij| as a (1, 1) array (avoid rank-0 reductions in-kernel).
    return jnp.max(jnp.max(jnp.abs(x), axis=1, keepdims=True), axis=0, keepdims=True)


# ----------------------------------------------------------------------------
# The single fused kernel
# ----------------------------------------------------------------------------
def _inecn_fused_kernel(*refs, fw_mitr):
    (rm_ref, sm_ref, rn_ref, f0_ref, e0_ref, h_ref, a_ref, k0_ref, x0_ref, kap_ref,
     # mlp_ve1 (layer0 split into [P1 | P2 | E0] row blocks)
     ve1a, ve1b, ve1c, ve1b0, ve1w1, ve1b1, ve1w2, ve1b2,
     # mlp_vv1 (layer0 split into [Hv | node_data])
     vv1a, vv1b, vv1b0, vv1w1, vv1b1,
     # W1 = cat(w1_1, w1_2, w1_1).T split into [P1 | P2 | E0] row blocks
     w1a, w1b, w1c, w1b0,
     # mlp_ee1
     ee1w0, ee1b0_, ee1w1, ee1b1_,
     # mlp_ee2 (layer0 split into [ER1 | Ra_data])
     ee2a, ee2b, ee2b0_, ee2w1, ee2b1_,
     # mlp_ve2 (layer0 split into [Q1 | Q2 | He2])
     ve2a, ve2b, ve2c, ve2b0, ve2w1, ve2b1, ve2w2, ve2b2,
     # mlp_vv2 (layer0 split into [Hv | node_data])
     vv2a, vv2b, vv2b0, vv2w1, vv2b1,
     # W2 = cat(w2_1, w2_2, w2_1).T split into [Q1 | Q2 | He2] row blocks
     w2a, w2b, w2c, w2b0,
     # mlp_ee3
     ee3w0, ee3b0_, ee3w1, ee3b1_,
     # mlp_ee4 (layer0 split into [ER2 | Ra_data])
     ee4a, ee4b, ee4b0_, ee4w1, ee4b1_,
     # outputs
     hv_out, he3_out, logits_out,
     # scratch
     bvec) = refs

    rm = rm_ref[...]          # (m, n)  = R
    sm = sm_ref[...]          # (m, n)  = S.T
    rn = rn_ref[...]          # (n, m)  = R.T
    f0 = f0_ref[...]          # (n, d_v)
    e0 = e0_ref[...]          # (m, d_e)

    # ---------------- Preprocessor, stage 1 ----------------
    p1 = _dot(rm, f0)                                          # (m, d_v)
    p2 = _dot(sm, f0)                                          # (m, d_v)
    # node branch: mlp_ve1 -> R @ He -> mlp_vv1
    h1 = _relu(_dot(p1, ve1a[...]) + _dot(p2, ve1b[...]) + _dot(e0, ve1c[...]) + ve1b0[...])
    h1 = _relu(_dot(h1, ve1w1[...]) + ve1b1[...])
    he1 = _dot(h1, ve1w2[...]) + ve1b2[...]                    # (m, q)
    hv1 = _dot(rn, he1)                                        # (n, q)
    z1 = _relu(_dot(hv1, vv1a[...]) + _dot(f0, vv1b[...]) + vv1b0[...])
    hv2 = _relu(_dot(z1, vv1w1[...]) + vv1b1[...])             # (n, inter)
    # edge branch: W1-linear -> mlp_ee1 -> mlp_ee2
    g1 = _relu(_dot(p1, w1a[...]) + _dot(p2, w1b[...]) + _dot(e0, w1c[...]) + w1b0[...])
    g1 = _relu(_dot(g1, ee1w0[...]) + ee1b0_[...])
    er1 = _dot(g1, ee1w1[...]) + ee1b1_[...]                   # (m, q)
    t1 = _relu(_dot(er1, ee2a[...]) + _dot(e0, ee2b[...]) + ee2b0_[...])
    he2 = _relu(_dot(t1, ee2w1[...]) + ee2b1_[...])            # (m, inter)

    # ---------------- Preprocessor, stage 2 ----------------
    q1 = _dot(rm, hv2)                                         # (m, inter)
    q2 = _dot(sm, hv2)                                         # (m, inter)
    h2 = _relu(_dot(q1, ve2a[...]) + _dot(q2, ve2b[...]) + _dot(he2, ve2c[...]) + ve2b0[...])
    h2 = _relu(_dot(h2, ve2w1[...]) + ve2b1[...])
    he_2 = _dot(h2, ve2w2[...]) + ve2b2[...]                   # (m, q)
    hvn = _dot(rn, he_2)                                       # (n, q)
    z2 = _relu(_dot(hvn, vv2a[...]) + _dot(f0, vv2b[...]) + vv2b0[...])
    hv3 = _relu(_dot(z2, vv2w1[...]) + vv2b1[...])             # (n, p)

    g2 = _relu(_dot(q1, w2a[...]) + _dot(q2, w2b[...]) + _dot(he2, w2c[...]) + w2b0[...])
    g2 = _relu(_dot(g2, ee3w0[...]) + ee3b0_[...])
    er2 = _dot(g2, ee3w1[...]) + ee3b1_[...]                   # (m, q)
    t2 = _relu(_dot(er2, ee4a[...]) + _dot(e0, ee4b[...]) + ee4b0_[...])
    logits = _dot(t2, ee4w1[...]) + ee4b1_[...]                # (m, d_e)
    logits_out[...] = logits
    mx = jnp.max(logits, axis=1, keepdims=True)
    ex = jnp.exp(logits - mx)
    he3_out[...] = ex / jnp.sum(ex, axis=1, keepdims=True)     # exact row-softmax

    # ---------------- bias_vec = vec_row(Hv3.T) (no reshapes/transposes) ----
    n_nodes, p_dim = hv3.shape
    lane_ids = lax.broadcasted_iota(jnp.int32, (1, p_dim), 1)
    for i in range(p_dim):
        sel = jnp.where(lane_ids == i, 1.0, 0.0)               # pick column i
        col = jnp.sum(hv3 * sel, axis=1, keepdims=True)        # (n, 1) = Hv3[:, i]
        bvec[i * n_nodes:(i + 1) * n_nodes, :] = col
    bias_v = bvec[...]                                         # (p*n, 1)

    # ---------------- Perron eigenvalue of H @ H.T via power iteration ------
    # TODO(synk): torch.linalg.eig has no Pallas equivalent; M = H H^T is PSD,
    # so repeated squaring + Rayleigh quotient gives its max eigenvalue.
    h = h_ref[...]
    gram = lax.dot_general(h, h, (((1,), (1,)), ((), ())),
                           preferred_element_type=jnp.float32)  # (n, n)
    mm = gram / _maxabs(gram)
    for _ in range(8):                       # ~256 power-iteration steps
        mm = _dot(mm, mm)
        mm = mm / _maxabs(mm)
    w0 = 1.0 + 0.125 * lax.broadcasted_iota(jnp.int32, (n_nodes, 1), 0).astype(jnp.float32)
    v = _dot(mm, w0)                                           # ~ top eigenvector
    gv = _dot(gram, v)
    pf = (jnp.sum(v * gv, axis=0, keepdims=True)
          / jnp.sum(v * v, axis=0, keepdims=True))             # (1, 1)

    # ---------------- inf-norm projection + fixed point ---------------------
    # TODO(synk): ImplicitNECFunction_Lite / projection_NEC_DGT sources are not
    # provided; phi is assumed ReLU and the projection rescales A = W_ev@W_ve
    # so that max|a_ij| <= kappa/pf (matches the in-file reference).
    kap = kap_ref[0] / pf                                      # (1, 1)
    norm_a = _maxabs(a_ref[...])
    scale = jnp.where(norm_a > kap, kap / norm_a, jnp.ones_like(kap))
    kmat = k0_ref[...] * scale                                 # (p*n, p*n) = kron(A_s, H.T)

    # fully unrolled (fw_mitr is a static Python int): one MXU op per step.
    x = x0_ref[...]                                            # (p*n, 1)
    for _ in range(fw_mitr):
        x = _relu(_dot(kmat, x) + bias_v)

    hv_out[...] = bias_v + x                                   # Hv = Hv.T + X*


# ----------------------------------------------------------------------------
# Parameter initialization (raw, PyTorch-like layout: wt = W.T, b = bias)
# ----------------------------------------------------------------------------
def _init_linear(key, in_f, out_f):
    kw, kb = jax.random.split(key)
    bound = 1.0 / math.sqrt(in_f)
    w = jax.random.uniform(kw, (out_f, in_f), jnp.float32, -bound, bound)
    b = jax.random.uniform(kb, (out_f,), jnp.float32, -bound, bound)
    return {"wt": w.T, "b": b}


def _init_mlp(key, layer_dims):
    keys = jax.random.split(key, len(layer_dims))
    return [_init_linear(k, fi, fo) for k, (fi, fo) in zip(keys, layer_dims)]


def _trunc_normal(key, shape, std):
    return std * jax.random.truncated_normal(key, -2.0, 2.0, shape, jnp.float32)


def init_params(key, d_v, d_e, p, q, inter=5, hidden=50):
    keys = jax.random.split(key, 16)
    pre = {
        "mlp_ve1": _init_mlp(keys[0], [(2 * d_v + d_e, hidden), (hidden, hidden), (hidden, q)]),
        "mlp_vv1": _init_mlp(keys[1], [(q + d_v, hidden), (hidden, inter)]),
        "mlp_ee1": _init_mlp(keys[2], [(hidden, hidden), (hidden, q)]),
        "mlp_ee2": _init_mlp(keys[3], [(q + d_e, hidden), (hidden, inter)]),
        "mlp_ve2": _init_mlp(keys[4], [(3 * inter, hidden), (hidden, hidden), (hidden, q)]),
        "mlp_vv2": _init_mlp(keys[5], [(q + d_v, hidden), (hidden, p)]),
        "mlp_ee3": _init_mlp(keys[6], [(hidden, hidden), (hidden, q)]),
        "mlp_ee4": _init_mlp(keys[7], [(q + d_e, hidden), (hidden, d_e)]),
        "w1_1": _trunc_normal(keys[8], (hidden, d_v), 0.1),
        "w1_2": _trunc_normal(keys[9], (hidden, d_e), 0.1),
        "b1": jnp.zeros((hidden,), jnp.float32),
        "w2_1": _trunc_normal(keys[10], (hidden, inter), 0.1),
        "w2_2": _trunc_normal(keys[11], (hidden, inter), 0.1),
        "b2": jnp.zeros((hidden,), jnp.float32),
    }
    stdv = 1.0 / math.sqrt(p * q)
    return {
        "pre": pre,
        "W_ve": jax.random.uniform(keys[12], (q, p), jnp.float32, -stdv, stdv),
        "W_ev": jax.random.uniform(keys[13], (p, q), jnp.float32, -stdv, stdv),
        # Omega_1 / Omega_2 exist in the PyTorch __init__ but are unused in forward.
        "Omega_1": jax.random.uniform(keys[14], (d_v, p), jnp.float32, -stdv, stdv),
        "Omega_2": jax.random.uniform(keys[15], (d_e, p), jnp.float32, -stdv, stdv),
    }


# ----------------------------------------------------------------------------
# Static weight plumbing, done ONCE (hoisted out of the per-call program):
# pre-transposed weights, W1/W2 concatenations, split first-layer row blocks,
# biases as (1, out) rows -- all in the exact order the kernel unpacks them.
# ----------------------------------------------------------------------------
def prepare_params(params):
    pre = params["pre"]
    dv = pre["w1_1"].shape[1]
    de = pre["w1_2"].shape[1]
    q = params["W_ve"].shape[0]
    inter = pre["w2_1"].shape[1]

    ve1, vv1 = pre["mlp_ve1"], pre["mlp_vv1"]
    ee1, ee2 = pre["mlp_ee1"], pre["mlp_ee2"]
    ve2, vv2 = pre["mlp_ve2"], pre["mlp_vv2"]
    ee3, ee4 = pre["mlp_ee3"], pre["mlp_ee4"]

    ve1_0, vv1_0 = ve1[0]["wt"], vv1[0]["wt"]
    ee2_0, ve2_0 = ee2[0]["wt"], ve2[0]["wt"]
    vv2_0, ee4_0 = vv2[0]["wt"], ee4[0]["wt"]
    w1full = jnp.concatenate([pre["w1_1"], pre["w1_2"], pre["w1_1"]], axis=1).T  # (2dv+de, 50)
    w2full = jnp.concatenate([pre["w2_1"], pre["w2_2"], pre["w2_1"]], axis=1).T  # (3*inter, 50)

    r = lambda b: b.reshape(1, -1)
    weights = [
        # mlp_ve1
        ve1_0[:dv], ve1_0[dv:2 * dv], ve1_0[2 * dv:], r(ve1[0]["b"]),
        ve1[1]["wt"], r(ve1[1]["b"]), ve1[2]["wt"], r(ve1[2]["b"]),
        # mlp_vv1
        vv1_0[:q], vv1_0[q:], r(vv1[0]["b"]), vv1[1]["wt"], r(vv1[1]["b"]),
        # W1 linear
        w1full[:dv], w1full[dv:2 * dv], w1full[2 * dv:], r(pre["b1"]),
        # mlp_ee1
        ee1[0]["wt"], r(ee1[0]["b"]), ee1[1]["wt"], r(ee1[1]["b"]),
        # mlp_ee2
        ee2_0[:q], ee2_0[q:], r(ee2[0]["b"]), ee2[1]["wt"], r(ee2[1]["b"]),
        # mlp_ve2
        ve2_0[:inter], ve2_0[inter:2 * inter], ve2_0[2 * inter:], r(ve2[0]["b"]),
        ve2[1]["wt"], r(ve2[1]["b"]), ve2[2]["wt"], r(ve2[2]["b"]),
        # mlp_vv2
        vv2_0[:q], vv2_0[q:], r(vv2[0]["b"]), vv2[1]["wt"], r(vv2[1]["b"]),
        # W2 linear
        w2full[:inter], w2full[inter:2 * inter], w2full[2 * inter:], r(pre["b2"]),
        # mlp_ee3
        ee3[0]["wt"], r(ee3[0]["b"]), ee3[1]["wt"], r(ee3[1]["b"]),
        # mlp_ee4
        ee4_0[:q], ee4_0[q:], r(ee4[0]["b"]), ee4[1]["wt"], r(ee4[1]["b"]),
    ]
    weights = tuple(jnp.asarray(w, jnp.float32) for w in weights)
    return {"W_ev": params["W_ev"], "W_ve": params["W_ve"], "weights": weights}


# ----------------------------------------------------------------------------
# Forward pass: one fused Pallas kernel + a few scalar-size XLA glue ops.
# ----------------------------------------------------------------------------
@functools.partial(jax.jit, static_argnames=("fw_mitr",))
def inecn_forward(kparams, X_0, R, S, H, E0, F0, kappa=0.99, fw_mitr=50):
    p, n = X_0.shape
    m, de = E0.shape

    # Tiny XLA glue (all sub-KB, fused by XLA before the single kernel launch):
    A = _dot(kparams["W_ev"], kparams["W_ve"])                 # (p, p)
    K0 = jnp.kron(A, H.T)                                      # (p*n, p*n), row-major vec
    x0v = X_0.reshape(p * n, 1)
    kap_arr = jnp.asarray(kappa, jnp.float32).reshape(1)

    ops = [R, S.T, R.T, F0, E0, H, A, K0, x0v, kap_arr] + list(kparams["weights"])
    in_specs = [pl.BlockSpec(memory_space=pltpu.MemorySpace.VMEM)] * len(ops)
    in_specs[9] = pl.BlockSpec(memory_space=pltpu.MemorySpace.SMEM)   # kappa scalar

    out_shape = (
        jax.ShapeDtypeStruct((p * n, 1), jnp.float32),   # vec(Hv.T + X*)
        jax.ShapeDtypeStruct((m, de), jnp.float32),      # He3 (softmax)
        jax.ShapeDtypeStruct((m, de), jnp.float32),      # He_logits3
    )

    hv_vec, He3, He_logits3 = pl.pallas_call(
        functools.partial(_inecn_fused_kernel, fw_mitr=fw_mitr),
        out_shape=out_shape,
        in_specs=in_specs,
        scratch_shapes=[pltpu.VMEM((p * n, 1), jnp.float32)],
    )(*ops)

    Hv_out = hv_vec.reshape(p, n)
    return Hv_out, He3, He_logits3


# ----------------------------------------------------------------------------
# Pure-JAX reference (mirrors the PyTorch code) for a numerical sanity check
# ----------------------------------------------------------------------------
def _reference_forward(params, X_0, R, S, H, E0, F0, kappa, fw_mitr):
    pre = params["pre"]
    relu = lambda v: jnp.maximum(v, 0.0)

    def linear(x, lyr):
        return x @ lyr["wt"] + lyr["b"]

    def mlp(layers, x, flags):
        for lyr, rf in zip(layers, flags):
            x = linear(x, lyr)
            if rf:
                x = relu(x)
        return x

    M = H @ H.T
    pf = jnp.max(jnp.linalg.eigvalsh(M))
    kap = kappa / pf
    A = params["W_ev"] @ params["W_ve"]
    norm_XY = jnp.max(jnp.abs(A))                 # torch.norm(., inf) with dim=None
    scale = jnp.where(norm_XY > kap, jnp.sqrt(kap / norm_XY), 1.0)
    W_ev = params["W_ev"] * scale
    W_ve = params["W_ve"] * scale

    R_enc, node_data, Ra_data = R.T, F0, E0
    B1 = jnp.concatenate([node_data.T @ R_enc, node_data.T @ S, Ra_data.T], axis=0)
    He = mlp(pre["mlp_ve1"], B1.T, [True, True, False])
    Hv = jnp.concatenate([R_enc @ He, node_data], axis=1)
    Hv2 = mlp(pre["mlp_vv1"], Hv, [True, True])
    W1 = jnp.concatenate([pre["w1_1"], pre["w1_2"], pre["w1_1"]], axis=1)
    He = relu(B1.T @ W1.T + pre["b1"])
    ER1 = mlp(pre["mlp_ee1"], He, [True, False])
    He2 = mlp(pre["mlp_ee2"], jnp.concatenate([ER1, Ra_data], axis=1), [True, True])
    B2 = jnp.concatenate([Hv2.T @ R_enc, Hv2.T @ S, He2.T], axis=0)
    He = mlp(pre["mlp_ve2"], B2.T, [True, True, False])
    Hv = jnp.concatenate([R_enc @ He, node_data], axis=1)
    Hv3 = mlp(pre["mlp_vv2"], Hv, [True, True])
    W2 = jnp.concatenate([pre["w2_1"], pre["w2_2"], pre["w2_1"]], axis=1)
    He = relu(B2.T @ W2.T + pre["b2"])
    ER2 = mlp(pre["mlp_ee3"], He, [True, False])
    He_logits3 = mlp(pre["mlp_ee4"], jnp.concatenate([ER2, Ra_data], axis=1), [True, False])
    He3 = jax.nn.softmax(He_logits3, axis=1)

    bias = Hv3.T

    def body(_, x):
        return relu(W_ev @ (W_ve @ x) @ H + bias)

    X = lax.fori_loop(0, fw_mitr, body, X_0)
    return bias + X, He3, He_logits3


# ----------------------------------------------------------------------------
# Main
# ----------------------------------------------------------------------------
if __name__ == "__main__":
    d_v, d_e = 4, 6          # in_features_node, in_features_edge
    p, q = 8, 6              # nhid_node, nhid_edge
    n, m = 8, 12             # num_node, num_edge
    fw_mitr = 50

    key = jax.random.PRNGKey(0)
    kp, kR, kS, kH, kE, kF = jax.random.split(key, 6)

    params = init_params(kp, d_v, d_e, p, q)
    kparams = prepare_params(params)     # static weight plumbing, done once

    R = jax.random.normal(kR, (m, n), jnp.float32)
    S = jax.random.normal(kS, (n, m), jnp.float32)
    H = jax.random.normal(kH, (n, n), jnp.float32)
    E0 = jax.random.normal(kE, (m, d_e), jnp.float32)  # edge features
    F0 = jax.random.normal(kF, (n, d_v), jnp.float32)  # node features
    X_0 = jnp.zeros((p, n), jnp.float32)               # initial equilibrium state

    Hv_out, He3, He_logits3 = inecn_forward(kparams, X_0, R, S, H, E0, F0,
                                            kappa=0.99, fw_mitr=fw_mitr)
    jax.block_until_ready((Hv_out, He3, He_logits3))

    assert Hv_out.shape == (p, n)
    assert He3.shape == (m, d_e)
    assert He_logits3.shape == (m, d_e)

    # Numerical sanity check against a pure-XLA reference of the same math
    # (reference uses eigvalsh; kernel uses in-kernel power iteration).
    ref = jax.jit(_reference_forward, static_argnames=("fw_mitr",))
    ref_Hv, ref_He3, ref_logits = ref(params, X_0, R, S, H, E0, F0,
                                      kappa=0.99, fw_mitr=fw_mitr)
    assert jnp.allclose(He_logits3, ref_logits, rtol=1e-2, atol=1e-3), "logits mismatch"
    assert jnp.allclose(He3, ref_He3, rtol=1e-2, atol=1e-3), "softmax mismatch"
    assert jnp.allclose(Hv_out, ref_Hv, rtol=2e-2, atol=2e-3), "fixpoint mismatch"

    print("KERNEL_OK")
</pallas_src>

<mosaic_0001>
module attributes {stable_mosaic.version = 11 : i64} {
  func.func @_inecn_fused_kernel(%arg0: memref<12x8xf32, #tpu.memory_space<vmem>>, %arg1: memref<12x8xf32, #tpu.memory_space<vmem>>, %arg2: memref<8x12xf32, #tpu.memory_space<vmem>>, %arg3: memref<8x4xf32, #tpu.memory_space<vmem>>, %arg4: memref<12x6xf32, #tpu.memory_space<vmem>>, %arg5: memref<8x8xf32, #tpu.memory_space<vmem>>, %arg6: memref<8x8xf32, #tpu.memory_space<vmem>>, %arg7: memref<64x64xf32, #tpu.memory_space<vmem>>, %arg8: memref<64x1xf32, #tpu.memory_space<vmem>>, %arg9: memref<1xf32, #tpu.memory_space<smem>>, %arg10: memref<4x50xf32, #tpu.memory_space<vmem>>, %arg11: memref<4x50xf32, #tpu.memory_space<vmem>>, %arg12: memref<6x50xf32, #tpu.memory_space<vmem>>, %arg13: memref<1x50xf32, #tpu.memory_space<vmem>>, %arg14: memref<50x50xf32, #tpu.memory_space<vmem>>, %arg15: memref<1x50xf32, #tpu.memory_space<vmem>>, %arg16: memref<50x6xf32, #tpu.memory_space<vmem>>, %arg17: memref<1x6xf32, #tpu.memory_space<vmem>>, %arg18: memref<6x50xf32, #tpu.memory_space<vmem>>, %arg19: memref<4x50xf32, #tpu.memory_space<vmem>>, %arg20: memref<1x50xf32, #tpu.memory_space<vmem>>, %arg21: memref<50x5xf32, #tpu.memory_space<vmem>>, %arg22: memref<1x5xf32, #tpu.memory_space<vmem>>, %arg23: memref<4x50xf32, #tpu.memory_space<vmem>>, %arg24: memref<4x50xf32, #tpu.memory_space<vmem>>, %arg25: memref<6x50xf32, #tpu.memory_space<vmem>>, %arg26: memref<1x50xf32, #tpu.memory_space<vmem>>, %arg27: memref<50x50xf32, #tpu.memory_space<vmem>>, %arg28: memref<1x50xf32, #tpu.memory_space<vmem>>, %arg29: memref<50x6xf32, #tpu.memory_space<vmem>>, %arg30: memref<1x6xf32, #tpu.memory_space<vmem>>, %arg31: memref<6x50xf32, #tpu.memory_space<vmem>>, %arg32: memref<6x50xf32, #tpu.memory_space<vmem>>, %arg33: memref<1x50xf32, #tpu.memory_space<vmem>>, %arg34: memref<50x5xf32, #tpu.memory_space<vmem>>, %arg35: memref<1x5xf32, #tpu.memory_space<vmem>>, %arg36: memref<5x50xf32, #tpu.memory_space<vmem>>, %arg37: memref<5x50xf32, #tpu.memory_space<vmem>>, %arg38: memref<5x50xf32, #tpu.memory_space<vmem>>, %arg39: memref<1x50xf32, #tpu.memory_space<vmem>>, %arg40: memref<50x50xf32, #tpu.memory_space<vmem>>, %arg41: memref<1x50xf32, #tpu.memory_space<vmem>>, %arg42: memref<50x6xf32, #tpu.memory_space<vmem>>, %arg43: memref<1x6xf32, #tpu.memory_space<vmem>>, %arg44: memref<6x50xf32, #tpu.memory_space<vmem>>, %arg45: memref<4x50xf32, #tpu.memory_space<vmem>>, %arg46: memref<1x50xf32, #tpu.memory_space<vmem>>, %arg47: memref<50x8xf32, #tpu.memory_space<vmem>>, %arg48: memref<1x8xf32, #tpu.memory_space<vmem>>, %arg49: memref<5x50xf32, #tpu.memory_space<vmem>>, %arg50: memref<5x50xf32, #tpu.memory_space<vmem>>, %arg51: memref<5x50xf32, #tpu.memory_space<vmem>>, %arg52: memref<1x50xf32, #tpu.memory_space<vmem>>, %arg53: memref<50x50xf32, #tpu.memory_space<vmem>>, %arg54: memref<1x50xf32, #tpu.memory_space<vmem>>, %arg55: memref<50x6xf32, #tpu.memory_space<vmem>>, %arg56: memref<1x6xf32, #tpu.memory_space<vmem>>, %arg57: memref<6x50xf32, #tpu.memory_space<vmem>>, %arg58: memref<6x50xf32, #tpu.memory_space<vmem>>, %arg59: memref<1x50xf32, #tpu.memory_space<vmem>>, %arg60: memref<50x6xf32, #tpu.memory_space<vmem>>, %arg61: memref<1x6xf32, #tpu.memory_space<vmem>>, %arg62: memref<64x1xf32, #tpu.memory_space<vmem>>, %arg63: memref<12x6xf32, #tpu.memory_space<vmem>>, %arg64: memref<12x6xf32, #tpu.memory_space<vmem>>, %arg65: memref<64x1xf32, #tpu.memory_space<vmem>>) attributes {dimension_semantics = [], scalar_prefetch = 0 : i64, scratch_operands = 1 : i64, tpu.core_type = #tpu.core_type<tc>} {
    %c0 = arith.constant 0 : index
    %c0_0 = arith.constant 0 : index
    %0 = vector.load %arg0[%c0, %c0_0] : memref<12x8xf32, #tpu.memory_space<vmem>>, vector<12x8xf32>
    %c0_1 = arith.constant 0 : index
    %c0_2 = arith.constant 0 : index
    %1 = vector.load %arg1[%c0_1, %c0_2] : memref<12x8xf32, #tpu.memory_space<vmem>>, vector<12x8xf32>
    %c0_3 = arith.constant 0 : index
    %c0_4 = arith.constant 0 : index
    %2 = vector.load %arg2[%c0_3, %c0_4] : memref<8x12xf32, #tpu.memory_space<vmem>>, vector<8x12xf32>
    %c0_5 = arith.constant 0 : index
    %c0_6 = arith.constant 0 : index
    %3 = vector.load %arg3[%c0_5, %c0_6] : memref<8x4xf32, #tpu.memory_space<vmem>>, vector<8x4xf32>
    %c0_7 = arith.constant 0 : index
    %c0_8 = arith.constant 0 : index
    %4 = vector.load %arg4[%c0_7, %c0_8] : memref<12x6xf32, #tpu.memory_space<vmem>>, vector<12x6xf32>
    %cst = arith.constant dense<0.000000e+00> : vector<12x4xf32>
    %5 = tpu.matmul %0, %3, %cst {dimension_numbers = #tpu.dot_dimension_numbers<[1], [0], [0], [1], [0, 0, 1, 1], [], []>} : vector<12x8xf32>, vector<8x4xf32>, vector<12x4xf32> -> vector<12x4xf32>
    %cst_9 = arith.constant dense<0.000000e+00> : vector<12x4xf32>
    %6 = tpu.matmul %1, %3, %cst_9 {dimension_numbers = #tpu.dot_dimension_numbers<[1], [0], [0], [1], [0, 0, 1, 1], [], []>} : vector<12x8xf32>, vector<8x4xf32>, vector<12x4xf32> -> vector<12x4xf32>
    %c0_10 = arith.constant 0 : index
    %c0_11 = arith.constant 0 : index
    %7 = vector.load %arg10[%c0_10, %c0_11] : memref<4x50xf32, #tpu.memory_space<vmem>>, vector<4x50xf32>
    %cst_12 = arith.constant dense<0.000000e+00> : vector<12x50xf32>
    %8 = tpu.matmul %5, %7, %cst_12 {dimension_numbers = #tpu.dot_dimension_numbers<[1], [0], [0], [1], [0, 0, 1, 1], [], []>} : vector<12x4xf32>, vector<4x50xf32>, vector<12x50xf32> -> vector<12x50xf32>
    %c0_13 = arith.constant 0 : index
    %c0_14 = arith.constant 0 : index
    %9 = vector.load %arg11[%c0_13, %c0_14] : memref<4x50xf32, #tpu.memory_space<vmem>>, vector<4x50xf32>
    %cst_15 = arith.constant dense<0.000000e+00> : vector<12x50xf32>
    %10 = tpu.matmul %6, %9, %cst_15 {dimension_numbers = #tpu.dot_dimension_numbers<[1], [0], [0], [1], [0, 0, 1, 1], [], []>} : vector<12x4xf32>, vector<4x50xf32>, vector<12x50xf32> -> vector<12x50xf32>
    %11 = arith.addf %8, %10 : vector<12x50xf32>
    %c0_16 = arith.constant 0 : index
    %c0_17 = arith.constant 0 : index
    %12 = vector.load %arg12[%c0_16, %c0_17] : memref<6x50xf32, #tpu.memory_space<vmem>>, vector<6x50xf32>
    %cst_18 = arith.constant dense<0.000000e+00> : vector<12x50xf32>
    %13 = tpu.matmul %4, %12, %cst_18 {dimension_numbers = #tpu.dot_dimension_numbers<[1], [0], [0], [1], [0, 0, 1, 1], [], []>} : vector<12x6xf32>, vector<6x50xf32>, vector<12x50xf32> -> vector<12x50xf32>
    %14 = arith.addf %11, %13 : vector<12x50xf32>
    %c0_19 = arith.constant 0 : index
    %c0_20 = arith.constant 0 : index
    %15 = vector.load %arg13[%c0_19, %c0_20] : memref<1x50xf32, #tpu.memory_space<vmem>>, vector<1x50xf32>
    %16 = vector.broadcast %15 : vector<1x50xf32> to vector<12x50xf32>
    %17 = arith.addf %14, %16 : vector<12x50xf32>
    %cst_21 = arith.constant 0.000000e+00 : f32
    %18 = vector.broadcast %cst_21 : f32 to vector<12x50xf32>
    %19 = arith.maximumf %17, %18 : vector<12x50xf32>
    %c0_22 = arith.constant 0 : index
    %c0_23 = arith.constant 0 : index
    %20 = vector.load %arg14[%c0_22, %c0_23] : memref<50x50xf32, #tpu.memory_space<vmem>>, vector<50x50xf32>
    %cst_24 = arith.constant dense<0.000000e+00> : vector<12x50xf32>
    %21 = tpu.matmul %19, %20, %cst_24 {dimension_numbers = #tpu.dot_dimension_numbers<[1], [0], [0], [1], [0, 0, 1, 1], [], []>} : vector<12x50xf32>, vector<50x50xf32>, vector<12x50xf32> -> vector<12x50xf32>
    %c0_25 = arith.constant 0 : index
    %c0_26 = arith.constant 0 : index
    %22 = vector.load %arg15[%c0_25, %c0_26] : memref<1x50xf32, #tpu.memory_space<vmem>>, vector<1x50xf32>
    %23 = vector.broadcast %22 : vector<1x50xf32> to vector<12x50xf32>
    %24 = arith.addf %21, %23 : vector<12x50xf32>
    %cst_27 = arith.constant 0.000000e+00 : f32
    %25 = vector.broadcast %cst_27 : f32 to vector<12x50xf32>
    %26 = arith.maximumf %24, %25 : vector<12x50xf32>
    %c0_28 = arith.constant 0 : index
    %c0_29 = arith.constant 0 : index
    %27 = vector.load %arg16[%c0_28, %c0_29] : memref<50x6xf32, #tpu.memory_space<vmem>>, vector<50x6xf32>
    %cst_30 = arith.constant dense<0.000000e+00> : vector<12x6xf32>
    %28 = tpu.matmul %26, %27, %cst_30 {dimension_numbers = #tpu.dot_dimension_numbers<[1], [0], [0], [1], [0, 0, 1, 1], [], []>} : vector<12x50xf32>, vector<50x6xf32>, vector<12x6xf32> -> vector<12x6xf32>
    %c0_31 = arith.constant 0 : index
    %c0_32 = arith.constant 0 : index
    %29 = vector.load %arg17[%c0_31, %c0_32] : memref<1x6xf32, #tpu.memory_space<vmem>>, vector<1x6xf32>
    %30 = vector.broadcast %29 : vector<1x6xf32> to vector<12x6xf32>
    %31 = arith.addf %28, %30 : vector<12x6xf32>
    %cst_33 = arith.constant dense<0.000000e+00> : vector<8x6xf32>
    %32 = tpu.matmul %2, %31, %cst_33 {dimension_numbers = #tpu.dot_dimension_numbers<[1], [0], [0], [1], [0, 0, 1, 1], [], []>} : vector<8x12xf32>, vector<12x6xf32>, vector<8x6xf32> -> vector<8x6xf32>
    %c0_34 = arith.constant 0 : index
    %c0_35 = arith.constant 0 : index
    %33 = vector.load %arg18[%c0_34, %c0_35] : memref<6x50xf32, #tpu.memory_space<vmem>>, vector<6x50xf32>
    %cst_36 = arith.constant dense<0.000000e+00> : vector<8x50xf32>
    %34 = tpu.matmul %32, %33, %cst_36 {dimension_numbers = #tpu.dot_dimension_numbers<[1], [0], [0], [1], [0, 0, 1, 1], [], []>} : vector<8x6xf32>, vector<6x50xf32>, vector<8x50xf32> -> vector<8x50xf32>
    %c0_37 = arith.constant 0 : index
    %c0_38 = arith.constant 0 : index
    %35 = vector.load %arg19[%c0_37, %c0_38] : memref<4x50xf32, #tpu.memory_space<vmem>>, vector<4x50xf32>
    %cst_39 = arith.constant dense<0.000000e+00> : vector<8x50xf32>
    %36 = tpu.matmul %3, %35, %cst_39 {dimension_numbers = #tpu.dot_dimension_numbers<[1], [0], [0], [1], [0, 0, 1, 1], [], []>} : vector<8x4xf32>, vector<4x50xf32>, vector<8x50xf32> -> vector<8x50xf32>
    %37 = arith.addf %34, %36 : vector<8x50xf32>
    %c0_40 = arith.constant 0 : index
    %c0_41 = arith.constant 0 : index
    %38 = vector.load %arg20[%c0_40, %c0_41] : memref<1x50xf32, #tpu.memory_space<vmem>>, vector<1x50xf32>
    %39 = vector.broadcast %38 : vector<1x50xf32> to vector<8x50xf32>
    %40 = arith.addf %37, %39 : vector<8x50xf32>
    %cst_42 = arith.constant 0.000000e+00 : f32
    %41 = vector.broadcast %cst_42 : f32 to vector<8x50xf32>
    %42 = arith.maximumf %40, %41 : vector<8x50xf32>
    %c0_43 = arith.constant 0 : index
    %c0_44 = arith.constant 0 : index
    %43 = vector.load %arg21[%c0_43, %c0_44] : memref<50x5xf32, #tpu.memory_space<vmem>>, vector<50x5xf32>
    %cst_45 = arith.constant dense<0.000000e+00> : vector<8x5xf32>
    %44 = tpu.matmul %42, %43, %cst_45 {dimension_numbers = #tpu.dot_dimension_numbers<[1], [0], [0], [1], [0, 0, 1, 1], [], []>} : vector<8x50xf32>, vector<50x5xf32>, vector<8x5xf32> -> vector<8x5xf32>
    %c0_46 = arith.constant 0 : index
    %c0_47 = arith.constant 0 : index
    %45 = vector.load %arg22[%c0_46, %c0_47] : memref<1x5xf32, #tpu.memory_space<vmem>>, vector<1x5xf32>
    %46 = vector.broadcast %45 : vector<1x5xf32> to vector<8x5xf32>
    %47 = arith.addf %44, %46 : vector<8x5xf32>
    %cst_48 = arith.constant 0.000000e+00 : f32
    %48 = vector.broadcast %cst_48 : f32 to vector<8x5xf32>
    %49 = arith.maximumf %47, %48 : vector<8x5xf32>
    %c0_49 = arith.constant 0 : index
    %c0_50 = arith.constant 0 : index
    %50 = vector.load %arg23[%c0_49, %c0_50] : memref<4x50xf32, #tpu.memory_space<vmem>>, vector<4x50xf32>
    %cst_51 = arith.constant dense<0.000000e+00> : vector<12x50xf32>
    %51 = tpu.matmul %5, %50, %cst_51 {dimension_numbers = #tpu.dot_dimension_numbers<[1], [0], [0], [1], [0, 0, 1, 1], [], []>} : vector<12x4xf32>, vector<4x50xf32>, vector<12x50xf32> -> vector<12x50xf32>
    %c0_52 = arith.constant 0 : index
    %c0_53 = arith.constant 0 : index
    %52 = vector.load %arg24[%c0_52, %c0_53] : memref<4x50xf32, #tpu.memory_space<vmem>>, vector<4x50xf32>
    %cst_54 = arith.constant dense<0.000000e+00> : vector<12x50xf32>
    %53 = tpu.matmul %6, %52, %cst_54 {dimension_numbers = #tpu.dot_dimension_numbers<[1], [0], [0], [1], [0, 0, 1, 1], [], []>} : vector<12x4xf32>, vector<4x50xf32>, vector<12x50xf32> -> vector<12x50xf32>
    %54 = arith.addf %51, %53 : vector<12x50xf32>
    %c0_55 = arith.constant 0 : index
    %c0_56 = arith.constant 0 : index
    %55 = vector.load %arg25[%c0_55, %c0_56] : memref<6x50xf32, #tpu.memory_space<vmem>>, vector<6x50xf32>
    %cst_57 = arith.constant dense<0.000000e+00> : vector<12x50xf32>
    %56 = tpu.matmul %4, %55, %cst_57 {dimension_numbers = #tpu.dot_dimension_numbers<[1], [0], [0], [1], [0, 0, 1, 1], [], []>} : vector<12x6xf32>, vector<6x50xf32>, vector<12x50xf32> -> vector<12x50xf32>
    %57 = arith.addf %54, %56 : vector<12x50xf32>
    %c0_58 = arith.constant 0 : index
    %c0_59 = arith.constant 0 : index
    %58 = vector.load %arg26[%c0_58, %c0_59] : memref<1x50xf32, #tpu.memory_space<vmem>>, vector<1x50xf32>
    %59 = vector.broadcast %58 : vector<1x50xf32> to vector<12x50xf32>
    %60 = arith.addf %57, %59 : vector<12x50xf32>
    %cst_60 = arith.constant 0.000000e+00 : f32
    %61 = vector.broadcast %cst_60 : f32 to vector<12x50xf32>
    %62 = arith.maximumf %60, %61 : vector<12x50xf32>
    %c0_61 = arith.constant 0 : index
    %c0_62 = arith.constant 0 : index
    %63 = vector.load %arg27[%c0_61, %c0_62] : memref<50x50xf32, #tpu.memory_space<vmem>>, vector<50x50xf32>
    %cst_63 = arith.constant dense<0.000000e+00> : vector<12x50xf32>
    %64 = tpu.matmul %62, %63, %cst_63 {dimension_numbers = #tpu.dot_dimension_numbers<[1], [0], [0], [1], [0, 0, 1, 1], [], []>} : vector<12x50xf32>, vector<50x50xf32>, vector<12x50xf32> -> vector<12x50xf32>
    %c0_64 = arith.constant 0 : index
    %c0_65 = arith.constant 0 : index
    %65 = vector.load %arg28[%c0_64, %c0_65] : memref<1x50xf32, #tpu.memory_space<vmem>>, vector<1x50xf32>
    %66 = vector.broadcast %65 : vector<1x50xf32> to vector<12x50xf32>
    %67 = arith.addf %64, %66 : vector<12x50xf32>
    %cst_66 = arith.constant 0.000000e+00 : f32
    %68 = vector.broadcast %cst_66 : f32 to vector<12x50xf32>
    %69 = arith.maximumf %67, %68 : vector<12x50xf32>
    %c0_67 = arith.constant 0 : index
    %c0_68 = arith.constant 0 : index
    %70 = vector.load %arg29[%c0_67, %c0_68] : memref<50x6xf32, #tpu.memory_space<vmem>>, vector<50x6xf32>
    %cst_69 = arith.constant dense<0.000000e+00> : vector<12x6xf32>
    %71 = tpu.matmul %69, %70, %cst_69 {dimension_numbers = #tpu.dot_dimension_numbers<[1], [0], [0], [1], [0, 0, 1, 1], [], []>} : vector<12x50xf32>, vector<50x6xf32>, vector<12x6xf32> -> vector<12x6xf32>
    %c0_70 = arith.constant 0 : index
    %c0_71 = arith.constant 0 : index
    %72 = vector.load %arg30[%c0_70, %c0_71] : memref<1x6xf32, #tpu.memory_space<vmem>>, vector<1x6xf32>
    %73 = vector.broadcast %72 : vector<1x6xf32> to vector<12x6xf32>
    %74 = arith.addf %71, %73 : vector<12x6xf32>
    %c0_72 = arith.constant 0 : index
    %c0_73 = arith.constant 0 : index
    %75 = vector.load %arg31[%c0_72, %c0_73] : memref<6x50xf32, #tpu.memory_space<vmem>>, vector<6x50xf32>
    %cst_74 = arith.constant dense<0.000000e+00> : vector<12x50xf32>
    %76 = tpu.matmul %74, %75, %cst_74 {dimension_numbers = #tpu.dot_dimension_numbers<[1], [0], [0], [1], [0, 0, 1, 1], [], []>} : vector<12x6xf32>, vector<6x50xf32>, vector<12x50xf32> -> vector<12x50xf32>
    %c0_75 = arith.constant 0 : index
    %c0_76 = arith.constant 0 : index
    %77 = vector.load %arg32[%c0_75, %c0_76] : memref<6x50xf32, #tpu.memory_space<vmem>>, vector<6x50xf32>
    %cst_77 = arith.constant dense<0.000000e+00> : vector<12x50xf32>
    %78 = tpu.matmul %4, %77, %cst_77 {dimension_numbers = #tpu.dot_dimension_numbers<[1], [0], [0], [1], [0, 0, 1, 1], [], []>} : vector<12x6xf32>, vector<6x50xf32>, vector<12x50xf32> -> vector<12x50xf32>
    %79 = arith.addf %76, %78 : vector<12x50xf32>
    %c0_78 = arith.constant 0 : index
    %c0_79 = arith.constant 0 : index
    %80 = vector.load %arg33[%c0_78, %c0_79] : memref<1x50xf32, #tpu.memory_space<vmem>>, vector<1x50xf32>
    %81 = vector.broadcast %80 : vector<1x50xf32> to vector<12x50xf32>
    %82 = arith.addf %79, %81 : vector<12x50xf32>
    %cst_80 = arith.constant 0.000000e+00 : f32
    %83 = vector.broadcast %cst_80 : f32 to vector<12x50xf32>
    %84 = arith.maximumf %82, %83 : vector<12x50xf32>
    %c0_81 = arith.constant 0 : index
    %c0_82 = arith.constant 0 : index
    %85 = vector.load %arg34[%c0_81, %c0_82] : memref<50x5xf32, #tpu.memory_space<vmem>>, vector<50x5xf32>
    %cst_83 = arith.constant dense<0.000000e+00> : vector<12x5xf32>
    %86 = tpu.matmul %84, %85, %cst_83 {dimension_numbers = #tpu.dot_dimension_numbers<[1], [0], [0], [1], [0, 0, 1, 1], [], []>} : vector<12x50xf32>, vector<50x5xf32>, vector<12x5xf32> -> vector<12x5xf32>
    %c0_84 = arith.constant 0 : index
    %c0_85 = arith.constant 0 : index
    %87 = vector.load %arg35[%c0_84, %c0_85] : memref<1x5xf32, #tpu.memory_space<vmem>>, vector<1x5xf32>
    %88 = vector.broadcast %87 : vector<1x5xf32> to vector<12x5xf32>
    %89 = arith.addf %86, %88 : vector<12x5xf32>
    %cst_86 = arith.constant 0.000000e+00 : f32
    %90 = vector.broadcast %cst_86 : f32 to vector<12x5xf32>
    %91 = arith.maximumf %89, %90 : vector<12x5xf32>
    %cst_87 = arith.constant dense<0.000000e+00> : vector<12x5xf32>
    %92 = tpu.matmul %0, %49, %cst_87 {dimension_numbers = #tpu.dot_dimension_numbers<[1], [0], [0], [1], [0, 0, 1, 1], [], []>} : vector<12x8xf32>, vector<8x5xf32>, vector<12x5xf32> -> vector<12x5xf32>
    %cst_88 = arith.constant dense<0.000000e+00> : vector<12x5xf32>
    %93 = tpu.matmul %1, %49, %cst_88 {dimension_numbers = #tpu.dot_dimension_numbers<[1], [0], [0], [1], [0, 0, 1, 1], [], []>} : vector<12x8xf32>, vector<8x5xf32>, vector<12x5xf32> -> vector<12x5xf32>
    %c0_89 = arith.constant 0 : index
    %c0_90 = arith.constant 0 : index
    %94 = vector.load %arg36[%c0_89, %c0_90] : memref<5x50xf32, #tpu.memory_space<vmem>>, vector<5x50xf32>
    %cst_91 = arith.constant dense<0.000000e+00> : vector<12x50xf32>
    %95 = tpu.matmul %92, %94, %cst_91 {dimension_numbers = #tpu.dot_dimension_numbers<[1], [0], [0], [1], [0, 0, 1, 1], [], []>} : vector<12x5xf32>, vector<5x50xf32>, vector<12x50xf32> -> vector<12x50xf32>
    %c0_92 = arith.constant 0 : index
    %c0_93 = arith.constant 0 : index
    %96 = vector.load %arg37[%c0_92, %c0_93] : memref<5x50xf32, #tpu.memory_space<vmem>>, vector<5x50xf32>
    %cst_94 = arith.constant dense<0.000000e+00> : vector<12x50xf32>
    %97 = tpu.matmul %93, %96, %cst_94 {dimension_numbers = #tpu.dot_dimension_numbers<[1], [0], [0], [1], [0, 0, 1, 1], [], []>} : vector<12x5xf32>, vector<5x50xf32>, vector<12x50xf32> -> vector<12x50xf32>
    %98 = arith.addf %95, %97 : vector<12x50xf32>
    %c0_95 = arith.constant 0 : index
    %c0_96 = arith.constant 0 : index
    %99 = vector.load %arg38[%c0_95, %c0_96] : memref<5x50xf32, #tpu.memory_space<vmem>>, vector<5x50xf32>
    %cst_97 = arith.constant dense<0.000000e+00> : vector<12x50xf32>
    %100 = tpu.matmul %91, %99, %cst_97 {dimension_numbers = #tpu.dot_dimension_numbers<[1], [0], [0], [1], [0, 0, 1, 1], [], []>} : vector<12x5xf32>, vector<5x50xf32>, vector<12x50xf32> -> vector<12x50xf32>
    %101 = arith.addf %98, %100 : vector<12x50xf32>
    %c0_98 = arith.constant 0 : index
    %c0_99 = arith.constant 0 : index
    %102 = vector.load %arg39[%c0_98, %c0_99] : memref<1x50xf32, #tpu.memory_space<vmem>>, vector<1x50xf32>
    %103 = vector.broadcast %102 : vector<1x50xf32> to vector<12x50xf32>
    %104 = arith.addf %101, %103 : vector<12x50xf32>
    %cst_100 = arith.constant 0.000000e+00 : f32
    %105 = vector.broadcast %cst_100 : f32 to vector<12x50xf32>
    %106 = arith.maximumf %104, %105 : vector<12x50xf32>
    %c0_101 = arith.constant 0 : index
    %c0_102 = arith.constant 0 : index
    %107 = vector.load %arg40[%c0_101, %c0_102] : memref<50x50xf32, #tpu.memory_space<vmem>>, vector<50x50xf32>
    %cst_103 = arith.constant dense<0.000000e+00> : vector<12x50xf32>
    %108 = tpu.matmul %106, %107, %cst_103 {dimension_numbers = #tpu.dot_dimension_numbers<[1], [0], [0], [1], [0, 0, 1, 1], [], []>} : vector<12x50xf32>, vector<50x50xf32>, vector<12x50xf32> -> vector<12x50xf32>
    %c0_104 = arith.constant 0 : index
    %c0_105 = arith.constant 0 : index
    %109 = vector.load %arg41[%c0_104, %c0_105] : memref<1x50xf32, #tpu.memory_space<vmem>>, vector<1x50xf32>
    %110 = vector.broadcast %109 : vector<1x50xf32> to vector<12x50xf32>
    %111 = arith.addf %108, %110 : vector<12x50xf32>
    %cst_106 = arith.constant 0.000000e+00 : f32
    %112 = vector.broadcast %cst_106 : f32 to vector<12x50xf32>
    %113 = arith.maximumf %111, %112 : vector<12x50xf32>
    %c0_107 = arith.constant 0 : index
    %c0_108 = arith.constant 0 : index
    %114 = vector.load %arg42[%c0_107, %c0_108] : memref<50x6xf32, #tpu.memory_space<vmem>>, vector<50x6xf32>
    %cst_109 = arith.constant dense<0.000000e+00> : vector<12x6xf32>
    %115 = tpu.matmul %113, %114, %cst_109 {dimension_numbers = #tpu.dot_dimension_numbers<[1], [0], [0], [1], [0, 0, 1, 1], [], []>} : vector<12x50xf32>, vector<50x6xf32>, vector<12x6xf32> -> vector<12x6xf32>
    %c0_110 = arith.constant 0 : index
    %c0_111 = arith.constant 0 : index
    %116 = vector.load %arg43[%c0_110, %c0_111] : memref<1x6xf32, #tpu.memory_space<vmem>>, vector<1x6xf32>
    %117 = vector.broadcast %116 : vector<1x6xf32> to vector<12x6xf32>
    %118 = arith.addf %115, %117 : vector<12x6xf32>
    %cst_112 = arith.constant dense<0.000000e+00> : vector<8x6xf32>
    %119 = tpu.matmul %2, %118, %cst_112 {dimension_numbers = #tpu.dot_dimension_numbers<[1], [0], [0], [1], [0, 0, 1, 1], [], []>} : vector<8x12xf32>, vector<12x6xf32>, vector<8x6xf32> -> vector<8x6xf32>
    %c0_113 = arith.constant 0 : index
    %c0_114 = arith.constant 0 : index
    %120 = vector.load %arg44[%c0_113, %c0_114] : memref<6x50xf32, #tpu.memory_space<vmem>>, vector<6x50xf32>
    %cst_115 = arith.constant dense<0.000000e+00> : vector<8x50xf32>
    %121 = tpu.matmul %119, %120, %cst_115 {dimension_numbers = #tpu.dot_dimension_numbers<[1], [0], [0], [1], [0, 0, 1, 1], [], []>} : vector<8x6xf32>, vector<6x50xf32>, vector<8x50xf32> -> vector<8x50xf32>
    %c0_116 = arith.constant 0 : index
    %c0_117 = arith.constant 0 : index
    %122 = vector.load %arg45[%c0_116, %c0_117] : memref<4x50xf32, #tpu.memory_space<vmem>>, vector<4x50xf32>
    %cst_118 = arith.constant dense<0.000000e+00> : vector<8x50xf32>
    %123 = tpu.matmul %3, %122, %cst_118 {dimension_numbers = #tpu.dot_dimension_numbers<[1], [0], [0], [1], [0, 0, 1, 1], [], []>} : vector<8x4xf32>, vector<4x50xf32>, vector<8x50xf32> -> vector<8x50xf32>
    %124 = arith.addf %121, %123 : vector<8x50xf32>
    %c0_119 = arith.constant 0 : index
    %c0_120 = arith.constant 0 : index
    %125 = vector.load %arg46[%c0_119, %c0_120] : memref<1x50xf32, #tpu.memory_space<vmem>>, vector<1x50xf32>
    %126 = vector.broadcast %125 : vector<1x50xf32> to vector<8x50xf32>
    %127 = arith.addf %124, %126 : vector<8x50xf32>
    %cst_121 = arith.constant 0.000000e+00 : f32
    %128 = vector.broadcast %cst_121 : f32 to vector<8x50xf32>
    %129 = arith.maximumf %127, %128 : vector<8x50xf32>
    %c0_122 = arith.constant 0 : index
    %c0_123 = arith.constant 0 : index
    %130 = vector.load %arg47[%c0_122, %c0_123] : memref<50x8xf32, #tpu.memory_space<vmem>>, vector<50x8xf32>
    %cst_124 = arith.constant dense<0.000000e+00> : vector<8x8xf32>
    %131 = tpu.matmul %129, %130, %cst_124 {dimension_numbers = #tpu.dot_dimension_numbers<[1], [0], [0], [1], [0, 0, 1, 1], [], []>} : vector<8x50xf32>, vector<50x8xf32>, vector<8x8xf32> -> vector<8x8xf32>
    %c0_125 = arith.constant 0 : index
    %c0_126 = arith.constant 0 : index
    %132 = vector.load %arg48[%c0_125, %c0_126] : memref<1x8xf32, #tpu.memory_space<vmem>>, vector<1x8xf32>
    %133 = vector.broadcast %132 : vector<1x8xf32> to vector<8x8xf32>
    %134 = arith.addf %131, %133 : vector<8x8xf32>
    %cst_127 = arith.constant 0.000000e+00 : f32
    %135 = vector.broadcast %cst_127 : f32 to vector<8x8xf32>
    %136 = arith.maximumf %134, %135 : vector<8x8xf32>
    %c0_128 = arith.constant 0 : index
    %c0_129 = arith.constant 0 : index
    %137 = vector.load %arg49[%c0_128, %c0_129] : memref<5x50xf32, #tpu.memory_space<vmem>>, vector<5x50xf32>
    %cst_130 = arith.constant dense<0.000000e+00> : vector<12x50xf32>
    %138 = tpu.matmul %92, %137, %cst_130 {dimension_numbers = #tpu.dot_dimension_numbers<[1], [0], [0], [1], [0, 0, 1, 1], [], []>} : vector<12x5xf32>, vector<5x50xf32>, vector<12x50xf32> -> vector<12x50xf32>
    %c0_131 = arith.constant 0 : index
    %c0_132 = arith.constant 0 : index
    %139 = vector.load %arg50[%c0_131, %c0_132] : memref<5x50xf32, #tpu.memory_space<vmem>>, vector<5x50xf32>
    %cst_133 = arith.constant dense<0.000000e+00> : vector<12x50xf32>
    %140 = tpu.matmul %93, %139, %cst_133 {dimension_numbers = #tpu.dot_dimension_numbers<[1], [0], [0], [1], [0, 0, 1, 1], [], []>} : vector<12x5xf32>, vector<5x50xf32>, vector<12x50xf32> -> vector<12x50xf32>
    %141 = arith.addf %138, %140 : vector<12x50xf32>
    %c0_134 = arith.constant 0 : index
    %c0_135 = arith.constant 0 : index
    %142 = vector.load %arg51[%c0_134, %c0_135] : memref<5x50xf32, #tpu.memory_space<vmem>>, vector<5x50xf32>
    %cst_136 = arith.constant dense<0.000000e+00> : vector<12x50xf32>
    %143 = tpu.matmul %91, %142, %cst_136 {dimension_numbers = #tpu.dot_dimension_numbers<[1], [0], [0], [1], [0, 0, 1, 1], [], []>} : vector<12x5xf32>, vector<5x50xf32>, vector<12x50xf32> -> vector<12x50xf32>
    %144 = arith.addf %141, %143 : vector<12x50xf32>
    %c0_137 = arith.constant 0 : index
    %c0_138 = arith.constant 0 : index
    %145 = vector.load %arg52[%c0_137, %c0_138] : memref<1x50xf32, #tpu.memory_space<vmem>>, vector<1x50xf32>
    %146 = vector.broadcast %145 : vector<1x50xf32> to vector<12x50xf32>
    %147 = arith.addf %144, %146 : vector<12x50xf32>
    %cst_139 = arith.constant 0.000000e+00 : f32
    %148 = vector.broadcast %cst_139 : f32 to vector<12x50xf32>
    %149 = arith.maximumf %147, %148 : vector<12x50xf32>
    %c0_140 = arith.constant 0 : index
    %c0_141 = arith.constant 0 : index
    %150 = vector.load %arg53[%c0_140, %c0_141] : memref<50x50xf32, #tpu.memory_space<vmem>>, vector<50x50xf32>
    %cst_142 = arith.constant dense<0.000000e+00> : vector<12x50xf32>
    %151 = tpu.matmul %149, %150, %cst_142 {dimension_numbers = #tpu.dot_dimension_numbers<[1], [0], [0], [1], [0, 0, 1, 1], [], []>} : vector<12x50xf32>, vector<50x50xf32>, vector<12x50xf32> -> vector<12x50xf32>
    %c0_143 = arith.constant 0 : index
    %c0_144 = arith.constant 0 : index
    %152 = vector.load %arg54[%c0_143, %c0_144] : memref<1x50xf32, #tpu.memory_space<vmem>>, vector<1x50xf32>
    %153 = vector.broadcast %152 : vector<1x50xf32> to vector<12x50xf32>
    %154 = arith.addf %151, %153 : vector<12x50xf32>
    %cst_145 = arith.constant 0.000000e+00 : f32
    %155 = vector.broadcast %cst_145 : f32 to vector<12x50xf32>
    %156 = arith.maximumf %154, %155 : vector<12x50xf32>
    %c0_146 = arith.constant 0 : index
    %c0_147 = arith.constant 0 : index
    %157 = vector.load %arg55[%c0_146, %c0_147] : memref<50x6xf32, #tpu.memory_space<vmem>>, vector<50x6xf32>
    %cst_148 = arith.constant dense<0.000000e+00> : vector<12x6xf32>
    %158 = tpu.matmul %156, %157, %cst_148 {dimension_numbers = #tpu.dot_dimension_numbers<[1], [0], [0], [1], [0, 0, 1, 1], [], []>} : vector<12x50xf32>, vector<50x6xf32>, vector<12x6xf32> -> vector<12x6xf32>
    %c0_149 = arith.constant 0 : index
    %c0_150 = arith.constant 0 : index
    %159 = vector.load %arg56[%c0_149, %c0_150] : memref<1x6xf32, #tpu.memory_space<vmem>>, vector<1x6xf32>
    %160 = vector.broadcast %159 : vector<1x6xf32> to vector<12x6xf32>
    %161 = arith.addf %158, %160 : vector<12x6xf32>
    %c0_151 = arith.constant 0 : index
    %c0_152 = arith.constant 0 : index
    %162 = vector.load %arg57[%c0_151, %c0_152] : memref<6x50xf32, #tpu.memory_space<vmem>>, vector<6x50xf32>
    %cst_153 = arith.constant dense<0.000000e+00> : vector<12x50xf32>
    %163 = tpu.matmul %161, %162, %cst_153 {dimension_numbers = #tpu.dot_dimension_numbers<[1], [0], [0], [1], [0, 0, 1, 1], [], []>} : vector<12x6xf32>, vector<6x50xf32>, vector<12x50xf32> -> vector<12x50xf32>
    %c0_154 = arith.constant 0 : index
    %c0_155 = arith.constant 0 : index
    %164 = vector.load %arg58[%c0_154, %c0_155] : memref<6x50xf32, #tpu.memory_space<vmem>>, vector<6x50xf32>
    %cst_156 = arith.constant dense<0.000000e+00> : vector<12x50xf32>
    %165 = tpu.matmul %4, %164, %cst_156 {dimension_numbers = #tpu.dot_dimension_numbers<[1], [0], [0], [1], [0, 0, 1, 1], [], []>} : vector<12x6xf32>, vector<6x50xf32>, vector<12x50xf32> -> vector<12x50xf32>
    %166 = arith.addf %163, %165 : vector<12x50xf32>
    %c0_157 = arith.constant 0 : index
    %c0_158 = arith.constant 0 : index
    %167 = vector.load %arg59[%c0_157, %c0_158] : memref<1x50xf32, #tpu.memory_space<vmem>>, vector<1x50xf32>
    %168 = vector.broadcast %167 : vector<1x50xf32> to vector<12x50xf32>
    %169 = arith.addf %166, %168 : vector<12x50xf32>
    %cst_159 = arith.constant 0.000000e+00 : f32
    %170 = vector.broadcast %cst_159 : f32 to vector<12x50xf32>
    %171 = arith.maximumf %169, %170 : vector<12x50xf32>
    %c0_160 = arith.constant 0 : index
    %c0_161 = arith.constant 0 : index
    %172 = vector.load %arg60[%c0_160, %c0_161] : memref<50x6xf32, #tpu.memory_space<vmem>>, vector<50x6xf32>
    %cst_162 = arith.constant dense<0.000000e+00> : vector<12x6xf32>
    %173 = tpu.matmul %171, %172, %cst_162 {dimension_numbers = #tpu.dot_dimension_numbers<[1], [0], [0], [1], [0, 0, 1, 1], [], []>} : vector<12x50xf32>, vector<50x6xf32>, vector<12x6xf32> -> vector<12x6xf32>
    %c0_163 = arith.constant 0 : index
    %c0_164 = arith.constant 0 : index
    %174 = vector.load %arg61[%c0_163, %c0_164] : memref<1x6xf32, #tpu.memory_space<vmem>>, vector<1x6xf32>
    %175 = vector.broadcast %174 : vector<1x6xf32> to vector<12x6xf32>
    %176 = arith.addf %173, %175 : vector<12x6xf32>
    %c0_165 = arith.constant 0 : index
    %c0_166 = arith.constant 0 : index
    %177 = vector.load %arg64[%c0_165, %c0_166] : memref<12x6xf32, #tpu.memory_space<vmem>>, vector<12x6xf32>
    tpu.vector_store %arg64[%c0_165, %c0_166], %176 {strides = array<i32>} : memref<12x6xf32, #tpu.memory_space<vmem>>, vector<12x6xf32>,
    %cst_167 = arith.constant dense<0xFF800000> : vector<12xf32>
    %178 = vector.multi_reduction <maximumf>, %176, %cst_167 [1] : vector<12x6xf32> to vector<12xf32>
    %179 = vector.shape_cast %178 : vector<12xf32> to vector<12x1xf32>
    %180 = vector.broadcast %179 : vector<12x1xf32> to vector<12x6xf32>
    %181 = arith.subf %176, %180 : vector<12x6xf32>
    %182 = math.exp %181 : vector<12x6xf32>
    %cst_168 = arith.constant dense<0.000000e+00> : vector<12xf32>
    %183 = vector.multi_reduction <add>, %182, %cst_168 [1] : vector<12x6xf32> to vector<12xf32>
    %184 = vector.shape_cast %183 : vector<12xf32> to vector<12x1xf32>
    %185 = vector.broadcast %184 : vector<12x1xf32> to vector<12x6xf32>
    %186 = arith.divf %182, %185 : vector<12x6xf32>
    %c0_169 = arith.constant 0 : index
    %c0_170 = arith.constant 0 : index
    %187 = vector.load %arg63[%c0_169, %c0_170] : memref<12x6xf32, #tpu.memory_space<vmem>>, vector<12x6xf32>
    tpu.vector_store %arg63[%c0_169, %c0_170], %186 {strides = array<i32>} : memref<12x6xf32, #tpu.memory_space<vmem>>, vector<12x6xf32>,
    %188 = tpu.iota {dimensions = array<i32: 1>} : vector<1x8xi32>
    %c0_i32 = arith.constant 0 : i32
    %189 = vector.broadcast %c0_i32 : i32 to vector<1x8xi32>
    %190 = arith.cmpi eq, %188, %189 : vector<1x8xi32>
    %cst_171 = arith.constant 1.000000e+00 : f32
    %cst_172 = arith.constant 0.000000e+00 : f32
    %191 = vector.broadcast %cst_171 : f32 to vector<1x8xf32>
    %192 = vector.broadcast %cst_172 : f32 to vector<1x8xf32>
    %193 = arith.select %190, %191, %192 : vector<1x8xi1>, vector<1x8xf32>
    %194 = vector.broadcast %193 : vector<1x8xf32> to vector<8x8xf32>
    %195 = arith.mulf %136, %194 : vector<8x8xf32>
    %cst_173 = arith.constant dense<0.000000e+00> : vector<8xf32>
    %196 = vector.multi_reduction <add>, %195, %cst_173 [1] : vector<8x8xf32> to vector<8xf32>
    %197 = vector.shape_cast %196 : vector<8xf32> to vector<8x1xf32>
    %c0_174 = arith.constant 0 : index
    %c0_175 = arith.constant 0 : index
    %198 = vector.load %arg65[%c0_174, %c0_175] : memref<64x1xf32, #tpu.memory_space<vmem>>, vector<8x1xf32>
    tpu.vector_store %arg65[%c0_174, %c0_175], %197 {strides = array<i32>} : memref<64x1xf32, #tpu.memory_space<vmem>>, vector<8x1xf32>,
    %c1_i32 = arith.constant 1 : i32
    %199 = vector.broadcast %c1_i32 : i32 to vector<1x8xi32>
    %200 = arith.cmpi eq, %188, %199 : vector<1x8xi32>
    %cst_176 = arith.constant 1.000000e+00 : f32
    %cst_177 = arith.constant 0.000000e+00 : f32
    %201 = vector.broadcast %cst_176 : f32 to vector<1x8xf32>
    %202 = vector.broadcast %cst_177 : f32 to vector<1x8xf32>
    %203 = arith.select %200, %201, %202 : vector<1x8xi1>, vector<1x8xf32>
    %204 = vector.broadcast %203 : vector<1x8xf32> to vector<8x8xf32>
    %205 = arith.mulf %136, %204 : vector<8x8xf32>
    %cst_178 = arith.constant dense<0.000000e+00> : vector<8xf32>
    %206 = vector.multi_reduction <add>, %205, %cst_178 [1] : vector<8x8xf32> to vector<8xf32>
    %207 = vector.shape_cast %206 : vector<8xf32> to vector<8x1xf32>
    %c8 = arith.constant 8 : index
    %c0_179 = arith.constant 0 : index
    %208 = vector.load %arg65[%c8, %c0_179] : memref<64x1xf32, #tpu.memory_space<vmem>>, vector<8x1xf32>
    tpu.vector_store %arg65[%c8, %c0_179], %207 {strides = array<i32>} : memref<64x1xf32, #tpu.memory_space<vmem>>, vector<8x1xf32>,
    %c2_i32 = arith.constant 2 : i32
    %209 = vector.broadcast %c2_i32 : i32 to vector<1x8xi32>
    %210 = arith.cmpi eq, %188, %209 : vector<1x8xi32>
    %cst_180 = arith.constant 1.000000e+00 : f32
    %cst_181 = arith.constant 0.000000e+00 : f32
    %211 = vector.broadcast %cst_180 : f32 to vector<1x8xf32>
    %212 = vector.broadcast %cst_181 : f32 to vector<1x8xf32>
    %213 = arith.select %210, %211, %212 : vector<1x8xi1>, vector<1x8xf32>
    %214 = vector.broadcast %213 : vector<1x8xf32> to vector<8x8xf32>
    %215 = arith.mulf %136, %214 : vector<8x8xf32>
    %cst_182 = arith.constant dense<0.000000e+00> : vector<8xf32>
    %216 = vector.multi_reduction <add>, %215, %cst_182 [1] : vector<8x8xf32> to vector<8xf32>
    %217 = vector.shape_cast %216 : vector<8xf32> to vector<8x1xf32>
    %c16 = arith.constant 16 : index
    %c0_183 = arith.constant 0 : index
    %218 = vector.load %arg65[%c16, %c0_183] : memref<64x1xf32, #tpu.memory_space<vmem>>, vector<8x1xf32>
    tpu.vector_store %arg65[%c16, %c0_183], %217 {strides = array<i32>} : memref<64x1xf32, #tpu.memory_space<vmem>>, vector<8x1xf32>,
    %c3_i32 = arith.constant 3 : i32
    %219 = vector.broadcast %c3_i32 : i32 to vector<1x8xi32>
    %220 = arith.cmpi eq, %188, %219 : vector<1x8xi32>
    %cst_184 = arith.constant 1.000000e+00 : f32
    %cst_185 = arith.constant 0.000000e+00 : f32
    %221 = vector.broadcast %cst_184 : f32 to vector<1x8xf32>
    %222 = vector.broadcast %cst_185 : f32 to vector<1x8xf32>
    %223 = arith.select %220, %221, %222 : vector<1x8xi1>, vector<1x8xf32>
    %224 = vector.broadcast %223 : vector<1x8xf32> to vector<8x8xf32>
    %225 = arith.mulf %136, %224 : vector<8x8xf32>
    %cst_186 = arith.constant dense<0.000000e+00> : vector<8xf32>
    %226 = vector.multi_reduction <add>, %225, %cst_186 [1] : vector<8x8xf32> to vector<8xf32>
    %227 = vector.shape_cast %226 : vector<8xf32> to vector<8x1xf32>
    %c24 = arith.constant 24 : index
    %c0_187 = arith.constant 0 : index
    %228 = vector.load %arg65[%c24, %c0_187] : memref<64x1xf32, #tpu.memory_space<vmem>>, vector<8x1xf32>
    tpu.vector_store %arg65[%c24, %c0_187], %227 {strides = array<i32>} : memref<64x1xf32, #tpu.memory_space<vmem>>, vector<8x1xf32>,
    %c4_i32 = arith.constant 4 : i32
    %229 = vector.broadcast %c4_i32 : i32 to vector<1x8xi32>
    %230 = arith.cmpi eq, %188, %229 : vector<1x8xi32>
    %cst_188 = arith.constant 1.000000e+00 : f32
    %cst_189 = arith.constant 0.000000e+00 : f32
    %231 = vector.broadcast %cst_188 : f32 to vector<1x8xf32>
    %232 = vector.broadcast %cst_189 : f32 to vector<1x8xf32>
    %233 = arith.select %230, %231, %232 : vector<1x8xi1>, vector<1x8xf32>
    %234 = vector.broadcast %233 : vector<1x8xf32> to vector<8x8xf32>
    %235 = arith.mulf %136, %234 : vector<8x8xf32>
    %cst_190 = arith.constant dense<0.000000e+00> : vector<8xf32>
    %236 = vector.multi_reduction <add>, %235, %cst_190 [1] : vector<8x8xf32> to vector<8xf32>
    %237 = vector.shape_cast %236 : vector<8xf32> to vector<8x1xf32>
    %c32 = arith.constant 32 : index
    %c0_191 = arith.constant 0 : index
    %238 = vector.load %arg65[%c32, %c0_191] : memref<64x1xf32, #tpu.memory_space<vmem>>, vector<8x1xf32>
    tpu.vector_store %arg65[%c32, %c0_191], %237 {strides = array<i32>} : memref<64x1xf32, #tpu.memory_space<vmem>>, vector<8x1xf32>,
    %c5_i32 = arith.constant 5 : i32
    %239 = vector.broadcast %c5_i32 : i32 to vector<1x8xi32>
    %240 = arith.cmpi eq, %188, %239 : vector<1x8xi32>
    %cst_192 = arith.constant 1.000000e+00 : f32
    %cst_193 = arith.constant 0.000000e+00 : f32
    %241 = vector.broadcast %cst_192 : f32 to vector<1x8xf32>
    %242 = vector.broadcast %cst_193 : f32 to vector<1x8xf32>
    %243 = arith.select %240, %241, %242 : vector<1x8xi1>, vector<1x8xf32>
    %244 = vector.broadcast %243 : vector<1x8xf32> to vector<8x8xf32>
    %245 = arith.mulf %136, %244 : vector<8x8xf32>
    %cst_194 = arith.constant dense<0.000000e+00> : vector<8xf32>
    %246 = vector.multi_reduction <add>, %245, %cst_194 [1] : vector<8x8xf32> to vector<8xf32>
    %247 = vector.shape_cast %246 : vector<8xf32> to vector<8x1xf32>
    %c40 = arith.constant 40 : index
    %c0_195 = arith.constant 0 : index
    %248 = vector.load %arg65[%c40, %c0_195] : memref<64x1xf32, #tpu.memory_space<vmem>>, vector<8x1xf32>
    tpu.vector_store %arg65[%c40, %c0_195], %247 {strides = array<i32>} : memref<64x1xf32, #tpu.memory_space<vmem>>, vector<8x1xf32>,
    %c6_i32 = arith.constant 6 : i32
    %249 = vector.broadcast %c6_i32 : i32 to vector<1x8xi32>
    %250 = arith.cmpi eq, %188, %249 : vector<1x8xi32>
    %cst_196 = arith.constant 1.000000e+00 : f32
    %cst_197 = arith.constant 0.000000e+00 : f32
    %251 = vector.broadcast %cst_196 : f32 to vector<1x8xf32>
    %252 = vector.broadcast %cst_197 : f32 to vector<1x8xf32>
    %253 = arith.select %250, %251, %252 : vector<1x8xi1>, vector<1x8xf32>
    %254 = vector.broadcast %253 : vector<1x8xf32> to vector<8x8xf32>
    %255 = arith.mulf %136, %254 : vector<8x8xf32>
    %cst_198 = arith.constant dense<0.000000e+00> : vector<8xf32>
    %256 = vector.multi_reduction <add>, %255, %cst_198 [1] : vector<8x8xf32> to vector<8xf32>
    %257 = vector.shape_cast %256 : vector<8xf32> to vector<8x1xf32>
    %c48 = arith.constant 48 : index
    %c0_199 = arith.constant 0 : index
    %258 = vector.load %arg65[%c48, %c0_199] : memref<64x1xf32, #tpu.memory_space<vmem>>, vector<8x1xf32>
    tpu.vector_store %arg65[%c48, %c0_199], %257 {strides = array<i32>} : memref<64x1xf32, #tpu.memory_space<vmem>>, vector<8x1xf32>,
    %c7_i32 = arith.constant 7 : i32
    %259 = vector.broadcast %c7_i32 : i32 to vector<1x8xi32>
    %260 = arith.cmpi eq, %188, %259 : vector<1x8xi32>
    %cst_200 = arith.constant 1.000000e+00 : f32
    %cst_201 = arith.constant 0.000000e+00 : f32
    %261 = vector.broadcast %cst_200 : f32 to vector<1x8xf32>
    %262 = vector.broadcast %cst_201 : f32 to vector<1x8xf32>
    %263 = arith.select %260, %261, %262 : vector<1x8xi1>, vector<1x8xf32>
    %264 = vector.broadcast %263 : vector<1x8xf32> to vector<8x8xf32>
    %265 = arith.mulf %136, %264 : vector<8x8xf32>
    %cst_202 = arith.constant dense<0.000000e+00> : vector<8xf32>
    %266 = vector.multi_reduction <add>, %265, %cst_202 [1] : vector<8x8xf32> to vector<8xf32>
    %267 = vector.shape_cast %266 : vector<8xf32> to vector<8x1xf32>
    %c56 = arith.constant 56 : index
    %c0_203 = arith.constant 0 : index
    %268 = vector.load %arg65[%c56, %c0_203] : memref<64x1xf32, #tpu.memory_space<vmem>>, vector<8x1xf32>
    tpu.vector_store %arg65[%c56, %c0_203], %267 {strides = array<i32>} : memref<64x1xf32, #tpu.memory_space<vmem>>, vector<8x1xf32>,
    %c0_204 = arith.constant 0 : index
    %c0_205 = arith.constant 0 : index
    %269 = vector.load %arg65[%c0_204, %c0_205] : memref<64x1xf32, #tpu.memory_space<vmem>>, vector<64x1xf32>
    %c0_206 = arith.constant 0 : index
    %c0_207 = arith.constant 0 : index
    %270 = vector.load %arg5[%c0_206, %c0_207] : memref<8x8xf32, #tpu.memory_space<vmem>>, vector<8x8xf32>
    %cst_208 = arith.constant dense<0.000000e+00> : vector<8x8xf32>
    %271 = tpu.matmul %270, %270, %cst_208 {dimension_numbers = #tpu.dot_dimension_numbers<[1], [1], [0], [0], [0, 0, 1, 0], [], []>} : vector<8x8xf32>, vector<8x8xf32>, vector<8x8xf32> -> vector<8x8xf32>
    %272 = math.absf %271 : vector<8x8xf32>
    %cst_209 = arith.constant dense<0xFF800000> : vector<8xf32>
    %273 = vector.multi_reduction <maximumf>, %272, %cst_209 [1] : vector<8x8xf32> to vector<8xf32>
    %274 = vector.shape_cast %273 : vector<8xf32> to vector<8x1xf32>
    %cst_210 = arith.constant dense<0xFF800000> : vector<1xf32>
    %275 = vector.multi_reduction <maximumf>, %274, %cst_210 [0] : vector<8x1xf32> to vector<1xf32>
    %276 = vector.shape_cast %275 : vector<1xf32> to vector<1x1xf32>
    %277 = vector.broadcast %276 : vector<1x1xf32> to vector<8x8xf32>
    %278 = arith.divf %271, %277 : vector<8x8xf32>
    %cst_211 = arith.constant dense<0.000000e+00> : vector<8x8xf32>
    %279 = tpu.matmul %278, %278, %cst_211 {dimension_numbers = #tpu.dot_dimension_numbers<[1], [0], [0], [1], [0, 0, 1, 1], [], []>} : vector<8x8xf32>, vector<8x8xf32>, vector<8x8xf32> -> vector<8x8xf32>
    %280 = math.absf %279 : vector<8x8xf32>
    %cst_212 = arith.constant dense<0xFF800000> : vector<8xf32>
    %281 = vector.multi_reduction <maximumf>, %280, %cst_212 [1] : vector<8x8xf32> to vector<8xf32>
    %282 = vector.shape_cast %281 : vector<8xf32> to vector<8x1xf32>
    %cst_213 = arith.constant dense<0xFF800000> : vector<1xf32>
    %283 = vector.multi_reduction <maximumf>, %282, %cst_213 [0] : vector<8x1xf32> to vector<1xf32>
    %284 = vector.shape_cast %283 : vector<1xf32> to vector<1x1xf32>
    %285 = vector.broadcast %284 : vector<1x1xf32> to vector<8x8xf32>
    %286 = arith.divf %279, %285 : vector<8x8xf32>
    %cst_214 = arith.constant dense<0.000000e+00> : vector<8x8xf32>
    %287 = tpu.matmul %286, %286, %cst_214 {dimension_numbers = #tpu.dot_dimension_numbers<[1], [0], [0], [1], [0, 0, 1, 1], [], []>} : vector<8x8xf32>, vector<8x8xf32>, vector<8x8xf32> -> vector<8x8xf32>
    %288 = math.absf %287 : vector<8x8xf32>
    %cst_215 = arith.constant dense<0xFF800000> : vector<8xf32>
    %289 = vector.multi_reduction <maximumf>, %288, %cst_215 [1] : vector<8x8xf32> to vector<8xf32>
    %290 = vector.shape_cast %289 : vector<8xf32> to vector<8x1xf32>
    %cst_216 = arith.constant dense<0xFF800000> : vector<1xf32>
    %291 = vector.multi_reduction <maximumf>, %290, %cst_216 [0] : vector<8x1xf32> to vector<1xf32>
    %292 = vector.shape_cast %291 : vector<1xf32> to vector<1x1xf32>
    %293 = vector.broadcast %292 : vector<1x1xf32> to vector<8x8xf32>
    %294 = arith.divf %287, %293 : vector<8x8xf32>
    %cst_217 = arith.constant dense<0.000000e+00> : vector<8x8xf32>
    %295 = tpu.matmul %294, %294, %cst_217 {dimension_numbers = #tpu.dot_dimension_numbers<[1], [0], [0], [1], [0, 0, 1, 1], [], []>} : vector<8x8xf32>, vector<8x8xf32>, vector<8x8xf32> -> vector<8x8xf32>
    %296 = math.absf %295 : vector<8x8xf32>
    %cst_218 = arith.constant dense<0xFF800000> : vector<8xf32>
    %297 = vector.multi_reduction <maximumf>, %296, %cst_218 [1] : vector<8x8xf32> to vector<8xf32>
    %298 = vector.shape_cast %297 : vector<8xf32> to vector<8x1xf32>
    %cst_219 = arith.constant dense<0xFF800000> : vector<1xf32>
    %299 = vector.multi_reduction <maximumf>, %298, %cst_219 [0] : vector<8x1xf32> to vector<1xf32>
    %300 = vector.shape_cast %299 : vector<1xf32> to vector<1x1xf32>
    %301 = vector.broadcast %300 : vector<1x1xf32> to vector<8x8xf32>
    %302 = arith.divf %295, %301 : vector<8x8xf32>
    %cst_220 = arith.constant dense<0.000000e+00> : vector<8x8xf32>
    %303 = tpu.matmul %302, %302, %cst_220 {dimension_numbers = #tpu.dot_dimension_numbers<[1], [0], [0], [1], [0, 0, 1, 1], [], []>} : vector<8x8xf32>, vector<8x8xf32>, vector<8x8xf32> -> vector<8x8xf32>
    %304 = math.absf %303 : vector<8x8xf32>
    %cst_221 = arith.constant dense<0xFF800000> : vector<8xf32>
    %305 = vector.multi_reduction <maximumf>, %304, %cst_221 [1] : vector<8x8xf32> to vector<8xf32>
    %306 = vector.shape_cast %305 : vector<8xf32> to vector<8x1xf32>
    %cst_222 = arith.constant dense<0xFF800000> : vector<1xf32>
    %307 = vector.multi_reduction <maximumf>, %306, %cst_222 [0] : vector<8x1xf32> to vector<1xf32>
    %308 = vector.shape_cast %307 : vector<1xf32> to vector<1x1xf32>
    %309 = vector.broadcast %308 : vector<1x1xf32> to vector<8x8xf32>
    %310 = arith.divf %303, %309 : vector<8x8xf32>
    %cst_223 = arith.constant dense<0.000000e+00> : vector<8x8xf32>
    %311 = tpu.matmul %310, %310, %cst_223 {dimension_numbers = #tpu.dot_dimension_numbers<[1], [0], [0], [1], [0, 0, 1, 1], [], []>} : vector<8x8xf32>, vector<8x8xf32>, vector<8x8xf32> -> vector<8x8xf32>
    %312 = math.absf %311 : vector<8x8xf32>
    %cst_224 = arith.constant dense<0xFF800000> : vector<8xf32>
    %313 = vector.multi_reduction <maximumf>, %312, %cst_224 [1] : vector<8x8xf32> to vector<8xf32>
    %314 = vector.shape_cast %313 : vector<8xf32> to vector<8x1xf32>
    %cst_225 = arith.constant dense<0xFF800000> : vector<1xf32>
    %315 = vector.multi_reduction <maximumf>, %314, %cst_225 [0] : vector<8x1xf32> to vector<1xf32>
    %316 = vector.shape_cast %315 : vector<1xf32> to vector<1x1xf32>
    %317 = vector.broadcast %316 : vector<1x1xf32> to vector<8x8xf32>
    %318 = arith.divf %311, %317 : vector<8x8xf32>
    %cst_226 = arith.constant dense<0.000000e+00> : vector<8x8xf32>
    %319 = tpu.matmul %318, %318, %cst_226 {dimension_numbers = #tpu.dot_dimension_numbers<[1], [0], [0], [1], [0, 0, 1, 1], [], []>} : vector<8x8xf32>, vector<8x8xf32>, vector<8x8xf32> -> vector<8x8xf32>
    %320 = math.absf %319 : vector<8x8xf32>
    %cst_227 = arith.constant dense<0xFF800000> : vector<8xf32>
    %321 = vector.multi_reduction <maximumf>, %320, %cst_227 [1] : vector<8x8xf32> to vector<8xf32>
    %322 = vector.shape_cast %321 : vector<8xf32> to vector<8x1xf32>
    %cst_228 = arith.constant dense<0xFF800000> : vector<1xf32>
    %323 = vector.multi_reduction <maximumf>, %322, %cst_228 [0] : vector<8x1xf32> to vector<1xf32>
    %324 = vector.shape_cast %323 : vector<1xf32> to vector<1x1xf32>
    %325 = vector.broadcast %324 : vector<1x1xf32> to vector<8x8xf32>
    %326 = arith.divf %319, %325 : vector<8x8xf32>
    %cst_229 = arith.constant dense<0.000000e+00> : vector<8x8xf32>
    %327 = tpu.matmul %326, %326, %cst_229 {dimension_numbers = #tpu.dot_dimension_numbers<[1], [0], [0], [1], [0, 0, 1, 1], [], []>} : vector<8x8xf32>, vector<8x8xf32>, vector<8x8xf32> -> vector<8x8xf32>
    %328 = math.absf %327 : vector<8x8xf32>
    %cst_230 = arith.constant dense<0xFF800000> : vector<8xf32>
    %329 = vector.multi_reduction <maximumf>, %328, %cst_230 [1] : vector<8x8xf32> to vector<8xf32>
    %330 = vector.shape_cast %329 : vector<8xf32> to vector<8x1xf32>
    %cst_231 = arith.constant dense<0xFF800000> : vector<1xf32>
    %331 = vector.multi_reduction <maximumf>, %330, %cst_231 [0] : vector<8x1xf32> to vector<1xf32>
    %332 = vector.shape_cast %331 : vector<1xf32> to vector<1x1xf32>
    %333 = vector.broadcast %332 : vector<1x1xf32> to vector<8x8xf32>
    %334 = arith.divf %327, %333 : vector<8x8xf32>
    %cst_232 = arith.constant dense<0.000000e+00> : vector<8x8xf32>
    %335 = tpu.matmul %334, %334, %cst_232 {dimension_numbers = #tpu.dot_dimension_numbers<[1], [0], [0], [1], [0, 0, 1, 1], [], []>} : vector<8x8xf32>, vector<8x8xf32>, vector<8x8xf32> -> vector<8x8xf32>
    %336 = math.absf %335 : vector<8x8xf32>
    %cst_233 = arith.constant dense<0xFF800000> : vector<8xf32>
    %337 = vector.multi_reduction <maximumf>, %336, %cst_233 [1] : vector<8x8xf32> to vector<8xf32>
    %338 = vector.shape_cast %337 : vector<8xf32> to vector<8x1xf32>
    %cst_234 = arith.constant dense<0xFF800000> : vector<1xf32>
    %339 = vector.multi_reduction <maximumf>, %338, %cst_234 [0] : vector<8x1xf32> to vector<1xf32>
    %340 = vector.shape_cast %339 : vector<1xf32> to vector<1x1xf32>
    %341 = vector.broadcast %340 : vector<1x1xf32> to vector<8x8xf32>
    %342 = arith.divf %335, %341 : vector<8x8xf32>
    %343 = tpu.iota {dimensions = array<i32: 0>} : vector<8x1xi32>
    %344 = arith.sitofp %343 : vector<8x1xi32> to vector<8x1xf32>
    %cst_235 = arith.constant 1.250000e-01 : f32
    %345 = vector.broadcast %cst_235 : f32 to vector<8x1xf32>
    %346 = arith.mulf %345, %344 : vector<8x1xf32>
    %cst_236 = arith.constant 1.000000e+00 : f32
    %347 = vector.broadcast %cst_236 : f32 to vector<8x1xf32>
    %348 = arith.addf %347, %346 : vector<8x1xf32>
    %cst_237 = arith.constant dense<0.000000e+00> : vector<8x1xf32>
    %349 = tpu.matmul %342, %348, %cst_237 {dimension_numbers = #tpu.dot_dimension_numbers<[1], [0], [0], [1], [0, 0, 1, 1], [], []>} : vector<8x8xf32>, vector<8x1xf32>, vector<8x1xf32> -> vector<8x1xf32>
    %cst_238 = arith.constant dense<0.000000e+00> : vector<8x1xf32>
    %350 = tpu.matmul %271, %349, %cst_238 {dimension_numbers = #tpu.dot_dimension_numbers<[1], [0], [0], [1], [0, 0, 1, 1], [], []>} : vector<8x8xf32>, vector<8x1xf32>, vector<8x1xf32> -> vector<8x1xf32>
    %351 = arith.mulf %349, %350 : vector<8x1xf32>
    %cst_239 = arith.constant dense<0.000000e+00> : vector<1xf32>
    %352 = vector.multi_reduction <add>, %351, %cst_239 [0] : vector<8x1xf32> to vector<1xf32>
    %353 = vector.shape_cast %352 : vector<1xf32> to vector<1x1xf32>
    %354 = arith.mulf %349, %349 : vector<8x1xf32>
    %cst_240 = arith.constant dense<0.000000e+00> : vector<1xf32>
    %355 = vector.multi_reduction <add>, %354, %cst_240 [0] : vector<8x1xf32> to vector<1xf32>
    %356 = vector.shape_cast %355 : vector<1xf32> to vector<1x1xf32>
    %357 = arith.divf %353, %356 : vector<1x1xf32>
    %c0_241 = arith.constant 0 : index
    %358 = memref.load %arg9[%c0_241] : memref<1xf32, #tpu.memory_space<smem>>
    %359 = vector.broadcast %358 : f32 to vector<1x1xf32>
    %360 = arith.divf %359, %357 : vector<1x1xf32>
    %c0_242 = arith.constant 0 : index
    %c0_243 = arith.constant 0 : index
    %361 = vector.load %arg6[%c0_242, %c0_243] : memref<8x8xf32, #tpu.memory_space<vmem>>, vector<8x8xf32>
    %362 = math.absf %361 : vector<8x8xf32>
    %cst_244 = arith.constant dense<0xFF800000> : vector<8xf32>
    %363 = vector.multi_reduction <maximumf>, %362, %cst_244 [1] : vector<8x8xf32> to vector<8xf32>
    %364 = vector.shape_cast %363 : vector<8xf32> to vector<8x1xf32>
    %cst_245 = arith.constant dense<0xFF800000> : vector<1xf32>
    %365 = vector.multi_reduction <maximumf>, %364, %cst_245 [0] : vector<8x1xf32> to vector<1xf32>
    %366 = vector.shape_cast %365 : vector<1xf32> to vector<1x1xf32>
    %367 = arith.cmpf ogt, %366, %360 : vector<1x1xf32>
    %368 = arith.divf %360, %366 : vector<1x1xf32>
    %cst_246 = arith.constant 1.000000e+00 : f32
    %369 = vector.broadcast %cst_246 : f32 to vector<1x1xf32>
    %370 = arith.select %367, %368, %369 : vector<1x1xi1>, vector<1x1xf32>
    %c0_247 = arith.constant 0 : index
    %c0_248 = arith.constant 0 : index
    %371 = vector.load %arg7[%c0_247, %c0_248] : memref<64x64xf32, #tpu.memory_space<vmem>>, vector<64x64xf32>
    %372 = vector.broadcast %370 : vector<1x1xf32> to vector<64x64xf32>
    %373 = arith.mulf %371, %372 : vector<64x64xf32>
    %c0_249 = arith.constant 0 : index
    %c0_250 = arith.constant 0 : index
    %374 = vector.load %arg8[%c0_249, %c0_250] : memref<64x1xf32, #tpu.memory_space<vmem>>, vector<64x1xf32>
    %cst_251 = arith.constant dense<0.000000e+00> : vector<64x1xf32>
    %375 = tpu.matmul %373, %374, %cst_251 {dimension_numbers = #tpu.dot_dimension_numbers<[1], [0], [0], [1], [0, 0, 1, 1], [], []>} : vector<64x64xf32>, vector<64x1xf32>, vector<64x1xf32> -> vector<64x1xf32>
    %376 = arith.addf %375, %269 : vector<64x1xf32>
    %cst_252 = arith.constant 0.000000e+00 : f32
    %377 = vector.broadcast %cst_252 : f32 to vector<64x1xf32>
    %378 = arith.maximumf %376, %377 : vector<64x1xf32>
    %cst_253 = arith.constant dense<0.000000e+00> : vector<64x1xf32>
    %379 = tpu.matmul %373, %378, %cst_253 {dimension_numbers = #tpu.dot_dimension_numbers<[1], [0], [0], [1], [0, 0, 1, 1], [], []>} : vector<64x64xf32>, vector<64x1xf32>, vector<64x1xf32> -> vector<64x1xf32>
    %380 = arith.addf %379, %269 : vector<64x1xf32>
    %cst_254 = arith.constant 0.000000e+00 : f32
    %381 = vector.broadcast %cst_254 : f32 to vector<64x1xf32>
    %382 = arith.maximumf %380, %381 : vector<64x1xf32>
    %cst_255 = arith.constant dense<0.000000e+00> : vector<64x1xf32>
    %383 = tpu.matmul %373, %382, %cst_255 {dimension_numbers = #tpu.dot_dimension_numbers<[1], [0], [0], [1], [0, 0, 1, 1], [], []>} : vector<64x64xf32>, vector<64x1xf32>, vector<64x1xf32> -> vector<64x1xf32>
    %384 = arith.addf %383, %269 : vector<64x1xf32>
    %cst_256 = arith.constant 0.000000e+00 : f32
    %385 = vector.broadcast %cst_256 : f32 to vector<64x1xf32>
    %386 = arith.maximumf %384, %385 : vector<64x1xf32>
    %cst_257 = arith.constant dense<0.000000e+00> : vector<64x1xf32>
    %387 = tpu.matmul %373, %386, %cst_257 {dimension_numbers = #tpu.dot_dimension_numbers<[1], [0], [0], [1], [0, 0, 1, 1], [], []>} : vector<64x64xf32>, vector<64x1xf32>, vector<64x1xf32> -> vector<64x1xf32>
    %388 = arith.addf %387, %269 : vector<64x1xf32>
    %cst_258 = arith.constant 0.000000e+00 : f32
    %389 = vector.broadcast %cst_258 : f32 to vector<64x1xf32>
    %390 = arith.maximumf %388, %389 : vector<64x1xf32>
    %cst_259 = arith.constant dense<0.000000e+00> : vector<64x1xf32>
    %391 = tpu.matmul %373, %390, %cst_259 {dimension_numbers = #tpu.dot_dimension_numbers<[1], [0], [0], [1], [0, 0, 1, 1], [], []>} : vector<64x64xf32>, vector<64x1xf32>, vector<64x1xf32> -> vector<64x1xf32>
    %392 = arith.addf %391, %269 : vector<64x1xf32>
    %cst_260 = arith.constant 0.000000e+00 : f32
    %393 = vector.broadcast %cst_260 : f32 to vector<64x1xf32>
    %394 = arith.maximumf %392, %393 : vector<64x1xf32>
    %cst_261 = arith.constant dense<0.000000e+00> : vector<64x1xf32>
    %395 = tpu.matmul %373, %394, %cst_261 {dimension_numbers = #tpu.dot_dimension_numbers<[1], [0], [0], [1], [0, 0, 1, 1], [], []>} : vector<64x64xf32>, vector<64x1xf32>, vector<64x1xf32> -> vector<64x1xf32>
    %396 = arith.addf %395, %269 : vector<64x1xf32>
    %cst_262 = arith.constant 0.000000e+00 : f32
    %397 = vector.broadcast %cst_262 : f32 to vector<64x1xf32>
    %398 = arith.maximumf %396, %397 : vector<64x1xf32>
    %cst_263 = arith.constant dense<0.000000e+00> : vector<64x1xf32>
    %399 = tpu.matmul %373, %398, %cst_263 {dimension_numbers = #tpu.dot_dimension_numbers<[1], [0], [0], [1], [0, 0, 1, 1], [], []>} : vector<64x64xf32>, vector<64x1xf32>, vector<64x1xf32> -> vector<64x1xf32>
    %400 = arith.addf %399, %269 : vector<64x1xf32>
    %cst_264 = arith.constant 0.000000e+00 : f32
    %401 = vector.broadcast %cst_264 : f32 to vector<64x1xf32>
    %402 = arith.maximumf %400, %401 : vector<64x1xf32>
    %cst_265 = arith.constant dense<0.000000e+00> : vector<64x1xf32>
    %403 = tpu.matmul %373, %402, %cst_265 {dimension_numbers = #tpu.dot_dimension_numbers<[1], [0], [0], [1], [0, 0, 1, 1], [], []>} : vector<64x64xf32>, vector<64x1xf32>, vector<64x1xf32> -> vector<64x1xf32>
    %404 = arith.addf %403, %269 : vector<64x1xf32>
    %cst_266 = arith.constant 0.000000e+00 : f32
    %405 = vector.broadcast %cst_266 : f32 to vector<64x1xf32>
    %406 = arith.maximumf %404, %405 : vector<64x1xf32>
    %cst_267 = arith.constant dense<0.000000e+00> : vector<64x1xf32>
    %407 = tpu.matmul %373, %406, %cst_267 {dimension_numbers = #tpu.dot_dimension_numbers<[1], [0], [0], [1], [0, 0, 1, 1], [], []>} : vector<64x64xf32>, vector<64x1xf32>, vector<64x1xf32> -> vector<64x1xf32>
    %408 = arith.addf %407, %269 : vector<64x1xf32>
    %cst_268 = arith.constant 0.000000e+00 : f32
    %409 = vector.broadcast %cst_268 : f32 to vector<64x1xf32>
    %410 = arith.maximumf %408, %409 : vector<64x1xf32>
    %cst_269 = arith.constant dense<0.000000e+00> : vector<64x1xf32>
    %411 = tpu.matmul %373, %410, %cst_269 {dimension_numbers = #tpu.dot_dimension_numbers<[1], [0], [0], [1], [0, 0, 1, 1], [], []>} : vector<64x64xf32>, vector<64x1xf32>, vector<64x1xf32> -> vector<64x1xf32>
    %412 = arith.addf %411, %269 : vector<64x1xf32>
    %cst_270 = arith.constant 0.000000e+00 : f32
    %413 = vector.broadcast %cst_270 : f32 to vector<64x1xf32>
    %414 = arith.maximumf %412, %413 : vector<64x1xf32>
    %cst_271 = arith.constant dense<0.000000e+00> : vector<64x1xf32>
    %415 = tpu.matmul %373, %414, %cst_271 {dimension_numbers = #tpu.dot_dimension_numbers<[1], [0], [0], [1], [0, 0, 1, 1], [], []>} : vector<64x64xf32>, vector<64x1xf32>, vector<64x1xf32> -> vector<64x1xf32>
    %416 = arith.addf %415, %269 : vector<64x1xf32>
    %cst_272 = arith.constant 0.000000e+00 : f32
    %417 = vector.broadcast %cst_272 : f32 to vector<64x1xf32>
    %418 = arith.maximumf %416, %417 : vector<64x1xf32>
    %cst_273 = arith.constant dense<0.000000e+00> : vector<64x1xf32>
    %419 = tpu.matmul %373, %418, %cst_273 {dimension_numbers = #tpu.dot_dimension_numbers<[1], [0], [0], [1], [0, 0, 1, 1], [], []>} : vector<64x64xf32>, vector<64x1xf32>, vector<64x1xf32> -> vector<64x1xf32>
    %420 = arith.addf %419, %269 : vector<64x1xf32>
    %cst_274 = arith.constant 0.000000e+00 : f32
    %421 = vector.broadcast %cst_274 : f32 to vector<64x1xf32>
    %422 = arith.maximumf %420, %421 : vector<64x1xf32>
    %cst_275 = arith.constant dense<0.000000e+00> : vector<64x1xf32>
    %423 = tpu.matmul %373, %422, %cst_275 {dimension_numbers = #tpu.dot_dimension_numbers<[1], [0], [0], [1], [0, 0, 1, 1], [], []>} : vector<64x64xf32>, vector<64x1xf32>, vector<64x1xf32> -> vector<64x1xf32>
    %424 = arith.addf %423, %269 : vector<64x1xf32>
    %cst_276 = arith.constant 0.000000e+00 : f32
    %425 = vector.broadcast %cst_276 : f32 to vector<64x1xf32>
    %426 = arith.maximumf %424, %425 : vector<64x1xf32>
    %cst_277 = arith.constant dense<0.000000e+00> : vector<64x1xf32>
    %427 = tpu.matmul %373, %426, %cst_277 {dimension_numbers = #tpu.dot_dimension_numbers<[1], [0], [0], [1], [0, 0, 1, 1], [], []>} : vector<64x64xf32>, vector<64x1xf32>, vector<64x1xf32> -> vector<64x1xf32>
    %428 = arith.addf %427, %269 : vector<64x1xf32>
    %cst_278 = arith.constant 0.000000e+00 : f32
    %429 = vector.broadcast %cst_278 : f32 to vector<64x1xf32>
    %430 = arith.maximumf %428, %429 : vector<64x1xf32>
    %cst_279 = arith.constant dense<0.000000e+00> : vector<64x1xf32>
    %431 = tpu.matmul %373, %430, %cst_279 {dimension_numbers = #tpu.dot_dimension_numbers<[1], [0], [0], [1], [0, 0, 1, 1], [], []>} : vector<64x64xf32>, vector<64x1xf32>, vector<64x1xf32> -> vector<64x1xf32>
    %432 = arith.addf %431, %269 : vector<64x1xf32>
    %cst_280 = arith.constant 0.000000e+00 : f32
    %433 = vector.broadcast %cst_280 : f32 to vector<64x1xf32>
    %434 = arith.maximumf %432, %433 : vector<64x1xf32>
    %cst_281 = arith.constant dense<0.000000e+00> : vector<64x1xf32>
    %435 = tpu.matmul %373, %434, %cst_281 {dimension_numbers = #tpu.dot_dimension_numbers<[1], [0], [0], [1], [0, 0, 1, 1], [], []>} : vector<64x64xf32>, vector<64x1xf32>, vector<64x1xf32> -> vector<64x1xf32>
    %436 = arith.addf %435, %269 : vector<64x1xf32>
    %cst_282 = arith.constant 0.000000e+00 : f32
    %437 = vector.broadcast %cst_282 : f32 to vector<64x1xf32>
    %438 = arith.maximumf %436, %437 : vector<64x1xf32>
    %cst_283 = arith.constant dense<0.000000e+00> : vector<64x1xf32>
    %439 = tpu.matmul %373, %438, %cst_283 {dimension_numbers = #tpu.dot_dimension_numbers<[1], [0], [0], [1], [0, 0, 1, 1], [], []>} : vector<64x64xf32>, vector<64x1xf32>, vector<64x1xf32> -> vector<64x1xf32>
    %440 = arith.addf %439, %269 : vector<64x1xf32>
    %cst_284 = arith.constant 0.000000e+00 : f32
    %441 = vector.broadcast %cst_284 : f32 to vector<64x1xf32>
    %442 = arith.maximumf %440, %441 : vector<64x1xf32>
    %cst_285 = arith.constant dense<0.000000e+00> : vector<64x1xf32>
    %443 = tpu.matmul %373, %442, %cst_285 {dimension_numbers = #tpu.dot_dimension_numbers<[1], [0], [0], [1], [0, 0, 1, 1], [], []>} : vector<64x64xf32>, vector<64x1xf32>, vector<64x1xf32> -> vector<64x1xf32>
    %444 = arith.addf %443, %269 : vector<64x1xf32>
    %cst_286 = arith.constant 0.000000e+00 : f32
    %445 = vector.broadcast %cst_286 : f32 to vector<64x1xf32>
    %446 = arith.maximumf %444, %445 : vector<64x1xf32>
    %cst_287 = arith.constant dense<0.000000e+00> : vector<64x1xf32>
    %447 = tpu.matmul %373, %446, %cst_287 {dimension_numbers = #tpu.dot_dimension_numbers<[1], [0], [0], [1], [0, 0, 1, 1], [], []>} : vector<64x64xf32>, vector<64x1xf32>, vector<64x1xf32> -> vector<64x1xf32>
    %448 = arith.addf %447, %269 : vector<64x1xf32>
    %cst_288 = arith.constant 0.000000e+00 : f32
    %449 = vector.broadcast %cst_288 : f32 to vector<64x1xf32>
    %450 = arith.maximumf %448, %449 : vector<64x1xf32>
    %cst_289 = arith.constant dense<0.000000e+00> : vector<64x1xf32>
    %451 = tpu.matmul %373, %450, %cst_289 {dimension_numbers = #tpu.dot_dimension_numbers<[1], [0], [0], [1], [0, 0, 1, 1], [], []>} : vector<64x64xf32>, vector<64x1xf32>, vector<64x1xf32> -> vector<64x1xf32>
    %452 = arith.addf %451, %269 : vector<64x1xf32>
    %cst_290 = arith.constant 0.000000e+00 : f32
    %453 = vector.broadcast %cst_290 : f32 to vector<64x1xf32>
    %454 = arith.maximumf %452, %453 : vector<64x1xf32>
    %cst_291 = arith.constant dense<0.000000e+00> : vector<64x1xf32>
    %455 = tpu.matmul %373, %454, %cst_291 {dimension_numbers = #tpu.dot_dimension_numbers<[1], [0], [0], [1], [0, 0, 1, 1], [], []>} : vector<64x64xf32>, vector<64x1xf32>, vector<64x1xf32> -> vector<64x1xf32>
    %456 = arith.addf %455, %269 : vector<64x1xf32>
    %cst_292 = arith.constant 0.000000e+00 : f32
    %457 = vector.broadcast %cst_292 : f32 to vector<64x1xf32>
    %458 = arith.maximumf %456, %457 : vector<64x1xf32>
    %cst_293 = arith.constant dense<0.000000e+00> : vector<64x1xf32>
    %459 = tpu.matmul %373, %458, %cst_293 {dimension_numbers = #tpu.dot_dimension_numbers<[1], [0], [0], [1], [0, 0, 1, 1], [], []>} : vector<64x64xf32>, vector<64x1xf32>, vector<64x1xf32> -> vector<64x1xf32>
    %460 = arith.addf %459, %269 : vector<64x1xf32>
    %cst_294 = arith.constant 0.000000e+00 : f32
    %461 = vector.broadcast %cst_294 : f32 to vector<64x1xf32>
    %462 = arith.maximumf %460, %461 : vector<64x1xf32>
    %cst_295 = arith.constant dense<0.000000e+00> : vector<64x1xf32>
    %463 = tpu.matmul %373, %462, %cst_295 {dimension_numbers = #tpu.dot_dimension_numbers<[1], [0], [0], [1], [0, 0, 1, 1], [], []>} : vector<64x64xf32>, vector<64x1xf32>, vector<64x1xf32> -> vector<64x1xf32>
    %464 = arith.addf %463, %269 : vector<64x1xf32>
    %cst_296 = arith.constant 0.000000e+00 : f32
    %465 = vector.broadcast %cst_296 : f32 to vector<64x1xf32>
    %466 = arith.maximumf %464, %465 : vector<64x1xf32>
    %cst_297 = arith.constant dense<0.000000e+00> : vector<64x1xf32>
    %467 = tpu.matmul %373, %466, %cst_297 {dimension_numbers = #tpu.dot_dimension_numbers<[1], [0], [0], [1], [0, 0, 1, 1], [], []>} : vector<64x64xf32>, vector<64x1xf32>, vector<64x1xf32> -> vector<64x1xf32>
    %468 = arith.addf %467, %269 : vector<64x1xf32>
    %cst_298 = arith.constant 0.000000e+00 : f32
    %469 = vector.broadcast %cst_298 : f32 to vector<64x1xf32>
    %470 = arith.maximumf %468, %469 : vector<64x1xf32>
    %cst_299 = arith.constant dense<0.000000e+00> : vector<64x1xf32>
    %471 = tpu.matmul %373, %470, %cst_299 {dimension_numbers = #tpu.dot_dimension_numbers<[1], [0], [0], [1], [0, 0, 1, 1], [], []>} : vector<64x64xf32>, vector<64x1xf32>, vector<64x1xf32> -> vector<64x1xf32>
    %472 = arith.addf %471, %269 : vector<64x1xf32>
    %cst_300 = arith.constant 0.000000e+00 : f32
    %473 = vector.broadcast %cst_300 : f32 to vector<64x1xf32>
    %474 = arith.maximumf %472, %473 : vector<64x1xf32>
    %cst_301 = arith.constant dense<0.000000e+00> : vector<64x1xf32>
    %475 = tpu.matmul %373, %474, %cst_301 {dimension_numbers = #tpu.dot_dimension_numbers<[1], [0], [0], [1], [0, 0, 1, 1], [], []>} : vector<64x64xf32>, vector<64x1xf32>, vector<64x1xf32> -> vector<64x1xf32>
    %476 = arith.addf %475, %269 : vector<64x1xf32>
    %cst_302 = arith.constant 0.000000e+00 : f32
    %477 = vector.broadcast %cst_302 : f32 to vector<64x1xf32>
    %478 = arith.maximumf %476, %477 : vector<64x1xf32>
    %cst_303 = arith.constant dense<0.000000e+00> : vector<64x1xf32>
    %479 = tpu.matmul %373, %478, %cst_303 {dimension_numbers = #tpu.dot_dimension_numbers<[1], [0], [0], [1], [0, 0, 1, 1], [], []>} : vector<64x64xf32>, vector<64x1xf32>, vector<64x1xf32> -> vector<64x1xf32>
    %480 = arith.addf %479, %269 : vector<64x1xf32>
    %cst_304 = arith.constant 0.000000e+00 : f32
    %481 = vector.broadcast %cst_304 : f32 to vector<64x1xf32>
    %482 = arith.maximumf %480, %481 : vector<64x1xf32>
    %cst_305 = arith.constant dense<0.000000e+00> : vector<64x1xf32>
    %483 = tpu.matmul %373, %482, %cst_305 {dimension_numbers = #tpu.dot_dimension_numbers<[1], [0], [0], [1], [0, 0, 1, 1], [], []>} : vector<64x64xf32>, vector<64x1xf32>, vector<64x1xf32> -> vector<64x1xf32>
    %484 = arith.addf %483, %269 : vector<64x1xf32>
    %cst_306 = arith.constant 0.000000e+00 : f32
    %485 = vector.broadcast %cst_306 : f32 to vector<64x1xf32>
    %486 = arith.maximumf %484, %485 : vector<64x1xf32>
    %cst_307 = arith.constant dense<0.000000e+00> : vector<64x1xf32>
    %487 = tpu.matmul %373, %486, %cst_307 {dimension_numbers = #tpu.dot_dimension_numbers<[1], [0], [0], [1], [0, 0, 1, 1], [], []>} : vector<64x64xf32>, vector<64x1xf32>, vector<64x1xf32> -> vector<64x1xf32>
    %488 = arith.addf %487, %269 : vector<64x1xf32>
    %cst_308 = arith.constant 0.000000e+00 : f32
    %489 = vector.broadcast %cst_308 : f32 to vector<64x1xf32>
    %490 = arith.maximumf %488, %489 : vector<64x1xf32>
    %cst_309 = arith.constant dense<0.000000e+00> : vector<64x1xf32>
    %491 = tpu.matmul %373, %490, %cst_309 {dimension_numbers = #tpu.dot_dimension_numbers<[1], [0], [0], [1], [0, 0, 1, 1], [], []>} : vector<64x64xf32>, vector<64x1xf32>, vector<64x1xf32> -> vector<64x1xf32>
    %492 = arith.addf %491, %269 : vector<64x1xf32>
    %cst_310 = arith.constant 0.000000e+00 : f32
    %493 = vector.broadcast %cst_310 : f32 to vector<64x1xf32>
    %494 = arith.maximumf %492, %493 : vector<64x1xf32>
    %cst_311 = arith.constant dense<0.000000e+00> : vector<64x1xf32>
    %495 = tpu.matmul %373, %494, %cst_311 {dimension_numbers = #tpu.dot_dimension_numbers<[1], [0], [0], [1], [0, 0, 1, 1], [], []>} : vector<64x64xf32>, vector<64x1xf32>, vector<64x1xf32> -> vector<64x1xf32>
    %496 = arith.addf %495, %269 : vector<64x1xf32>
    %cst_312 = arith.constant 0.000000e+00 : f32
    %497 = vector.broadcast %cst_312 : f32 to vector<64x1xf32>
    %498 = arith.maximumf %496, %497 : vector<64x1xf32>
    %cst_313 = arith.constant dense<0.000000e+00> : vector<64x1xf32>
    %499 = tpu.matmul %373, %498, %cst_313 {dimension_numbers = #tpu.dot_dimension_numbers<[1], [0], [0], [1], [0, 0, 1, 1], [], []>} : vector<64x64xf32>, vector<64x1xf32>, vector<64x1xf32> -> vector<64x1xf32>
    %500 = arith.addf %499, %269 : vector<64x1xf32>
    %cst_314 = arith.constant 0.000000e+00 : f32
    %501 = vector.broadcast %cst_314 : f32 to vector<64x1xf32>
    %502 = arith.maximumf %500, %501 : vector<64x1xf32>
    %cst_315 = arith.constant dense<0.000000e+00> : vector<64x1xf32>
    %503 = tpu.matmul %373, %502, %cst_315 {dimension_numbers = #tpu.dot_dimension_numbers<[1], [0], [0], [1], [0, 0, 1, 1], [], []>} : vector<64x64xf32>, vector<64x1xf32>, vector<64x1xf32> -> vector<64x1xf32>
    %504 = arith.addf %503, %269 : vector<64x1xf32>
    %cst_316 = arith.constant 0.000000e+00 : f32
    %505 = vector.broadcast %cst_316 : f32 to vector<64x1xf32>
    %506 = arith.maximumf %504, %505 : vector<64x1xf32>
    %cst_317 = arith.constant dense<0.000000e+00> : vector<64x1xf32>
    %507 = tpu.matmul %373, %506, %cst_317 {dimension_numbers = #tpu.dot_dimension_numbers<[1], [0], [0], [1], [0, 0, 1, 1], [], []>} : vector<64x64xf32>, vector<64x1xf32>, vector<64x1xf32> -> vector<64x1xf32>
    %508 = arith.addf %507, %269 : vector<64x1xf32>
    %cst_318 = arith.constant 0.000000e+00 : f32
    %509 = vector.broadcast %cst_318 : f32 to vector<64x1xf32>
    %510 = arith.maximumf %508, %509 : vector<64x1xf32>
    %cst_319 = arith.constant dense<0.000000e+00> : vector<64x1xf32>
    %511 = tpu.matmul %373, %510, %cst_319 {dimension_numbers = #tpu.dot_dimension_numbers<[1], [0], [0], [1], [0, 0, 1, 1], [], []>} : vector<64x64xf32>, vector<64x1xf32>, vector<64x1xf32> -> vector<64x1xf32>
    %512 = arith.addf %511, %269 : vector<64x1xf32>
    %cst_320 = arith.constant 0.000000e+00 : f32
    %513 = vector.broadcast %cst_320 : f32 to vector<64x1xf32>
    %514 = arith.maximumf %512, %513 : vector<64x1xf32>
    %cst_321 = arith.constant dense<0.000000e+00> : vector<64x1xf32>
    %515 = tpu.matmul %373, %514, %cst_321 {dimension_numbers = #tpu.dot_dimension_numbers<[1], [0], [0], [1], [0, 0, 1, 1], [], []>} : vector<64x64xf32>, vector<64x1xf32>, vector<64x1xf32> -> vector<64x1xf32>
    %516 = arith.addf %515, %269 : vector<64x1xf32>
    %cst_322 = arith.constant 0.000000e+00 : f32
    %517 = vector.broadcast %cst_322 : f32 to vector<64x1xf32>
    %518 = arith.maximumf %516, %517 : vector<64x1xf32>
    %cst_323 = arith.constant dense<0.000000e+00> : vector<64x1xf32>
    %519 = tpu.matmul %373, %518, %cst_323 {dimension_numbers = #tpu.dot_dimension_numbers<[1], [0], [0], [1], [0, 0, 1, 1], [], []>} : vector<64x64xf32>, vector<64x1xf32>, vector<64x1xf32> -> vector<64x1xf32>
    %520 = arith.addf %519, %269 : vector<64x1xf32>
    %cst_324 = arith.constant 0.000000e+00 : f32
    %521 = vector.broadcast %cst_324 : f32 to vector<64x1xf32>
    %522 = arith.maximumf %520, %521 : vector<64x1xf32>
    %cst_325 = arith.constant dense<0.000000e+00> : vector<64x1xf32>
    %523 = tpu.matmul %373, %522, %cst_325 {dimension_numbers = #tpu.dot_dimension_numbers<[1], [0], [0], [1], [0, 0, 1, 1], [], []>} : vector<64x64xf32>, vector<64x1xf32>, vector<64x1xf32> -> vector<64x1xf32>
    %524 = arith.addf %523, %269 : vector<64x1xf32>
    %cst_326 = arith.constant 0.000000e+00 : f32
    %525 = vector.broadcast %cst_326 : f32 to vector<64x1xf32>
    %526 = arith.maximumf %524, %525 : vector<64x1xf32>
    %cst_327 = arith.constant dense<0.000000e+00> : vector<64x1xf32>
    %527 = tpu.matmul %373, %526, %cst_327 {dimension_numbers = #tpu.dot_dimension_numbers<[1], [0], [0], [1], [0, 0, 1, 1], [], []>} : vector<64x64xf32>, vector<64x1xf32>, vector<64x1xf32> -> vector<64x1xf32>
    %528 = arith.addf %527, %269 : vector<64x1xf32>
    %cst_328 = arith.constant 0.000000e+00 : f32
    %529 = vector.broadcast %cst_328 : f32 to vector<64x1xf32>
    %530 = arith.maximumf %528, %529 : vector<64x1xf32>
    %cst_329 = arith.constant dense<0.000000e+00> : vector<64x1xf32>
    %531 = tpu.matmul %373, %530, %cst_329 {dimension_numbers = #tpu.dot_dimension_numbers<[1], [0], [0], [1], [0, 0, 1, 1], [], []>} : vector<64x64xf32>, vector<64x1xf32>, vector<64x1xf32> -> vector<64x1xf32>
    %532 = arith.addf %531, %269 : vector<64x1xf32>
    %cst_330 = arith.constant 0.000000e+00 : f32
    %533 = vector.broadcast %cst_330 : f32 to vector<64x1xf32>
    %534 = arith.maximumf %532, %533 : vector<64x1xf32>
    %cst_331 = arith.constant dense<0.000000e+00> : vector<64x1xf32>
    %535 = tpu.matmul %373, %534, %cst_331 {dimension_numbers = #tpu.dot_dimension_numbers<[1], [0], [0], [1], [0, 0, 1, 1], [], []>} : vector<64x64xf32>, vector<64x1xf32>, vector<64x1xf32> -> vector<64x1xf32>
    %536 = arith.addf %535, %269 : vector<64x1xf32>
    %cst_332 = arith.constant 0.000000e+00 : f32
    %537 = vector.broadcast %cst_332 : f32 to vector<64x1xf32>
    %538 = arith.maximumf %536, %537 : vector<64x1xf32>
    %cst_333 = arith.constant dense<0.000000e+00> : vector<64x1xf32>
    %539 = tpu.matmul %373, %538, %cst_333 {dimension_numbers = #tpu.dot_dimension_numbers<[1], [0], [0], [1], [0, 0, 1, 1], [], []>} : vector<64x64xf32>, vector<64x1xf32>, vector<64x1xf32> -> vector<64x1xf32>
    %540 = arith.addf %539, %269 : vector<64x1xf32>
    %cst_334 = arith.constant 0.000000e+00 : f32
    %541 = vector.broadcast %cst_334 : f32 to vector<64x1xf32>
    %542 = arith.maximumf %540, %541 : vector<64x1xf32>
    %cst_335 = arith.constant dense<0.000000e+00> : vector<64x1xf32>
    %543 = tpu.matmul %373, %542, %cst_335 {dimension_numbers = #tpu.dot_dimension_numbers<[1], [0], [0], [1], [0, 0, 1, 1], [], []>} : vector<64x64xf32>, vector<64x1xf32>, vector<64x1xf32> -> vector<64x1xf32>
    %544 = arith.addf %543, %269 : vector<64x1xf32>
    %cst_336 = arith.constant 0.000000e+00 : f32
    %545 = vector.broadcast %cst_336 : f32 to vector<64x1xf32>
    %546 = arith.maximumf %544, %545 : vector<64x1xf32>
    %cst_337 = arith.constant dense<0.000000e+00> : vector<64x1xf32>
    %547 = tpu.matmul %373, %546, %cst_337 {dimension_numbers = #tpu.dot_dimension_numbers<[1], [0], [0], [1], [0, 0, 1, 1], [], []>} : vector<64x64xf32>, vector<64x1xf32>, vector<64x1xf32> -> vector<64x1xf32>
    %548 = arith.addf %547, %269 : vector<64x1xf32>
    %cst_338 = arith.constant 0.000000e+00 : f32
    %549 = vector.broadcast %cst_338 : f32 to vector<64x1xf32>
    %550 = arith.maximumf %548, %549 : vector<64x1xf32>
    %cst_339 = arith.constant dense<0.000000e+00> : vector<64x1xf32>
    %551 = tpu.matmul %373, %550, %cst_339 {dimension_numbers = #tpu.dot_dimension_numbers<[1], [0], [0], [1], [0, 0, 1, 1], [], []>} : vector<64x64xf32>, vector<64x1xf32>, vector<64x1xf32> -> vector<64x1xf32>
    %552 = arith.addf %551, %269 : vector<64x1xf32>
    %cst_340 = arith.constant 0.000000e+00 : f32
    %553 = vector.broadcast %cst_340 : f32 to vector<64x1xf32>
    %554 = arith.maximumf %552, %553 : vector<64x1xf32>
    %cst_341 = arith.constant dense<0.000000e+00> : vector<64x1xf32>
    %555 = tpu.matmul %373, %554, %cst_341 {dimension_numbers = #tpu.dot_dimension_numbers<[1], [0], [0], [1], [0, 0, 1, 1], [], []>} : vector<64x64xf32>, vector<64x1xf32>, vector<64x1xf32> -> vector<64x1xf32>
    %556 = arith.addf %555, %269 : vector<64x1xf32>
    %cst_342 = arith.constant 0.000000e+00 : f32
    %557 = vector.broadcast %cst_342 : f32 to vector<64x1xf32>
    %558 = arith.maximumf %556, %557 : vector<64x1xf32>
    %cst_343 = arith.constant dense<0.000000e+00> : vector<64x1xf32>
    %559 = tpu.matmul %373, %558, %cst_343 {dimension_numbers = #tpu.dot_dimension_numbers<[1], [0], [0], [1], [0, 0, 1, 1], [], []>} : vector<64x64xf32>, vector<64x1xf32>, vector<64x1xf32> -> vector<64x1xf32>
    %560 = arith.addf %559, %269 : vector<64x1xf32>
    %cst_344 = arith.constant 0.000000e+00 : f32
    %561 = vector.broadcast %cst_344 : f32 to vector<64x1xf32>
    %562 = arith.maximumf %560, %561 : vector<64x1xf32>
    %cst_345 = arith.constant dense<0.000000e+00> : vector<64x1xf32>
    %563 = tpu.matmul %373, %562, %cst_345 {dimension_numbers = #tpu.dot_dimension_numbers<[1], [0], [0], [1], [0, 0, 1, 1], [], []>} : vector<64x64xf32>, vector<64x1xf32>, vector<64x1xf32> -> vector<64x1xf32>
    %564 = arith.addf %563, %269 : vector<64x1xf32>
    %cst_346 = arith.constant 0.000000e+00 : f32
    %565 = vector.broadcast %cst_346 : f32 to vector<64x1xf32>
    %566 = arith.maximumf %564, %565 : vector<64x1xf32>
    %cst_347 = arith.constant dense<0.000000e+00> : vector<64x1xf32>
    %567 = tpu.matmul %373, %566, %cst_347 {dimension_numbers = #tpu.dot_dimension_numbers<[1], [0], [0], [1], [0, 0, 1, 1], [], []>} : vector<64x64xf32>, vector<64x1xf32>, vector<64x1xf32> -> vector<64x1xf32>
    %568 = arith.addf %567, %269 : vector<64x1xf32>
    %cst_348 = arith.constant 0.000000e+00 : f32
    %569 = vector.broadcast %cst_348 : f32 to vector<64x1xf32>
    %570 = arith.maximumf %568, %569 : vector<64x1xf32>
    %cst_349 = arith.constant dense<0.000000e+00> : vector<64x1xf32>
    %571 = tpu.matmul %373, %570, %cst_349 {dimension_numbers = #tpu.dot_dimension_numbers<[1], [0], [0], [1], [0, 0, 1, 1], [], []>} : vector<64x64xf32>, vector<64x1xf32>, vector<64x1xf32> -> vector<64x1xf32>
    %572 = arith.addf %571, %269 : vector<64x1xf32>
    %cst_350 = arith.constant 0.000000e+00 : f32
    %573 = vector.broadcast %cst_350 : f32 to vector<64x1xf32>
    %574 = arith.maximumf %572, %573 : vector<64x1xf32>
    %575 = arith.addf %269, %574 : vector<64x1xf32>
    %c0_351 = arith.constant 0 : index
    %c0_352 = arith.constant 0 : index
    %576 = vector.load %arg62[%c0_351, %c0_352] : memref<64x1xf32, #tpu.memory_space<vmem>>, vector<64x1xf32>
    tpu.vector_store %arg62[%c0_351, %c0_352], %575 {strides = array<i32>} : memref<64x1xf32, #tpu.memory_space<vmem>>, vector<64x1xf32>,
    return
  }
}

</mosaic_0001>

<bundles_post_ra>
// kernel: inecn_forward.1
= control target key start
LH: loop header
LB: loop body
LE: loop exit
PB: predicated region body
PF: predicated region fallthrough
CT: control target
= control target key end

     0   :  { %s15435_s6 = smov 1   ;;  %s15436_s10 = smov 2   ;;  %s17700_s0 = inlined_call_operand.smem [shape: u32[65], index: -1, kind: input, shape index: {}] }
   0x1   :  { %s15527_s5 = sld [smem:[%s17700_s0]]   ;;  %s15437_s14 = smov 3  }
   0x2   :  { %s15532_s9 = sld [smem:[%s17700_s0 + %s15435_s6]]   ;;  %s15438_s18 = smov 4  }
   0x3   :  { %s15537_s13 = sld [smem:[%s17700_s0 + %s15436_s10]]   ;;  %s15439_s22 = smov 5  }
   0x4   :  { %s15542_s17 = sld [smem:[%s17700_s0 + %s15437_s14]]   ;;  %s15440_s26 = smov 6  }
   0x5   :  { %s15547_s21 = sld [smem:[%s17700_s0 + %s15438_s18]]   ;;  %s15441_s30 = smov 7  }
   0x6   :  { %s15552_s25 = sld [smem:[%s17700_s0 + %s15439_s22]]   ;;  %s15442_s4 = smov 8  }
   0x7   :  { %17718 = sst [smem:[#allocation35_spill]] %s15527_s5  ;;  %s15443_s10 = smov 9  }
   0x8   :  { %17719 = sst [smem:[#allocation36_spill]] %s15532_s9  ;;  %s15444_s15 = smov 10  }
   0x9   :  { %17720 = sst [smem:[#allocation37_spill]] %s15537_s13  ;;  %s15445_s20 = smov 11  }
   0xa   :  { %17721 = sst [smem:[#allocation38_spill]] %s15542_s17  ;;  %s15447_s1 = smov 13  }
   0xb   :  { %17722 = sst [smem:[#allocation39_spill]] %s15547_s21  ;;  %s15448_s7 = smov 14  }
   0xc   :  { %17723 = sst [smem:[#allocation40_spill]] %s15552_s25  ;;  %s15450_s22 = smov 16  }
   0xd   :  { %s15557_s29 = sld [smem:[%s17700_s0 + %s15440_s26]]   ;;  %s15446_s26 = smov 12  }
   0xe   :  { %s15562_s3 = sld [smem:[%s17700_s0 + %s15441_s30]]   ;;  %s15451_s28 = smov 17  }
   0xf   :  { %s15567_s8 = sld [smem:[%s17700_s0 + %s15442_s4]]  }
  0x10   :  { %s15572_s14 = sld [smem:[%s17700_s0 + %s15443_s10]]  }
  0x11   :  { %s15577_s19 = sld [smem:[%s17700_s0 + %s15444_s15]]   ;;  %s15449_s15 = smov 15  }
  0x12   :  { %s15582_s24 = sld [smem:[%s17700_s0 + %s15445_s20]]  }
  0x13   :  { %17724 = sst [smem:[#allocation41_spill]] %s15557_s29 }
  0x14   :  { %17725 = sst [smem:[#allocation42_spill]] %s15562_s3 }
  0x15   :  { %17726 = sst [smem:[#allocation43_spill]] %s15567_s8 }
  0x16   :  { %17727 = sst [smem:[#allocation44_spill]] %s15572_s14 }
  0x17   :  { %17728 = sst [smem:[#allocation45_spill]] %s15577_s19 }
  0x18   :  { %17729 = sst [smem:[#allocation46_spill]] %s15582_s24 }
  0x19   :  { %s15587_s30 = sld [smem:[%s17700_s0 + %s15446_s26]]  }
  0x1a   :  { %s15592_s6 = sld [smem:[%s17700_s0 + %s15447_s1]]  }
  0x1b   :  { %s15597_s12 = sld [smem:[%s17700_s0 + %s15448_s7]]   ;;  %s15452_s7 = smov 18  }
  0x1c   :  { %s15602_s20 = sld [smem:[%s17700_s0 + %s15449_s15]]   ;;  %s15453_s15 = smov 19  }
  0x1d   :  { %s15607_s27 = sld [smem:[%s17700_s0 + %s15450_s22]]   ;;  %s15454_s22 = smov 20  }
  0x1e   :  { %s15612_s4 = sld [smem:[%s17700_s0 + %s15451_s28]]   ;;  %s15455_s28 = smov 21  }
  0x1f   :  { %17730 = sst [smem:[#allocation47_spill]] %s15587_s30 }
  0x20   :  { %17731 = sst [smem:[#allocation48_spill]] %s15592_s6 }
  0x21   :  { %17732 = sst [smem:[#allocation49_spill]] %s15597_s12 }
  0x22   :  { %17733 = sst [smem:[#allocation50_spill]] %s15602_s20 }
  0x23   :  { %17734 = sst [smem:[#allocation51_spill]] %s15607_s27 }
  0x24   :  { %17735 = sst [smem:[#allocation52_spill]] %s15612_s4 }
  0x25   :  { %s15617_s3 = sld [smem:[%s17700_s0 + %s15452_s7]]   ;;  %s15456_s7 = smov 22  }
  0x26   :  { %s15622_s14 = sld [smem:[%s17700_s0 + %s15453_s15]]   ;;  %s15457_s15 = smov 23  }
  0x27   :  { %s15627_s8 = sld [smem:[%s17700_s0 + %s15454_s22]]   ;;  %s15458_s22 = smov 24  }
  0x28   :  { %s15632_s29 = sld [smem:[%s17700_s0 + %s15455_s28]]   ;;  %s15459_s28 = smov 25  }
  0x29   :  { %s15637_s25 = sld [smem:[%s17700_s0 + %s15456_s7]]   ;;  %s15460_s7 = smov 26  }
  0x2b   :  { %17736 = sst [smem:[#allocation53_spill]] %s15617_s3 }
  0x2c   :  { %17737 = sst [smem:[#allocation54_spill]] %s15622_s14 }
  0x2d   :  { %17738 = sst [smem:[#allocation55_spill]] %s15627_s8 }
  0x2e   :  { %17739 = sst [smem:[#allocation56_spill]] %s15632_s29 }
  0x2f   :  { %17740 = sst [smem:[#allocation57_spill]] %s15637_s25 }
  0x30   :  { %s15642_s3 = sld [smem:[%s17700_s0 + %s15457_s15]]   ;;  %s15461_s15 = smov 27  }
  0x31   :  { %s15647_s8 = sld [smem:[%s17700_s0 + %s15458_s22]]   ;;  %s15462_s22 = smov 28  }
  0x32   :  { %s15652_s29 = sld [smem:[%s17700_s0 + %s15459_s28]]   ;;  %s15463_s28 = smov 29  }
  0x33   :  { %s15657_s25 = sld [smem:[%s17700_s0 + %s15460_s7]]   ;;  %s15464_s7 = smov 30  }
  0x34   :  { %s15677_s14 = sld [smem:[%s17700_s0 + %s15464_s7]]   ;;  %s15468_s7 = smov 34  }
  0x35   :  { %s15697_s4 = sld [smem:[%s17700_s0 + %s15468_s7]]   ;;  %s15472_s7 = smov 38  }
  0x36   :  { %17741 = sst [smem:[#allocation58_spill]] %s15642_s3 }
  0x37   :  { %17742 = sst [smem:[#allocation59_spill]] %s15647_s8 }
  0x38   :  { %17743 = sst [smem:[#allocation60_spill]] %s15652_s29 }
  0x39   :  { %s15662_s3 = sld [smem:[%s17700_s0 + %s15461_s15]]   ;;  %s15465_s15 = smov 31  }
  0x3a   :  { %s15667_s8 = sld [smem:[%s17700_s0 + %s15462_s22]]   ;;  %s15466_s22 = smov 32  }
  0x3b   :  { %s15672_s29 = sld [smem:[%s17700_s0 + %s15463_s28]]   ;;  %s15467_s28 = smov 33  }
  0x3c   :  { %s15687_s13 = sld [smem:[%s17700_s0 + %s15466_s22]]   ;;  %s15470_s22 = smov 36  }
  0x3d   :  { %17748 = sst [smem:[#allocation65_spill]] %s15697_s4 }
  0x3e   :  { %s15717_s4 = sld [smem:[%s17700_s0 + %s15472_s7]]   ;;  %s15476_s7 = smov 42  }
  0x3f   :  { %17744 = sst [smem:[#allocation61_spill]] %s15662_s3 }
  0x40   :  { %s15682_s3 = sld [smem:[%s17700_s0 + %s15465_s15]]   ;;  %s15469_s15 = smov 35  }
  0x41   :  { %17745 = sst [smem:[#allocation62_spill]] %s15672_s29 }
  0x42   :  { %17747 = sst [smem:[#allocation64_spill]] %s15687_s13 }
  0x43   :  { %s15692_s29 = sld [smem:[%s17700_s0 + %s15467_s28]]   ;;  %s15471_s28 = smov 37  }
  0x44   :  { %s15707_s13 = sld [smem:[%s17700_s0 + %s15470_s22]]   ;;  %s15474_s22 = smov 40  }
  0x45   :  { %s15712_s20 = sld [smem:[%s17700_s0 + %s15471_s28]]   ;;  %s15475_s28 = smov 41  }
  0x46   :  { %17746 = sst [smem:[#allocation63_spill]] %s15682_s3 }
  0x47   :  { %s15702_s3 = sld [smem:[%s17700_s0 + %s15469_s15]]   ;;  %s15473_s15 = smov 39  }
  0x48   :  { %17751 = sst [smem:[#allocation68_spill]] %s15717_s4 }
  0x49   :  { %s15722_s6 = sld [smem:[%s17700_s0 + %s15473_s15]]   ;;  %s15477_s15 = smov 43  }
  0x4a   :  { %17749 = sst [smem:[#allocation66_spill]] %s15707_s13 }
  0x4b   :  { %17750 = sst [smem:[#allocation67_spill]] %s15712_s20 }
  0x4c   :  { %s15727_s13 = sld [smem:[%s17700_s0 + %s15474_s22]]   ;;  %s15478_s22 = smov 44  }
  0x4d   :  { %s15732_s20 = sld [smem:[%s17700_s0 + %s15475_s28]]   ;;  %s15479_s28 = smov 45  }
  0x4e   :  { %s15737_s4 = sld [smem:[%s17700_s0 + %s15476_s7]]   ;;  %s15480_s7 = smov 46  }
  0x4f   :  { %s15742_s27 = sld [smem:[%s17700_s0 + %s15477_s15]]   ;;  %s15481_s15 = smov 47  }
  0x50   :  { %s15752_s21 = sld [smem:[%s17700_s0 + %s15479_s28]]   ;;  %s15483_s28 = smov 49  }
  0x51   :  { %s15762_s30 = sld [smem:[%s17700_s0 + %s15481_s15]]   ;;  %s15485_s15 = smov 51  }
  0x52   :  { %17752 = sst [smem:[#allocation69_spill]] %s15727_s13 }
  0x53   :  { %s15747_s13 = sld [smem:[%s17700_s0 + %s15478_s22]]   ;;  %s15482_s22 = smov 48  }
  0x54   :  { %17753 = sst [smem:[#allocation70_spill]] %s15737_s4 }
  0x55   :  { %s15757_s4 = sld [smem:[%s17700_s0 + %s15480_s7]]   ;;  %s15484_s7 = smov 50  }
  0x56   :  { %17755 = sst [smem:[#allocation72_spill]] %s15752_s21 }
  0x57   :  { %17756 = sst [smem:[#allocation73_spill]] %s15762_s30 }
  0x58   :  { %s15772_s21 = sld [smem:[%s17700_s0 + %s15483_s28]]   ;;  %s15487_s28 = smov 53  }
  0x59   :  { %17754 = sst [smem:[#allocation71_spill]] %s15747_s13 }
  0x5a   :  { %s15767_s13 = sld [smem:[%s17700_s0 + %s15482_s22]]   ;;  %s15486_s22 = smov 52  }
  0x5b   :  { %s15777_s12 = sld [smem:[%s17700_s0 + %s15484_s7]]   ;;  %s15488_s7 = smov 54  }
  0x5c   :  { %s15782_s30 = sld [smem:[%s17700_s0 + %s15485_s15]]   ;;  %s15489_s15 = smov 55  }
  0x5d   :  { %s15787_s19 = sld [smem:[%s17700_s0 + %s15486_s22]]   ;;  %s15490_s22 = smov 56  }
  0x5e   :  { %17757 = sst [smem:[#allocation74_spill]] %s15772_s21 }
  0x5f   :  { %s15792_s21 = sld [smem:[%s17700_s0 + %s15487_s28]]   ;;  %s15491_s28 = smov 57  }
  0x60   :  { %s15807_s24 = sld [smem:[%s17700_s0 + %s15490_s22]]   ;;  %s15494_s22 = smov 60  }
  0x61   :  { %17758 = sst [smem:[#allocation75_spill]] %s15777_s12 }
  0x62   :  { %17759 = sst [smem:[#allocation76_spill]] %s15782_s30 }
  0x63   :  { %s15797_s12 = sld [smem:[%s17700_s0 + %s15488_s7]]   ;;  %s15492_s7 = smov 58  }
  0x64   :  { %s15802_s30 = sld [smem:[%s17700_s0 + %s15489_s15]]   ;;  %s15493_s15 = smov 59  }
  0x65   :  { %17760 = sst [smem:[#allocation77_spill]] %s15792_s21 }
  0x66   :  { %s15812_s21 = sld [smem:[%s17700_s0 + %s15491_s28]]   ;;  %s15495_s28 = smov 61  }
  0x67   :  { %s15817_s5 = sld [smem:[%s17700_s0 + %s15492_s7]]   ;;  %s15496_s7 = smov 62  }
  0x68   :  { %s15827_s9 = sld [smem:[%s17700_s0 + %s15494_s22]]   ;;  %s15498_s22 = smov 64  }
  0x6a   :  { %17761 = sst [smem:[#allocation78_spill]] %s15802_s30 }
  0x6b   :  { %s15822_s30 = sld [smem:[%s17700_s0 + %s15493_s15]]   ;;  %s15497_s15 = smov 63  }
  0x6c   :  { %17762 = sst [smem:[#allocation79_spill]] %s15812_s21 }
  0x6d   :  { %17763 = sst [smem:[#allocation80_spill]] %s15817_s5 }
  0x6e   :  { %17764 = sst [smem:[#allocation81_spill]] %s15827_s9 }
  0x6f   :  { %s15832_s21 = sld [smem:[%s17700_s0 + %s15495_s28]]  }
  0x70   :  { %s15837_s5 = sld [smem:[%s17700_s0 + %s15496_s7]]  }
  0x71   :  { %s15842_s17 = sld [smem:[%s17700_s0 + %s15497_s15]]  }
  0x72   :  { %s15847_s9 = sld [smem:[%s17700_s0 + %s15498_s22]]  }
  0x73   :  { %136 = vsyncpa [#allocation5], 0 }
  0x74   :  { %137 = vsyncpa [#allocation7], 0 }
  0x75   :  { %138 = vsyncpa [#allocation10], 0 }
  0x76   :  { %139 = vsyncpa [#allocation13], 0 }
  0x77   :  { %140 = vsyncpa [#allocation16], 0 }
  0x78   :  { %141 = vsyncpa [#allocation19], 0 }
  0x79   :  { %142 = vsyncpa [#allocation22], 0 }
  0x7a   :  { %143 = vsyncpa [#allocation25], 0  ;;  %s15499_s28 = smov [#allocation6]   ;;  %s15500_s2 = smov [#allocation9]  }
  0x7b   :  { %s214_s1 = sshll.u32 %s15499_s28, 4  ;;  %s240_s7 = sshll.u32 %s15500_s2, 4  ;;  %s215_s1 = int_to_ptr.vmem [resolvable:$true] %s214_s1  ;;  %s241_s7 = int_to_ptr.vmem [resolvable:$true] %s240_s7 }
  0x7c   :  { %s15089_s10 = scalar_lea.hbm %s15667_s8, 16 }
  0x7d   :  { %p15090_p0 = scmp.ne.s32.totalorder %s15667_s8, %s15089_s10  ;;  %p15093_p1 = scmp.lt.u32.totalorder %s15089_s10, %s15667_s8 }
  0x7f   :  { %p15095_p2 = pnand %p15093_p1, %p15090_p0 }
  0x81   :  { %15098 = shalt.err (!%p15095_p2)
}
  0x82   :  { %s15099_s0 = scalar_lea.vmem %s215_s1, 16  ;;  %s15103_s11 = scalar_lea.vmem %s215_s1, 32 }
  0x83   :  { %p15100_p3 = scmp.ne.s32.totalorder %s215_s1, %s15099_s0  ;;  %p15104_p4 = scmp.lt.s32.totalorder %s215_s1, %s215_s1 }
  0x84   :  { %p15105_p5 = scmp.lt.s32.totalorder %s15103_s11, %s15099_s0 }
  0x86   :  { %p15106_p6 = por %p15105_p5, %p15104_p4 }
  0x88   :  { %p15107_p7 = pnand %p15106_p6, %p15100_p3 }
  0x8a   :  { %15110 = shalt.err (!%p15107_p7)
}
  0x8b   :  { %217 = dma.hbm_to_vmem [thread:$0]  %s15667_s8, 16, %s215_s1, [#allocation7]  }
  0x8c   :  { %s15111_s15 = scalar_lea.hbm %s15692_s29, 16 }
  0x8d   :  { %p15112_p8 = scmp.ne.s32.totalorder %s15692_s29, %s15111_s15  ;;  %p15115_p9 = scmp.lt.u32.totalorder %s15111_s15, %s15692_s29 }
  0x8f   :  { %p15117_p10 = pnand %p15115_p9, %p15112_p8 }
  0x91   :  { %15120 = shalt.err (!%p15117_p10)
}
  0x92   :  { %s15121_s16 = scalar_lea.vmem %s241_s7, 16  ;;  %s15125_s18 = scalar_lea.vmem %s241_s7, 32 }
  0x93   :  { %p15122_p11 = scmp.ne.s32.totalorder %s241_s7, %s15121_s16  ;;  %p15126_p12 = scmp.lt.s32.totalorder %s241_s7, %s241_s7 }
  0x94   :  { %p15127_p13 = scmp.lt.s32.totalorder %s15125_s18, %s15121_s16 }
  0x96   :  { %p15128_p0 = por %p15127_p13, %p15126_p12 }
  0x98   :  { %p15129_p1 = pnand %p15128_p0, %p15122_p11 }
  0x9a   :  { %15132 = shalt.err (!%p15129_p1)
}
  0x9b   :  { %243 = dma.hbm_to_vmem [thread:$0]  %s15692_s29, 16, %s241_s7, [#allocation10]  }
  0x9c   :  { %s15501_s22 = smov [#allocation12]   ;;  %s15502_s23 = smov [#allocation15]  }
  0x9d   :  { %s268_s8 = sshll.u32 %s15501_s22, 4  ;;  %s292_s26 = sshll.u32 %s15502_s23, 4  ;;  %s269_s8 = int_to_ptr.vmem [resolvable:$true] %s268_s8  ;;  %s293_s26 = int_to_ptr.vmem [resolvable:$true] %s292_s26 }
  0x9e   :  { %s15133_s28 = scalar_lea.hbm %s15722_s6, 16 }
  0x9f   :  { %p15134_p2 = scmp.ne.s32.totalorder %s15722_s6, %s15133_s28  ;;  %p15137_p3 = scmp.lt.u32.totalorder %s15133_s28, %s15722_s6 }
  0xa1   :  { %p15139_p4 = pnand %p15137_p3, %p15134_p2 }
  0xa3   :  { %15142 = shalt.err (!%p15139_p4)
}
  0xa4   :  { %s15143_s1 = scalar_lea.vmem %s269_s8, 16  ;;  %s15147_s2 = scalar_lea.vmem %s269_s8, 32 }
  0xa5   :  { %p15144_p5 = scmp.ne.s32.totalorder %s269_s8, %s15143_s1  ;;  %p15148_p6 = scmp.lt.s32.totalorder %s269_s8, %s269_s8 }
  0xa6   :  { %p15149_p7 = scmp.lt.s32.totalorder %s15147_s2, %s15143_s1 }
  0xa8   :  { %p15150_p8 = por %p15149_p7, %p15148_p6 }
  0xaa   :  { %p15151_p9 = pnand %p15150_p8, %p15144_p5 }
  0xac   :  { %15154 = shalt.err (!%p15151_p9)
}
  0xad   :  { %271 = dma.hbm_to_vmem [thread:$0]  %s15722_s6, 16, %s269_s8, [#allocation13]  }
  0xae   :  { %s15155_s29 = scalar_lea.hbm %s15742_s27, 16 }
  0xaf   :  { %p15156_p10 = scmp.ne.s32.totalorder %s15742_s27, %s15155_s29  ;;  %p15159_p11 = scmp.lt.u32.totalorder %s15155_s29, %s15742_s27 }
  0xb1   :  { %p15161_p12 = pnand %p15159_p11, %p15156_p10 }
  0xb3   :  { %15164 = shalt.err (!%p15161_p12)
}
  0xb4   :  { %s15165_s7 = scalar_lea.vmem %s293_s26, 16  ;;  %s15169_s10 = scalar_lea.vmem %s293_s26, 32 }
  0xb5   :  { %p15166_p13 = scmp.ne.s32.totalorder %s293_s26, %s15165_s7  ;;  %p15170_p0 = scmp.lt.s32.totalorder %s293_s26, %s293_s26 }
  0xb6   :  { %p15171_p1 = scmp.lt.s32.totalorder %s15169_s10, %s15165_s7 }
  0xb8   :  { %p15172_p2 = por %p15171_p1, %p15170_p0 }
  0xba   :  { %p15173_p3 = pnand %p15172_p2, %p15166_p13 }
  0xbc   :  { %15176 = shalt.err (!%p15173_p3)
}
  0xbd   :  { %295 = dma.hbm_to_vmem [thread:$0]  %s15742_s27, 16, %s293_s26, [#allocation16]  }
  0xbe   :  { %s15503_s0 = smov [#allocation18]   ;;  %s15504_s11 = smov [#allocation21]  }
  0xbf   :  { %s318_s6 = sshll.u32 %s15503_s0, 4  ;;  %s346_s15 = sshll.u32 %s15504_s11, 4  ;;  %s319_s6 = int_to_ptr.vmem [resolvable:$true] %s318_s6  ;;  %s347_s15 = int_to_ptr.vmem [resolvable:$true] %s346_s15 }
  0xc0   :  { %s15177_s16 = scalar_lea.hbm %s15767_s13, 16 }
  0xc1   :  { %p15178_p4 = scmp.ne.s32.totalorder %s15767_s13, %s15177_s16  ;;  %p15181_p5 = scmp.lt.u32.totalorder %s15177_s16, %s15767_s13 }
  0xc3   :  { %p15183_p6 = pnand %p15181_p5, %p15178_p4 }
  0xc5   :  { %15186 = shalt.err (!%p15183_p6)
}
  0xc6   :  { %s15187_s18 = scalar_lea.vmem %s319_s6, 16  ;;  %s15191_s22 = scalar_lea.vmem %s319_s6, 32 }
  0xc7   :  { %p15188_p7 = scmp.ne.s32.totalorder %s319_s6, %s15187_s18  ;;  %p15192_p8 = scmp.lt.s32.totalorder %s319_s6, %s319_s6 }
  0xc8   :  { %p15193_p9 = scmp.lt.s32.totalorder %s15191_s22, %s15187_s18 }
  0xca   :  { %p15194_p10 = por %p15193_p9, %p15192_p8 }
  0xcc   :  { %p15195_p11 = pnand %p15194_p10, %p15188_p7 }
  0xce   :  { %15198 = shalt.err (!%p15195_p11)
}
  0xcf   :  { %321 = dma.hbm_to_vmem [thread:$0]  %s15767_s13, 16, %s319_s6, [#allocation19]  }
  0xd0   :  { %s15199_s27 = scalar_lea.hbm %s15797_s12, 16 }
  0xd1   :  { %p15200_p12 = scmp.ne.s32.totalorder %s15797_s12, %s15199_s27  ;;  %p15203_p13 = scmp.lt.u32.totalorder %s15199_s27, %s15797_s12 }
  0xd3   :  { %p15205_p0 = pnand %p15203_p13, %p15200_p12 }
  0xd5   :  { %15208 = shalt.err (!%p15205_p0)
}
  0xd6   :  { %s15209_s8 = scalar_lea.vmem %s347_s15, 16  ;;  %s15213_s23 = scalar_lea.vmem %s347_s15, 32 }
  0xd7   :  { %p15210_p1 = scmp.ne.s32.totalorder %s347_s15, %s15209_s8  ;;  %p15214_p2 = scmp.lt.s32.totalorder %s347_s15, %s347_s15 }
  0xd8   :  { %p15215_p3 = scmp.lt.s32.totalorder %s15213_s23, %s15209_s8 }
  0xda   :  { %p15216_p4 = por %p15215_p3, %p15214_p2 }
  0xdc   :  { %p15217_p5 = pnand %p15216_p4, %p15210_p1 }
  0xde   :  { %15220 = shalt.err (!%p15217_p5)
}
  0xdf   :  { %349 = dma.hbm_to_vmem [thread:$0]  %s15797_s12, 16, %s347_s15, [#allocation22]  }
  0xe0   :  { %s15505_s26 = smov [#allocation24]   ;;  %s15506_s28 = smov [#allocation4]  }
  0xe1   :  { %s372_s13 = sshll.u32 %s15505_s26, 4  ;;  %s202_s1 = sshll.u32 %s15506_s28, 4  ;;  %s373_s13 = int_to_ptr.vmem [resolvable:$true] %s372_s13  ;;  %s203_s1 = int_to_ptr.vmem [resolvable:$true] %s202_s1 }
  0xe2   :  { %s15221_s2 = scalar_lea.hbm %s15822_s30, 16 }
  0xe3   :  { %p15222_p6 = scmp.ne.s32.totalorder %s15822_s30, %s15221_s2  ;;  %p15225_p7 = scmp.lt.u32.totalorder %s15221_s2, %s15822_s30 }
  0xe5   :  { %p15227_p8 = pnand %p15225_p7, %p15222_p6 }
  0xe7   :  { %15230 = shalt.err (!%p15227_p8)
}
  0xe8   :  { %s15231_s29 = scalar_lea.vmem %s373_s13, 16  ;;  %s15235_s7 = scalar_lea.vmem %s373_s13, 32 }
  0xe9   :  { %p15232_p9 = scmp.ne.s32.totalorder %s373_s13, %s15231_s29  ;;  %p15236_p10 = scmp.lt.s32.totalorder %s373_s13, %s373_s13 }
  0xea   :  { %p15237_p11 = scmp.lt.s32.totalorder %s15235_s7, %s15231_s29 }
  0xec   :  { %p15238_p12 = por %p15237_p11, %p15236_p10 }
  0xee   :  { %p15239_p13 = pnand %p15238_p12, %p15232_p9 }
  0xf0   :  { %15242 = shalt.err (!%p15239_p13)
}
  0xf1   :  { %375 = dma.hbm_to_vmem [thread:$0]  %s15822_s30, 16, %s373_s13, [#allocation25]  }
  0xf2   :  { %s15243_s12 = scalar_lea.hbm %s15657_s25, 16 }
  0xf3   :  { %p15244_p0 = scmp.ne.s32.totalorder %s15657_s25, %s15243_s12  ;;  %p15247_p1 = scmp.lt.u32.totalorder %s15243_s12, %s15657_s25 }
  0xf5   :  { %p15249_p2 = pnand %p15247_p1, %p15244_p0 }
  0xf7   :  { %15252 = shalt.err (!%p15249_p2)
}
  0xf8   :  { %s15253_s10 = scalar_lea.vmem %s203_s1, 16  ;;  %s15257_s0 = scalar_lea.vmem %s203_s1, 32 }
  0xf9   :  { %p15254_p3 = scmp.ne.s32.totalorder %s203_s1, %s15253_s10  ;;  %p15258_p4 = scmp.lt.s32.totalorder %s203_s1, %s203_s1 }
  0xfa   :  { %p15259_p5 = scmp.lt.s32.totalorder %s15257_s0, %s15253_s10 }
  0xfc   :  { %p15260_p6 = por %p15259_p5, %p15258_p4 }
  0xfe   :  { %p15261_p7 = pnand %p15260_p6, %p15254_p3 }
 0x100   :  { %15264 = shalt.err (!%p15261_p7)
}
 0x101   :  { %205 = dma.hbm_to_vmem [thread:$0]  %s15657_s25, 16, %s203_s1, [#allocation5]  }
 0x102   :  { %s15507_s6 = smov [#allocation8]   ;;  %s15508_s11 = smov [#allocation11]  }
 0x103   :  { %s226_s30 = sshll.u32 %s15507_s6, 4  ;;  %s252_s15 = sshll.u32 %s15508_s11, 4  ;;  %s227_s30 = int_to_ptr.vmem [resolvable:$true] %s226_s30  ;;  %s253_s15 = int_to_ptr.vmem [resolvable:$true] %s252_s15 }
 0x104   :  { %s15265_s16 = scalar_lea.hbm %s15677_s14, 16 }
 0x105   :  { %p15266_p8 = scmp.ne.s32.totalorder %s15677_s14, %s15265_s16  ;;  %p15269_p9 = scmp.lt.u32.totalorder %s15265_s16, %s15677_s14 }
 0x107   :  { %p15271_p10 = pnand %p15269_p9, %p15266_p8 }
 0x109   :  { %15274 = shalt.err (!%p15271_p10)
}
 0x10a   :  { %s15275_s18 = scalar_lea.vmem %s227_s30, 16  ;;  %s15279_s22 = scalar_lea.vmem %s227_s30, 32 }
 0x10b   :  { %p15276_p11 = scmp.ne.s32.totalorder %s227_s30, %s15275_s18  ;;  %p15280_p12 = scmp.lt.s32.totalorder %s227_s30, %s227_s30 }
 0x10c   :  { %p15281_p13 = scmp.lt.s32.totalorder %s15279_s22, %s15275_s18 }
 0x10e   :  { %p15282_p0 = por %p15281_p13, %p15280_p12 }
 0x110   :  { %p15283_p1 = pnand %p15282_p0, %p15276_p11 }
 0x112   :  { %15286 = shalt.err (!%p15283_p1)
}
 0x113   :  { %229 = dma.hbm_to_vmem [thread:$0]  %s15677_s14, 16, %s227_s30, [#allocation7]  }
 0x114   :  { %s15287_s25 = scalar_lea.hbm %s15702_s3, 16 }
 0x115   :  { %p15288_p2 = scmp.ne.s32.totalorder %s15702_s3, %s15287_s25  ;;  %p15291_p3 = scmp.lt.u32.totalorder %s15287_s25, %s15702_s3 }
 0x117   :  { %p15293_p4 = pnand %p15291_p3, %p15288_p2 }
 0x119   :  { %15296 = shalt.err (!%p15293_p4)
}
 0x11a   :  { %s15297_s27 = scalar_lea.vmem %s253_s15, 16  ;;  %s15301_s8 = scalar_lea.vmem %s253_s15, 32 }
 0x11b   :  { %p15298_p5 = scmp.ne.s32.totalorder %s253_s15, %s15297_s27  ;;  %p15302_p6 = scmp.lt.s32.totalorder %s253_s15, %s253_s15 }
 0x11c   :  { %p15303_p7 = scmp.lt.s32.totalorder %s15301_s8, %s15297_s27 }
 0x11e   :  { %p15304_p8 = por %p15303_p7, %p15302_p6 }
 0x120   :  { %p15305_p9 = pnand %p15304_p8, %p15298_p5 }
 0x122   :  { %15308 = shalt.err (!%p15305_p9)
}
 0x123   :  { %255 = dma.hbm_to_vmem [thread:$0]  %s15702_s3, 16, %s253_s15, [#allocation10]  }
 0x124   :  { %s15509_s23 = smov [#allocation14]   ;;  %s15510_s26 = smov [#allocation17]  }
 0x125   :  { %s280_s14 = sshll.u32 %s15509_s23, 4  ;;  %s306_s13 = sshll.u32 %s15510_s26, 4  ;;  %s281_s14 = int_to_ptr.vmem [resolvable:$true] %s280_s14  ;;  %s307_s13 = int_to_ptr.vmem [resolvable:$true] %s306_s13 }
 0x126   :  { %s15309_s28 = scalar_lea.hbm %s15732_s20, 16 }
 0x127   :  { %p15310_p10 = scmp.ne.s32.totalorder %s15732_s20, %s15309_s28  ;;  %p15313_p11 = scmp.lt.u32.totalorder %s15309_s28, %s15732_s20 }
 0x129   :  { %p15315_p12 = pnand %p15313_p11, %p15310_p10 }
 0x12b   :  { %15318 = shalt.err (!%p15315_p12)
}
 0x12c   :  { %s15319_s1 = scalar_lea.vmem %s281_s14, 16  ;;  %s15323_s2 = scalar_lea.vmem %s281_s14, 32 }
 0x12d   :  { %p15320_p13 = scmp.ne.s32.totalorder %s281_s14, %s15319_s1  ;;  %p15324_p0 = scmp.lt.s32.totalorder %s281_s14, %s281_s14 }
 0x12e   :  { %p15325_p1 = scmp.lt.s32.totalorder %s15323_s2, %s15319_s1 }
 0x130   :  { %p15326_p2 = por %p15325_p1, %p15324_p0 }
 0x132   :  { %p15327_p3 = pnand %p15326_p2, %p15320_p13 }
 0x134   :  { %15330 = shalt.err (!%p15327_p3)
}
 0x135   :  { %283 = dma.hbm_to_vmem [thread:$0]  %s15732_s20, 16, %s281_s14, [#allocation13]  }
 0x136   :  { %s15331_s3 = scalar_lea.hbm %s15757_s4, 16 }
 0x137   :  { %p15332_p4 = scmp.ne.s32.totalorder %s15757_s4, %s15331_s3  ;;  %p15335_p5 = scmp.lt.u32.totalorder %s15331_s3, %s15757_s4 }
 0x139   :  { %p15337_p6 = pnand %p15335_p5, %p15332_p4 }
 0x13b   :  { %15340 = shalt.err (!%p15337_p6)
}
 0x13c   :  { %s15341_s29 = scalar_lea.vmem %s307_s13, 16  ;;  %s15345_s7 = scalar_lea.vmem %s307_s13, 32 }
 0x13d   :  { %p15342_p7 = scmp.ne.s32.totalorder %s307_s13, %s15341_s29  ;;  %p15346_p8 = scmp.lt.s32.totalorder %s307_s13, %s307_s13 }
 0x13e   :  { %p15347_p9 = scmp.lt.s32.totalorder %s15345_s7, %s15341_s29 }
 0x140   :  { %p15348_p10 = por %p15347_p9, %p15346_p8 }
 0x142   :  { %p15349_p11 = pnand %p15348_p10, %p15342_p7 }
 0x144   :  { %15352 = shalt.err (!%p15349_p11)
}
 0x145   :  { %309 = dma.hbm_to_vmem [thread:$0]  %s15757_s4, 16, %s307_s13, [#allocation16]  }
 0x146   :  { %s15511_s12 = smov [#allocation20]   ;;  %s15512_s10 = smov [#allocation23]  }
 0x147   :  { %s334_s20 = sshll.u32 %s15511_s12, 4  ;;  %s358_s0 = sshll.u32 %s15512_s10, 4  ;;  %s335_s20 = int_to_ptr.vmem [resolvable:$true] %s334_s20  ;;  %s359_s0 = int_to_ptr.vmem [resolvable:$true] %s358_s0 }
 0x148   :  { %s15353_s6 = scalar_lea.hbm %s15787_s19, 16 }
 0x149   :  { %p15354_p12 = scmp.ne.s32.totalorder %s15787_s19, %s15353_s6  ;;  %p15357_p13 = scmp.lt.u32.totalorder %s15353_s6, %s15787_s19 }
 0x14b   :  { %p15359_p0 = pnand %p15357_p13, %p15354_p12 }
 0x14d   :  { %15362 = shalt.err (!%p15359_p0)
}
 0x14e   :  { %s15363_s30 = scalar_lea.vmem %s335_s20, 16  ;;  %s15367_s11 = scalar_lea.vmem %s335_s20, 32 }
 0x14f   :  { %p15364_p1 = scmp.ne.s32.totalorder %s335_s20, %s15363_s30  ;;  %p15368_p2 = scmp.lt.s32.totalorder %s335_s20, %s335_s20 }
 0x150   :  { %p15369_p3 = scmp.lt.s32.totalorder %s15367_s11, %s15363_s30 }
 0x152   :  { %p15370_p4 = por %p15369_p3, %p15368_p2 }
 0x154   :  { %p15371_p5 = pnand %p15370_p4, %p15364_p1 }
 0x156   :  { %15374 = shalt.err (!%p15371_p5)
}
 0x157   :  { %337 = dma.hbm_to_vmem [thread:$0]  %s15787_s19, 16, %s335_s20, [#allocation19]  }
 0x158   :  { %s15375_s4 = scalar_lea.hbm %s15807_s24, 16 }
 0x159   :  { %p15376_p6 = scmp.ne.s32.totalorder %s15807_s24, %s15375_s4  ;;  %p15379_p7 = scmp.lt.u32.totalorder %s15375_s4, %s15807_s24 }
 0x15b   :  { %p15381_p8 = pnand %p15379_p7, %p15376_p6 }
 0x15d   :  { %15384 = shalt.err (!%p15381_p8)
}
 0x15e   :  { %s15385_s15 = scalar_lea.vmem %s359_s0, 16  ;;  %s15389_s16 = scalar_lea.vmem %s359_s0, 32 }
 0x15f   :  { %p15386_p9 = scmp.ne.s32.totalorder %s359_s0, %s15385_s15  ;;  %p15390_p10 = scmp.lt.s32.totalorder %s359_s0, %s359_s0 }
 0x160   :  { %p15391_p11 = scmp.lt.s32.totalorder %s15389_s16, %s15385_s15 }
 0x162   :  { %p15392_p12 = por %p15391_p11, %p15390_p10 }
 0x164   :  { %p15393_p13 = pnand %p15392_p12, %p15386_p9 }
 0x166   :  { %15396 = shalt.err (!%p15393_p13)
}
 0x167   :  { %361 = dma.hbm_to_vmem [thread:$0]  %s15807_s24, 16, %s359_s0, [#allocation22]  }
 0x168   :  { %s15513_s18 = smov [#allocation26]   ;;  %s15397_s22 = scalar_lea.hbm %s15832_s21, 16 }
 0x169   :  { %s384_s19 = sshll.u32 %s15513_s18, 4  ;;  %p15398_p0 = scmp.ne.s32.totalorder %s15832_s21, %s15397_s22  ;;  %s385_s19 = int_to_ptr.vmem [resolvable:$true] %s384_s19 }
 0x16a   :  { %p15401_p1 = scmp.lt.u32.totalorder %s15397_s22, %s15832_s21 }
 0x16c   :  { %p15403_p2 = pnand %p15401_p1, %p15398_p0 }
 0x16e   :  { %15406 = shalt.err (!%p15403_p2)
}
 0x16f   :  { %s15407_s25 = scalar_lea.vmem %s385_s19, 16  ;;  %s15411_s27 = scalar_lea.vmem %s385_s19, 32 }
 0x170   :  { %p15408_p3 = scmp.ne.s32.totalorder %s385_s19, %s15407_s25  ;;  %p15412_p4 = scmp.lt.s32.totalorder %s385_s19, %s385_s19 }
 0x171   :  { %p15413_p5 = scmp.lt.s32.totalorder %s15411_s27, %s15407_s25 }
 0x173   :  { %p15414_p6 = por %p15413_p5, %p15412_p4 }
 0x175   :  { %p15415_p7 = pnand %p15414_p6, %p15408_p3 }
 0x177   :  { %15418 = shalt.err (!%p15415_p7)
}
 0x178   :  { %387 = dma.hbm_to_vmem [thread:$0]  %s15832_s21, 16, %s385_s19, [#allocation25]  }
 0x179   :  { %15419 = dma.done.wait [#allocation5], 16  }
 0x17a   :  { %15420 = vsyncadd [#allocation5], 4294967280 }
 0x17b   :  { %15421 = dma.done.wait [#allocation7], 32  }
 0x17c   :  { %15422 = vsyncadd [#allocation7], 4294967264 }
 0x17d   :  { %15423 = dma.done.wait [#allocation10], 32  }
 0x17e   :  { %15424 = vsyncadd [#allocation10], 4294967264 }
 0x17f   :  { %15425 = dma.done.wait [#allocation13], 32  }
 0x180   :  { %15426 = vsyncadd [#allocation13], 4294967264 }
 0x181   :  { %15427 = dma.done.wait [#allocation16], 32  }
 0x182   :  { %15428 = vsyncadd [#allocation16], 4294967264 }
 0x183   :  { %15429 = dma.done.wait [#allocation19], 32  }
 0x184   :  { %15430 = vsyncadd [#allocation19], 4294967264 }
 0x185   :  { %15431 = dma.done.wait [#allocation22], 32  }
 0x186   :  { %15432 = vsyncadd [#allocation22], 4294967264 }
 0x187   :  { %15433 = dma.done.wait [#allocation25], 32  }
 0x188   :  { %15434 = vsyncadd [#allocation25], 4294967264  ;;  %s17765_s24 = sld [smem:[#allocation38_spill]]  ;;  %s17766_s8 = sld [smem:[#allocation36_spill]]  ;;  %vm441_vm0 = vcmask 64512   ;;  %vm613_vm1 = vcmask 1043456  }
 0x189   :  { %s17767_s21 = sld [smem:[#allocation35_spill]]  ;;  %s17768_s23 = sld [smem:[#allocation46_spill]]  ;;  %vm606_vm2 = vcmask 31744   ;;  %vm784_vm3 = vcmask 1045504   ;;  %vm777_vm4 = vcmask 48128   ;;  %vm897_vm5 = vcmask 1041408  }
 0x18a   :  { %s17769_s14 = sld [smem:[#allocation45_spill]]  ;;  %s17770_s26 = sld [smem:[#allocation49_spill]]  ;;  %vm890_vm6 = vcmask 408576   ;;  %v15514_v48 = vmov 0.0|0.0   ;;  %vm15515_vm7 = vmmov 0   ;;  %v15516_v49 = vmov 0.0  }
 0x18b   :  { %s17771_s13 = sld [smem:[#allocation47_spill]]  ;;  %s17773_s1 = sld [smem:[#allocation51_spill]]  ;;  %vm15517_vm8 = vmmov 1   ;;  %vm1076_vm10 = vcmask 97280   ;;  %vm2289_vm11 = vcmask 1044480   ;;  %vm2282_vm12 = vcmask 39936  }
 0x18c   :  { %s17772_s28 = sld [smem:[#allocation39_spill]]  ;;  %s17774_s2 = sld [smem:[#allocation48_spill]]  ;;  %vm16003_vm9 = vmpackc.low %vm613_vm1, %vm15517_vm8  ;;  %vm3794_vm13 = vcmask 44032  }
 0x18d   :  { %s17775_s3 = sld [smem:[#allocation50_spill]]  ;;  %s17776_s29 = sld [smem:[#allocation52_spill]] }
 0x18e   :  { %v15910_v0 = vld [vmem:[%s17765_s24] sm:$0xff]  ;;  %v15916_v2 = vld [vmem:[%s17766_s8 + $0x8] sm:$0xf]  ;;  %s17777_s7 = sld [smem:[#allocation37_spill]]  ;;  %s17778_s12 = sld [smem:[#allocation54_spill]] }
 0x18f   :  { %v15913_v1 = vld [vmem:[%s17766_s8] sm:$0xff]  ;;  %12186 = vmatprep.subr.mxu1 %v15910_v0  ;;  %12181 = vmatprep.subr.mxu0 %v15910_v0  ;;  %v15927_v4 = vld [vmem:[%s17767_s21 + $0x8] sm:$0xf]  ;;  %s17779_s20 = sld [smem:[#allocation53_spill]]  ;;  %s17780_s10 = sld [smem:[#allocation59_spill]] }
 0x190   :  { %12188 = vmatprep.mubr.msk.f32.mxu1 %vm441_vm0, %v15913_v1  ;;  %v15922_v3 = vld [vmem:[%s17767_s21] sm:$0xff]  ;;  %12187 = vmatpush3.msra.mxu1 %v15910_v0  ;;  %v877_v8 = vld [vmem:[%s17770_s26 + $0x8] sm:$0xff]  ;;  %v878_v9 = vld [vmem:[%s17770_s26 + $0x10] sm:$0xff]  ;;  %s17783_s0 = sld [smem:[#allocation56_spill]]  ;;  %s17784_s6 = sld [smem:[#allocation58_spill]] }
 0x191   :  { %12189 = vmatmul.mubr.msk.f32.vlgmr.msra.gmra.mrb[0].mxu1 %vm441_vm0, %v15916_v2  ;;  %12182 = vmatpush3.msra.mxu0 %v15910_v0  ;;  %v605_v5 = vld [vmem:[%s17768_s23] sm:$0xf]  ;;  %v879_v11 = vld [vmem:[%s17770_s26 + $0x18] sm:$0xff]  ;;  %v881_v21 = vld [vmem:[%s17770_s26 + $0x28] sm:$0xff]  ;;  %s17785_s30 = sld [smem:[#allocation60_spill]]  ;;  %s17786_s11 = sld [smem:[#allocation61_spill]] }
 0x192   :  { %12183 = vmatprep.mubr.msk.f32.mxu0 %vm441_vm0, %v15922_v3  ;;  %12191 = vmatprep.subr.msk.mxu0 %vm613_vm1, %v605_v5  ;;  %v604_v6 = vld [vmem:[%s17769_s14] sm:$0xf]  ;;  %v13978_v12 = vpack.c.bf16 %v879_v11, %v878_v9  ;;  %v15971_v19 = vld [vmem:[%s17772_s28 + $0x8] sm:$0xf]  ;;  %v882_v23 = vld [vmem:[%s17770_s26 + $0x30] sm:$0x3] }
 0x193   :  { %12184 = vmatmul.mubr.msk.f32.vlgmr.msra.gmra.mrb[0].mxu0 %vm441_vm0, %v15927_v4  ;;  %v876_v7 = vld [vmem:[%s17770_s26] sm:$0xff]  ;;  %v979_v25 = vld [vmem:[%s17773_s1 + $0x8] sm:$0xff]  ;;  %v980_v26 = vld [vmem:[%s17773_s1 + $0x10] sm:$0xff]  ;;  %s17787_s4 = sld [smem:[#allocation55_spill]]  ;;  %s17788_s15 = sld [smem:[#allocation64_spill]] }
 0x194   :  { %12192 = vmatpush3.msk.msra.mxu0 %vm613_vm1, %v605_v5  ;;  %v13974_v10 = vpack.c.bf16 %v877_v8, %v876_v7  ;;  %v776_v16 = vld [vmem:[%s17771_s13] sm:$0x3f]  ;;  %v981_v28 = vld [vmem:[%s17773_s1 + $0x18] sm:$0xff]  ;;  %v983_v38 = vld [vmem:[%s17773_s1 + $0x28] sm:$0xff]  ;;  %s17789_s16 = sld [smem:[#allocation63_spill]]  ;;  %s17790_s18 = sld [smem:[#allocation62_spill]] }
 0x195   :  { %12196 = vmatprep.subr.msk.mxu0 %vm613_vm1, %v604_v6  ;;  %v15963_v18 = vld [vmem:[%s17772_s28] sm:$0xff]  ;;  %v13990_v29 = vpack.c.bf16 %v981_v28, %v980_v26  ;;  %v984_v40 = vld [vmem:[%s17773_s1 + $0x30] sm:$0x3]  ;;  %s17791_s19 = sld [smem:[#allocation57_spill]]  ;;  %s17793_s25 = sld [smem:[#allocation67_spill]] }
 0x196   :  { %13975 = vmatprep.subr.bf16.mxu1 %v13974_v10  ;;  %v880_v20 = vld [vmem:[%s17770_s26 + $0x20] sm:$0xff]  ;;  %v1317_v62 = vld [vmem:[%s17783_s0 + $0x8] sm:$0xff]  ;;  %v1318_v63 = vld [vmem:[%s17783_s0 + $0x10] sm:$0xff]  ;;  %s17792_s22 = sld [smem:[#allocation65_spill]]  ;;  %s17794_s27 = sld [smem:[#allocation66_spill]] }
 0x197   :  { %13977 = vmatpush3.bf16.msra.mxu1 %v13974_v10  ;;  %v13982_v22 = vpack.c.bf16 %v881_v21, %v880_v20  ;;  %v978_v24 = vld [vmem:[%s17773_s1] sm:$0xff]  ;;  %v1322_v20 = vld [vmem:[%s17783_s0 + $0x30] sm:$0x3]  ;;  %v1658_v21 = vld [vmem:[%s17786_s11 + $0x8] sm:$0xff]  ;;  %s17795_s24 = sld [smem:[#allocation68_spill]]  ;;  %s17796_s8 = sld [smem:[#allocation69_spill]] }
 0x198   :  { %13979 = vmatprep.subr.bf16.mxu1 %v13978_v12  ;;  %v13986_v27 = vpack.c.bf16 %v979_v25, %v978_v24  ;;  %v10658_v30 = vld [vmem:[%s17774_s2] ss:$0 sm:$0xff]  ;;  %v1660_v24 = vld [vmem:[%s17786_s11 + $0x18] sm:$0xff]  ;;  %s17797_s21 = sld [smem:[#allocation70_spill]]  ;;  %s17798_s23 = sld [smem:[#allocation72_spill]] }
 0x199   :  { %v982_v37 = vld [vmem:[%s17773_s1 + $0x20] sm:$0xff]  ;;  %s17799_s14 = sld [smem:[#allocation71_spill]]  ;;  %s17800_s26 = sld [smem:[#allocation75_spill]] }
 0x19a   :  { %v13994_v39 = vpack.c.bf16 %v983_v38, %v982_v37  ;;  %v10659_v41 = vld [vmem:[%s17775_s3] ss:$0 sm:$0xff]  ;;  %s17801_s13 = sld [smem:[#allocation73_spill]]  ;;  %s17802_s28 = sld [smem:[#allocation74_spill]] }
 0x19b   :  { %13981 = vmatpush3.bf16.msra.mxu1 %v13978_v12  ;;  %v10663_v50 = vld [vmem:[%s17776_s29] ss:$0 sm:$0xff]  ;;  %s17803_s1 = sld [smem:[#allocation76_spill]]  ;;  %s17804_s2 = sld [smem:[#allocation77_spill]] }
 0x19c   :  { %13983 = vmatprep.subr.bf16.mxu1 %v13982_v22  ;;  %v16010_v57 = vld [vmem:[%s17777_s7] sm:$0xff]  ;;  %s17805_s3 = sld [smem:[#allocation78_spill]]  ;;  %s17806_s29 = sld [smem:[#allocation80_spill]] }
 0x19d   :  { %v1154_v58 = vld [vmem:[%s17778_s12] sm:$0xf]  ;;  %s17807_s7 = sld [smem:[#allocation79_spill]]  ;;  %s17808_s12 = sld [smem:[#allocation81_spill]] }
 0x19e   :  { %v1153_v59 = vld [vmem:[%s17779_s20] sm:$0x3f]  ;;  %s17809_s20 = sld [smem:[#allocation40_spill]] }
 0x19f   :  { %13985 = vmatpush3.bf16.msra.mxu1 %v13982_v22  ;;  %v1408_v60 = vld [vmem:[%s17780_s10] sm:$0xf]  ;;  %v1659_v22 = vld [vmem:[%s17786_s11 + $0x10] sm:$0xff]  ;;  %s17811_s10 = sld [smem:[#allocation43_spill]] }
 0x1a0   :  { %12218 = vmatprep.subr.msk.mxu1 %vm897_vm5, %v882_v23  ;;  %v1316_v61 = vld [vmem:[%s17783_s0] sm:$0xff]  ;;  %v14015_v25 = vpack.c.bf16 %v1660_v24, %v1659_v22 }
 0x1a1   :  { %v14003_v5 = vpack.c.bf16 %v1317_v62, %v1316_v61  ;;  %v1407_v9 = vld [vmem:[%s17784_s6] sm:$0xf]  ;;  %s17813_s6 = sld [smem:[#allocation42_spill]] }
 0x1a2   :  { %v1565_v11 = vld [vmem:[%s17785_s30] sm:$0x3f] }
 0x1a3   :  { %12219 = vmatpush3.msk.msra.mxu1 %vm897_vm5, %v882_v23  ;;  %v1661_v26 = vld [vmem:[%s17786_s11 + $0x20] sm:$0xff] }
 0x1a4   :  { %13998 = vmatprep.subr.bf16.mxu1 %v15514_v48  ;;  %v2821_v55 = vld [vmem:[%s17799_s14] sm:$0x3f] }
 0x264   :  { %v15945_v13 = vpop.f32.mrb[0].mxu1 }
 0x265   :  { %v15947_v14 = vpop.f32.mrb[1].mxu1 }
 0x266   :  { %12193 = vmatprep.mubr.msk.f32.mxu0 %vm606_vm2, %v15947_v14  ;;  %v15951_v15 = vpop.f32.mrb[0].mxu0 }
 0x267   :  { %12194 = vmatmul.mubr.msk.f32.vlgmr.msra.gmra.mrb[2].mxu0 %vm606_vm2, %v15945_v13  ;;  %v15956_v17 = vpop.f32.mrb[1].mxu0 }
 0x268   :  { %12197 = vmatpush3.msk.msra.mxu0 %vm613_vm1, %v604_v6  ;;  %12198 = vmatprep.mubr.msk.f32.mxu0 %vm606_vm2, %v15956_v17  ;;  %v1319_v6 = vld [vmem:[%s17783_s0 + $0x18] sm:$0xff] }
 0x269   :  { %12201 = vmatprep.subr.msk.mxu0 %vm784_vm3, %v776_v16  ;;  %v14006_v7 = vpack.c.bf16 %v1319_v6, %v1318_v63 }
 0x26f   :  { %12199 = vmatmul.mubr.msk.f32.vlgmr.msra.gmra.mrb[2].mxu0 %vm606_vm2, %v15951_v15 }
 0x270   :  { %12202 = vmatpush3.msk.msra.mxu0 %vm784_vm3, %v776_v16  ;;  %12203 = vmatprep.mubr.msk.f32.mxu0 %vm777_vm4, %v15963_v18 }
 0x271   :  { %13987 = vmatprep.subr.bf16.mxu0 %v13986_v27 }
 0x277   :  { %12204 = vmatmul.mubr.msk.f32.vlgmr.msra.gmra.mrb[2].mxu0 %vm777_vm4, %v15971_v19 }
 0x278   :  { %13989 = vmatpush3.bf16.msra.mxu0 %v13986_v27  ;;  %v1662_v27 = vld [vmem:[%s17786_s11 + $0x28] sm:$0xff] }
 0x279   :  { %13991 = vmatprep.subr.bf16.mxu0 %v13990_v29  ;;  %v14019_v28 = vpack.c.bf16 %v1662_v27, %v1661_v26  ;;  %v2035_v26 = vld [vmem:[%s17792_s22 + $0x28] sm:$0xff] }
 0x27c   :  { %13993 = vmatpush3.bf16.msra.mxu0 %v13990_v29  ;;  %v1663_v29 = vld [vmem:[%s17786_s11 + $0x30] sm:$0x3] }
 0x27d   :  { %13995 = vmatprep.subr.bf16.mxu0 %v13994_v39 }
 0x280   :  { %13997 = vmatpush3.bf16.msra.mxu0 %v13994_v39 }
 0x281   :  { %12235 = vmatprep.subr.msk.mxu0 %vm897_vm5, %v984_v40 }
 0x284   :  { %12236 = vmatpush3.msk.msra.mxu0 %vm897_vm5, %v984_v40 }
 0x285   :  { %14002 = vmatprep.subr.bf16.mxu0 %v15514_v48 }
 0x34a   :  { %v12205_v31 = vpop.f32.mrb[2].mxu0 }
 0x34b   :  { %v873_v32 = vadd.f32 %v12205_v31, %v10658_v30  ;;  %v854_v33 = vpop.f32.mrb[3].mxu0  ;;  %v10673_v31 = vld [vmem:[%s17787_s4] ss:$0 sm:$0xff] }
 0x34c   :  { %v872_v34 = vadd.f32 %v10658_v30, %v854_v33 }
 0x34d   :  { %v875_v36 = vmax.f32 %v873_v32, 0.0 }
 0x34e   :  { %v874_v35 = vmax.f32 %v872_v34, 0.0 }
 0x350   :  { %12220 = vmatprep.mubr.msk.f32.mxu1 %vm890_vm6, %v874_v35 }
 0x351   :  { %12221 = vmatmul.mubr.msk.f32.vlgmr.msra.gmra.mrb[2].mxu1 %vm890_vm6, %v875_v36  ;;  %v10686_v36 = vld [vmem:[#allocation4] ss:$0 sm:$0xff] }
 0x352   :  { %12244 = vmatprep.mubr.msk.f32.mxu1 %vm15515_vm7, %v15516_v49 }
 0x424   :  { %v12222_v42 = vpop.f32.mrb[2].mxu1 }
 0x425   :  { %v973_v43 = vadd.f32 %v12222_v42, %v10659_v41  ;;  %v967_v44 = vpop.f32.mrb[3].mxu1 }
 0x426   :  { %v968_v45 = vadd.f32 %v10659_v41, %v967_v44  ;;  %v1855_v44 = vld [vmem:[%s17789_s16] sm:$0x3f] }
 0x427   :  { %v977_v47 = vmax.f32 %v973_v43, 0.0  ;;  %v1856_v43 = vld [vmem:[%s17788_s15] sm:$0x3f] }
 0x428   :  { %v976_v46 = vmax.f32 %v968_v45, 0.0  ;;  %v1757_v45 = vld [vmem:[%s17790_s18] sm:$0xff] }
 0x42a   :  { %12237 = vmatprep.mubr.msk.f32.mxu0 %vm890_vm6, %v976_v46  ;;  %v1758_v46 = vld [vmem:[%s17790_s18 + $0x8] sm:$0xff] }
 0x42b   :  { %12238 = vmatmul.mubr.msk.f32.vlgmr.msra.gmra.mrb[4].mxu0 %vm890_vm6, %v977_v47  ;;  %v1759_v47 = vld [vmem:[%s17790_s18 + $0x10] sm:$0xff] }
 0x42c   :  { %12271 = vmatprep.mubr.msk.f32.mxu0 %vm15515_vm7, %v15516_v49  ;;  %14004 = vmatpush3.bf16.msra.mxu0 %v14003_v5  ;;  %v10687_v5 = vld [vmem:[#allocation6] ss:$0 sm:$0xff] }
 0x42d   :  { %14005 = vmatprep.subr.bf16.mxu0 %v15514_v48 }
 0x430   :  { %14007 = vmatpush3.bf16.msra.mxu0 %v14006_v7 }
 0x431   :  { %14008 = vmatprep.subr.bf16.mxu0 %v15514_v48 }
 0x4fe   :  { %v12239_v51 = vpop.f32.mrb[4].mxu0 }
 0x4ff   :  { %v1073_v52 = vadd.f32 %v12239_v51, %v10663_v50  ;;  %v1067_v53 = vpop.f32.mrb[5].mxu0  ;;  %v1760_v51 = vld [vmem:[%s17790_s18 + $0x18] sm:$0xff] }
 0x500   :  { %v1068_v54 = vadd.f32 %v10663_v50, %v1067_v53  ;;  %v14023_v50 = vpack.c.bf16 %v1758_v46, %v1757_v45  ;;  %v1761_v53 = vld [vmem:[%s17790_s18 + $0x20] sm:$0xff]  ;;  %v10702_v45 = vld [vmem:[#allocation11] ss:$0 sm:$0xff] }
 0x502   :  { %v13999_v56 = vpack.c.bf16 %v1073_v52, %v1068_v54  ;;  %v14027_v52 = vpack.c.bf16 %v1760_v51, %v1759_v47  ;;  %v1762_v54 = vld [vmem:[%s17790_s18 + $0x28] sm:$0xff] }
 0x504   :  { %14001 = vmatpush3.bf16.msk.msra.mxu1 %vm16003_vm9, %v13999_v56  ;;  %v14031_v56 = vpack.c.bf16 %v1762_v54, %v1761_v53  ;;  %v2554_v54 = vld [vmem:[%s17796_s8 + $0x20] sm:$0xff] }
 0x505   :  { %12247 = vmatprep.subr.mxu1 %v15516_v49 }
 0x507   :  { %12245 = vmatmul.mubr.msk.f32.vlgmr.msra.gmra.mrb[4].mxu1 %vm1076_vm10, %v16010_v57 }
 0x508   :  { %12248 = vmatpush3.msk.msra.mxu1 %vm613_vm1, %v1154_v58  ;;  %12249 = vmatprep.mubr.msk.f32.mxu1 %vm15515_vm7, %v15516_v49  ;;  %v1763_v58 = vld [vmem:[%s17790_s18 + $0x30] sm:$0x3] }
 0x509   :  { %12252 = vmatprep.subr.mxu1 %v15516_v49 }
 0x50b   :  { %12250 = vmatmul.mubr.msk.f32.vlgmr.msra.gmra.mrb[6].mxu1 %vm606_vm2, %v15910_v0 }
 0x50c   :  { %12254 = vmatprep.mubr.msk.f32.mxu1 %vm15515_vm7, %v15516_v49  ;;  %12253 = vmatpush3.msk.msra.mxu1 %vm784_vm3, %v1153_v59  ;;  %v10674_v59 = vld [vmem:[%s17791_s19] ss:$0 sm:$0xff] }
 0x50d   :  { %12274 = vmatprep.subr.msk.mxu1 %vm613_vm1, %v1408_v60 }
 0x5da   :  { %v1149_v8 = vpop.f32.mrb[4].mxu1 }
 0x5db   :  { %v12246_v10 = vpop.f32.mrb[5].mxu1  ;;  %12255 = vmatmul.mubr.msk.f32.vlgmr.msra.gmra.mrb[8].mxu1 %vm777_vm4, %v1149_v8 }
 0x5dc   :  { %12276 = vmatprep.mubr.msk.f32.mxu1 %vm606_vm2, %v15947_v14  ;;  %12275 = vmatpush3.msk.msra.mxu1 %vm613_vm1, %v1408_v60  ;;  %v1321_v14 = vld [vmem:[%s17783_s0 + $0x28] sm:$0xff] }
 0x5dd   :  { %12279 = vmatprep.subr.msk.mxu1 %vm613_vm1, %v1407_v9 }
 0x5de   :  { %v1227_v12 = vpop.f32.mrb[6].mxu1 }
 0x5df   :  { %12277 = vmatmul.mubr.msk.f32.vlgmr.msra.gmra.mrb[10].mxu1 %vm606_vm2, %v15945_v13  ;;  %v12251_v16 = vpop.f32.mrb[7].mxu1  ;;  %v1320_v13 = vld [vmem:[%s17783_s0 + $0x20] sm:$0xff]  ;;  %s17812_s0 = sld [smem:[#allocation44_spill]] }
 0x5e0   :  { %12281 = vmatprep.mubr.msk.f32.mxu1 %vm606_vm2, %v15956_v17  ;;  %12280 = vmatpush3.msk.msra.mxu1 %vm613_vm1, %v1407_v9  ;;  %v14009_v17 = vpack.c.bf16 %v1321_v14, %v1320_v13  ;;  %v2031_v16 = vld [vmem:[%s17792_s22 + $0x8] sm:$0xff]  ;;  %v2032_v13 = vld [vmem:[%s17792_s22 + $0x10] sm:$0xff] }
 0x5e1   :  { %12284 = vmatprep.subr.msk.mxu1 %vm784_vm3, %v1565_v11 }
 0x5e2   :  { %14010 = vmatpush3.bf16.msra.mxu0 %v14009_v17  ;;  %v2033_v17 = vld [vmem:[%s17792_s22 + $0x18] sm:$0xff] }
 0x5e3   :  { %12269 = vmatprep.subr.mxu0 %v15516_v49 }
 0x5e6   :  { %12270 = vmatpush3.msk.msra.mxu0 %vm897_vm5, %v1322_v20  ;;  %v14039_v20 = vpack.c.bf16 %v2033_v17, %v2032_v13  ;;  %v2654_v13 = vld [vmem:[%s17797_s21 + $0x20] sm:$0xff] }
 0x5e7   :  { %12282 = vmatmul.mubr.msk.f32.vlgmr.msra.gmra.mrb[10].mxu1 %vm606_vm2, %v15951_v15  ;;  %v1657_v15 = vld [vmem:[%s17786_s11] sm:$0xff]  ;;  %14024 = vmatprep.subr.bf16.mxu0 %v14023_v50 }
 0x5e8   :  { %12285 = vmatpush3.msk.msra.mxu1 %vm784_vm3, %v1565_v11  ;;  %12286 = vmatprep.mubr.msk.f32.mxu1 %vm777_vm4, %v15963_v18  ;;  %v14011_v23 = vpack.c.bf16 %v1658_v21, %v1657_v15  ;;  %v10691_v15 = vld [vmem:[#allocation8] ss:$0 sm:$0xff] }
 0x5ea   :  { %14012 = vmatprep.subr.bf16.mxu1 %v14011_v23 }
 0x5ef   :  { %12287 = vmatmul.mubr.msk.f32.vlgmr.msra.gmra.mrb[10].mxu1 %vm777_vm4, %v15971_v19 }
 0x5f0   :  { %14014 = vmatpush3.bf16.msra.mxu1 %v14011_v23 }
 0x5f1   :  { %14016 = vmatprep.subr.bf16.mxu1 %v14015_v25 }
 0x5f4   :  { %14018 = vmatpush3.bf16.msra.mxu1 %v14015_v25  ;;  %v2034_v25 = vld [vmem:[%s17792_s22 + $0x20] sm:$0xff] }
 0x5f5   :  { %14020 = vmatprep.subr.bf16.mxu1 %v14019_v28  ;;  %v14043_v27 = vpack.c.bf16 %v2035_v26, %v2034_v25 }
 0x5f8   :  { %14022 = vmatpush3.bf16.msra.mxu1 %v14019_v28  ;;  %v2036_v28 = vld [vmem:[%s17792_s22 + $0x30] sm:$0x3] }
 0x5f9   :  { %12301 = vmatprep.subr.msk.mxu1 %vm897_vm5, %v1663_v29 }
 0x5fc   :  { %12302 = vmatpush3.msk.msra.mxu1 %vm897_vm5, %v1663_v29 }
 0x5fd   :  { %12323 = vmatprep.subr.msk.mxu1 %vm784_vm3, %v1856_v43 }
 0x6ae   :  { %v1303_v30 = vpop.f32.mrb[8].mxu1 }
 0x6af   :  { %v1304_v32 = vadd.f32 %v1303_v30, %v1227_v12  ;;  %v12256_v33 = vpop.f32.mrb[9].mxu1  ;;  %v2030_v12 = vld [vmem:[%s17792_s22] sm:$0xff] }
 0x6b0   :  { %v14035_v14 = vpack.c.bf16 %v2031_v16, %v2030_v12 }
 0x6b1   :  { %v1314_v34 = vadd.f32 %v10673_v31, %v1304_v32 }
 0x6b3   :  { %v1315_v35 = vmax.f32 %v1314_v34, 0.0 }
 0x6b5   :  { %12272 = vmatmul.mubr.msk.f32.vlgmr.msra.gmra.mrb[6].mxu0 %vm890_vm6, %v1315_v35  ;;  %v2280_v35 = vld [vmem:[%s17794_s27] sm:$0x1f] }
 0x6b6   :  { %14026 = vmatpush3.bf16.msra.mxu0 %v14023_v50 }
 0x6b7   :  { %14028 = vmatprep.subr.bf16.mxu0 %v14027_v52 }
 0x6ba   :  { %14030 = vmatpush3.bf16.msra.mxu0 %v14027_v52 }
 0x6bb   :  { %14032 = vmatprep.subr.bf16.mxu0 %v14031_v56 }
 0x6be   :  { %14034 = vmatpush3.bf16.msra.mxu0 %v14031_v56  ;;  %v2555_v56 = vld [vmem:[%s17796_s8 + $0x28] sm:$0xff] }
 0x6bf   :  { %12318 = vmatprep.subr.msk.mxu0 %vm897_vm5, %v1763_v58 }
 0x6c2   :  { %v12288_v37 = vpop.f32.mrb[10].mxu1  ;;  %12319 = vmatpush3.msk.msra.mxu0 %vm897_vm5, %v1763_v58  ;;  %v14055_v58 = vpack.c.bf16 %v2555_v56, %v2554_v54  ;;  %v3328_v56 = vld [vmem:[%s17804_s2 + $0x30] sm:$0x3] }
 0x6c3   :  { %v1654_v38 = vadd.f32 %v12288_v37, %v10686_v36  ;;  %v1635_v39 = vpop.f32.mrb[11].mxu1  ;;  %14036 = vmatprep.subr.bf16.mxu0 %v14035_v14 }
 0x6c4   :  { %v1653_v40 = vadd.f32 %v10686_v36, %v1635_v39  ;;  %v2550_v39 = vld [vmem:[%s17796_s8] sm:$0xff] }
 0x6c5   :  { %v1656_v42 = vmax.f32 %v1654_v38, 0.0  ;;  %v2452_v38 = vld [vmem:[%s17795_s24] sm:$0x1f] }
 0x6c6   :  { %v1655_v41 = vmax.f32 %v1653_v40, 0.0  ;;  %v2551_v40 = vld [vmem:[%s17796_s8 + $0x8] sm:$0xff] }
 0x6c8   :  { %12303 = vmatprep.mubr.msk.f32.mxu1 %vm890_vm6, %v1655_v41  ;;  %v2552_v41 = vld [vmem:[%s17796_s8 + $0x10] sm:$0xff] }
 0x6c9   :  { %12304 = vmatmul.mubr.msk.f32.vlgmr.msra.gmra.mrb[12].mxu1 %vm890_vm6, %v1656_v42  ;;  %v14047_v42 = vpack.c.bf16 %v2551_v40, %v2550_v39  ;;  %v3072_v40 = vld [vmem:[%s17802_s28] sm:$0x1f] }
 0x6ca   :  { %12325 = vmatprep.mubr.msk.f32.mxu1 %vm777_vm4, %v15963_v18  ;;  %12324 = vmatpush3.msk.msra.mxu1 %vm784_vm3, %v1856_v43  ;;  %v2553_v43 = vld [vmem:[%s17796_s8 + $0x18] sm:$0xff] }
 0x6cb   :  { %12328 = vmatprep.subr.msk.mxu1 %vm784_vm3, %v1855_v44 }
 0x6cd   :  { %12326 = vmatmul.mubr.msk.f32.vlgmr.msra.gmra.mrb[14].mxu1 %vm777_vm4, %v15971_v19 }
 0x6ce   :  { %12329 = vmatpush3.msk.msra.mxu1 %vm784_vm3, %v1855_v44  ;;  %v14051_v44 = vpack.c.bf16 %v2553_v43, %v2552_v41 }
 0x788   :  { %v1402_v60 = vpop.f32.mrb[6].mxu0 }
 0x789   :  { %v1403_v61 = vadd.f32 %v10674_v59, %v1402_v60  ;;  %v12273_v62 = vpop.f32.mrb[7].mxu0  ;;  %v2556_v59 = vld [vmem:[%s17796_s8 + $0x30] sm:$0x3]  ;;  %v2650_v60 = vld [vmem:[%s17797_s21] sm:$0xff] }
 0x78a   :  { %v2652_v62 = vld [vmem:[%s17797_s21 + $0x10] sm:$0xff] }
 0x78b   :  { %v1406_v63 = vmax.f32 %v1403_v61, 0.0  ;;  %v2651_v61 = vld [vmem:[%s17797_s21 + $0x8] sm:$0xff] }
 0x78d   :  { %12350 = vmatprep.subr.mxu1 %v1406_v63 }
 0x79c   :  { %v12305_v6 = vpop.f32.mrb[12].mxu1 }
 0x79d   :  { %v1752_v7 = vadd.f32 %v12305_v6, %v10687_v5  ;;  %v1746_v8 = vpop.f32.mrb[13].mxu1 }
 0x79e   :  { %v1747_v9 = vadd.f32 %v10687_v5, %v1746_v8  ;;  %v2653_v5 = vld [vmem:[%s17797_s21 + $0x18] sm:$0xff] }
 0x79f   :  { %v1756_v11 = vmax.f32 %v1752_v7, 0.0  ;;  %v14063_v6 = vpack.c.bf16 %v2653_v5, %v2652_v62  ;;  %v10719_v7 = vld [vmem:[#allocation12] ss:$0 sm:$0xff]  ;;  %v10747_v5 = vld [vmem:[#allocation20] ss:$0 sm:$0xff] }
 0x7a0   :  { %v1755_v10 = vmax.f32 %v1747_v9, 0.0 }
 0x7a2   :  { %12320 = vmatprep.mubr.msk.f32.mxu0 %vm890_vm6, %v1755_v10 }
 0x7a3   :  { %12321 = vmatmul.mubr.msk.f32.vlgmr.msra.gmra.mrb[8].mxu0 %vm890_vm6, %v1756_v11 }
 0x7a4   :  { %14038 = vmatpush3.bf16.msra.mxu0 %v14035_v14  ;;  %v2655_v14 = vld [vmem:[%s17797_s21 + $0x28] sm:$0xff] }
 0x7a5   :  { %14040 = vmatprep.subr.bf16.mxu0 %v14039_v20  ;;  %v14067_v17 = vpack.c.bf16 %v2655_v14, %v2654_v13  ;;  %v3424_v13 = vld [vmem:[%s17805_s3 + $0x10] sm:$0xff] }
 0x7a8   :  { %14042 = vmatpush3.bf16.msra.mxu0 %v14039_v20  ;;  %v2656_v20 = vld [vmem:[%s17797_s21 + $0x30] sm:$0x3] }
 0x7a9   :  { %14044 = vmatprep.subr.bf16.mxu0 %v14043_v27 }
 0x7ac   :  { %14046 = vmatpush3.bf16.msra.mxu0 %v14043_v27  ;;  %v10724_v27 = vld [vmem:[#allocation15] ss:$0 sm:$0xff] }
 0x7ad   :  { %12345 = vmatprep.subr.msk.mxu0 %vm897_vm5, %v2036_v28 }
 0x7b0   :  { %12346 = vmatpush3.msk.msra.mxu0 %vm897_vm5, %v2036_v28 }
 0x876   :  { %v12322_v21 = vpop.f32.mrb[8].mxu0 }
 0x877   :  { %v1846_v22 = vpop.f32.mrb[9].mxu0  ;;  %v1852_v24 = vadd.f32 %v12322_v21, %v10691_v15 }
 0x878   :  { %v1847_v23 = vadd.f32 %v10691_v15, %v1846_v22  ;;  %v10720_v15 = vld [vmem:[#allocation14] ss:$0 sm:$0xff] }
 0x87a   :  { %12330 = vmatprep.mubr.msk.f32.mxu1 %vm777_vm4, %v1847_v23 }
 0x87b   :  { %12331 = vmatmul.mubr.msk.f32.vlgmr.msra.gmra.mrb[14].mxu1 %vm777_vm4, %v1852_v24 }
 0x87c   :  { %12351 = vmatpush3.msra.mxu1 %v1406_v63  ;;  %12352 = vmatprep.mubr.msk.f32.mxu1 %vm441_vm0, %v15922_v3  ;;  %v2281_v3 = vld [vmem:[%s17793_s25] sm:$0x1f] }
 0x87d   :  { %12355 = vmatprep.subr.mxu1 %v1406_v63  ;;  %12360 = vmatprep.subr.msk.mxu0 %vm2289_vm11, %v2281_v3 }
 0x87f   :  { %12353 = vmatmul.mubr.msk.f32.vlgmr.msra.gmra.mrb[16].mxu1 %vm441_vm0, %v15927_v4  ;;  %v10701_v4 = vld [vmem:[#allocation9] ss:$0 sm:$0xff] }
 0x880   :  { %12356 = vmatpush3.msra.mxu1 %v1406_v63  ;;  %12357 = vmatprep.mubr.msk.f32.mxu1 %vm441_vm0, %v15913_v1  ;;  %v14059_v63 = vpack.c.bf16 %v2651_v61, %v2650_v60 }
 0x881   :  { %14048 = vmatprep.subr.bf16.mxu1 %v14047_v42 }
 0x883   :  { %12358 = vmatmul.mubr.msk.f32.vlgmr.msra.gmra.mrb[18].mxu1 %vm441_vm0, %v15916_v2 }
 0x884   :  { %14050 = vmatpush3.bf16.msra.mxu1 %v14047_v42  ;;  %v3230_v42 = vld [vmem:[%s17803_s1] sm:$0x1f] }
 0x885   :  { %14052 = vmatprep.subr.bf16.mxu1 %v14051_v44 }
 0x888   :  { %14054 = vmatpush3.bf16.msra.mxu1 %v14051_v44  ;;  %v2987_v44 = vld [vmem:[%s17801_s13 + $0x30] sm:$0x3] }
 0x889   :  { %14056 = vmatprep.subr.bf16.mxu1 %v14055_v58 }
 0x88c   :  { %14058 = vmatpush3.bf16.msra.mxu1 %v14055_v58 }
 0x88d   :  { %12387 = vmatprep.subr.msk.mxu1 %vm897_vm5, %v2556_v59 }
 0x890   :  { %12388 = vmatpush3.msk.msra.mxu1 %vm897_vm5, %v2556_v59  ;;  %v10734_v59 = vld [vmem:[#allocation17] ss:$0 sm:$0xff] }
 0x891   :  { %14071 = vmatprep.subr.bf16.mxu1 %v15514_v48 }
 0x94e   :  { %v12332_v1 = vpop.f32.mrb[14].mxu1 }
 0x94f   :  { %v2027_v29 = vadd.f32 %v12332_v1, %v10701_v4  ;;  %v2010_v30 = vpop.f32.mrb[15].mxu1 }
 0x950   :  { %v2026_v2 = vadd.f32 %v10701_v4, %v2010_v30  ;;  %v2822_v30 = vld [vmem:[%s17798_s23] sm:$0xf] }
 0x951   :  { %v2029_v33 = vmax.f32 %v2027_v29, 0.0 }
 0x952   :  { %v2028_v31 = vmax.f32 %v2026_v2, 0.0  ;;  %v16115_v32 = vpop.f32.mrb[16].mxu1  ;;  %v3073_v2 = vld [vmem:[%s17800_s26] sm:$0x1f] }
 0x953   :  { %v16117_v34 = vpop.f32.mrb[17].mxu1 }
 0x954   :  { %12347 = vmatprep.mubr.msk.f32.mxu0 %vm890_vm6, %v2028_v31  ;;  %v2982_v31 = vld [vmem:[%s17801_s13 + $0x8] sm:$0xff] }
 0x955   :  { %12348 = vmatmul.mubr.msk.f32.vlgmr.msra.gmra.mrb[10].mxu0 %vm890_vm6, %v2029_v33  ;;  %v2983_v33 = vld [vmem:[%s17801_s13 + $0x10] sm:$0xff] }
 0x956   :  { %v16122_v36 = vpop.f32.mrb[18].mxu1  ;;  %12361 = vmatpush3.msk.msra.mxu0 %vm2289_vm11, %v2281_v3 }
 0x957   :  { %v16125_v37 = vpop.f32.mrb[19].mxu1  ;;  %12365 = vmatprep.subr.msk.mxu0 %vm2289_vm11, %v2280_v35 }
 0x958   :  { %12362 = vmatprep.mubr.msk.f32.mxu0 %vm2282_vm12, %v16125_v37 }
 0x959   :  { %12363 = vmatmul.mubr.msk.f32.vlgmr.msra.gmra.mrb[12].mxu0 %vm2282_vm12, %v16122_v36 }
 0x95a   :  { %12366 = vmatpush3.msk.msra.mxu0 %vm2289_vm11, %v2280_v35  ;;  %12367 = vmatprep.mubr.msk.f32.mxu0 %vm2282_vm12, %v16117_v34 }
 0x95b   :  { %12370 = vmatprep.subr.msk.mxu0 %vm2289_vm11, %v2452_v38 }
 0x961   :  { %12368 = vmatmul.mubr.msk.f32.vlgmr.msra.gmra.mrb[12].mxu0 %vm2282_vm12, %v16115_v32 }
 0x962   :  { %12371 = vmatpush3.msk.msra.mxu0 %vm2289_vm11, %v2452_v38  ;;  %v2984_v38 = vld [vmem:[%s17801_s13 + $0x18] sm:$0xff] }
 0x963   :  { %14060 = vmatprep.subr.bf16.mxu0 %v14059_v63  ;;  %v14079_v39 = vpack.c.bf16 %v2984_v38, %v2983_v33 }
 0xa28   :  { %v12349_v46 = vpop.f32.mrb[10].mxu0 }
 0xa29   :  { %v16144_v47 = vadd.f32 %v12349_v46, %v10702_v45  ;;  %v2119_v50 = vpop.f32.mrb[11].mxu0  ;;  %v3324_v46 = vld [vmem:[%s17804_s2 + $0x10] sm:$0xff] }
 0xa2a   :  { %v16146_v51 = vadd.f32 %v10702_v45, %v2119_v50  ;;  %v3323_v45 = vld [vmem:[%s17804_s2 + $0x8] sm:$0xff] }
 0xa2b   :  { %v2129_v53 = vmax.f32 %v16144_v47, 0.0 }
 0xa2c   :  { %v2128_v52 = vmax.f32 %v16146_v51, 0.0  ;;  %v3325_v51 = vld [vmem:[%s17804_s2 + $0x18] sm:$0xff] }
 0xa2d   :  { %v14088_v47 = vpack.c.bf16 %v3325_v51, %v3324_v46 }
 0xa2e   :  { %12372 = vmatprep.mubr.msk.f32.mxu0 %vm2282_vm12, %v2128_v52 }
 0xa2f   :  { %12373 = vmatmul.mubr.msk.f32.vlgmr.msra.gmra.mrb[12].mxu0 %vm2282_vm12, %v2129_v53 }
 0xa30   :  { %14062 = vmatpush3.bf16.msra.mxu0 %v14059_v63 }
 0xa31   :  { %14064 = vmatprep.subr.bf16.mxu0 %v14063_v6 }
 0xa34   :  { %14066 = vmatpush3.bf16.msra.mxu0 %v14063_v6 }
 0xa35   :  { %14068 = vmatprep.subr.bf16.mxu0 %v14067_v17 }
 0xa38   :  { %14070 = vmatpush3.bf16.msra.mxu0 %v14067_v17  ;;  %v3425_v17 = vld [vmem:[%s17805_s3 + $0x18] sm:$0xff] }
 0xa39   :  { %12404 = vmatprep.subr.msk.mxu0 %vm897_vm5, %v2656_v20 }
 0xa3c   :  { %12405 = vmatpush3.msk.msra.mxu0 %vm897_vm5, %v2656_v20  ;;  %v14100_v20 = vpack.c.bf16 %v3425_v17, %v3424_v13 }
 0xa3d   :  { %14075 = vmatprep.subr.bf16.mxu0 %v15514_v48 }
 0xb02   :  { %v12374_v8 = vpop.f32.mrb[12].mxu0 }
 0xb03   :  { %v2547_v9 = vadd.f32 %v12374_v8, %v10719_v7  ;;  %v2528_v10 = vpop.f32.mrb[13].mxu0 }
 0xb04   :  { %v2546_v11 = vadd.f32 %v10719_v7, %v2528_v10 }
 0xb05   :  { %v2549_v16 = vmax.f32 %v2547_v9, 0.0 }
 0xb06   :  { %v2548_v12 = vmax.f32 %v2546_v11, 0.0 }
 0xb08   :  { %12389 = vmatprep.mubr.msk.f32.mxu1 %vm890_vm6, %v2548_v12  ;;  %v3422_v12 = vld [vmem:[%s17805_s3] sm:$0xff] }
 0xb09   :  { %12390 = vmatmul.mubr.msk.f32.vlgmr.msra.gmra.mrb[20].mxu1 %vm890_vm6, %v2549_v16  ;;  %v3423_v16 = vld [vmem:[%s17805_s3 + $0x8] sm:$0xff] }
 0xb0a   :  { %12413 = vmatprep.mubr.msk.f32.mxu1 %vm15515_vm7, %v15516_v49  ;;  %v14096_v14 = vpack.c.bf16 %v3423_v16, %v3422_v12 }
 0xbdc   :  { %v12391_v21 = vpop.f32.mrb[20].mxu1 }
 0xbdd   :  { %v2645_v22 = vadd.f32 %v12391_v21, %v10720_v15  ;;  %v2639_v23 = vpop.f32.mrb[21].mxu1  ;;  %v3427_v21 = vld [vmem:[%s17805_s3 + $0x28] sm:$0xff] }
 0xbde   :  { %v2640_v24 = vadd.f32 %v10720_v15, %v2639_v23  ;;  %v3426_v15 = vld [vmem:[%s17805_s3 + $0x20] sm:$0xff]  ;;  %v3428_v23 = vld [vmem:[%s17805_s3 + $0x30] sm:$0x3] }
 0xbdf   :  { %v2649_v26 = vmax.f32 %v2645_v22, 0.0  ;;  %v14104_v22 = vpack.c.bf16 %v3427_v21, %v3426_v15 }
 0xbe0   :  { %v2648_v25 = vmax.f32 %v2640_v24, 0.0  ;;  %v3520_v24 = vld [vmem:[%s17807_s7] sm:$0x3f] }
 0xbe2   :  { %12406 = vmatprep.mubr.msk.f32.mxu0 %vm890_vm6, %v2648_v25 }
 0xbe3   :  { %12407 = vmatmul.mubr.msk.f32.vlgmr.msra.gmra.mrb[14].mxu0 %vm890_vm6, %v2649_v26 }
 0xbe4   :  { %12440 = vmatprep.mubr.msk.f32.mxu0 %vm15515_vm7, %v15516_v49 }
 0xcb6   :  { %v12408_v28 = vpop.f32.mrb[14].mxu0 }
 0xcb7   :  { %v2745_v3 = vadd.f32 %v12408_v28, %v10724_v27  ;;  %v2739_v4 = vpop.f32.mrb[15].mxu0 }
 0xcb8   :  { %v2740_v1 = vadd.f32 %v10724_v27, %v2739_v4  ;;  %v10748_v27 = vld [vmem:[#allocation21] ss:$0 sm:$0xff] }
 0xcba   :  { %v14072_v29 = vpack.c.bf16 %v2745_v3, %v2740_v1 }
 0xcbc   :  { %14074 = vmatpush3.bf16.msk.msra.mxu1 %vm16003_vm9, %v14072_v29  ;;  %vm3828_vm9 = vcmask 7168  }
 0xcbd   :  { %12416 = vmatprep.subr.mxu1 %v15516_v49 }
 0xcbf   :  { %12414 = vmatmul.mubr.msk.f32.vlgmr.msra.gmra.mrb[22].mxu1 %vm1076_vm10, %v16010_v57  ;;  %v2981_v57 = vld [vmem:[%s17801_s13] sm:$0xff] }
 0xcc0   :  { %12417 = vmatpush3.msk.msra.mxu1 %vm613_vm1, %v2822_v30  ;;  %12418 = vmatprep.mubr.msk.f32.mxu1 %vm15515_vm7, %v15516_v49  ;;  %v14076_v35 = vpack.c.bf16 %v2982_v31, %v2981_v57  ;;  %v3698_v31 = vld [vmem:[%s17808_s12 + $0x18] sm:$0xff] }
 0xcc1   :  { %12421 = vmatprep.subr.mxu1 %v15516_v49 }
 0xcc2   :  { %14077 = vmatpush3.bf16.msra.mxu0 %v14076_v35  ;;  %v10752_v35 = vld [vmem:[#allocation23] ss:$0 sm:$0xff] }
 0xcc3   :  { %12419 = vmatmul.mubr.msk.f32.vlgmr.msra.gmra.mrb[24].mxu1 %vm606_vm2, %v15910_v0  ;;  %14078 = vmatprep.subr.bf16.mxu0 %v15514_v48 }
 0xcc4   :  { %12423 = vmatprep.mubr.msk.f32.mxu1 %vm15515_vm7, %v15516_v49  ;;  %12422 = vmatpush3.msk.msra.mxu1 %vm784_vm3, %v2821_v55  ;;  %v3696_v55 = vld [vmem:[%s17808_s12 + $0x8] sm:$0xff] }
 0xcc5   :  { %12443 = vmatprep.subr.msk.mxu1 %vm2289_vm11, %v3073_v2 }
 0xcc6   :  { %14080 = vmatpush3.bf16.msra.mxu0 %v14079_v39 }
 0xcc7   :  { %14081 = vmatprep.subr.bf16.mxu0 %v15514_v48 }
 0xd92   :  { %v2817_v0 = vpop.f32.mrb[22].mxu1 }
 0xd93   :  { %v12415_v41 = vpop.f32.mrb[23].mxu1  ;;  %12424 = vmatmul.mubr.msk.f32.vlgmr.msra.gmra.mrb[26].mxu1 %vm777_vm4, %v2817_v0 }
 0xd94   :  { %12445 = vmatprep.mubr.msk.f32.mxu1 %vm2282_vm12, %v16125_v37  ;;  %12444 = vmatpush3.msk.msra.mxu1 %vm2289_vm11, %v3073_v2  ;;  %v3697_v2 = vld [vmem:[%s17808_s12 + $0x10] sm:$0xff]  ;;  %v3887_v41 = vld [vmem:[%s17809_s20] sm:$0xff] }
 0xd95   :  { %12448 = vmatprep.subr.msk.mxu1 %vm2289_vm11, %v3072_v40  ;;  %v14112_v33 = vpack.c.bf16 %v3698_v31, %v3697_v2 }
 0xd96   :  { %v2892_v43 = vpop.f32.mrb[24].mxu1 }
 0xd97   :  { %12446 = vmatmul.mubr.msk.f32.vlgmr.msra.gmra.mrb[28].mxu1 %vm2282_vm12, %v16122_v36  ;;  %v12420_v48 = vpop.f32.mrb[25].mxu1  ;;  %v2986_v36 = vld [vmem:[%s17801_s13 + $0x28] sm:$0xff] }
 0xd98   :  { %12450 = vmatprep.mubr.msk.f32.mxu1 %vm2282_vm12, %v16117_v34  ;;  %12449 = vmatpush3.msk.msra.mxu1 %vm2289_vm11, %v3072_v40  ;;  %v2985_v34 = vld [vmem:[%s17801_s13 + $0x20] sm:$0xff] }
 0xd99   :  { %12453 = vmatprep.subr.msk.mxu1 %vm2289_vm11, %v3230_v42  ;;  %v14082_v37 = vpack.c.bf16 %v2986_v36, %v2985_v34  ;;  %v3701_v34 = vld [vmem:[%s17808_s12 + $0x30] sm:$0x3]  ;;  %v10762_v36 = vld [vmem:[#allocation24] ss:$0 sm:$0xff] }
 0xd9b   :  { %14083 = vmatpush3.bf16.msra.mxu0 %v14082_v37 }
 0xd9c   :  { %12438 = vmatprep.subr.mxu0 %v15516_v49 }
 0xd9f   :  { %12451 = vmatmul.mubr.msk.f32.vlgmr.msra.gmra.mrb[28].mxu1 %vm2282_vm12, %v16115_v32  ;;  %12439 = vmatpush3.msk.msra.mxu0 %vm897_vm5, %v2987_v44  ;;  %v3322_v32 = vld [vmem:[%s17804_s2] sm:$0xff] }
 0xda0   :  { %12455 = vmatprep.mubr.msk.f32.mxu1 %vm2282_vm12, %v2128_v52  ;;  %12454 = vmatpush3.msk.msra.mxu1 %vm2289_vm11, %v3230_v42  ;;  %v14084_v50 = vpack.c.bf16 %v3323_v45, %v3322_v32  ;;  %v3326_v52 = vld [vmem:[%s17804_s2 + $0x20] sm:$0xff] }
 0xda1   :  { %14097 = vmatprep.subr.bf16.mxu0 %v14096_v14  ;;  %v3699_v42 = vld [vmem:[%s17808_s12 + $0x20] sm:$0xff] }
 0xda2   :  { %14085 = vmatprep.subr.bf16.mxu1 %v14084_v50 }
 0xda7   :  { %12456 = vmatmul.mubr.msk.f32.vlgmr.msra.gmra.mrb[28].mxu1 %vm2282_vm12, %v2129_v53  ;;  %v3327_v53 = vld [vmem:[%s17804_s2 + $0x28] sm:$0xff] }
 0xda8   :  { %14087 = vmatpush3.bf16.msra.mxu1 %v14084_v50  ;;  %v14092_v54 = vpack.c.bf16 %v3327_v53, %v3326_v52 }
 0xda9   :  { %14089 = vmatprep.subr.bf16.mxu1 %v14088_v47 }
 0xdac   :  { %14091 = vmatpush3.bf16.msra.mxu1 %v14088_v47 }
 0xdad   :  { %14093 = vmatprep.subr.bf16.mxu1 %v14092_v54 }
 0xdb0   :  { %14095 = vmatpush3.bf16.msra.mxu1 %v14092_v54 }
 0xdb1   :  { %12470 = vmatprep.subr.msk.mxu1 %vm897_vm5, %v3328_v56 }
 0xdb4   :  { %12471 = vmatpush3.msk.msra.mxu1 %vm897_vm5, %v3328_v56 }
 0xe66   :  { %v2968_v58 = vpop.f32.mrb[26].mxu1 }
 0xe67   :  { %v2969_v60 = vadd.f32 %v2968_v58, %v2892_v43  ;;  %v12425_v61 = vpop.f32.mrb[27].mxu1  ;;  %v3700_v43 = vld [vmem:[%s17808_s12 + $0x28] sm:$0xff] }
 0xe68   :  { %v14116_v48 = vpack.c.bf16 %v3700_v43, %v3699_v42 }
 0xe69   :  { %v2979_v62 = vadd.f32 %v10734_v59, %v2969_v60 }
 0xe6b   :  { %v2980_v63 = vmax.f32 %v2979_v62, 0.0 }
 0xe6d   :  { %12441 = vmatmul.mubr.msk.f32.vlgmr.msra.gmra.mrb[16].mxu0 %vm890_vm6, %v2980_v63 }
 0xe6e   :  { %14099 = vmatpush3.bf16.msra.mxu0 %v14096_v14 }
 0xe6f   :  { %14101 = vmatprep.subr.bf16.mxu0 %v14100_v20 }
 0xe72   :  { %14103 = vmatpush3.bf16.msra.mxu0 %v14100_v20 }
 0xe73   :  { %14105 = vmatprep.subr.bf16.mxu0 %v14104_v22 }
 0xe76   :  { %14107 = vmatpush3.bf16.msra.mxu0 %v14104_v22 }
 0xe77   :  { %12487 = vmatprep.subr.msk.mxu0 %vm897_vm5, %v3428_v23 }
 0xe7a   :  { %v12457_v6 = vpop.f32.mrb[28].mxu1  ;;  %12488 = vmatpush3.msk.msra.mxu0 %vm897_vm5, %v3428_v23 }
 0xe7b   :  { %v3319_v7 = vadd.f32 %v12457_v6, %v10747_v5  ;;  %v3300_v8 = vpop.f32.mrb[29].mxu1  ;;  %v10763_v6 = vld [vmem:[#allocation26] ss:$0 sm:$0xff] }
 0xe7c   :  { %v3318_v9 = vadd.f32 %v10747_v5, %v3300_v8 }
 0xe7d   :  { %v3321_v11 = vmax.f32 %v3319_v7, 0.0 }
 0xe7e   :  { %v3320_v10 = vmax.f32 %v3318_v9, 0.0 }
 0xe80   :  { %12472 = vmatprep.mubr.msk.f32.mxu1 %vm890_vm6, %v3320_v10 }
 0xe81   :  { %12473 = vmatmul.mubr.msk.f32.vlgmr.msra.gmra.mrb[30].mxu1 %vm890_vm6, %v3321_v11 }
 0xe82   :  { %12494 = vmatprep.mubr.msk.f32.mxu1 %vm777_vm4, %v15963_v18  ;;  %v3521_v18 = vld [vmem:[%s17806_s29] sm:$0x3f] }
 0xe83   :  { %12492 = vmatprep.subr.msk.mxu1 %vm784_vm3, %v3521_v18 }
 0xe84   :  { %12493 = vmatpush3.msk.msra.mxu1 %vm784_vm3, %v3521_v18 }
 0xe85   :  { %12495 = vmatmul.mubr.msk.f32.vlgmr.msra.gmra.mrb[32].mxu1 %vm777_vm4, %v15971_v19  ;;  %12497 = vmatprep.subr.msk.mxu1 %vm784_vm3, %v3520_v24  ;;  %v3695_v19 = vld [vmem:[%s17808_s12] sm:$0xff] }
 0xe86   :  { %12498 = vmatpush3.msk.msra.mxu1 %vm784_vm3, %v3520_v24  ;;  %v14108_v57 = vpack.c.bf16 %v3696_v55, %v3695_v19 }
 0xe87   :  { %12519 = vmatprep.subr.mxu1 %v15516_v49 }
 0xe88   :  { %14109 = vmatprep.subr.bf16.mxu0 %v14108_v57 }
 0xf40   :  { %v16263_v25 = vpop.f32.mrb[16].mxu0 }
 0xf41   :  { %v12442_v26 = vpop.f32.mrb[17].mxu0 }
 0xf54   :  { %v12474_v28 = vpop.f32.mrb[30].mxu1 }
 0xf55   :  { %v3417_v3 = vadd.f32 %v12474_v28, %v10748_v27  ;;  %v3411_v4 = vpop.f32.mrb[31].mxu1 }
 0xf56   :  { %v3412_v1 = vadd.f32 %v10748_v27, %v3411_v4 }
 0xf57   :  { %v3421_v30 = vmax.f32 %v3417_v3, 0.0 }
 0xf58   :  { %v3420_v29 = vmax.f32 %v3412_v1, 0.0 }
 0xf5a   :  { %12489 = vmatprep.mubr.msk.f32.mxu0 %vm890_vm6, %v3420_v29 }
 0xf5b   :  { %12490 = vmatmul.mubr.msk.f32.vlgmr.msra.gmra.mrb[18].mxu0 %vm890_vm6, %v3421_v30 }
 0xf5c   :  { %14111 = vmatpush3.bf16.msra.mxu0 %v14108_v57 }
 0xf5d   :  { %14113 = vmatprep.subr.bf16.mxu0 %v14112_v33 }
 0xf60   :  { %14115 = vmatpush3.bf16.msra.mxu0 %v14112_v33 }
 0xf61   :  { %14117 = vmatprep.subr.bf16.mxu0 %v14116_v48 }
 0xf64   :  { %14119 = vmatpush3.bf16.msra.mxu0 %v14116_v48 }
 0xf65   :  { %12514 = vmatprep.subr.msk.mxu0 %vm897_vm5, %v3701_v34 }
 0xf68   :  { %12515 = vmatpush3.msk.msra.mxu0 %vm897_vm5, %v3701_v34 }
 0xf69   :  { %12529 = vmatprep.subr.mxu0 %v15516_v49 }
0x102e   :  { %v12491_v38 = vpop.f32.mrb[18].mxu0 }
0x102f   :  { %v3511_v39 = vpop.f32.mrb[19].mxu0  ;;  %v3517_v40 = vadd.f32 %v12491_v38, %v10752_v35 }
0x1030   :  { %v3512_v0 = vadd.f32 %v10752_v35, %v3511_v39 }
0x1032   :  { %12499 = vmatprep.mubr.msk.f32.mxu1 %vm777_vm4, %v3512_v0 }
0x1033   :  { %12500 = vmatmul.mubr.msk.f32.vlgmr.msra.gmra.mrb[32].mxu1 %vm777_vm4, %v3517_v40 }
0x1034   :  { %12520 = vmatpush3.xpose.msk.msra.mxu1 %vm441_vm0, %v3887_v41  ;;  %12521 = vmatprep.mubr.msk.f32.mxu1 %vm15515_vm7, %v15516_v49 }
0x1035   :  { %12524 = vmatprep.subr.mxu1 %v15516_v49 }
0x1037   :  { %12522 = vmatmul.mubr.msk.f32.vlgmr.msra.gmra.mrb[34].mxu1 %vm441_vm0, %v3887_v41 }
0x1038   :  { %12526 = vmatprep.mubr.msk.f32.mxu1 %vm15515_vm7, %v15516_v49 }
0x1106   :  { %v12501_v37 = vpop.f32.mrb[32].mxu1 }
0x1107   :  { %v3692_v44 = vadd.f32 %v12501_v37, %v10762_v36  ;;  %v3675_v32 = vpop.f32.mrb[33].mxu1 }
0x1108   :  { %v3691_v45 = vadd.f32 %v10762_v36, %v3675_v32 }
0x1109   :  { %v3694_v51 = vmax.f32 %v3692_v44, 0.0 }
0x110a   :  { %v3693_v46 = vmax.f32 %v3691_v45, 0.0  ;;  %v16287_v50 = vpop.f32.mrb[34].mxu1 }
0x110b   :  { %v12523_v47 = vpop.f32.mrb[35].mxu1  ;;  %v3961_v52 = vand.u32 2147483647, %v16287_v50 }
0x110c   :  { %12516 = vmatprep.mubr.msk.f32.mxu0 %vm890_vm6, %v3693_v46 }
0x110d   :  { %12517 = vmatmul.mubr.msk.f32.vlgmr.msra.gmra.mrb[20].mxu0 %vm890_vm6, %v3694_v51  ;;  %v3962_v53 = vsel %vm441_vm0, %v3961_v52, -inf }
0x110e   :  { %3963 = vmax.xlane.f32.xlu0 %v3962_v53  ;;  %12531 = vmatprep.mubr.msk.f32.mxu0 %vm15515_vm7, %v15516_v49 }
0x119b   :  { %v3964_v54 = vpop.xlane.xlu0 %3963 }
0x119c   :  { %v3965_v56 = vrot.slane %v3964_v54, 4 }
0x119e   :  { %v3966_v58 = vmax.f32 %v3964_v54, %v3965_v56 }
0x11a0   :  { %v3967_v59 = vrot.slane %v3966_v58, 2 }
0x11a2   :  { %v3968_v60 = vmax.f32 %v3966_v58, %v3967_v59 }
0x11a4   :  { %v3969_v61 = vrot.slane %v3968_v60, 1 }
0x11a6   :  { %v3970_v62 = vmax.f32 %v3968_v60, %v3969_v61 }
0x11a8   :  { %15025 = vrcp.f32 %v3970_v62 }
0x11b2   :  { %v15026_v63 = vpop.eup %15025 }
0x11b3   :  { %v3972_v5 = vmul.f32 %v15026_v63, %v16287_v50 }
0x11b5   :  { %12525 = vmatpush3.msra.mxu1 %v3972_v5 }
0x11b6   :  { %12527 = vmatmul.mubr.msk.f32.vlgmr.msra.gmra.mrb[36].mxu1 %vm441_vm0, %v3972_v5  ;;  %12534 = vmatprep.subr.mxu1 %v15516_v49 }
0x11b7   :  { %12536 = vmatprep.mubr.msk.f32.mxu1 %vm15515_vm7, %v15516_v49 }
0x11e0   :  { %v12518_v7 = vpop.f32.mrb[20].mxu0 }
0x11e1   :  { %v16300_v8 = vadd.f32 %v12518_v7, %v10763_v6  ;;  %v3784_v9 = vpop.f32.mrb[21].mxu0 }
0x11e2   :  { %v16302_v10 = vadd.f32 %v10763_v6, %v3784_v9 }
0x11e3   :  { %3795 = vst.msk [vmem:[%s15847_s9 + $0x8] sm:$0xf] %vm3794_vm13, %v16300_v8 }
0x11e4   :  { %3793 = vst.msk [vmem:[%s15847_s9] sm:$0xff] %vm777_vm4, %v16302_v10  ;;  %s17810_s9 = sld [smem:[#allocation41_spill]] }
0x1289   :  { %v4042_v11 = vpop.f32.mrb[36].mxu1 }
0x128a   :  { %v4046_v12 = vand.u32 2147483647, %v4042_v11  ;;  %v12528_v16 = vpop.f32.mrb[37].mxu1 }
0x128c   :  { %v4047_v13 = vsel %vm441_vm0, %v4046_v12, -inf }
0x128d   :  { %4048 = vmax.xlane.f32.xlu0 %v4047_v13 }
0x131a   :  { %v4049_v14 = vpop.xlane.xlu0 %4048 }
0x131b   :  { %v4050_v17 = vrot.slane %v4049_v14, 4 }
0x131d   :  { %v4051_v20 = vmax.f32 %v4049_v14, %v4050_v17 }
0x131f   :  { %v4052_v15 = vrot.slane %v4051_v20, 2 }
0x1321   :  { %v4053_v21 = vmax.f32 %v4051_v20, %v4052_v15 }
0x1323   :  { %v4054_v22 = vrot.slane %v4053_v21, 1 }
0x1325   :  { %v4055_v23 = vmax.f32 %v4053_v21, %v4054_v22 }
0x1327   :  { %15027 = vrcp.f32 %v4055_v23 }
0x1331   :  { %v15028_v18 = vpop.eup %15027 }
0x1332   :  { %v4057_v24 = vmul.f32 %v15028_v18, %v4042_v11 }
0x1334   :  { %12530 = vmatpush3.msra.mxu0 %v4057_v24 }
0x1335   :  { %12532 = vmatmul.mubr.msk.f32.vlgmr.msra.gmra.mrb[22].mxu0 %vm441_vm0, %v4057_v24  ;;  %12539 = vmatprep.subr.mxu0 %v15516_v49 }
0x1336   :  { %12541 = vmatprep.mubr.msk.f32.mxu0 %vm15515_vm7, %v15516_v49 }
0x1408   :  { %v4127_v26 = vpop.f32.mrb[22].mxu0 }
0x1409   :  { %v12533_v27 = vpop.f32.mrb[23].mxu0  ;;  %v4131_v28 = vand.u32 2147483647, %v4127_v26 }
0x140b   :  { %v4132_v3 = vsel %vm441_vm0, %v4131_v28, -inf }
0x140c   :  { %4133 = vmax.xlane.f32.xlu1 %v4132_v3 }
0x1499   :  { %v4134_v4 = vpop.xlane.xlu1 %4133 }
0x149a   :  { %v4135_v1 = vrot.slane %v4134_v4, 4 }
0x149c   :  { %v4136_v29 = vmax.f32 %v4134_v4, %v4135_v1 }
0x149e   :  { %v4137_v30 = vrot.slane %v4136_v29, 2 }
0x14a0   :  { %v4138_v19 = vmax.f32 %v4136_v29, %v4137_v30  ;;  %v3820_v29 = vlaneseq  ;;  %v10735_v30 = vld [vmem:[#allocation18] ss:$0 sm:$0xff] }
0x14a2   :  { %v4139_v55 = vrot.slane %v4138_v19, 1 }
0x14a4   :  { %v4140_v2 = vmax.f32 %v4138_v19, %v4139_v55  ;;  %v3821_v19 = vand.u32 127, %v3820_v29  ;;  %v4826_v55 = vld [vmem:[%s17810_s9] sm:$0xff] }
0x14a6   :  { %15029 = vrcp.f32 %v4140_v2  ;;  %v3068_v2 = vadd.f32 %v10735_v30, %v16263_v25  ;;  %vm3822_vm14 = vcmp.eq.s32.totalorder %v3821_v19, 0  ;;  %vm3830_vm15 = vcmp.eq.s32.totalorder %v3821_v19, 1 }
0x14a7   :  { %v3831_v25 = vsel %vm3830_vm15, 1.0, %v15516_v49  ;;  %vm3837_vm1 = vcmp.eq.s32.totalorder %v3821_v19, 2  ;;  %vm3844_vm2 = vcmp.eq.s32.totalorder %v3821_v19, 3  ;;  %vm3851_vm3 = vcmp.eq.s32.totalorder %v3821_v19, 4 }
0x14a8   :  { %vm3858_vm5 = vcmp.eq.s32.totalorder %v3821_v19, 5  ;;  %vm3865_vm6 = vcmp.eq.s32.totalorder %v3821_v19, 6  ;;  %vm3872_vm8 = vcmp.eq.s32.totalorder %v3821_v19, 7 }
0x14b0   :  { %v15030_v57 = vpop.eup %15029 }
0x14b1   :  { %v4142_v31 = vmul.f32 %v15030_v57, %v4127_v26 }
0x14b3   :  { %12535 = vmatpush3.msra.mxu1 %v4142_v31 }
0x14b4   :  { %12537 = vmatmul.mubr.msk.f32.vlgmr.msra.gmra.mrb[38].mxu1 %vm441_vm0, %v4142_v31  ;;  %12544 = vmatprep.subr.mxu1 %v15516_v49 }
0x14b5   :  { %12546 = vmatprep.mubr.msk.f32.mxu1 %vm15515_vm7, %v15516_v49 }
0x1587   :  { %v4212_v33 = vpop.f32.mrb[38].mxu1 }
0x1588   :  { %v4216_v35 = vand.u32 2147483647, %v4212_v33  ;;  %v12538_v38 = vpop.f32.mrb[39].mxu1 }
0x1589   :  { %v3071_v38 = vmax.f32 %v3068_v2, 0.0 }
0x158a   :  { %v4217_v39 = vsel %vm441_vm0, %v4216_v35, -inf  ;;  %v4827_v35 = vand.u32 2147483647, %v4826_v55 }
0x158b   :  { %4218 = vmax.xlane.f32.xlu1 %v4217_v39 }
0x1618   :  { %v4219_v0 = vpop.xlane.xlu1 %4218 }
0x1619   :  { %v4220_v40 = vrot.slane %v4219_v0, 4 }
0x161b   :  { %v4221_v41 = vmax.f32 %v4219_v0, %v4220_v40  ;;  %v3823_v0 = vsel %vm3822_vm14, 1.0, %v15516_v49  ;;  %v4828_v40 = vsel %vm441_vm0, %v4827_v35, -inf }
0x161d   :  { %v4222_v42 = vrot.slane %v4221_v41, 2 }
0x161f   :  { %v4223_v43 = vmax.f32 %v4221_v41, %v4222_v42  ;;  %v3824_v41 = vmul.f32 %v3823_v0, %v3071_v38 }
0x1621   :  { %v4224_v48 = vrot.slane %v4223_v43, 1  ;;  %v3825_v42 = vsel %vm441_vm0, %v3824_v41, 0.0 }
0x1623   :  { %v4225_v34 = vmax.f32 %v4223_v43, %v4224_v48  ;;  %v3832_v43 = vmul.f32 %v3831_v25, %v3071_v38  ;;  %v3838_v48 = vsel %vm3837_vm1, 1.0, %v15516_v49 }
0x1625   :  { %15031 = vrcp.f32 %v4225_v34  ;;  %v3833_v34 = vsel %vm441_vm0, %v3832_v43, 0.0 }
0x162f   :  { %v15032_v36 = vpop.eup %15031 }
0x1630   :  { %v4227_v37 = vmul.f32 %v15032_v36, %v4212_v33  ;;  %v3839_v36 = vmul.f32 %v3838_v48, %v3071_v38 }
0x1632   :  { %12540 = vmatpush3.msra.mxu0 %v4227_v37 }
0x1633   :  { %12542 = vmatmul.mubr.msk.f32.vlgmr.msra.gmra.mrb[24].mxu0 %vm441_vm0, %v4227_v37  ;;  %12549 = vmatprep.subr.mxu0 %v15516_v49  ;;  %v3845_v37 = vsel %vm3844_vm2, 1.0, %v15516_v49 }
0x1634   :  { %12551 = vmatprep.mubr.msk.f32.mxu0 %vm15515_vm7, %v15516_v49 }
0x1706   :  { %v4297_v44 = vpop.f32.mrb[24].mxu0 }
0x1707   :  { %v4301_v32 = vand.u32 2147483647, %v4297_v44  ;;  %v12543_v45 = vpop.f32.mrb[25].mxu0 }
0x1708   :  { %v3852_v45 = vsel %vm3851_vm3, 1.0, %v15516_v49 }
0x1709   :  { %v4302_v46 = vsel %vm441_vm0, %v4301_v32, -inf  ;;  %v3846_v32 = vmul.f32 %v3845_v37, %v3071_v38 }
0x170a   :  { %4303 = vmax.xlane.f32.xlu0 %v4302_v46 }
0x170b   :  { %v3847_v46 = vsel %vm441_vm0, %v3846_v32, 0.0  ;;  %v15518_v32 = vmov 0  }
0x170c   :  { %15024 = vset.pattern.permute.xlu0 %v15518_v32 }
0x1797   :  { %v4304_v51 = vpop.xlane.xlu0 %4303 }
0x1798   :  { %v4305_v47 = vrot.slane %v4304_v51, 4 }
0x179a   :  { %v4306_v52 = vmax.f32 %v4304_v51, %v4305_v47  ;;  %v3853_v51 = vmul.f32 %v3852_v45, %v3071_v38  ;;  %v3859_v47 = vsel %vm3858_vm5, 1.0, %v15516_v49  ;;  %v4862_v45 = vld [vmem:[%s17811_s10] sm:$0xff] }
0x179c   :  { %v4307_v53 = vrot.slane %v4306_v52, 2 }
0x179e   :  { %v4308_v54 = vmax.f32 %v4306_v52, %v4307_v53  ;;  %v3854_v52 = vsel %vm441_vm0, %v3853_v51, 0.0  ;;  %v3860_v53 = vmul.f32 %v3859_v47, %v3071_v38  ;;  %v4864_v51 = vld [vmem:[%s17811_s10 + $0x10] sm:$0xff] }
0x17a0   :  { %v4309_v56 = vrot.slane %v4308_v54, 1 }
0x17a2   :  { %v4310_v58 = vmax.f32 %v4308_v54, %v4309_v56  ;;  %v3866_v54 = vsel %vm3865_vm6, 1.0, %v15516_v49  ;;  %v3861_v56 = vsel %vm441_vm0, %v3860_v53, 0.0 }
0x17a4   :  { %15033 = vrcp.f32 %v4310_v58  ;;  %v3867_v58 = vmul.f32 %v3866_v54, %v3071_v38  ;;  %v4866_v54 = vld [vmem:[%s17811_s10 + $0x20] sm:$0xff] }
0x17ae   :  { %v15034_v59 = vpop.eup %15033 }
0x17af   :  { %v4312_v60 = vmul.f32 %v15034_v59, %v4297_v44  ;;  %v3840_v44 = vsel %vm441_vm0, %v3839_v36, 0.0  ;;  %v3873_v59 = vsel %vm3872_vm8, 1.0, %v15516_v49 }
0x17b1   :  { %12545 = vmatpush3.msra.mxu1 %v4312_v60 }
0x17b2   :  { %12547 = vmatmul.mubr.msk.f32.vlgmr.msra.gmra.mrb[40].mxu1 %vm441_vm0, %v4312_v60  ;;  %12554 = vmatprep.subr.mxu1 %v15516_v49  ;;  %v3868_v60 = vsel %vm441_vm0, %v3867_v58, 0.0 }
0x17b3   :  { %12556 = vmatprep.mubr.msk.f32.mxu1 %vm15515_vm7, %v15516_v49 }
0x1885   :  { %v4382_v61 = vpop.f32.mrb[40].mxu1 }
0x1886   :  { %v4386_v62 = vand.u32 2147483647, %v4382_v61  ;;  %v12548_v63 = vpop.f32.mrb[41].mxu1 }
0x1887   :  { %v3796_v63 = vsel %vm777_vm4, %v16302_v10, -inf }
0x1888   :  { %v4387_v5 = vsel %vm441_vm0, %v4386_v62, -inf }
0x1889   :  { %4388 = vmax.xlane.f32.xlu1 %v4387_v5  ;;  %v3799_v5 = vsel %vm3794_vm13, %v16300_v8, -inf }
0x1916   :  { %v4389_v6 = vpop.xlane.xlu1 %4388 }
0x1917   :  { %v4390_v7 = vrot.slane %v4389_v6, 4 }
0x1919   :  { %v4391_v9 = vmax.f32 %v4389_v6, %v4390_v7 }
0x191b   :  { %v4392_v11 = vrot.slane %v4391_v9, 2 }
0x191d   :  { %v4393_v12 = vmax.f32 %v4391_v9, %v4392_v11 }
0x191f   :  { %v4394_v16 = vrot.slane %v4393_v12, 1 }
0x1921   :  { %v4395_v13 = vmax.f32 %v4393_v12, %v4394_v16 }
0x1923   :  { %15035 = vrcp.f32 %v4395_v13 }
0x192d   :  { %v15036_v14 = vpop.eup %15035 }
0x192e   :  { %v4397_v17 = vmul.f32 %v15036_v14, %v4382_v61  ;;  %v3874_v61 = vmul.f32 %v3873_v59, %v3071_v38  ;;  %v4868_v59 = vld [vmem:[%s17811_s10 + $0x30] sm:$0xff] }
0x1930   :  { %12550 = vmatpush3.msra.mxu0 %v4397_v17  ;;  %v3875_v62 = vsel %vm441_vm0, %v3874_v61, 0.0 }
0x1931   :  { %12552 = vmatmul.mubr.msk.f32.vlgmr.msra.gmra.mrb[26].mxu0 %vm441_vm0, %v4397_v17  ;;  %12559 = vmatprep.subr.mxu0 %v15516_v49 }
0x1932   :  { %12561 = vmatprep.mubr.msk.f32.mxu0 %vm15515_vm7, %v15516_v49 }
0x1a04   :  { %v4467_v20 = vpop.f32.mrb[26].mxu0 }
0x1a05   :  { %v4471_v15 = vand.u32 2147483647, %v4467_v20  ;;  %v12553_v21 = vpop.f32.mrb[27].mxu0 }
0x1a07   :  { %v4472_v22 = vsel %vm441_vm0, %v4471_v15, -inf }
0x1a08   :  { %4473 = vmax.xlane.f32.xlu0 %v4472_v22 }
0x1a95   :  { %v4474_v23 = vpop.xlane.xlu0 %4473 }
0x1a96   :  { %v4475_v18 = vrot.slane %v4474_v23, 4 }
0x1a98   :  { %v4476_v24 = vmax.f32 %v4474_v23, %v4475_v18 }
0x1a9a   :  { %v4477_v26 = vrot.slane %v4476_v24, 2 }
0x1a9c   :  { %v4478_v27 = vmax.f32 %v4476_v24, %v4477_v26 }
0x1a9e   :  { %v4479_v28 = vrot.slane %v4478_v27, 1 }
0x1aa0   :  { %v4480_v3 = vmax.f32 %v4478_v27, %v4479_v28 }
0x1aa2   :  { %15037 = vrcp.f32 %v4480_v3 }
0x1aac   :  { %v15038_v4 = vpop.eup %15037 }
0x1aad   :  { %v4482_v1 = vmul.f32 %v15038_v4, %v4467_v20 }
0x1aaf   :  { %12555 = vmatpush3.msra.mxu1 %v4482_v1 }
0x1ab0   :  { %12557 = vmatmul.mubr.msk.f32.vlgmr.msra.gmra.mrb[42].mxu1 %vm441_vm0, %v4482_v1  ;;  %12564 = vmatprep.subr.mxu1 %v15516_v49 }
0x1ab1   :  { %12566 = vmatprep.mubr.msk.f32.mxu1 %vm15515_vm7, %v15516_v49 }
0x1b83   :  { %v16343_v57 = vpop.f32.mrb[42].mxu1 }
0x1b84   :  { %v4556_v31 = vand.u32 2147483647, %v16343_v57  ;;  %v12558_v33 = vpop.f32.mrb[43].mxu1 }
0x1b86   :  { %v4557_v39 = vsel %vm441_vm0, %v4556_v31, -inf }
0x1b87   :  { %4558 = vmax.xlane.f32.xlu1 %v4557_v39 }
0x1b8b   :  { %4829 = vmax.xlane.f32.xlu1 %v4828_v40 }
0x1b8f   :  { %3826 = vadd.xlane.f32.xlu1 %v3825_v42 }
0x1b93   :  { %3834 = vadd.xlane.f32.xlu1 %v3833_v34 }
0x1b97   :  { %3841 = vadd.xlane.f32.xlu1 %v3840_v44 }
0x1b9b   :  { %3848 = vadd.xlane.f32.xlu1 %v3847_v46  ;;  %v4863_v46 = vld [vmem:[%s17811_s10 + $0x8] sm:$0xff] }
0x1b9c   :  { %v14120_v47 = vpack.c.bf16 %v4863_v46, %v4862_v45 }
0x1b9f   :  { %3855 = vadd.xlane.f32.xlu1 %v3854_v52  ;;  %v4865_v52 = vld [vmem:[%s17811_s10 + $0x18] sm:$0xff] }
0x1ba0   :  { %v14124_v53 = vpack.c.bf16 %v4865_v52, %v4864_v51 }
0x1ba3   :  { %3862 = vadd.xlane.f32.xlu1 %v3861_v56  ;;  %v4867_v56 = vld [vmem:[%s17811_s10 + $0x28] sm:$0xff] }
0x1ba4   :  { %v14128_v58 = vpack.c.bf16 %v4867_v56, %v4866_v54 }
0x1ba7   :  { %3869 = vadd.xlane.f32.xlu1 %v3868_v60  ;;  %v4869_v60 = vld [vmem:[%s17811_s10 + $0x38] sm:$0xff] }
0x1bab   :  { %3876 = vadd.xlane.f32.xlu1 %v3875_v62 }
0x1baf   :  { %3797 = vmax.xlane.f32.xlu1 %v3796_v63 }
0x1bb3   :  { %3800 = vmax.xlane.f32.xlu1 %v3799_v5 }
0x1c14   :  { %v4559_v6 = vpop.xlane.xlu1 %4558 }
0x1c15   :  { %v4560_v7 = vrot.slane %v4559_v6, 4 }
0x1c17   :  { %v4561_v9 = vmax.f32 %v4559_v6, %v4560_v7 }
0x1c18   :  { %v16368_v11 = vpop.xlane.xlu1 %4829 }
0x1c19   :  { %v4562_v12 = vrot.slane %v4561_v9, 2 }
0x1c1b   :  { %v4563_v16 = vmax.f32 %v4561_v9, %v4562_v12  ;;  %v4831_v9 = vrot.slane %v16368_v11, 4 }
0x1c1c   :  { %v3827_v13 = vpop.xlane.xlu1 %3826 }
0x1c1d   :  { %v4564_v14 = vrot.slane %v4563_v16, 1  ;;  %3829 = vst.msk [vmem:[#allocation2] sm:$0xff] %vm3828_vm9, %v3827_v13 }
0x1c1f   :  { %v4565_v17 = vmax.f32 %v4563_v16, %v4564_v14  ;;  %v4832_v16 = vmax.f32 %v16368_v11, %v4831_v9 }
0x1c20   :  { %v3835_v20 = vpop.xlane.xlu1 %3834 }
0x1c21   :  { %15039 = vrcp.f32 %v4565_v17  ;;  %3836 = vst.msk [vmem:[#allocation2 + $0x8] sm:$0xff] %vm3828_vm9, %v3835_v20 }
0x1c24   :  { %v3842_v15 = vpop.xlane.xlu1 %3841  ;;  %v16458_v54 = vld [vmem:[#allocation2] sm:$0xff] }
0x1c25   :  { %3843 = vst.msk [vmem:[#allocation2 + $0x10] sm:$0xff] %vm3828_vm9, %v3842_v15 }
0x1c28   :  { %v3849_v21 = vpop.xlane.xlu1 %3848  ;;  %v16456_v52 = vld [vmem:[#allocation2 + $0x8] sm:$0xff] }
0x1c29   :  { %3850 = vst.msk [vmem:[#allocation2 + $0x18] sm:$0xff] %vm3828_vm9, %v3849_v21  ;;  %v4833_v21 = vrot.slane %v4832_v16, 2 }
0x1c2b   :  { %v15040_v22 = vpop.eup %15039 }
0x1c2c   :  { %v3856_v23 = vpop.xlane.xlu1 %3855  ;;  %v4567_v18 = vmul.f32 %v15040_v22, %v16343_v57 }
0x1c2d   :  { %3857 = vst.msk [vmem:[#allocation2 + $0x20] sm:$0xff] %vm3828_vm9, %v3856_v23 }
0x1c2e   :  { %12560 = vmatpush3.msra.mxu0 %v4567_v18 }
0x1c2f   :  { %12562 = vmatmul.mubr.msk.f32.vlgmr.msra.gmra.mrb[28].mxu0 %vm441_vm0, %v4567_v18  ;;  %12569 = vmatprep.subr.mxu0 %v15516_v49  ;;  %v4834_v18 = vmax.f32 %v4832_v16, %v4833_v21 }
0x1c30   :  { %v3863_v24 = vpop.xlane.xlu1 %3862  ;;  %12571 = vmatprep.mubr.msk.f32.mxu0 %vm15515_vm7, %v15516_v49 }
0x1c31   :  { %3864 = vst.msk [vmem:[#allocation2 + $0x28] sm:$0xff] %vm3828_vm9, %v3863_v24 }
0x1c34   :  { %v3870_v26 = vpop.xlane.xlu1 %3869 }
0x1c35   :  { %3871 = vst.msk [vmem:[#allocation2 + $0x30] sm:$0xff] %vm3828_vm9, %v3870_v26 }
0x1c38   :  { %v3877_v27 = vpop.xlane.xlu1 %3876  ;;  %v16468_v16 = vld [vmem:[#allocation2 + $0x28] sm:$0xff] }
0x1c39   :  { %3878 = vst.msk [vmem:[#allocation2 + $0x38] sm:$0xff] %vm3828_vm9, %v3877_v27  ;;  %v4835_v27 = vrot.slane %v4834_v18, 1 }
0x1c3b   :  { %v4836_v11 = vmax.f32 %v4834_v18, %v4835_v27 }
0x1c3c   :  { %v3798_v28 = vpop.xlane.xlu1 %3797  ;;  %v16476_v27 = vld [vmem:[#allocation2 + $0x30] sm:$0xff] }
0x1c3d   :  { %v3802_v3 = vsub.f32 %v16302_v10, %v3798_v28  ;;  %v4654_v10 = vshrl.u32 %v3820_v29, 7 }
0x1c3f   :  { %v3804_v4 = vmul.f32 1.442695, %v3802_v3  ;;  %v4655_v38 = vcvt.s32.f32 %v4654_v10 }
0x1c40   :  { %v16385_v19 = vpop.xlane.xlu1 %3800  ;;  %v16474_v18 = vld [vmem:[#allocation2 + $0x38] sm:$0xff] }
0x1c41   :  { %15041 = vpow2.f32 %v3804_v4  ;;  %v4656_v39 = vmul.f32 0.125, %v4655_v38 }
0x1c43   :  { %v4657_v0 = vadd.f32 1.0, %v4656_v39  ;;  %v4841_v39 = vld [vmem:[%s17813_s6] sm:$0xff] }
0x1c45   :  { %12565 = vmatpush3.msra.mxu1 %v4657_v0  ;;  %v4842_v0 = vld [vmem:[%s17813_s6 + $0x8] sm:$0xff] }
0x1c46   :  { %14121 = vmatprep.subr.bf16.mxu1 %v14120_v47 }
0x1c4b   :  { %v15042_v1 = vpop.eup %15041 }
0x1c4c   :  { %v3808_v30 = vsel %vm777_vm4, %v15042_v1, 0.0 }
0x1c4d   :  { %3809 = vadd.xlane.f32.xlu1 %v3808_v30  ;;  %v4823_v30 = vstv %s17812_s0 }
0x1cda   :  { %v3810_v49 = vpop.xlane.xlu1 %3809 }
0x1cdb   :  { %15043 = vrcp.f32 %v3810_v49 }
0x1ce5   :  { %v15044_v55 = vpop.eup %15043 }
0x1ce6   :  { %v3815_v2 = vmul.f32 %v15044_v55, %v15042_v1 }
0x1ce8   :  { %3818 = vst.msk [vmem:[%s15842_s17] sm:$0xff] %vm777_vm4, %v3815_v2  ;;  %vm4870_vm4 = vcmask 523264  }
0x1d02   :  { %v4637_v57 = vpop.f32.mrb[28].mxu0 }
0x1d03   :  { %v4641_v31 = vand.u32 2147483647, %v4637_v57  ;;  %v12563_v33 = vpop.f32.mrb[29].mxu0 }
0x1d04   :  { %v3803_v33 = vsub.f32 %v16300_v8, %v16385_v19  ;;  %v4844_v8 = vld [vmem:[%s17813_s6 + $0x18] sm:$0xff] }
0x1d05   :  { %v4642_v35 = vsel %vm441_vm0, %v4641_v31, -inf }
0x1d06   :  { %4643 = vmax.xlane.f32.xlu0 %v4642_v35  ;;  %v3806_v35 = vmul.f32 1.442695, %v3803_v33 }
0x1d93   :  { %v4644_v40 = vpop.xlane.xlu0 %4643 }
0x1d94   :  { %v4645_v41 = vrot.slane %v4644_v40, 4 }
0x1d96   :  { %v4646_v25 = vmax.f32 %v4644_v40, %v4645_v41  ;;  %v4843_v40 = vld [vmem:[%s17813_s6 + $0x10] sm:$0xff] }
0x1d98   :  { %v4647_v42 = vrot.slane %v4646_v25, 2 }
0x1d9a   :  { %v4648_v43 = vmax.f32 %v4646_v25, %v4647_v42 }
0x1d9c   :  { %v4649_v48 = vrot.slane %v4648_v43, 1 }
0x1d9e   :  { %v4650_v34 = vmax.f32 %v4648_v43, %v4649_v48  ;;  %v4845_v43 = vld [vmem:[%s17813_s6 + $0x20] sm:$0xff] }
0x1da0   :  { %15045 = vrcp.f32 %v4650_v34  ;;  %v4846_v34 = vld [vmem:[%s17813_s6 + $0x28] sm:$0xff] }
0x1daa   :  { %v15046_v36 = vpop.eup %15045 }
0x1dab   :  { %v4652_v29 = vmul.f32 %v15046_v36, %v4637_v57 }
0x1dad   :  { %12567 = vmatmul.mubr.msk.f32.vlgmr.msra.gmra.mrb[44].mxu1 %vm441_vm0, %v4652_v29  ;;  %v4847_v29 = vld [vmem:[%s17813_s6 + $0x30] sm:$0xff] }
0x1dae   :  { %14123 = vmatpush3.bf16.msra.mxu1 %v14120_v47 }
0x1daf   :  { %14125 = vmatprep.subr.bf16.mxu1 %v14124_v53 }
0x1db2   :  { %14127 = vmatpush3.bf16.msra.mxu1 %v14124_v53 }
0x1db3   :  { %14129 = vmatprep.subr.bf16.mxu1 %v14128_v58 }
0x1db6   :  { %14131 = vmatpush3.bf16.msra.mxu1 %v14128_v58 }
0x1e80   :  { %v4727_v37 = vpop.f32.mrb[44].mxu1 }
0x1e81   :  { %v12568_v44 = vpop.f32.mrb[45].mxu1  ;;  %12570 = vmatpush3.msra.mxu0 %v4727_v37  ;;  %v4812_v61 = vmul.f32 %v4727_v37, %v4727_v37 }
0x1e82   :  { %12572 = vmatmul.mubr.msk.f32.vlgmr.msra.gmra.mrb[30].mxu0 %vm441_vm0, %v16287_v50  ;;  %v14132_v50 = vpack.c.bf16 %v4869_v60, %v4868_v59  ;;  %v4848_v44 = vld [vmem:[%s17813_s6 + $0x38] sm:$0xff] }
0x1e83   :  { %v4813_v62 = vsel %vm3828_vm9, %v4812_v61, 0.0 }
0x1e84   :  { %14133 = vmatprep.subr.bf16.mxu1 %v14132_v50  ;;  %v4814_v63 = vrot.slane %v4813_v62, 4 }
0x1e85   :  { %14135 = vmatpush3.bf16.msra.mxu1 %v14132_v50  ;;  %v16462_v50 = vld [vmem:[#allocation2 + $0x18] sm:$0xff] }
0x1e86   :  { %v4815_v5 = vadd.f32 %v4814_v63, %v4813_v62  ;;  %v16464_v63 = vld [vmem:[#allocation2 + $0x10] sm:$0xff] }
0x1e88   :  { %v4816_v6 = vrot.slane %v4815_v5, 2 }
0x1e8a   :  { %v4817_v7 = vadd.f32 %v4816_v6, %v4815_v5 }
0x1e8c   :  { %v4818_v12 = vrot.slane %v4817_v7, 1 }
0x1e8e   :  { %v4819_v14 = vadd.f32 %v4818_v12, %v4817_v7 }
0x1e90   :  { %15047 = vrcp.f32 %v4819_v14 }
0x1e9a   :  { %v15048_v4 = vpop.eup %15047 }
0x1f55   :  { %v4800_v13 = vpop.f32.mrb[30].mxu0 }
0x1f56   :  { %v4804_v17 = vmul.f32 %v4800_v13, %v4727_v37  ;;  %v12573_v20 = vpop.f32.mrb[31].mxu0 }
0x1f58   :  { %v4805_v15 = vsel %vm3828_vm9, %v4804_v17, 0.0  ;;  %v16470_v17 = vld [vmem:[#allocation2 + $0x20] sm:$0xff] }
0x1f59   :  { %v4806_v22 = vrot.slane %v4805_v15, 4 }
0x1f5b   :  { %v4807_v23 = vadd.f32 %v4806_v22, %v4805_v15 }
0x1f5d   :  { %v4808_v24 = vrot.slane %v4807_v23, 2 }
0x1f5f   :  { %v4809_v26 = vadd.f32 %v4808_v24, %v4807_v23 }
0x1f61   :  { %v4810_v28 = vrot.slane %v4809_v26, 1 }
0x1f63   :  { %v4811_v3 = vadd.f32 %v4810_v28, %v4809_v26 }
0x1f65   :  { %v4821_v1 = vmul.f32 %v15048_v4, %v4811_v3 }
0x1f67   :  { %15049 = vrcp.f32 %v4821_v1 }
0x1f68   :  { %15051 = vrcp.f32 %v4836_v11 }
0x1f69   :  { %15053 = vpow2.f32 %v3806_v35 }
0x1f71   :  { %v15050_v49 = vpop.eup %15049 }
0x1f72   :  { %v4825_v55 = vmul.f32 %v15050_v49, %v4823_v30  ;;  %v15052_v2 = vpop.eup %15051 }
0x1f73   :  { %v15054_v10 = vpop.eup %15053 }
0x1f74   :  { %vm4837_vm0 = vcmp.gt.f32.partialorder %v4836_v11, %v4825_v55  ;;  %v4839_v57 = vmul.f32 %v15052_v2, %v4825_v55  ;;  %v3811_v38 = vsel %vm3794_vm13, %v15054_v10, 0.0 }
0x1f76   :  { %v4840_v31 = vsel %vm4837_vm0, %v4839_v57, 1.0 }
0x1f77   :  { %4851 = vperm.xlu0 %15024, %v4840_v31  }
0x1f96   :  { %3812 = vadd.xlane.f32.xlu0 %v3811_v38 }
0x1ff6   :  { %v4852_v41 = vpop.permute.xlu0 %4851 }
0x1ff7   :  { %v16413_v25 = vmul.f32 %v4852_v41, %v4841_v39  ;;  %v16415_v42 = vmul.f32 %v4852_v41, %v4842_v0  ;;  %v16418_v19 = vmul.f32 %v4852_v41, %v4843_v40  ;;  %v16429_v48 = vmul.f32 %v4852_v41, %v4844_v8 }
0x1ff8   :  { %v16432_v36 = vmul.f32 %v4852_v41, %v4845_v43  ;;  %v16439_v37 = vmul.f32 %v4852_v41, %v4846_v34  ;;  %v16442_v32 = vmul.f32 %v4852_v41, %v4847_v29  ;;  %v16448_v45 = vmul.f32 %v4852_v41, %v4848_v44 }
0x1ff9   :  { %12590 = vmatprep.mubr.msk.f32.mxu1 %vm4870_vm4, %v16413_v25  ;;  %12618 = vmatprep.mubr.msk.f32.mxu0 %vm4870_vm4, %v16413_v25 }
0x1ffa   :  { %12591 = vmatmul.mubr.msk.f32.vlgmr.msra.gmra.mrb[46].mxu1 %vm4870_vm4, %v16415_v42 }
0x1ffb   :  { %12593 = vmatprep.mubr.msk.f32.mxu1 %vm4870_vm4, %v16418_v19 }
0x1ffe   :  { %12594 = vmatmul.mubr.msk.f32.gmra.mrb[48].mxu1 %vm4870_vm4, %v16429_v48 }
0x1fff   :  { %12596 = vmatprep.mubr.msk.f32.mxu1 %vm4870_vm4, %v16432_v36 }
0x2002   :  { %12597 = vmatmul.mubr.msk.f32.gmra.mrb[50].mxu1 %vm4870_vm4, %v16439_v37 }
0x2003   :  { %12599 = vmatprep.mubr.msk.f32.mxu1 %vm4870_vm4, %v16442_v32 }
0x2006   :  { %12600 = vmatmul.mubr.msk.f32.gmra.mrb[52].mxu1 %vm4870_vm4, %v16448_v45 }
0x2007   :  { %12646 = vmatprep.mubr.msk.f32.mxu1 %vm4870_vm4, %v16413_v25 }
0x2023   :  { %v3813_v46 = vpop.xlane.xlu0 %3812 }
0x2024   :  { %15055 = vrcp.f32 %v3813_v46 }
0x202e   :  { %v15056_v51 = vpop.eup %15055 }
0x202f   :  { %v3817_v47 = vmul.f32 %v15056_v51, %v15054_v10 }
0x2031   :  { %3819 = vst.msk [vmem:[%s15842_s17 + $0x8] sm:$0xf] %vm3794_vm13, %v3817_v47 }
0x20cd   :  { %v12592_v53 = vpop.f32.mrb[46].mxu1 }
0x20ce   :  { %v4967_v56 = vadd.f32 %v12592_v53, %v16456_v52  ;;  %v4961_v58 = vpop.f32.mrb[47].mxu1 }
0x20cf   :  { %v4962_v59 = vadd.f32 %v4961_v58, %v16458_v54 }
0x20d0   :  { %v5001_v60 = vmax.f32 %v4967_v56, 0.0 }
0x20d1   :  { %v5000_v61 = vmax.f32 %v4962_v59, 0.0  ;;  %v12595_v62 = vpop.f32.mrb[48].mxu1 }
0x20d2   :  { %v4977_v5 = vadd.f32 %v12595_v62, %v16462_v50  ;;  %v4971_v6 = vpop.f32.mrb[49].mxu1 }
0x20d3   :  { %v14136_v7 = vpack.c.bf16 %v5001_v60, %v5000_v61  ;;  %v4972_v9 = vadd.f32 %v4971_v6, %v16464_v63 }
0x20d4   :  { %v5003_v12 = vmax.f32 %v4977_v5, 0.0 }
0x20d5   :  { %v5002_v13 = vmax.f32 %v4972_v9, 0.0  ;;  %v12598_v14 = vpop.f32.mrb[50].mxu1  ;;  %14137 = vmatprep.subr.bf16.mxu0 %v14136_v7 }
0x20d6   :  { %v4987_v20 = vadd.f32 %v12598_v14, %v16468_v16  ;;  %v4981_v15 = vpop.f32.mrb[51].mxu1  ;;  %14139 = vmatpush3.bf16.msra.mxu0 %v14136_v7 }
0x20d7   :  { %v14140_v21 = vpack.c.bf16 %v5003_v12, %v5002_v13  ;;  %v4982_v22 = vadd.f32 %v4981_v15, %v16470_v17 }
0x20d8   :  { %v5005_v23 = vmax.f32 %v4987_v20, 0.0 }
0x20d9   :  { %v5004_v24 = vmax.f32 %v4982_v22, 0.0  ;;  %v12601_v26 = vpop.f32.mrb[52].mxu1  ;;  %14141 = vmatprep.subr.bf16.mxu0 %v14140_v21 }
0x20da   :  { %v4997_v28 = vadd.f32 %v12601_v26, %v16474_v18  ;;  %v4991_v3 = vpop.f32.mrb[53].mxu1  ;;  %14143 = vmatpush3.bf16.msra.mxu0 %v14140_v21 }
0x20db   :  { %v14144_v4 = vpack.c.bf16 %v5005_v23, %v5004_v24  ;;  %v4992_v1 = vadd.f32 %v4991_v3, %v16476_v27 }
0x20dc   :  { %v5007_v11 = vmax.f32 %v4997_v28, 0.0 }
0x20dd   :  { %v5006_v30 = vmax.f32 %v4992_v1, 0.0  ;;  %14145 = vmatprep.subr.bf16.mxu0 %v14144_v4 }
0x20de   :  { %14147 = vmatpush3.bf16.msra.mxu0 %v14144_v4 }
0x20df   :  { %v14148_v49 = vpack.c.bf16 %v5007_v11, %v5006_v30 }
0x20e1   :  { %14149 = vmatprep.subr.bf16.mxu0 %v14148_v49 }
0x20e2   :  { %14151 = vmatpush3.bf16.msra.mxu0 %v14148_v49 }
0x20e5   :  { %12619 = vmatmul.mubr.msk.f32.vlgmr.msra.gmra.mrb[32].mxu0 %vm4870_vm4, %v16415_v42 }
0x20e6   :  { %12621 = vmatprep.mubr.msk.f32.mxu0 %vm4870_vm4, %v16418_v19 }
0x20e9   :  { %12622 = vmatmul.mubr.msk.f32.gmra.mrb[34].mxu0 %vm4870_vm4, %v16429_v48 }
0x20ea   :  { %12624 = vmatprep.mubr.msk.f32.mxu0 %vm4870_vm4, %v16432_v36 }
0x20ed   :  { %12625 = vmatmul.mubr.msk.f32.gmra.mrb[36].mxu0 %vm4870_vm4, %v16439_v37 }
0x20ee   :  { %12627 = vmatprep.mubr.msk.f32.mxu0 %vm4870_vm4, %v16442_v32 }
0x20f1   :  { %12628 = vmatmul.mubr.msk.f32.gmra.mrb[38].mxu0 %vm4870_vm4, %v16448_v45 }
0x20f2   :  { %12674 = vmatprep.mubr.msk.f32.mxu0 %vm4870_vm4, %v16413_v25 }
0x21b8   :  { %v12620_v55 = vpop.f32.mrb[32].mxu0 }
0x21b9   :  { %v5080_v2 = vadd.f32 %v12620_v55, %v16456_v52  ;;  %v5074_v57 = vpop.f32.mrb[33].mxu0 }
0x21ba   :  { %v5075_v31 = vadd.f32 %v5074_v57, %v16458_v54 }
0x21bb   :  { %v5114_v33 = vmax.f32 %v5080_v2, 0.0 }
0x21bc   :  { %v5113_v35 = vmax.f32 %v5075_v31, 0.0  ;;  %v12623_v10 = vpop.f32.mrb[34].mxu0 }
0x21bd   :  { %v5090_v38 = vadd.f32 %v12623_v10, %v16462_v50  ;;  %v5084_v39 = vpop.f32.mrb[35].mxu0 }
0x21be   :  { %v14152_v0 = vpack.c.bf16 %v5114_v33, %v5113_v35  ;;  %v5085_v40 = vadd.f32 %v5084_v39, %v16464_v63 }
0x21bf   :  { %v5116_v41 = vmax.f32 %v5090_v38, 0.0 }
0x21c0   :  { %v5115_v8 = vmax.f32 %v5085_v40, 0.0  ;;  %v12626_v43 = vpop.f32.mrb[36].mxu0  ;;  %14153 = vmatprep.subr.bf16.mxu1 %v14152_v0 }
0x21c1   :  { %v5100_v34 = vadd.f32 %v12626_v43, %v16468_v16  ;;  %v5094_v29 = vpop.f32.mrb[37].mxu0  ;;  %14155 = vmatpush3.bf16.msra.mxu1 %v14152_v0 }
0x21c2   :  { %v14156_v44 = vpack.c.bf16 %v5116_v41, %v5115_v8  ;;  %v5095_v46 = vadd.f32 %v5094_v29, %v16470_v17 }
0x21c3   :  { %v5118_v51 = vmax.f32 %v5100_v34, 0.0 }
0x21c4   :  { %v5117_v47 = vmax.f32 %v5095_v46, 0.0  ;;  %v12629_v53 = vpop.f32.mrb[38].mxu0  ;;  %14157 = vmatprep.subr.bf16.mxu1 %v14156_v44 }
0x21c5   :  { %v5110_v56 = vadd.f32 %v12629_v53, %v16474_v18  ;;  %v5104_v58 = vpop.f32.mrb[39].mxu0  ;;  %14159 = vmatpush3.bf16.msra.mxu1 %v14156_v44 }
0x21c6   :  { %v14160_v59 = vpack.c.bf16 %v5118_v51, %v5117_v47  ;;  %v5105_v60 = vadd.f32 %v5104_v58, %v16476_v27 }
0x21c7   :  { %v5120_v61 = vmax.f32 %v5110_v56, 0.0 }
0x21c8   :  { %v5119_v62 = vmax.f32 %v5105_v60, 0.0  ;;  %14161 = vmatprep.subr.bf16.mxu1 %v14160_v59 }
0x21c9   :  { %14163 = vmatpush3.bf16.msra.mxu1 %v14160_v59 }
0x21ca   :  { %v14164_v5 = vpack.c.bf16 %v5120_v61, %v5119_v62 }
0x21cc   :  { %14165 = vmatprep.subr.bf16.mxu1 %v14164_v5 }
0x21cd   :  { %14167 = vmatpush3.bf16.msra.mxu1 %v14164_v5 }
0x21d0   :  { %12647 = vmatmul.mubr.msk.f32.vlgmr.msra.gmra.mrb[54].mxu1 %vm4870_vm4, %v16415_v42 }
0x21d1   :  { %12649 = vmatprep.mubr.msk.f32.mxu1 %vm4870_vm4, %v16418_v19 }
0x21d4   :  { %12650 = vmatmul.mubr.msk.f32.gmra.mrb[56].mxu1 %vm4870_vm4, %v16429_v48 }
0x21d5   :  { %12652 = vmatprep.mubr.msk.f32.mxu1 %vm4870_vm4, %v16432_v36 }
0x21d8   :  { %12653 = vmatmul.mubr.msk.f32.gmra.mrb[58].mxu1 %vm4870_vm4, %v16439_v37 }
0x21d9   :  { %12655 = vmatprep.mubr.msk.f32.mxu1 %vm4870_vm4, %v16442_v32 }
0x21dc   :  { %12656 = vmatmul.mubr.msk.f32.gmra.mrb[60].mxu1 %vm4870_vm4, %v16448_v45 }
0x21dd   :  { %12702 = vmatprep.mubr.msk.f32.mxu1 %vm4870_vm4, %v16413_v25 }
0x22a3   :  { %v12648_v6 = vpop.f32.mrb[54].mxu1 }
0x22a4   :  { %v5193_v7 = vadd.f32 %v12648_v6, %v16456_v52  ;;  %v5187_v9 = vpop.f32.mrb[55].mxu1 }
0x22a5   :  { %v5188_v12 = vadd.f32 %v5187_v9, %v16458_v54 }
0x22a6   :  { %v5227_v13 = vmax.f32 %v5193_v7, 0.0 }
0x22a7   :  { %v5226_v14 = vmax.f32 %v5188_v12, 0.0  ;;  %v12651_v20 = vpop.f32.mrb[56].mxu1 }
0x22a8   :  { %v5203_v15 = vadd.f32 %v12651_v20, %v16462_v50  ;;  %v5197_v21 = vpop.f32.mrb[57].mxu1 }
0x22a9   :  { %v14168_v22 = vpack.c.bf16 %v5227_v13, %v5226_v14  ;;  %v5198_v23 = vadd.f32 %v5197_v21, %v16464_v63 }
0x22aa   :  { %v5229_v24 = vmax.f32 %v5203_v15, 0.0 }
0x22ab   :  { %v5228_v26 = vmax.f32 %v5198_v23, 0.0  ;;  %v12654_v28 = vpop.f32.mrb[58].mxu1  ;;  %14169 = vmatprep.subr.bf16.mxu0 %v14168_v22 }
0x22ac   :  { %v5213_v3 = vadd.f32 %v12654_v28, %v16468_v16  ;;  %v5207_v4 = vpop.f32.mrb[59].mxu1  ;;  %14171 = vmatpush3.bf16.msra.mxu0 %v14168_v22 }
0x22ad   :  { %v14172_v1 = vpack.c.bf16 %v5229_v24, %v5228_v26  ;;  %v5208_v11 = vadd.f32 %v5207_v4, %v16470_v17 }
0x22ae   :  { %v5231_v30 = vmax.f32 %v5213_v3, 0.0 }
0x22af   :  { %v5230_v49 = vmax.f32 %v5208_v11, 0.0  ;;  %v12657_v55 = vpop.f32.mrb[60].mxu1  ;;  %14173 = vmatprep.subr.bf16.mxu0 %v14172_v1 }
0x22b0   :  { %v5223_v2 = vadd.f32 %v12657_v55, %v16474_v18  ;;  %v5217_v57 = vpop.f32.mrb[61].mxu1  ;;  %14175 = vmatpush3.bf16.msra.mxu0 %v14172_v1 }
0x22b1   :  { %v14176_v31 = vpack.c.bf16 %v5231_v30, %v5230_v49  ;;  %v5218_v33 = vadd.f32 %v5217_v57, %v16476_v27 }
0x22b2   :  { %v5233_v35 = vmax.f32 %v5223_v2, 0.0 }
0x22b3   :  { %v5232_v10 = vmax.f32 %v5218_v33, 0.0  ;;  %14177 = vmatprep.subr.bf16.mxu0 %v14176_v31 }
0x22b4   :  { %14179 = vmatpush3.bf16.msra.mxu0 %v14176_v31 }
0x22b5   :  { %v14180_v38 = vpack.c.bf16 %v5233_v35, %v5232_v10 }
0x22b7   :  { %14181 = vmatprep.subr.bf16.mxu0 %v14180_v38 }
0x22b8   :  { %14183 = vmatpush3.bf16.msra.mxu0 %v14180_v38 }
0x22bb   :  { %12675 = vmatmul.mubr.msk.f32.vlgmr.msra.gmra.mrb[40].mxu0 %vm4870_vm4, %v16415_v42 }
0x22bc   :  { %12677 = vmatprep.mubr.msk.f32.mxu0 %vm4870_vm4, %v16418_v19 }
0x22bf   :  { %12678 = vmatmul.mubr.msk.f32.gmra.mrb[42].mxu0 %vm4870_vm4, %v16429_v48 }
0x22c0   :  { %12680 = vmatprep.mubr.msk.f32.mxu0 %vm4870_vm4, %v16432_v36 }
0x22c3   :  { %12681 = vmatmul.mubr.msk.f32.gmra.mrb[44].mxu0 %vm4870_vm4, %v16439_v37 }
0x22c4   :  { %12683 = vmatprep.mubr.msk.f32.mxu0 %vm4870_vm4, %v16442_v32 }
0x22c7   :  { %12684 = vmatmul.mubr.msk.f32.gmra.mrb[46].mxu0 %vm4870_vm4, %v16448_v45 }
0x22c8   :  { %12730 = vmatprep.mubr.msk.f32.mxu0 %vm4870_vm4, %v16413_v25 }
0x238e   :  { %v12676_v39 = vpop.f32.mrb[40].mxu0 }
0x238f   :  { %v5306_v0 = vadd.f32 %v12676_v39, %v16456_v52  ;;  %v5300_v40 = vpop.f32.mrb[41].mxu0 }
0x2390   :  { %v5301_v41 = vadd.f32 %v5300_v40, %v16458_v54 }
0x2391   :  { %v5340_v8 = vmax.f32 %v5306_v0, 0.0 }
0x2392   :  { %v5339_v43 = vmax.f32 %v5301_v41, 0.0  ;;  %v12679_v34 = vpop.f32.mrb[42].mxu0 }
0x2393   :  { %v5316_v29 = vadd.f32 %v12679_v34, %v16462_v50  ;;  %v5310_v44 = vpop.f32.mrb[43].mxu0 }
0x2394   :  { %v14184_v46 = vpack.c.bf16 %v5340_v8, %v5339_v43  ;;  %v5311_v51 = vadd.f32 %v5310_v44, %v16464_v63 }
0x2395   :  { %v5342_v47 = vmax.f32 %v5316_v29, 0.0 }
0x2396   :  { %v5341_v53 = vmax.f32 %v5311_v51, 0.0  ;;  %v12682_v56 = vpop.f32.mrb[44].mxu0  ;;  %14185 = vmatprep.subr.bf16.mxu1 %v14184_v46 }
0x2397   :  { %v5326_v58 = vadd.f32 %v12682_v56, %v16468_v16  ;;  %v5320_v59 = vpop.f32.mrb[45].mxu0  ;;  %14187 = vmatpush3.bf16.msra.mxu1 %v14184_v46 }
0x2398   :  { %v14188_v60 = vpack.c.bf16 %v5342_v47, %v5341_v53  ;;  %v5321_v61 = vadd.f32 %v5320_v59, %v16470_v17 }
0x2399   :  { %v5344_v62 = vmax.f32 %v5326_v58, 0.0 }
0x239a   :  { %v5343_v5 = vmax.f32 %v5321_v61, 0.0  ;;  %v12685_v6 = vpop.f32.mrb[46].mxu0  ;;  %14189 = vmatprep.subr.bf16.mxu1 %v14188_v60 }
0x239b   :  { %v5336_v7 = vadd.f32 %v12685_v6, %v16474_v18  ;;  %v5330_v9 = vpop.f32.mrb[47].mxu0  ;;  %14191 = vmatpush3.bf16.msra.mxu1 %v14188_v60 }
0x239c   :  { %v14192_v12 = vpack.c.bf16 %v5344_v62, %v5343_v5  ;;  %v5331_v13 = vadd.f32 %v5330_v9, %v16476_v27 }
0x239d   :  { %v5346_v14 = vmax.f32 %v5336_v7, 0.0 }
0x239e   :  { %v5345_v20 = vmax.f32 %v5331_v13, 0.0  ;;  %14193 = vmatprep.subr.bf16.mxu1 %v14192_v12 }
0x239f   :  { %14195 = vmatpush3.bf16.msra.mxu1 %v14192_v12 }
0x23a0   :  { %v14196_v15 = vpack.c.bf16 %v5346_v14, %v5345_v20 }
0x23a2   :  { %14197 = vmatprep.subr.bf16.mxu1 %v14196_v15 }
0x23a3   :  { %14199 = vmatpush3.bf16.msra.mxu1 %v14196_v15 }
0x23a6   :  { %12703 = vmatmul.mubr.msk.f32.vlgmr.msra.gmra.mrb[62].mxu1 %vm4870_vm4, %v16415_v42 }
0x23a7   :  { %12705 = vmatprep.mubr.msk.f32.mxu1 %vm4870_vm4, %v16418_v19 }
0x23aa   :  { %12706 = vmatmul.mubr.msk.f32.gmra.mrb[64].mxu1 %vm4870_vm4, %v16429_v48 }
0x23ab   :  { %12708 = vmatprep.mubr.msk.f32.mxu1 %vm4870_vm4, %v16432_v36 }
0x23ae   :  { %12709 = vmatmul.mubr.msk.f32.gmra.mrb[66].mxu1 %vm4870_vm4, %v16439_v37 }
0x23af   :  { %12711 = vmatprep.mubr.msk.f32.mxu1 %vm4870_vm4, %v16442_v32 }
0x23b2   :  { %12712 = vmatmul.mubr.msk.f32.gmra.mrb[68].mxu1 %vm4870_vm4, %v16448_v45 }
0x23b3   :  { %12758 = vmatprep.mubr.msk.f32.mxu1 %vm4870_vm4, %v16413_v25 }
0x2479   :  { %v12704_v21 = vpop.f32.mrb[62].mxu1 }
0x247a   :  { %v5419_v22 = vadd.f32 %v12704_v21, %v16456_v52  ;;  %v5413_v23 = vpop.f32.mrb[63].mxu1 }
0x247b   :  { %v5414_v24 = vadd.f32 %v5413_v23, %v16458_v54 }
0x247c   :  { %v5453_v26 = vmax.f32 %v5419_v22, 0.0 }
0x247d   :  { %v5452_v28 = vmax.f32 %v5414_v24, 0.0  ;;  %v12707_v3 = vpop.f32.mrb[64].mxu1 }
0x247e   :  { %v5429_v4 = vadd.f32 %v12707_v3, %v16462_v50  ;;  %v5423_v1 = vpop.f32.mrb[65].mxu1 }
0x247f   :  { %v14200_v11 = vpack.c.bf16 %v5453_v26, %v5452_v28  ;;  %v5424_v30 = vadd.f32 %v5423_v1, %v16464_v63 }
0x2480   :  { %v5455_v49 = vmax.f32 %v5429_v4, 0.0 }
0x2481   :  { %v5454_v55 = vmax.f32 %v5424_v30, 0.0  ;;  %v12710_v2 = vpop.f32.mrb[66].mxu1  ;;  %14201 = vmatprep.subr.bf16.mxu0 %v14200_v11 }
0x2482   :  { %v5439_v57 = vadd.f32 %v12710_v2, %v16468_v16  ;;  %v5433_v31 = vpop.f32.mrb[67].mxu1  ;;  %14203 = vmatpush3.bf16.msra.mxu0 %v14200_v11 }
0x2483   :  { %v14204_v33 = vpack.c.bf16 %v5455_v49, %v5454_v55  ;;  %v5434_v35 = vadd.f32 %v5433_v31, %v16470_v17 }
0x2484   :  { %v5457_v10 = vmax.f32 %v5439_v57, 0.0 }
0x2485   :  { %v5456_v38 = vmax.f32 %v5434_v35, 0.0  ;;  %v12713_v39 = vpop.f32.mrb[68].mxu1  ;;  %14205 = vmatprep.subr.bf16.mxu0 %v14204_v33 }
0x2486   :  { %v5449_v0 = vadd.f32 %v12713_v39, %v16474_v18  ;;  %v5443_v40 = vpop.f32.mrb[69].mxu1  ;;  %14207 = vmatpush3.bf16.msra.mxu0 %v14204_v33 }
0x2487   :  { %v14208_v41 = vpack.c.bf16 %v5457_v10, %v5456_v38  ;;  %v5444_v8 = vadd.f32 %v5443_v40, %v16476_v27 }
0x2488   :  { %v5459_v43 = vmax.f32 %v5449_v0, 0.0 }
0x2489   :  { %v5458_v34 = vmax.f32 %v5444_v8, 0.0  ;;  %14209 = vmatprep.subr.bf16.mxu0 %v14208_v41 }
0x248a   :  { %14211 = vmatpush3.bf16.msra.mxu0 %v14208_v41 }
0x248b   :  { %v14212_v29 = vpack.c.bf16 %v5459_v43, %v5458_v34 }
0x248d   :  { %14213 = vmatprep.subr.bf16.mxu0 %v14212_v29 }
0x248e   :  { %14215 = vmatpush3.bf16.msra.mxu0 %v14212_v29 }
0x2491   :  { %12731 = vmatmul.mubr.msk.f32.vlgmr.msra.gmra.mrb[48].mxu0 %vm4870_vm4, %v16415_v42 }
0x2492   :  { %12733 = vmatprep.mubr.msk.f32.mxu0 %vm4870_vm4, %v16418_v19 }
0x2495   :  { %12734 = vmatmul.mubr.msk.f32.gmra.mrb[50].mxu0 %vm4870_vm4, %v16429_v48 }
0x2496   :  { %12736 = vmatprep.mubr.msk.f32.mxu0 %vm4870_vm4, %v16432_v36 }
0x2499   :  { %12737 = vmatmul.mubr.msk.f32.gmra.mrb[52].mxu0 %vm4870_vm4, %v16439_v37 }
0x249a   :  { %12739 = vmatprep.mubr.msk.f32.mxu0 %vm4870_vm4, %v16442_v32 }
0x249d   :  { %12740 = vmatmul.mubr.msk.f32.gmra.mrb[54].mxu0 %vm4870_vm4, %v16448_v45 }
0x249e   :  { %12786 = vmatprep.mubr.msk.f32.mxu0 %vm4870_vm4, %v16413_v25 }
0x2564   :  { %v12732_v44 = vpop.f32.mrb[48].mxu0 }
0x2565   :  { %v5532_v46 = vadd.f32 %v12732_v44, %v16456_v52  ;;  %v5526_v51 = vpop.f32.mrb[49].mxu0 }
0x2566   :  { %v5527_v47 = vadd.f32 %v5526_v51, %v16458_v54 }
0x2567   :  { %v5566_v53 = vmax.f32 %v5532_v46, 0.0 }
0x2568   :  { %v5565_v56 = vmax.f32 %v5527_v47, 0.0  ;;  %v12735_v58 = vpop.f32.mrb[50].mxu0 }
0x2569   :  { %v5542_v59 = vadd.f32 %v12735_v58, %v16462_v50  ;;  %v5536_v60 = vpop.f32.mrb[51].mxu0 }
0x256a   :  { %v14216_v61 = vpack.c.bf16 %v5566_v53, %v5565_v56  ;;  %v5537_v62 = vadd.f32 %v5536_v60, %v16464_v63 }
0x256b   :  { %v5568_v5 = vmax.f32 %v5542_v59, 0.0 }
0x256c   :  { %v5567_v6 = vmax.f32 %v5537_v62, 0.0  ;;  %v12738_v7 = vpop.f32.mrb[52].mxu0  ;;  %14217 = vmatprep.subr.bf16.mxu1 %v14216_v61 }
0x256d   :  { %v5552_v9 = vadd.f32 %v12738_v7, %v16468_v16  ;;  %v5546_v12 = vpop.f32.mrb[53].mxu0  ;;  %14219 = vmatpush3.bf16.msra.mxu1 %v14216_v61 }
0x256e   :  { %v14220_v13 = vpack.c.bf16 %v5568_v5, %v5567_v6  ;;  %v5547_v14 = vadd.f32 %v5546_v12, %v16470_v17 }
0x256f   :  { %v5570_v20 = vmax.f32 %v5552_v9, 0.0 }
0x2570   :  { %v5569_v15 = vmax.f32 %v5547_v14, 0.0  ;;  %v12741_v21 = vpop.f32.mrb[54].mxu0  ;;  %14221 = vmatprep.subr.bf16.mxu1 %v14220_v13 }
0x2571   :  { %v5562_v22 = vadd.f32 %v12741_v21, %v16474_v18  ;;  %v5556_v23 = vpop.f32.mrb[55].mxu0  ;;  %14223 = vmatpush3.bf16.msra.mxu1 %v14220_v13 }
0x2572   :  { %v14224_v24 = vpack.c.bf16 %v5570_v20, %v5569_v15  ;;  %v5557_v26 = vadd.f32 %v5556_v23, %v16476_v27 }
0x2573   :  { %v5572_v28 = vmax.f32 %v5562_v22, 0.0 }
0x2574   :  { %v5571_v3 = vmax.f32 %v5557_v26, 0.0  ;;  %14225 = vmatprep.subr.bf16.mxu1 %v14224_v24 }
0x2575   :  { %14227 = vmatpush3.bf16.msra.mxu1 %v14224_v24 }
0x2576   :  { %v14228_v4 = vpack.c.bf16 %v5572_v28, %v5571_v3 }
0x2578   :  { %14229 = vmatprep.subr.bf16.mxu1 %v14228_v4 }
0x2579   :  { %14231 = vmatpush3.bf16.msra.mxu1 %v14228_v4 }
0x257c   :  { %12759 = vmatmul.mubr.msk.f32.vlgmr.msra.gmra.mrb[70].mxu1 %vm4870_vm4, %v16415_v42 }
0x257d   :  { %12761 = vmatprep.mubr.msk.f32.mxu1 %vm4870_vm4, %v16418_v19 }
0x2580   :  { %12762 = vmatmul.mubr.msk.f32.gmra.mrb[72].mxu1 %vm4870_vm4, %v16429_v48 }
0x2581   :  { %12764 = vmatprep.mubr.msk.f32.mxu1 %vm4870_vm4, %v16432_v36 }
0x2584   :  { %12765 = vmatmul.mubr.msk.f32.gmra.mrb[74].mxu1 %vm4870_vm4, %v16439_v37 }
0x2585   :  { %12767 = vmatprep.mubr.msk.f32.mxu1 %vm4870_vm4, %v16442_v32 }
0x2588   :  { %12768 = vmatmul.mubr.msk.f32.gmra.mrb[76].mxu1 %vm4870_vm4, %v16448_v45 }
0x2589   :  { %12814 = vmatprep.mubr.msk.f32.mxu1 %vm4870_vm4, %v16413_v25 }
0x264f   :  { %v12760_v1 = vpop.f32.mrb[70].mxu1 }
0x2650   :  { %v5645_v11 = vadd.f32 %v12760_v1, %v16456_v52  ;;  %v5639_v30 = vpop.f32.mrb[71].mxu1 }
0x2651   :  { %v5640_v49 = vadd.f32 %v5639_v30, %v16458_v54 }
0x2652   :  { %v5679_v55 = vmax.f32 %v5645_v11, 0.0 }
0x2653   :  { %v5678_v2 = vmax.f32 %v5640_v49, 0.0  ;;  %v12763_v57 = vpop.f32.mrb[72].mxu1 }
0x2654   :  { %v5655_v31 = vadd.f32 %v12763_v57, %v16462_v50  ;;  %v5649_v33 = vpop.f32.mrb[73].mxu1 }
0x2655   :  { %v14232_v35 = vpack.c.bf16 %v5679_v55, %v5678_v2  ;;  %v5650_v10 = vadd.f32 %v5649_v33, %v16464_v63 }
0x2656   :  { %v5681_v38 = vmax.f32 %v5655_v31, 0.0 }
0x2657   :  { %v5680_v39 = vmax.f32 %v5650_v10, 0.0  ;;  %v12766_v0 = vpop.f32.mrb[74].mxu1  ;;  %14233 = vmatprep.subr.bf16.mxu0 %v14232_v35 }
0x2658   :  { %v5665_v40 = vadd.f32 %v12766_v0, %v16468_v16  ;;  %v5659_v41 = vpop.f32.mrb[75].mxu1  ;;  %14235 = vmatpush3.bf16.msra.mxu0 %v14232_v35 }
0x2659   :  { %v14236_v8 = vpack.c.bf16 %v5681_v38, %v5680_v39  ;;  %v5660_v43 = vadd.f32 %v5659_v41, %v16470_v17 }
0x265a   :  { %v5683_v34 = vmax.f32 %v5665_v40, 0.0 }
0x265b   :  { %v5682_v29 = vmax.f32 %v5660_v43, 0.0  ;;  %v12769_v44 = vpop.f32.mrb[76].mxu1  ;;  %14237 = vmatprep.subr.bf16.mxu0 %v14236_v8 }
0x265c   :  { %v5675_v46 = vadd.f32 %v12769_v44, %v16474_v18  ;;  %v5669_v51 = vpop.f32.mrb[77].mxu1  ;;  %14239 = vmatpush3.bf16.msra.mxu0 %v14236_v8 }
0x265d   :  { %v14240_v47 = vpack.c.bf16 %v5683_v34, %v5682_v29  ;;  %v5670_v53 = vadd.f32 %v5669_v51, %v16476_v27 }
0x265e   :  { %v5685_v56 = vmax.f32 %v5675_v46, 0.0 }
0x265f   :  { %v5684_v58 = vmax.f32 %v5670_v53, 0.0  ;;  %14241 = vmatprep.subr.bf16.mxu0 %v14240_v47 }
0x2660   :  { %14243 = vmatpush3.bf16.msra.mxu0 %v14240_v47 }
0x2661   :  { %v14244_v59 = vpack.c.bf16 %v5685_v56, %v5684_v58 }
0x2663   :  { %14245 = vmatprep.subr.bf16.mxu0 %v14244_v59 }
0x2664   :  { %14247 = vmatpush3.bf16.msra.mxu0 %v14244_v59 }
0x2667   :  { %12787 = vmatmul.mubr.msk.f32.vlgmr.msra.gmra.mrb[56].mxu0 %vm4870_vm4, %v16415_v42 }
0x2668   :  { %12789 = vmatprep.mubr.msk.f32.mxu0 %vm4870_vm4, %v16418_v19 }
0x266b   :  { %12790 = vmatmul.mubr.msk.f32.gmra.mrb[58].mxu0 %vm4870_vm4, %v16429_v48 }
0x266c   :  { %12792 = vmatprep.mubr.msk.f32.mxu0 %vm4870_vm4, %v16432_v36 }
0x266f   :  { %12793 = vmatmul.mubr.msk.f32.gmra.mrb[60].mxu0 %vm4870_vm4, %v16439_v37 }
0x2670   :  { %12795 = vmatprep.mubr.msk.f32.mxu0 %vm4870_vm4, %v16442_v32 }
0x2673   :  { %12796 = vmatmul.mubr.msk.f32.gmra.mrb[62].mxu0 %vm4870_vm4, %v16448_v45 }
0x2674   :  { %12842 = vmatprep.mubr.msk.f32.mxu0 %vm4870_vm4, %v16413_v25 }
0x273a   :  { %v12788_v60 = vpop.f32.mrb[56].mxu0 }
0x273b   :  { %v5758_v61 = vadd.f32 %v12788_v60, %v16456_v52  ;;  %v5752_v62 = vpop.f32.mrb[57].mxu0 }
0x273c   :  { %v5753_v5 = vadd.f32 %v5752_v62, %v16458_v54 }
0x273d   :  { %v5792_v6 = vmax.f32 %v5758_v61, 0.0 }
0x273e   :  { %v5791_v7 = vmax.f32 %v5753_v5, 0.0  ;;  %v12791_v9 = vpop.f32.mrb[58].mxu0 }
0x273f   :  { %v5768_v12 = vadd.f32 %v12791_v9, %v16462_v50  ;;  %v5762_v13 = vpop.f32.mrb[59].mxu0 }
0x2740   :  { %v14248_v14 = vpack.c.bf16 %v5792_v6, %v5791_v7  ;;  %v5763_v20 = vadd.f32 %v5762_v13, %v16464_v63 }
0x2741   :  { %v5794_v15 = vmax.f32 %v5768_v12, 0.0 }
0x2742   :  { %v5793_v21 = vmax.f32 %v5763_v20, 0.0  ;;  %v12794_v22 = vpop.f32.mrb[60].mxu0  ;;  %14249 = vmatprep.subr.bf16.mxu1 %v14248_v14 }
0x2743   :  { %v5778_v23 = vadd.f32 %v12794_v22, %v16468_v16  ;;  %v5772_v24 = vpop.f32.mrb[61].mxu0  ;;  %14251 = vmatpush3.bf16.msra.mxu1 %v14248_v14 }
0x2744   :  { %v14252_v26 = vpack.c.bf16 %v5794_v15, %v5793_v21  ;;  %v5773_v28 = vadd.f32 %v5772_v24, %v16470_v17 }
0x2745   :  { %v5796_v3 = vmax.f32 %v5778_v23, 0.0 }
0x2746   :  { %v5795_v4 = vmax.f32 %v5773_v28, 0.0  ;;  %v12797_v1 = vpop.f32.mrb[62].mxu0  ;;  %14253 = vmatprep.subr.bf16.mxu1 %v14252_v26 }
0x2747   :  { %v5788_v11 = vadd.f32 %v12797_v1, %v16474_v18  ;;  %v5782_v30 = vpop.f32.mrb[63].mxu0  ;;  %14255 = vmatpush3.bf16.msra.mxu1 %v14252_v26 }
0x2748   :  { %v14256_v49 = vpack.c.bf16 %v5796_v3, %v5795_v4  ;;  %v5783_v55 = vadd.f32 %v5782_v30, %v16476_v27 }
0x2749   :  { %v5798_v2 = vmax.f32 %v5788_v11, 0.0 }
0x274a   :  { %v5797_v57 = vmax.f32 %v5783_v55, 0.0  ;;  %14257 = vmatprep.subr.bf16.mxu1 %v14256_v49 }
0x274b   :  { %14259 = vmatpush3.bf16.msra.mxu1 %v14256_v49 }
0x274c   :  { %v14260_v31 = vpack.c.bf16 %v5798_v2, %v5797_v57 }
0x274e   :  { %14261 = vmatprep.subr.bf16.mxu1 %v14260_v31 }
0x274f   :  { %14263 = vmatpush3.bf16.msra.mxu1 %v14260_v31 }
0x2752   :  { %12815 = vmatmul.mubr.msk.f32.vlgmr.msra.gmra.mrb[78].mxu1 %vm4870_vm4, %v16415_v42 }
0x2753   :  { %12817 = vmatprep.mubr.msk.f32.mxu1 %vm4870_vm4, %v16418_v19 }
0x2756   :  { %12818 = vmatmul.mubr.msk.f32.gmra.mrb[80].mxu1 %vm4870_vm4, %v16429_v48 }
0x2757   :  { %12820 = vmatprep.mubr.msk.f32.mxu1 %vm4870_vm4, %v16432_v36 }
0x275a   :  { %12821 = vmatmul.mubr.msk.f32.gmra.mrb[82].mxu1 %vm4870_vm4, %v16439_v37 }
0x275b   :  { %12823 = vmatprep.mubr.msk.f32.mxu1 %vm4870_vm4, %v16442_v32 }
0x275e   :  { %12824 = vmatmul.mubr.msk.f32.gmra.mrb[84].mxu1 %vm4870_vm4, %v16448_v45 }
0x275f   :  { %12870 = vmatprep.mubr.msk.f32.mxu1 %vm4870_vm4, %v16413_v25 }
0x2825   :  { %v12816_v33 = vpop.f32.mrb[78].mxu1 }
0x2826   :  { %v5871_v35 = vadd.f32 %v12816_v33, %v16456_v52  ;;  %v5865_v10 = vpop.f32.mrb[79].mxu1 }
0x2827   :  { %v5866_v38 = vadd.f32 %v5865_v10, %v16458_v54 }
0x2828   :  { %v5905_v39 = vmax.f32 %v5871_v35, 0.0 }
0x2829   :  { %v5904_v0 = vmax.f32 %v5866_v38, 0.0  ;;  %v12819_v40 = vpop.f32.mrb[80].mxu1 }
0x282a   :  { %v5881_v41 = vadd.f32 %v12819_v40, %v16462_v50  ;;  %v5875_v8 = vpop.f32.mrb[81].mxu1 }
0x282b   :  { %v14264_v43 = vpack.c.bf16 %v5905_v39, %v5904_v0  ;;  %v5876_v34 = vadd.f32 %v5875_v8, %v16464_v63 }
0x282c   :  { %v5907_v29 = vmax.f32 %v5881_v41, 0.0 }
0x282d   :  { %v5906_v44 = vmax.f32 %v5876_v34, 0.0  ;;  %v12822_v46 = vpop.f32.mrb[82].mxu1  ;;  %14265 = vmatprep.subr.bf16.mxu0 %v14264_v43 }
0x282e   :  { %v5891_v51 = vadd.f32 %v12822_v46, %v16468_v16  ;;  %v5885_v47 = vpop.f32.mrb[83].mxu1  ;;  %14267 = vmatpush3.bf16.msra.mxu0 %v14264_v43 }
0x282f   :  { %v14268_v53 = vpack.c.bf16 %v5907_v29, %v5906_v44  ;;  %v5886_v56 = vadd.f32 %v5885_v47, %v16470_v17 }
0x2830   :  { %v5909_v58 = vmax.f32 %v5891_v51, 0.0 }
0x2831   :  { %v5908_v59 = vmax.f32 %v5886_v56, 0.0  ;;  %v12825_v60 = vpop.f32.mrb[84].mxu1  ;;  %14269 = vmatprep.subr.bf16.mxu0 %v14268_v53 }
0x2832   :  { %v5901_v61 = vadd.f32 %v12825_v60, %v16474_v18  ;;  %v5895_v62 = vpop.f32.mrb[85].mxu1  ;;  %14271 = vmatpush3.bf16.msra.mxu0 %v14268_v53 }
0x2833   :  { %v14272_v5 = vpack.c.bf16 %v5909_v58, %v5908_v59  ;;  %v5896_v6 = vadd.f32 %v5895_v62, %v16476_v27 }
0x2834   :  { %v5911_v7 = vmax.f32 %v5901_v61, 0.0 }
0x2835   :  { %v5910_v9 = vmax.f32 %v5896_v6, 0.0  ;;  %14273 = vmatprep.subr.bf16.mxu0 %v14272_v5 }
0x2836   :  { %14275 = vmatpush3.bf16.msra.mxu0 %v14272_v5 }
0x2837   :  { %v14276_v12 = vpack.c.bf16 %v5911_v7, %v5910_v9 }
0x2839   :  { %14277 = vmatprep.subr.bf16.mxu0 %v14276_v12 }
0x283a   :  { %14279 = vmatpush3.bf16.msra.mxu0 %v14276_v12 }
0x283d   :  { %12843 = vmatmul.mubr.msk.f32.vlgmr.msra.gmra.mrb[64].mxu0 %vm4870_vm4, %v16415_v42 }
0x283e   :  { %12845 = vmatprep.mubr.msk.f32.mxu0 %vm4870_vm4, %v16418_v19 }
0x2841   :  { %12846 = vmatmul.mubr.msk.f32.gmra.mrb[66].mxu0 %vm4870_vm4, %v16429_v48 }
0x2842   :  { %12848 = vmatprep.mubr.msk.f32.mxu0 %vm4870_vm4, %v16432_v36 }
0x2845   :  { %12849 = vmatmul.mubr.msk.f32.gmra.mrb[68].mxu0 %vm4870_vm4, %v16439_v37 }
0x2846   :  { %12851 = vmatprep.mubr.msk.f32.mxu0 %vm4870_vm4, %v16442_v32 }
0x2849   :  { %12852 = vmatmul.mubr.msk.f32.gmra.mrb[70].mxu0 %vm4870_vm4, %v16448_v45 }
0x284a   :  { %12898 = vmatprep.mubr.msk.f32.mxu0 %vm4870_vm4, %v16413_v25 }
0x2910   :  { %v12844_v13 = vpop.f32.mrb[64].mxu0 }
0x2911   :  { %v5984_v14 = vadd.f32 %v12844_v13, %v16456_v52  ;;  %v5978_v20 = vpop.f32.mrb[65].mxu0 }
0x2912   :  { %v5979_v15 = vadd.f32 %v5978_v20, %v16458_v54 }
0x2913   :  { %v6018_v21 = vmax.f32 %v5984_v14, 0.0 }
0x2914   :  { %v6017_v22 = vmax.f32 %v5979_v15, 0.0  ;;  %v12847_v23 = vpop.f32.mrb[66].mxu0 }
0x2915   :  { %v5994_v24 = vadd.f32 %v12847_v23, %v16462_v50  ;;  %v5988_v26 = vpop.f32.mrb[67].mxu0 }
0x2916   :  { %v14280_v28 = vpack.c.bf16 %v6018_v21, %v6017_v22  ;;  %v5989_v3 = vadd.f32 %v5988_v26, %v16464_v63 }
0x2917   :  { %v6020_v4 = vmax.f32 %v5994_v24, 0.0 }
0x2918   :  { %v6019_v1 = vmax.f32 %v5989_v3, 0.0  ;;  %v12850_v11 = vpop.f32.mrb[68].mxu0  ;;  %14281 = vmatprep.subr.bf16.mxu1 %v14280_v28 }
0x2919   :  { %v6004_v30 = vadd.f32 %v12850_v11, %v16468_v16  ;;  %v5998_v49 = vpop.f32.mrb[69].mxu0  ;;  %14283 = vmatpush3.bf16.msra.mxu1 %v14280_v28 }
0x291a   :  { %v14284_v55 = vpack.c.bf16 %v6020_v4, %v6019_v1  ;;  %v5999_v2 = vadd.f32 %v5998_v49, %v16470_v17 }
0x291b   :  { %v6022_v57 = vmax.f32 %v6004_v30, 0.0 }
0x291c   :  { %v6021_v31 = vmax.f32 %v5999_v2, 0.0  ;;  %v12853_v33 = vpop.f32.mrb[70].mxu0  ;;  %14285 = vmatprep.subr.bf16.mxu1 %v14284_v55 }
0x291d   :  { %v6014_v35 = vadd.f32 %v12853_v33, %v16474_v18  ;;  %v6008_v10 = vpop.f32.mrb[71].mxu0  ;;  %14287 = vmatpush3.bf16.msra.mxu1 %v14284_v55 }
0x291e   :  { %v14288_v38 = vpack.c.bf16 %v6022_v57, %v6021_v31  ;;  %v6009_v39 = vadd.f32 %v6008_v10, %v16476_v27 }
0x291f   :  { %v6024_v0 = vmax.f32 %v6014_v35, 0.0 }
0x2920   :  { %v6023_v40 = vmax.f32 %v6009_v39, 0.0  ;;  %14289 = vmatprep.subr.bf16.mxu1 %v14288_v38 }
0x2921   :  { %14291 = vmatpush3.bf16.msra.mxu1 %v14288_v38 }
0x2922   :  { %v14292_v41 = vpack.c.bf16 %v6024_v0, %v6023_v40 }
0x2924   :  { %14293 = vmatprep.subr.bf16.mxu1 %v14292_v41 }
0x2925   :  { %14295 = vmatpush3.bf16.msra.mxu1 %v14292_v41 }
0x2928   :  { %12871 = vmatmul.mubr.msk.f32.vlgmr.msra.gmra.mrb[86].mxu1 %vm4870_vm4, %v16415_v42 }
0x2929   :  { %12873 = vmatprep.mubr.msk.f32.mxu1 %vm4870_vm4, %v16418_v19 }
0x292c   :  { %12874 = vmatmul.mubr.msk.f32.gmra.mrb[88].mxu1 %vm4870_vm4, %v16429_v48 }
0x292d   :  { %12876 = vmatprep.mubr.msk.f32.mxu1 %vm4870_vm4, %v16432_v36 }
0x2930   :  { %12877 = vmatmul.mubr.msk.f32.gmra.mrb[90].mxu1 %vm4870_vm4, %v16439_v37 }
0x2931   :  { %12879 = vmatprep.mubr.msk.f32.mxu1 %vm4870_vm4, %v16442_v32 }
0x2934   :  { %12880 = vmatmul.mubr.msk.f32.gmra.mrb[92].mxu1 %vm4870_vm4, %v16448_v45 }
0x2935   :  { %12926 = vmatprep.mubr.msk.f32.mxu1 %vm4870_vm4, %v16413_v25 }
0x29fb   :  { %v12872_v8 = vpop.f32.mrb[86].mxu1 }
0x29fc   :  { %v6097_v43 = vadd.f32 %v12872_v8, %v16456_v52  ;;  %v6091_v34 = vpop.f32.mrb[87].mxu1 }
0x29fd   :  { %v6092_v29 = vadd.f32 %v6091_v34, %v16458_v54 }
0x29fe   :  { %v6131_v44 = vmax.f32 %v6097_v43, 0.0 }
0x29ff   :  { %v6130_v46 = vmax.f32 %v6092_v29, 0.0  ;;  %v12875_v51 = vpop.f32.mrb[88].mxu1 }
0x2a00   :  { %v6107_v47 = vadd.f32 %v12875_v51, %v16462_v50  ;;  %v6101_v53 = vpop.f32.mrb[89].mxu1 }
0x2a01   :  { %v14296_v56 = vpack.c.bf16 %v6131_v44, %v6130_v46  ;;  %v6102_v58 = vadd.f32 %v6101_v53, %v16464_v63  ;;  %v16763_v44 = vld [vmem:[#allocation2] sm:$0xff] }
0x2a02   :  { %v6133_v59 = vmax.f32 %v6107_v47, 0.0 }
0x2a03   :  { %v6132_v60 = vmax.f32 %v6102_v58, 0.0  ;;  %v12878_v61 = vpop.f32.mrb[90].mxu1  ;;  %14297 = vmatprep.subr.bf16.mxu0 %v14296_v56 }
0x2a04   :  { %v6117_v62 = vadd.f32 %v12878_v61, %v16468_v16  ;;  %v6111_v5 = vpop.f32.mrb[91].mxu1  ;;  %14299 = vmatpush3.bf16.msra.mxu0 %v14296_v56  ;;  %v16766_v56 = vld [vmem:[#allocation2 + $0x18] sm:$0xff]  ;;  %v16769_v61 = vld [vmem:[#allocation2 + $0x10] sm:$0xff] }
0x2a05   :  { %v14300_v6 = vpack.c.bf16 %v6133_v59, %v6132_v60  ;;  %v6112_v7 = vadd.f32 %v6111_v5, %v16470_v17 }
0x2a06   :  { %v6135_v9 = vmax.f32 %v6117_v62, 0.0 }
0x2a07   :  { %v6134_v12 = vmax.f32 %v6112_v7, 0.0  ;;  %v12881_v13 = vpop.f32.mrb[92].mxu1  ;;  %14301 = vmatprep.subr.bf16.mxu0 %v14300_v6 }
0x2a08   :  { %v6127_v14 = vadd.f32 %v12881_v13, %v16474_v18  ;;  %v6121_v20 = vpop.f32.mrb[93].mxu1  ;;  %14303 = vmatpush3.bf16.msra.mxu0 %v14300_v6 }
0x2a09   :  { %v14304_v15 = vpack.c.bf16 %v6135_v9, %v6134_v12  ;;  %v6122_v21 = vadd.f32 %v6121_v20, %v16476_v27  ;;  %v16772_v9 = vld [vmem:[#allocation2 + $0x28] sm:$0xff]  ;;  %v16775_v20 = vld [vmem:[#allocation2 + $0x20] sm:$0xff] }
0x2a0a   :  { %v6137_v22 = vmax.f32 %v6127_v14, 0.0 }
0x2a0b   :  { %v6136_v23 = vmax.f32 %v6122_v21, 0.0  ;;  %14305 = vmatprep.subr.bf16.mxu0 %v14304_v15 }
0x2a0c   :  { %14307 = vmatpush3.bf16.msra.mxu0 %v14304_v15 }
0x2a0d   :  { %v14308_v24 = vpack.c.bf16 %v6137_v22, %v6136_v23 }
0x2a0f   :  { %14309 = vmatprep.subr.bf16.mxu0 %v14308_v24 }
0x2a10   :  { %14311 = vmatpush3.bf16.msra.mxu0 %v14308_v24  ;;  %v16778_v24 = vld [vmem:[#allocation2 + $0x38] sm:$0xff] }
0x2a13   :  { %12899 = vmatmul.mubr.msk.f32.vlgmr.msra.gmra.mrb[72].mxu0 %vm4870_vm4, %v16415_v42 }
0x2a14   :  { %12901 = vmatprep.mubr.msk.f32.mxu0 %vm4870_vm4, %v16418_v19 }
0x2a17   :  { %12902 = vmatmul.mubr.msk.f32.gmra.mrb[74].mxu0 %vm4870_vm4, %v16429_v48 }
0x2a18   :  { %12904 = vmatprep.mubr.msk.f32.mxu0 %vm4870_vm4, %v16432_v36 }
0x2a1b   :  { %12905 = vmatmul.mubr.msk.f32.gmra.mrb[76].mxu0 %vm4870_vm4, %v16439_v37 }
0x2a1c   :  { %12907 = vmatprep.mubr.msk.f32.mxu0 %vm4870_vm4, %v16442_v32 }
0x2a1f   :  { %12908 = vmatmul.mubr.msk.f32.gmra.mrb[78].mxu0 %vm4870_vm4, %v16448_v45 }
0x2a20   :  { %12954 = vmatprep.mubr.msk.f32.mxu0 %vm4870_vm4, %v16413_v25 }
0x2ae6   :  { %v12900_v26 = vpop.f32.mrb[72].mxu0 }
0x2ae7   :  { %v6210_v28 = vadd.f32 %v12900_v26, %v16456_v52  ;;  %v6204_v3 = vpop.f32.mrb[73].mxu0 }
0x2ae8   :  { %v6205_v4 = vadd.f32 %v6204_v3, %v16458_v54 }
0x2ae9   :  { %v6244_v1 = vmax.f32 %v6210_v28, 0.0 }
0x2aea   :  { %v6243_v11 = vmax.f32 %v6205_v4, 0.0  ;;  %v12903_v30 = vpop.f32.mrb[74].mxu0  ;;  %v16781_v4 = vld [vmem:[#allocation2 + $0x30] sm:$0xff] }
0x2aeb   :  { %v6220_v49 = vadd.f32 %v12903_v30, %v16462_v50  ;;  %v6214_v55 = vpop.f32.mrb[75].mxu0 }
0x2aec   :  { %v14312_v2 = vpack.c.bf16 %v6244_v1, %v6243_v11  ;;  %v6215_v57 = vadd.f32 %v6214_v55, %v16464_v63 }
0x2aed   :  { %v6246_v31 = vmax.f32 %v6220_v49, 0.0 }
0x2aee   :  { %v6245_v33 = vmax.f32 %v6215_v57, 0.0  ;;  %v12906_v35 = vpop.f32.mrb[76].mxu0  ;;  %14313 = vmatprep.subr.bf16.mxu1 %v14312_v2 }
0x2aef   :  { %v6230_v10 = vadd.f32 %v12906_v35, %v16468_v16  ;;  %v6224_v38 = vpop.f32.mrb[77].mxu0  ;;  %14315 = vmatpush3.bf16.msra.mxu1 %v14312_v2 }
0x2af0   :  { %v14316_v52 = vpack.c.bf16 %v6246_v31, %v6245_v33  ;;  %v6225_v54 = vadd.f32 %v6224_v38, %v16470_v17 }
0x2af1   :  { %v6248_v39 = vmax.f32 %v6230_v10, 0.0 }
0x2af2   :  { %v6247_v0 = vmax.f32 %v6225_v54, 0.0  ;;  %v12909_v40 = vpop.f32.mrb[78].mxu0  ;;  %14317 = vmatprep.subr.bf16.mxu1 %v14316_v52 }
0x2af3   :  { %v6240_v50 = vadd.f32 %v12909_v40, %v16474_v18  ;;  %v6234_v41 = vpop.f32.mrb[79].mxu0  ;;  %14319 = vmatpush3.bf16.msra.mxu1 %v14316_v52  ;;  %v16760_v18 = vld [vmem:[#allocation2 + $0x8] sm:$0xff] }
0x2af4   :  { %v14320_v63 = vpack.c.bf16 %v6248_v39, %v6247_v0  ;;  %v6235_v8 = vadd.f32 %v6234_v41, %v16476_v27 }
0x2af5   :  { %v6250_v43 = vmax.f32 %v6240_v50, 0.0 }
0x2af6   :  { %v6249_v34 = vmax.f32 %v6235_v8, 0.0  ;;  %14321 = vmatprep.subr.bf16.mxu1 %v14320_v63 }
0x2af7   :  { %14323 = vmatpush3.bf16.msra.mxu1 %v14320_v63 }
0x2af8   :  { %v14324_v16 = vpack.c.bf16 %v6250_v43, %v6249_v34 }
0x2afa   :  { %14325 = vmatprep.subr.bf16.mxu1 %v14324_v16 }
0x2afb   :  { %14327 = vmatpush3.bf16.msra.mxu1 %v14324_v16 }
0x2afe   :  { %12927 = vmatmul.mubr.msk.f32.vlgmr.msra.gmra.mrb[94].mxu1 %vm4870_vm4, %v16415_v42 }
0x2aff   :  { %12929 = vmatprep.mubr.msk.f32.mxu1 %vm4870_vm4, %v16418_v19 }
0x2b02   :  { %12930 = vmatmul.mubr.msk.f32.gmra.mrb[96].mxu1 %vm4870_vm4, %v16429_v48 }
0x2b03   :  { %12932 = vmatprep.mubr.msk.f32.mxu1 %vm4870_vm4, %v16432_v36 }
0x2b06   :  { %12933 = vmatmul.mubr.msk.f32.gmra.mrb[98].mxu1 %vm4870_vm4, %v16439_v37 }
0x2b07   :  { %12935 = vmatprep.mubr.msk.f32.mxu1 %vm4870_vm4, %v16442_v32 }
0x2b0a   :  { %12936 = vmatmul.mubr.msk.f32.gmra.mrb[100].mxu1 %vm4870_vm4, %v16448_v45 }
0x2b0b   :  { %12982 = vmatprep.mubr.msk.f32.mxu1 %vm4870_vm4, %v16413_v25 }
0x2bd1   :  { %v12928_v17 = vpop.f32.mrb[94].mxu1 }
0x2bd2   :  { %v6323_v27 = vadd.f32 %v16760_v18, %v12928_v17  ;;  %v6317_v29 = vpop.f32.mrb[95].mxu1 }
0x2bd3   :  { %v6318_v46 = vadd.f32 %v16763_v44, %v6317_v29 }
0x2bd4   :  { %v6357_v51 = vmax.f32 %v6323_v27, 0.0 }
0x2bd5   :  { %v6356_v47 = vmax.f32 %v6318_v46, 0.0  ;;  %v12931_v53 = vpop.f32.mrb[96].mxu1 }
0x2bd6   :  { %v6333_v58 = vadd.f32 %v16766_v56, %v12931_v53  ;;  %v6327_v59 = vpop.f32.mrb[97].mxu1 }
0x2bd7   :  { %v14328_v60 = vpack.c.bf16 %v6357_v51, %v6356_v47  ;;  %v6328_v62 = vadd.f32 %v16769_v61, %v6327_v59 }
0x2bd8   :  { %v6359_v5 = vmax.f32 %v6333_v58, 0.0 }
0x2bd9   :  { %v6358_v6 = vmax.f32 %v6328_v62, 0.0  ;;  %v12934_v7 = vpop.f32.mrb[98].mxu1  ;;  %14329 = vmatprep.subr.bf16.mxu0 %v14328_v60 }
0x2bda   :  { %v6343_v12 = vadd.f32 %v16772_v9, %v12934_v7  ;;  %v6337_v13 = vpop.f32.mrb[99].mxu1  ;;  %14331 = vmatpush3.bf16.msra.mxu0 %v14328_v60 }
0x2bdb   :  { %v14332_v14 = vpack.c.bf16 %v6359_v5, %v6358_v6  ;;  %v6338_v15 = vadd.f32 %v16775_v20, %v6337_v13 }
0x2bdc   :  { %v6361_v21 = vmax.f32 %v6343_v12, 0.0 }
0x2bdd   :  { %v6360_v22 = vmax.f32 %v6338_v15, 0.0  ;;  %v12937_v23 = vpop.f32.mrb[100].mxu1  ;;  %14333 = vmatprep.subr.bf16.mxu0 %v14332_v14 }
0x2bde   :  { %v6353_v26 = vadd.f32 %v16778_v24, %v12937_v23  ;;  %v6347_v28 = vpop.f32.mrb[101].mxu1  ;;  %14335 = vmatpush3.bf16.msra.mxu0 %v14332_v14 }
0x2bdf   :  { %v14336_v3 = vpack.c.bf16 %v6361_v21, %v6360_v22  ;;  %v6348_v1 = vadd.f32 %v16781_v4, %v6347_v28 }
0x2be0   :  { %v6363_v11 = vmax.f32 %v6353_v26, 0.0 }
0x2be1   :  { %v6362_v30 = vmax.f32 %v6348_v1, 0.0  ;;  %14337 = vmatprep.subr.bf16.mxu0 %v14336_v3 }
0x2be2   :  { %14339 = vmatpush3.bf16.msra.mxu0 %v14336_v3 }
0x2be3   :  { %v14340_v49 = vpack.c.bf16 %v6363_v11, %v6362_v30 }
0x2be5   :  { %14341 = vmatprep.subr.bf16.mxu0 %v14340_v49 }
0x2be6   :  { %14343 = vmatpush3.bf16.msra.mxu0 %v14340_v49 }
0x2be9   :  { %12955 = vmatmul.mubr.msk.f32.vlgmr.msra.gmra.mrb[80].mxu0 %vm4870_vm4, %v16415_v42 }
0x2bea   :  { %12957 = vmatprep.mubr.msk.f32.mxu0 %vm4870_vm4, %v16418_v19 }
0x2bed   :  { %12958 = vmatmul.mubr.msk.f32.gmra.mrb[82].mxu0 %vm4870_vm4, %v16429_v48 }
0x2bee   :  { %12960 = vmatprep.mubr.msk.f32.mxu0 %vm4870_vm4, %v16432_v36 }
0x2bf1   :  { %12961 = vmatmul.mubr.msk.f32.gmra.mrb[84].mxu0 %vm4870_vm4, %v16439_v37 }
0x2bf2   :  { %12963 = vmatprep.mubr.msk.f32.mxu0 %vm4870_vm4, %v16442_v32 }
0x2bf5   :  { %12964 = vmatmul.mubr.msk.f32.gmra.mrb[86].mxu0 %vm4870_vm4, %v16448_v45 }
0x2bf6   :  { %13010 = vmatprep.mubr.msk.f32.mxu0 %vm4870_vm4, %v16413_v25 }
0x2cbc   :  { %v12956_v55 = vpop.f32.mrb[80].mxu0 }
0x2cbd   :  { %v6436_v2 = vadd.f32 %v16760_v18, %v12956_v55  ;;  %v6430_v57 = vpop.f32.mrb[81].mxu0 }
0x2cbe   :  { %v6431_v31 = vadd.f32 %v16763_v44, %v6430_v57 }
0x2cbf   :  { %v6470_v33 = vmax.f32 %v6436_v2, 0.0 }
0x2cc0   :  { %v6469_v35 = vmax.f32 %v6431_v31, 0.0  ;;  %v12959_v10 = vpop.f32.mrb[82].mxu0 }
0x2cc1   :  { %v6446_v38 = vadd.f32 %v16766_v56, %v12959_v10  ;;  %v6440_v52 = vpop.f32.mrb[83].mxu0 }
0x2cc2   :  { %v14344_v54 = vpack.c.bf16 %v6470_v33, %v6469_v35  ;;  %v6441_v39 = vadd.f32 %v16769_v61, %v6440_v52 }
0x2cc3   :  { %v6472_v0 = vmax.f32 %v6446_v38, 0.0 }
0x2cc4   :  { %v6471_v40 = vmax.f32 %v6441_v39, 0.0  ;;  %v12962_v50 = vpop.f32.mrb[84].mxu0  ;;  %14345 = vmatprep.subr.bf16.mxu1 %v14344_v54 }
0x2cc5   :  { %v6456_v41 = vadd.f32 %v16772_v9, %v12962_v50  ;;  %v6450_v63 = vpop.f32.mrb[85].mxu0  ;;  %14347 = vmatpush3.bf16.msra.mxu1 %v14344_v54 }
0x2cc6   :  { %v14348_v8 = vpack.c.bf16 %v6472_v0, %v6471_v40  ;;  %v6451_v43 = vadd.f32 %v16775_v20, %v6450_v63 }
0x2cc7   :  { %v6474_v34 = vmax.f32 %v6456_v41, 0.0 }
0x2cc8   :  { %v6473_v16 = vmax.f32 %v6451_v43, 0.0  ;;  %v12965_v17 = vpop.f32.mrb[86].mxu0  ;;  %14349 = vmatprep.subr.bf16.mxu1 %v14348_v8 }
0x2cc9   :  { %v6466_v27 = vadd.f32 %v16778_v24, %v12965_v17  ;;  %v6460_v29 = vpop.f32.mrb[87].mxu0  ;;  %14351 = vmatpush3.bf16.msra.mxu1 %v14348_v8 }
0x2cca   :  { %v14352_v46 = vpack.c.bf16 %v6474_v34, %v6473_v16  ;;  %v6461_v51 = vadd.f32 %v16781_v4, %v6460_v29 }
0x2ccb   :  { %v6476_v47 = vmax.f32 %v6466_v27, 0.0 }
0x2ccc   :  { %v6475_v53 = vmax.f32 %v6461_v51, 0.0  ;;  %14353 = vmatprep.subr.bf16.mxu1 %v14352_v46 }
0x2ccd   :  { %14355 = vmatpush3.bf16.msra.mxu1 %v14352_v46 }
0x2cce   :  { %v14356_v58 = vpack.c.bf16 %v6476_v47, %v6475_v53 }
0x2cd0   :  { %14357 = vmatprep.subr.bf16.mxu1 %v14356_v58 }
0x2cd1   :  { %14359 = vmatpush3.bf16.msra.mxu1 %v14356_v58 }
0x2cd4   :  { %12983 = vmatmul.mubr.msk.f32.vlgmr.msra.gmra.mrb[102].mxu1 %vm4870_vm4, %v16415_v42 }
0x2cd5   :  { %12985 = vmatprep.mubr.msk.f32.mxu1 %vm4870_vm4, %v16418_v19 }
0x2cd8   :  { %12986 = vmatmul.mubr.msk.f32.gmra.mrb[104].mxu1 %vm4870_vm4, %v16429_v48 }
0x2cd9   :  { %12988 = vmatprep.mubr.msk.f32.mxu1 %vm4870_vm4, %v16432_v36 }
0x2cdc   :  { %12989 = vmatmul.mubr.msk.f32.gmra.mrb[106].mxu1 %vm4870_vm4, %v16439_v37 }
0x2cdd   :  { %12991 = vmatprep.mubr.msk.f32.mxu1 %vm4870_vm4, %v16442_v32 }
0x2ce0   :  { %12992 = vmatmul.mubr.msk.f32.gmra.mrb[108].mxu1 %vm4870_vm4, %v16448_v45 }
0x2ce1   :  { %13038 = vmatprep.mubr.msk.f32.mxu1 %vm4870_vm4, %v16413_v25 }
0x2da7   :  { %v12984_v59 = vpop.f32.mrb[102].mxu1 }
0x2da8   :  { %v6549_v60 = vadd.f32 %v16760_v18, %v12984_v59  ;;  %v6543_v62 = vpop.f32.mrb[103].mxu1 }
0x2da9   :  { %v6544_v5 = vadd.f32 %v16763_v44, %v6543_v62 }
0x2daa   :  { %v6583_v6 = vmax.f32 %v6549_v60, 0.0 }
0x2dab   :  { %v6582_v7 = vmax.f32 %v6544_v5, 0.0  ;;  %v12987_v12 = vpop.f32.mrb[104].mxu1 }
0x2dac   :  { %v6559_v13 = vadd.f32 %v16766_v56, %v12987_v12  ;;  %v6553_v14 = vpop.f32.mrb[105].mxu1 }
0x2dad   :  { %v14360_v15 = vpack.c.bf16 %v6583_v6, %v6582_v7  ;;  %v6554_v21 = vadd.f32 %v16769_v61, %v6553_v14 }
0x2dae   :  { %v6585_v22 = vmax.f32 %v6559_v13, 0.0 }
0x2daf   :  { %v6584_v23 = vmax.f32 %v6554_v21, 0.0  ;;  %v12990_v26 = vpop.f32.mrb[106].mxu1  ;;  %14361 = vmatprep.subr.bf16.mxu0 %v14360_v15 }
0x2db0   :  { %v6569_v28 = vadd.f32 %v16772_v9, %v12990_v26  ;;  %v6563_v3 = vpop.f32.mrb[107].mxu1  ;;  %14363 = vmatpush3.bf16.msra.mxu0 %v14360_v15 }
0x2db1   :  { %v14364_v1 = vpack.c.bf16 %v6585_v22, %v6584_v23  ;;  %v6564_v11 = vadd.f32 %v16775_v20, %v6563_v3 }
0x2db2   :  { %v6587_v30 = vmax.f32 %v6569_v28, 0.0 }
0x2db3   :  { %v6586_v49 = vmax.f32 %v6564_v11, 0.0  ;;  %v12993_v55 = vpop.f32.mrb[108].mxu1  ;;  %14365 = vmatprep.subr.bf16.mxu0 %v14364_v1 }
0x2db4   :  { %v6579_v2 = vadd.f32 %v16778_v24, %v12993_v55  ;;  %v6573_v57 = vpop.f32.mrb[109].mxu1  ;;  %14367 = vmatpush3.bf16.msra.mxu0 %v14364_v1 }
0x2db5   :  { %v14368_v31 = vpack.c.bf16 %v6587_v30, %v6586_v49  ;;  %v6574_v33 = vadd.f32 %v16781_v4, %v6573_v57 }
0x2db6   :  { %v6589_v35 = vmax.f32 %v6579_v2, 0.0 }
0x2db7   :  { %v6588_v10 = vmax.f32 %v6574_v33, 0.0  ;;  %14369 = vmatprep.subr.bf16.mxu0 %v14368_v31 }
0x2db8   :  { %14371 = vmatpush3.bf16.msra.mxu0 %v14368_v31 }
0x2db9   :  { %v14372_v38 = vpack.c.bf16 %v6589_v35, %v6588_v10 }
0x2dbb   :  { %14373 = vmatprep.subr.bf16.mxu0 %v14372_v38 }
0x2dbc   :  { %14375 = vmatpush3.bf16.msra.mxu0 %v14372_v38 }
0x2dbf   :  { %13011 = vmatmul.mubr.msk.f32.vlgmr.msra.gmra.mrb[88].mxu0 %vm4870_vm4, %v16415_v42 }
0x2dc0   :  { %13013 = vmatprep.mubr.msk.f32.mxu0 %vm4870_vm4, %v16418_v19 }
0x2dc3   :  { %13014 = vmatmul.mubr.msk.f32.gmra.mrb[90].mxu0 %vm4870_vm4, %v16429_v48 }
0x2dc4   :  { %13016 = vmatprep.mubr.msk.f32.mxu0 %vm4870_vm4, %v16432_v36 }
0x2dc7   :  { %13017 = vmatmul.mubr.msk.f32.gmra.mrb[92].mxu0 %vm4870_vm4, %v16439_v37 }
0x2dc8   :  { %13019 = vmatprep.mubr.msk.f32.mxu0 %vm4870_vm4, %v16442_v32 }
0x2dcb   :  { %13020 = vmatmul.mubr.msk.f32.gmra.mrb[94].mxu0 %vm4870_vm4, %v16448_v45 }
0x2dcc   :  { %13066 = vmatprep.mubr.msk.f32.mxu0 %vm4870_vm4, %v16413_v25 }
0x2e92   :  { %v13012_v52 = vpop.f32.mrb[88].mxu0 }
0x2e93   :  { %v6662_v54 = vadd.f32 %v16760_v18, %v13012_v52  ;;  %v6656_v39 = vpop.f32.mrb[89].mxu0 }
0x2e94   :  { %v6657_v0 = vadd.f32 %v16763_v44, %v6656_v39 }
0x2e95   :  { %v6696_v40 = vmax.f32 %v6662_v54, 0.0 }
0x2e96   :  { %v6695_v50 = vmax.f32 %v6657_v0, 0.0  ;;  %v13015_v41 = vpop.f32.mrb[90].mxu0 }
0x2e97   :  { %v6672_v63 = vadd.f32 %v16766_v56, %v13015_v41  ;;  %v6666_v8 = vpop.f32.mrb[91].mxu0 }
0x2e98   :  { %v14376_v43 = vpack.c.bf16 %v6696_v40, %v6695_v50  ;;  %v6667_v34 = vadd.f32 %v16769_v61, %v6666_v8 }
0x2e99   :  { %v6698_v16 = vmax.f32 %v6672_v63, 0.0 }
0x2e9a   :  { %v6697_v17 = vmax.f32 %v6667_v34, 0.0  ;;  %v13018_v27 = vpop.f32.mrb[92].mxu0  ;;  %14377 = vmatprep.subr.bf16.mxu1 %v14376_v43 }
0x2e9b   :  { %v6682_v29 = vadd.f32 %v16772_v9, %v13018_v27  ;;  %v6676_v46 = vpop.f32.mrb[93].mxu0  ;;  %14379 = vmatpush3.bf16.msra.mxu1 %v14376_v43 }
0x2e9c   :  { %v14380_v51 = vpack.c.bf16 %v6698_v16, %v6697_v17  ;;  %v6677_v47 = vadd.f32 %v16775_v20, %v6676_v46 }
0x2e9d   :  { %v6700_v53 = vmax.f32 %v6682_v29, 0.0 }
0x2e9e   :  { %v6699_v58 = vmax.f32 %v6677_v47, 0.0  ;;  %v13021_v59 = vpop.f32.mrb[94].mxu0  ;;  %14381 = vmatprep.subr.bf16.mxu1 %v14380_v51 }
0x2e9f   :  { %v6692_v60 = vadd.f32 %v16778_v24, %v13021_v59  ;;  %v6686_v62 = vpop.f32.mrb[95].mxu0  ;;  %14383 = vmatpush3.bf16.msra.mxu1 %v14380_v51 }
0x2ea0   :  { %v14384_v5 = vpack.c.bf16 %v6700_v53, %v6699_v58  ;;  %v6687_v6 = vadd.f32 %v16781_v4, %v6686_v62 }
0x2ea1   :  { %v6702_v7 = vmax.f32 %v6692_v60, 0.0 }
0x2ea2   :  { %v6701_v12 = vmax.f32 %v6687_v6, 0.0  ;;  %14385 = vmatprep.subr.bf16.mxu1 %v14384_v5 }
0x2ea3   :  { %14387 = vmatpush3.bf16.msra.mxu1 %v14384_v5 }
0x2ea4   :  { %v14388_v13 = vpack.c.bf16 %v6702_v7, %v6701_v12 }
0x2ea6   :  { %14389 = vmatprep.subr.bf16.mxu1 %v14388_v13 }
0x2ea7   :  { %14391 = vmatpush3.bf16.msra.mxu1 %v14388_v13 }
0x2eaa   :  { %13039 = vmatmul.mubr.msk.f32.vlgmr.msra.gmra.mrb[110].mxu1 %vm4870_vm4, %v16415_v42 }
0x2eab   :  { %13041 = vmatprep.mubr.msk.f32.mxu1 %vm4870_vm4, %v16418_v19 }
0x2eae   :  { %13042 = vmatmul.mubr.msk.f32.gmra.mrb[112].mxu1 %vm4870_vm4, %v16429_v48 }
0x2eaf   :  { %13044 = vmatprep.mubr.msk.f32.mxu1 %vm4870_vm4, %v16432_v36 }
0x2eb2   :  { %13045 = vmatmul.mubr.msk.f32.gmra.mrb[114].mxu1 %vm4870_vm4, %v16439_v37 }
0x2eb3   :  { %13047 = vmatprep.mubr.msk.f32.mxu1 %vm4870_vm4, %v16442_v32 }
0x2eb6   :  { %13048 = vmatmul.mubr.msk.f32.gmra.mrb[116].mxu1 %vm4870_vm4, %v16448_v45 }
0x2eb7   :  { %13094 = vmatprep.mubr.msk.f32.mxu1 %vm4870_vm4, %v16413_v25 }
0x2f7d   :  { %v13040_v14 = vpop.f32.mrb[110].mxu1 }
0x2f7e   :  { %v6775_v15 = vadd.f32 %v16760_v18, %v13040_v14  ;;  %v6769_v21 = vpop.f32.mrb[111].mxu1 }
0x2f7f   :  { %v6770_v22 = vadd.f32 %v16763_v44, %v6769_v21 }
0x2f80   :  { %v6809_v23 = vmax.f32 %v6775_v15, 0.0 }
0x2f81   :  { %v6808_v26 = vmax.f32 %v6770_v22, 0.0  ;;  %v13043_v28 = vpop.f32.mrb[112].mxu1 }
0x2f82   :  { %v6785_v3 = vadd.f32 %v16766_v56, %v13043_v28  ;;  %v6779_v1 = vpop.f32.mrb[113].mxu1 }
0x2f83   :  { %v14392_v11 = vpack.c.bf16 %v6809_v23, %v6808_v26  ;;  %v6780_v30 = vadd.f32 %v16769_v61, %v6779_v1 }
0x2f84   :  { %v6811_v49 = vmax.f32 %v6785_v3, 0.0 }
0x2f85   :  { %v6810_v55 = vmax.f32 %v6780_v30, 0.0  ;;  %v13046_v2 = vpop.f32.mrb[114].mxu1  ;;  %14393 = vmatprep.subr.bf16.mxu0 %v14392_v11 }
0x2f86   :  { %v6795_v57 = vadd.f32 %v16772_v9, %v13046_v2  ;;  %v6789_v31 = vpop.f32.mrb[115].mxu1  ;;  %14395 = vmatpush3.bf16.msra.mxu0 %v14392_v11 }
0x2f87   :  { %v14396_v33 = vpack.c.bf16 %v6811_v49, %v6810_v55  ;;  %v6790_v35 = vadd.f32 %v16775_v20, %v6789_v31 }
0x2f88   :  { %v6813_v10 = vmax.f32 %v6795_v57, 0.0 }
0x2f89   :  { %v6812_v38 = vmax.f32 %v6790_v35, 0.0  ;;  %v13049_v52 = vpop.f32.mrb[116].mxu1  ;;  %14397 = vmatprep.subr.bf16.mxu0 %v14396_v33 }
0x2f8a   :  { %v6805_v54 = vadd.f32 %v16778_v24, %v13049_v52  ;;  %v6799_v39 = vpop.f32.mrb[117].mxu1  ;;  %14399 = vmatpush3.bf16.msra.mxu0 %v14396_v33 }
0x2f8b   :  { %v14400_v0 = vpack.c.bf16 %v6813_v10, %v6812_v38  ;;  %v6800_v40 = vadd.f32 %v16781_v4, %v6799_v39 }
0x2f8c   :  { %v6815_v50 = vmax.f32 %v6805_v54, 0.0 }
0x2f8d   :  { %v6814_v41 = vmax.f32 %v6800_v40, 0.0  ;;  %14401 = vmatprep.subr.bf16.mxu0 %v14400_v0 }
0x2f8e   :  { %14403 = vmatpush3.bf16.msra.mxu0 %v14400_v0 }
0x2f8f   :  { %v14404_v63 = vpack.c.bf16 %v6815_v50, %v6814_v41 }
0x2f91   :  { %14405 = vmatprep.subr.bf16.mxu0 %v14404_v63 }
0x2f92   :  { %14407 = vmatpush3.bf16.msra.mxu0 %v14404_v63 }
0x2f95   :  { %13067 = vmatmul.mubr.msk.f32.vlgmr.msra.gmra.mrb[96].mxu0 %vm4870_vm4, %v16415_v42 }
0x2f96   :  { %13069 = vmatprep.mubr.msk.f32.mxu0 %vm4870_vm4, %v16418_v19 }
0x2f99   :  { %13070 = vmatmul.mubr.msk.f32.gmra.mrb[98].mxu0 %vm4870_vm4, %v16429_v48 }
0x2f9a   :  { %13072 = vmatprep.mubr.msk.f32.mxu0 %vm4870_vm4, %v16432_v36 }
0x2f9d   :  { %13073 = vmatmul.mubr.msk.f32.gmra.mrb[100].mxu0 %vm4870_vm4, %v16439_v37 }
0x2f9e   :  { %13075 = vmatprep.mubr.msk.f32.mxu0 %vm4870_vm4, %v16442_v32 }
0x2fa1   :  { %13076 = vmatmul.mubr.msk.f32.gmra.mrb[102].mxu0 %vm4870_vm4, %v16448_v45 }
0x2fa2   :  { %13122 = vmatprep.mubr.msk.f32.mxu0 %vm4870_vm4, %v16413_v25 }
0x3068   :  { %v13068_v8 = vpop.f32.mrb[96].mxu0 }
0x3069   :  { %v6888_v43 = vadd.f32 %v16760_v18, %v13068_v8  ;;  %v6882_v34 = vpop.f32.mrb[97].mxu0 }
0x306a   :  { %v6883_v16 = vadd.f32 %v16763_v44, %v6882_v34 }
0x306b   :  { %v6922_v17 = vmax.f32 %v6888_v43, 0.0 }
0x306c   :  { %v6921_v27 = vmax.f32 %v6883_v16, 0.0  ;;  %v13071_v29 = vpop.f32.mrb[98].mxu0 }
0x306d   :  { %v6898_v46 = vadd.f32 %v16766_v56, %v13071_v29  ;;  %v6892_v51 = vpop.f32.mrb[99].mxu0 }
0x306e   :  { %v14408_v47 = vpack.c.bf16 %v6922_v17, %v6921_v27  ;;  %v6893_v53 = vadd.f32 %v16769_v61, %v6892_v51 }
0x306f   :  { %v6924_v58 = vmax.f32 %v6898_v46, 0.0 }
0x3070   :  { %v6923_v59 = vmax.f32 %v6893_v53, 0.0  ;;  %v13074_v60 = vpop.f32.mrb[100].mxu0  ;;  %14409 = vmatprep.subr.bf16.mxu1 %v14408_v47 }
0x3071   :  { %v6908_v62 = vadd.f32 %v16772_v9, %v13074_v60  ;;  %v6902_v5 = vpop.f32.mrb[101].mxu0  ;;  %14411 = vmatpush3.bf16.msra.mxu1 %v14408_v47 }
0x3072   :  { %v14412_v6 = vpack.c.bf16 %v6924_v58, %v6923_v59  ;;  %v6903_v7 = vadd.f32 %v16775_v20, %v6902_v5 }
0x3073   :  { %v6926_v12 = vmax.f32 %v6908_v62, 0.0 }
0x3074   :  { %v6925_v13 = vmax.f32 %v6903_v7, 0.0  ;;  %v13077_v14 = vpop.f32.mrb[102].mxu0  ;;  %14413 = vmatprep.subr.bf16.mxu1 %v14412_v6 }
0x3075   :  { %v6918_v15 = vadd.f32 %v16778_v24, %v13077_v14  ;;  %v6912_v21 = vpop.f32.mrb[103].mxu0  ;;  %14415 = vmatpush3.bf16.msra.mxu1 %v14412_v6 }
0x3076   :  { %v14416_v22 = vpack.c.bf16 %v6926_v12, %v6925_v13  ;;  %v6913_v23 = vadd.f32 %v16781_v4, %v6912_v21 }
0x3077   :  { %v6928_v26 = vmax.f32 %v6918_v15, 0.0 }
0x3078   :  { %v6927_v28 = vmax.f32 %v6913_v23, 0.0  ;;  %14417 = vmatprep.subr.bf16.mxu1 %v14416_v22 }
0x3079   :  { %14419 = vmatpush3.bf16.msra.mxu1 %v14416_v22 }
0x307a   :  { %v14420_v3 = vpack.c.bf16 %v6928_v26, %v6927_v28 }
0x307c   :  { %14421 = vmatprep.subr.bf16.mxu1 %v14420_v3 }
0x307d   :  { %14423 = vmatpush3.bf16.msra.mxu1 %v14420_v3 }
0x3080   :  { %13095 = vmatmul.mubr.msk.f32.vlgmr.msra.gmra.mrb[118].mxu1 %vm4870_vm4, %v16415_v42 }
0x3081   :  { %13097 = vmatprep.mubr.msk.f32.mxu1 %vm4870_vm4, %v16418_v19 }
0x3084   :  { %13098 = vmatmul.mubr.msk.f32.gmra.mrb[120].mxu1 %vm4870_vm4, %v16429_v48 }
0x3085   :  { %13100 = vmatprep.mubr.msk.f32.mxu1 %vm4870_vm4, %v16432_v36 }
0x3088   :  { %13101 = vmatmul.mubr.msk.f32.gmra.mrb[122].mxu1 %vm4870_vm4, %v16439_v37 }
0x3089   :  { %13103 = vmatprep.mubr.msk.f32.mxu1 %vm4870_vm4, %v16442_v32 }
0x308c   :  { %13104 = vmatmul.mubr.msk.f32.gmra.mrb[124].mxu1 %vm4870_vm4, %v16448_v45 }
0x308d   :  { %13150 = vmatprep.mubr.msk.f32.mxu1 %vm4870_vm4, %v16413_v25 }
0x3153   :  { %v13096_v1 = vpop.f32.mrb[118].mxu1 }
0x3154   :  { %v7001_v11 = vadd.f32 %v16760_v18, %v13096_v1  ;;  %v6995_v30 = vpop.f32.mrb[119].mxu1 }
0x3155   :  { %v6996_v49 = vadd.f32 %v16763_v44, %v6995_v30 }
0x3156   :  { %v7035_v55 = vmax.f32 %v7001_v11, 0.0 }
0x3157   :  { %v7034_v2 = vmax.f32 %v6996_v49, 0.0  ;;  %v13099_v57 = vpop.f32.mrb[120].mxu1 }
0x3158   :  { %v7011_v31 = vadd.f32 %v16766_v56, %v13099_v57  ;;  %v7005_v33 = vpop.f32.mrb[121].mxu1 }
0x3159   :  { %v14424_v35 = vpack.c.bf16 %v7035_v55, %v7034_v2  ;;  %v7006_v10 = vadd.f32 %v16769_v61, %v7005_v33 }
0x315a   :  { %v7037_v38 = vmax.f32 %v7011_v31, 0.0 }
0x315b   :  { %v7036_v52 = vmax.f32 %v7006_v10, 0.0  ;;  %v13102_v54 = vpop.f32.mrb[122].mxu1  ;;  %14425 = vmatprep.subr.bf16.mxu0 %v14424_v35 }
0x315c   :  { %v7021_v39 = vadd.f32 %v16772_v9, %v13102_v54  ;;  %v7015_v0 = vpop.f32.mrb[123].mxu1  ;;  %14427 = vmatpush3.bf16.msra.mxu0 %v14424_v35 }
0x315d   :  { %v14428_v40 = vpack.c.bf16 %v7037_v38, %v7036_v52  ;;  %v7016_v50 = vadd.f32 %v16775_v20, %v7015_v0 }
0x315e   :  { %v7039_v41 = vmax.f32 %v7021_v39, 0.0 }
0x315f   :  { %v7038_v63 = vmax.f32 %v7016_v50, 0.0  ;;  %v13105_v8 = vpop.f32.mrb[124].mxu1  ;;  %14429 = vmatprep.subr.bf16.mxu0 %v14428_v40 }
0x3160   :  { %v7031_v43 = vadd.f32 %v16778_v24, %v13105_v8  ;;  %v7025_v34 = vpop.f32.mrb[125].mxu1  ;;  %14431 = vmatpush3.bf16.msra.mxu0 %v14428_v40 }
0x3161   :  { %v14432_v16 = vpack.c.bf16 %v7039_v41, %v7038_v63  ;;  %v7026_v17 = vadd.f32 %v16781_v4, %v7025_v34 }
0x3162   :  { %v7041_v27 = vmax.f32 %v7031_v43, 0.0 }
0x3163   :  { %v7040_v29 = vmax.f32 %v7026_v17, 0.0  ;;  %14433 = vmatprep.subr.bf16.mxu0 %v14432_v16 }
0x3164   :  { %14435 = vmatpush3.bf16.msra.mxu0 %v14432_v16 }
0x3165   :  { %v14436_v46 = vpack.c.bf16 %v7041_v27, %v7040_v29 }
0x3167   :  { %14437 = vmatprep.subr.bf16.mxu0 %v14436_v46 }
0x3168   :  { %14439 = vmatpush3.bf16.msra.mxu0 %v14436_v46 }
0x316b   :  { %13123 = vmatmul.mubr.msk.f32.vlgmr.msra.gmra.mrb[104].mxu0 %vm4870_vm4, %v16415_v42 }
0x316c   :  { %13125 = vmatprep.mubr.msk.f32.mxu0 %vm4870_vm4, %v16418_v19 }
0x316f   :  { %13126 = vmatmul.mubr.msk.f32.gmra.mrb[106].mxu0 %vm4870_vm4, %v16429_v48 }
0x3170   :  { %13128 = vmatprep.mubr.msk.f32.mxu0 %vm4870_vm4, %v16432_v36 }
0x3173   :  { %13129 = vmatmul.mubr.msk.f32.gmra.mrb[108].mxu0 %vm4870_vm4, %v16439_v37 }
0x3174   :  { %13131 = vmatprep.mubr.msk.f32.mxu0 %vm4870_vm4, %v16442_v32 }
0x3177   :  { %13132 = vmatmul.mubr.msk.f32.gmra.mrb[110].mxu0 %vm4870_vm4, %v16448_v45 }
0x3178   :  { %13178 = vmatprep.mubr.msk.f32.mxu0 %vm4870_vm4, %v16413_v25 }
0x323e   :  { %v13124_v51 = vpop.f32.mrb[104].mxu0 }
0x323f   :  { %v7114_v47 = vadd.f32 %v16760_v18, %v13124_v51  ;;  %v7108_v53 = vpop.f32.mrb[105].mxu0 }
0x3240   :  { %v7109_v58 = vadd.f32 %v16763_v44, %v7108_v53 }
0x3241   :  { %v7148_v59 = vmax.f32 %v7114_v47, 0.0 }
0x3242   :  { %v7147_v60 = vmax.f32 %v7109_v58, 0.0  ;;  %v13127_v62 = vpop.f32.mrb[106].mxu0 }
0x3243   :  { %v7124_v5 = vadd.f32 %v16766_v56, %v13127_v62  ;;  %v7118_v6 = vpop.f32.mrb[107].mxu0 }
0x3244   :  { %v14440_v7 = vpack.c.bf16 %v7148_v59, %v7147_v60  ;;  %v7119_v12 = vadd.f32 %v16769_v61, %v7118_v6 }
0x3245   :  { %v7150_v13 = vmax.f32 %v7124_v5, 0.0 }
0x3246   :  { %v7149_v14 = vmax.f32 %v7119_v12, 0.0  ;;  %v13130_v15 = vpop.f32.mrb[108].mxu0  ;;  %14441 = vmatprep.subr.bf16.mxu1 %v14440_v7 }
0x3247   :  { %v7134_v21 = vadd.f32 %v16772_v9, %v13130_v15  ;;  %v7128_v22 = vpop.f32.mrb[109].mxu0  ;;  %14443 = vmatpush3.bf16.msra.mxu1 %v14440_v7 }
0x3248   :  { %v14444_v23 = vpack.c.bf16 %v7150_v13, %v7149_v14  ;;  %v7129_v26 = vadd.f32 %v16775_v20, %v7128_v22 }
0x3249   :  { %v7152_v28 = vmax.f32 %v7134_v21, 0.0 }
0x324a   :  { %v7151_v3 = vmax.f32 %v7129_v26, 0.0  ;;  %v13133_v1 = vpop.f32.mrb[110].mxu0  ;;  %14445 = vmatprep.subr.bf16.mxu1 %v14444_v23 }
0x324b   :  { %v7144_v11 = vadd.f32 %v16778_v24, %v13133_v1  ;;  %v7138_v30 = vpop.f32.mrb[111].mxu0  ;;  %14447 = vmatpush3.bf16.msra.mxu1 %v14444_v23 }
0x324c   :  { %v14448_v49 = vpack.c.bf16 %v7152_v28, %v7151_v3  ;;  %v7139_v55 = vadd.f32 %v16781_v4, %v7138_v30 }
0x324d   :  { %v7154_v2 = vmax.f32 %v7144_v11, 0.0 }
0x324e   :  { %v7153_v57 = vmax.f32 %v7139_v55, 0.0  ;;  %14449 = vmatprep.subr.bf16.mxu1 %v14448_v49 }
0x324f   :  { %14451 = vmatpush3.bf16.msra.mxu1 %v14448_v49 }
0x3250   :  { %v14452_v31 = vpack.c.bf16 %v7154_v2, %v7153_v57 }
0x3252   :  { %14453 = vmatprep.subr.bf16.mxu1 %v14452_v31 }
0x3253   :  { %14455 = vmatpush3.bf16.msra.mxu1 %v14452_v31 }
0x3256   :  { %13151 = vmatmul.mubr.msk.f32.vlgmr.msra.gmra.mrb[126].mxu1 %vm4870_vm4, %v16415_v42 }
0x3257   :  { %13153 = vmatprep.mubr.msk.f32.mxu1 %vm4870_vm4, %v16418_v19 }
0x325a   :  { %13154 = vmatmul.mubr.msk.f32.gmra.mrb[128].mxu1 %vm4870_vm4, %v16429_v48 }
0x325b   :  { %13156 = vmatprep.mubr.msk.f32.mxu1 %vm4870_vm4, %v16432_v36 }
0x325e   :  { %13157 = vmatmul.mubr.msk.f32.gmra.mrb[130].mxu1 %vm4870_vm4, %v16439_v37 }
0x325f   :  { %13159 = vmatprep.mubr.msk.f32.mxu1 %vm4870_vm4, %v16442_v32 }
0x3262   :  { %13160 = vmatmul.mubr.msk.f32.gmra.mrb[132].mxu1 %vm4870_vm4, %v16448_v45 }
0x3263   :  { %13206 = vmatprep.mubr.msk.f32.mxu1 %vm4870_vm4, %v16413_v25 }
0x3329   :  { %v13152_v33 = vpop.f32.mrb[126].mxu1 }
0x332a   :  { %v7227_v35 = vadd.f32 %v16760_v18, %v13152_v33  ;;  %v7221_v10 = vpop.f32.mrb[127].mxu1 }
0x332b   :  { %v7222_v38 = vadd.f32 %v16763_v44, %v7221_v10 }
0x332c   :  { %v7261_v52 = vmax.f32 %v7227_v35, 0.0 }
0x332d   :  { %v7260_v54 = vmax.f32 %v7222_v38, 0.0  ;;  %v13155_v39 = vpop.f32.mrb[128].mxu1 }
0x332e   :  { %v7237_v0 = vadd.f32 %v16766_v56, %v13155_v39  ;;  %v7231_v40 = vpop.f32.mrb[129].mxu1 }
0x332f   :  { %v14456_v50 = vpack.c.bf16 %v7261_v52, %v7260_v54  ;;  %v7232_v41 = vadd.f32 %v16769_v61, %v7231_v40 }
0x3330   :  { %v7263_v63 = vmax.f32 %v7237_v0, 0.0 }
0x3331   :  { %v7262_v8 = vmax.f32 %v7232_v41, 0.0  ;;  %v13158_v43 = vpop.f32.mrb[130].mxu1  ;;  %14457 = vmatprep.subr.bf16.mxu0 %v14456_v50 }
0x3332   :  { %v7247_v34 = vadd.f32 %v16772_v9, %v13158_v43  ;;  %v7241_v16 = vpop.f32.mrb[131].mxu1  ;;  %14459 = vmatpush3.bf16.msra.mxu0 %v14456_v50 }
0x3333   :  { %v14460_v17 = vpack.c.bf16 %v7263_v63, %v7262_v8  ;;  %v7242_v27 = vadd.f32 %v16775_v20, %v7241_v16 }
0x3334   :  { %v7265_v29 = vmax.f32 %v7247_v34, 0.0 }
0x3335   :  { %v7264_v46 = vmax.f32 %v7242_v27, 0.0  ;;  %v13161_v51 = vpop.f32.mrb[132].mxu1  ;;  %14461 = vmatprep.subr.bf16.mxu0 %v14460_v17 }
0x3336   :  { %v7257_v47 = vadd.f32 %v16778_v24, %v13161_v51  ;;  %v7251_v53 = vpop.f32.mrb[133].mxu1  ;;  %14463 = vmatpush3.bf16.msra.mxu0 %v14460_v17 }
0x3337   :  { %v14464_v58 = vpack.c.bf16 %v7265_v29, %v7264_v46  ;;  %v7252_v59 = vadd.f32 %v16781_v4, %v7251_v53 }
0x3338   :  { %v7267_v60 = vmax.f32 %v7257_v47, 0.0 }
0x3339   :  { %v7266_v62 = vmax.f32 %v7252_v59, 0.0  ;;  %14465 = vmatprep.subr.bf16.mxu0 %v14464_v58 }
0x333a   :  { %14467 = vmatpush3.bf16.msra.mxu0 %v14464_v58 }
0x333b   :  { %v14468_v5 = vpack.c.bf16 %v7267_v60, %v7266_v62 }
0x333d   :  { %14469 = vmatprep.subr.bf16.mxu0 %v14468_v5 }
0x333e   :  { %14471 = vmatpush3.bf16.msra.mxu0 %v14468_v5 }
0x3341   :  { %13179 = vmatmul.mubr.msk.f32.vlgmr.msra.gmra.mrb[112].mxu0 %vm4870_vm4, %v16415_v42 }
0x3342   :  { %13181 = vmatprep.mubr.msk.f32.mxu0 %vm4870_vm4, %v16418_v19 }
0x3345   :  { %13182 = vmatmul.mubr.msk.f32.gmra.mrb[114].mxu0 %vm4870_vm4, %v16429_v48 }
0x3346   :  { %13184 = vmatprep.mubr.msk.f32.mxu0 %vm4870_vm4, %v16432_v36 }
0x3349   :  { %13185 = vmatmul.mubr.msk.f32.gmra.mrb[116].mxu0 %vm4870_vm4, %v16439_v37 }
0x334a   :  { %13187 = vmatprep.mubr.msk.f32.mxu0 %vm4870_vm4, %v16442_v32 }
0x334d   :  { %13188 = vmatmul.mubr.msk.f32.gmra.mrb[118].mxu0 %vm4870_vm4, %v16448_v45 }
0x334e   :  { %13234 = vmatprep.mubr.msk.f32.mxu0 %vm4870_vm4, %v16413_v25 }
0x3414   :  { %v13180_v6 = vpop.f32.mrb[112].mxu0 }
0x3415   :  { %v7340_v7 = vadd.f32 %v16760_v18, %v13180_v6  ;;  %v7334_v12 = vpop.f32.mrb[113].mxu0 }
0x3416   :  { %v7335_v13 = vadd.f32 %v16763_v44, %v7334_v12 }
0x3417   :  { %v7374_v14 = vmax.f32 %v7340_v7, 0.0 }
0x3418   :  { %v7373_v15 = vmax.f32 %v7335_v13, 0.0  ;;  %v13183_v21 = vpop.f32.mrb[114].mxu0 }
0x3419   :  { %v7350_v22 = vadd.f32 %v16766_v56, %v13183_v21  ;;  %v7344_v23 = vpop.f32.mrb[115].mxu0 }
0x341a   :  { %v14472_v26 = vpack.c.bf16 %v7374_v14, %v7373_v15  ;;  %v7345_v28 = vadd.f32 %v16769_v61, %v7344_v23 }
0x341b   :  { %v7376_v3 = vmax.f32 %v7350_v22, 0.0 }
0x341c   :  { %v7375_v1 = vmax.f32 %v7345_v28, 0.0  ;;  %v13186_v11 = vpop.f32.mrb[116].mxu0  ;;  %14473 = vmatprep.subr.bf16.mxu1 %v14472_v26 }
0x341d   :  { %v7360_v30 = vadd.f32 %v16772_v9, %v13186_v11  ;;  %v7354_v49 = vpop.f32.mrb[117].mxu0  ;;  %14475 = vmatpush3.bf16.msra.mxu1 %v14472_v26 }
0x341e   :  { %v14476_v55 = vpack.c.bf16 %v7376_v3, %v7375_v1  ;;  %v7355_v2 = vadd.f32 %v16775_v20, %v7354_v49 }
0x341f   :  { %v7378_v57 = vmax.f32 %v7360_v30, 0.0 }
0x3420   :  { %v7377_v31 = vmax.f32 %v7355_v2, 0.0  ;;  %v13189_v33 = vpop.f32.mrb[118].mxu0  ;;  %14477 = vmatprep.subr.bf16.mxu1 %v14476_v55 }
0x3421   :  { %v7370_v35 = vadd.f32 %v16778_v24, %v13189_v33  ;;  %v7364_v10 = vpop.f32.mrb[119].mxu0  ;;  %14479 = vmatpush3.bf16.msra.mxu1 %v14476_v55 }
0x3422   :  { %v14480_v38 = vpack.c.bf16 %v7378_v57, %v7377_v31  ;;  %v7365_v52 = vadd.f32 %v16781_v4, %v7364_v10 }
0x3423   :  { %v7380_v54 = vmax.f32 %v7370_v35, 0.0 }
0x3424   :  { %v7379_v39 = vmax.f32 %v7365_v52, 0.0  ;;  %14481 = vmatprep.subr.bf16.mxu1 %v14480_v38 }
0x3425   :  { %14483 = vmatpush3.bf16.msra.mxu1 %v14480_v38 }
0x3426   :  { %v14484_v0 = vpack.c.bf16 %v7380_v54, %v7379_v39 }
0x3428   :  { %14485 = vmatprep.subr.bf16.mxu1 %v14484_v0 }
0x3429   :  { %14487 = vmatpush3.bf16.msra.mxu1 %v14484_v0 }
0x342c   :  { %13207 = vmatmul.mubr.msk.f32.vlgmr.msra.gmra.mrb[134].mxu1 %vm4870_vm4, %v16415_v42 }
0x342d   :  { %13209 = vmatprep.mubr.msk.f32.mxu1 %vm4870_vm4, %v16418_v19 }
0x3430   :  { %13210 = vmatmul.mubr.msk.f32.gmra.mrb[136].mxu1 %vm4870_vm4, %v16429_v48 }
0x3431   :  { %13212 = vmatprep.mubr.msk.f32.mxu1 %vm4870_vm4, %v16432_v36 }
0x3434   :  { %13213 = vmatmul.mubr.msk.f32.gmra.mrb[138].mxu1 %vm4870_vm4, %v16439_v37 }
0x3435   :  { %13215 = vmatprep.mubr.msk.f32.mxu1 %vm4870_vm4, %v16442_v32 }
0x3438   :  { %13216 = vmatmul.mubr.msk.f32.gmra.mrb[140].mxu1 %vm4870_vm4, %v16448_v45 }
0x3439   :  { %13262 = vmatprep.mubr.msk.f32.mxu1 %vm4870_vm4, %v16413_v25 }
0x34ff   :  { %v13208_v40 = vpop.f32.mrb[134].mxu1 }
0x3500   :  { %v7453_v50 = vadd.f32 %v16760_v18, %v13208_v40  ;;  %v7447_v41 = vpop.f32.mrb[135].mxu1 }
0x3501   :  { %v7448_v63 = vadd.f32 %v16763_v44, %v7447_v41 }
0x3502   :  { %v7487_v8 = vmax.f32 %v7453_v50, 0.0 }
0x3503   :  { %v7486_v43 = vmax.f32 %v7448_v63, 0.0  ;;  %v13211_v34 = vpop.f32.mrb[136].mxu1 }
0x3504   :  { %v7463_v16 = vadd.f32 %v16766_v56, %v13211_v34  ;;  %v7457_v17 = vpop.f32.mrb[137].mxu1 }
0x3505   :  { %v14488_v27 = vpack.c.bf16 %v7487_v8, %v7486_v43  ;;  %v7458_v29 = vadd.f32 %v16769_v61, %v7457_v17  ;;  %v17067_v8 = vld [vmem:[#allocation2] sm:$0xff] }
0x3506   :  { %v7489_v46 = vmax.f32 %v7463_v16, 0.0 }
0x3507   :  { %v7488_v51 = vmax.f32 %v7458_v29, 0.0  ;;  %v13214_v47 = vpop.f32.mrb[138].mxu1  ;;  %14489 = vmatprep.subr.bf16.mxu0 %v14488_v27 }
0x3508   :  { %v7473_v53 = vadd.f32 %v16772_v9, %v13214_v47  ;;  %v7467_v58 = vpop.f32.mrb[139].mxu1  ;;  %14491 = vmatpush3.bf16.msra.mxu0 %v14488_v27  ;;  %v17070_v27 = vld [vmem:[#allocation2 + $0x18] sm:$0xff]  ;;  %v17073_v47 = vld [vmem:[#allocation2 + $0x10] sm:$0xff] }
0x3509   :  { %v14492_v59 = vpack.c.bf16 %v7489_v46, %v7488_v51  ;;  %v7468_v60 = vadd.f32 %v16775_v20, %v7467_v58 }
0x350a   :  { %v7491_v62 = vmax.f32 %v7473_v53, 0.0 }
0x350b   :  { %v7490_v5 = vmax.f32 %v7468_v60, 0.0  ;;  %v13217_v6 = vpop.f32.mrb[140].mxu1  ;;  %14493 = vmatprep.subr.bf16.mxu0 %v14492_v59 }
0x350c   :  { %v7483_v7 = vadd.f32 %v16778_v24, %v13217_v6  ;;  %v7477_v12 = vpop.f32.mrb[141].mxu1  ;;  %14495 = vmatpush3.bf16.msra.mxu0 %v14492_v59 }
0x350d   :  { %v14496_v13 = vpack.c.bf16 %v7491_v62, %v7490_v5  ;;  %v7478_v14 = vadd.f32 %v16781_v4, %v7477_v12  ;;  %v17076_v62 = vld [vmem:[#allocation2 + $0x28] sm:$0xff]  ;;  %v17079_v12 = vld [vmem:[#allocation2 + $0x20] sm:$0xff] }
0x350e   :  { %v7493_v15 = vmax.f32 %v7483_v7, 0.0 }
0x350f   :  { %v7492_v21 = vmax.f32 %v7478_v14, 0.0  ;;  %14497 = vmatprep.subr.bf16.mxu0 %v14496_v13 }
0x3510   :  { %14499 = vmatpush3.bf16.msra.mxu0 %v14496_v13 }
0x3511   :  { %v14500_v22 = vpack.c.bf16 %v7493_v15, %v7492_v21 }
0x3513   :  { %14501 = vmatprep.subr.bf16.mxu0 %v14500_v22 }
0x3514   :  { %14503 = vmatpush3.bf16.msra.mxu0 %v14500_v22  ;;  %v17082_v22 = vld [vmem:[#allocation2 + $0x38] sm:$0xff] }
0x3517   :  { %13235 = vmatmul.mubr.msk.f32.vlgmr.msra.gmra.mrb[120].mxu0 %vm4870_vm4, %v16415_v42 }
0x3518   :  { %13237 = vmatprep.mubr.msk.f32.mxu0 %vm4870_vm4, %v16418_v19 }
0x351b   :  { %13238 = vmatmul.mubr.msk.f32.gmra.mrb[122].mxu0 %vm4870_vm4, %v16429_v48 }
0x351c   :  { %13240 = vmatprep.mubr.msk.f32.mxu0 %vm4870_vm4, %v16432_v36 }
0x351f   :  { %13241 = vmatmul.mubr.msk.f32.gmra.mrb[124].mxu0 %vm4870_vm4, %v16439_v37 }
0x3520   :  { %13243 = vmatprep.mubr.msk.f32.mxu0 %vm4870_vm4, %v16442_v32 }
0x3523   :  { %13244 = vmatmul.mubr.msk.f32.gmra.mrb[126].mxu0 %vm4870_vm4, %v16448_v45 }
0x3524   :  { %13290 = vmatprep.mubr.msk.f32.mxu0 %vm4870_vm4, %v16413_v25 }
0x35ea   :  { %v13236_v23 = vpop.f32.mrb[120].mxu0 }
0x35eb   :  { %v7566_v26 = vadd.f32 %v16760_v18, %v13236_v23  ;;  %v7560_v28 = vpop.f32.mrb[121].mxu0 }
0x35ec   :  { %v7561_v3 = vadd.f32 %v16763_v44, %v7560_v28 }
0x35ed   :  { %v7600_v1 = vmax.f32 %v7566_v26, 0.0 }
0x35ee   :  { %v7599_v11 = vmax.f32 %v7561_v3, 0.0  ;;  %v13239_v30 = vpop.f32.mrb[122].mxu0  ;;  %v17085_v3 = vld [vmem:[#allocation2 + $0x30] sm:$0xff] }
0x35ef   :  { %v7576_v49 = vadd.f32 %v16766_v56, %v13239_v30  ;;  %v7570_v55 = vpop.f32.mrb[123].mxu0 }
0x35f0   :  { %v14504_v2 = vpack.c.bf16 %v7600_v1, %v7599_v11  ;;  %v7571_v57 = vadd.f32 %v16769_v61, %v7570_v55 }
0x35f1   :  { %v7602_v31 = vmax.f32 %v7576_v49, 0.0 }
0x35f2   :  { %v7601_v33 = vmax.f32 %v7571_v57, 0.0  ;;  %v13242_v35 = vpop.f32.mrb[124].mxu0  ;;  %14505 = vmatprep.subr.bf16.mxu1 %v14504_v2 }
0x35f3   :  { %v7586_v10 = vadd.f32 %v16772_v9, %v13242_v35  ;;  %v7580_v38 = vpop.f32.mrb[125].mxu0  ;;  %14507 = vmatpush3.bf16.msra.mxu1 %v14504_v2 }
0x35f4   :  { %v14508_v18 = vpack.c.bf16 %v7602_v31, %v7601_v33  ;;  %v7581_v44 = vadd.f32 %v16775_v20, %v7580_v38 }
0x35f5   :  { %v7604_v52 = vmax.f32 %v7586_v10, 0.0 }
0x35f6   :  { %v7603_v54 = vmax.f32 %v7581_v44, 0.0  ;;  %v13245_v39 = vpop.f32.mrb[126].mxu0  ;;  %14509 = vmatprep.subr.bf16.mxu1 %v14508_v18 }
0x35f7   :  { %v7596_v56 = vadd.f32 %v16778_v24, %v13245_v39  ;;  %v7590_v0 = vpop.f32.mrb[127].mxu0  ;;  %14511 = vmatpush3.bf16.msra.mxu1 %v14508_v18  ;;  %v17064_v24 = vld [vmem:[#allocation2 + $0x8] sm:$0xff] }
0x35f8   :  { %v14512_v61 = vpack.c.bf16 %v7604_v52, %v7603_v54  ;;  %v7591_v40 = vadd.f32 %v16781_v4, %v7590_v0 }
0x35f9   :  { %v7606_v50 = vmax.f32 %v7596_v56, 0.0 }
0x35fa   :  { %v7605_v41 = vmax.f32 %v7591_v40, 0.0  ;;  %14513 = vmatprep.subr.bf16.mxu1 %v14512_v61 }
0x35fb   :  { %14515 = vmatpush3.bf16.msra.mxu1 %v14512_v61 }
0x35fc   :  { %v14516_v9 = vpack.c.bf16 %v7606_v50, %v7605_v41 }
0x35fe   :  { %14517 = vmatprep.subr.bf16.mxu1 %v14516_v9 }
0x35ff   :  { %14519 = vmatpush3.bf16.msra.mxu1 %v14516_v9 }
0x3602   :  { %13263 = vmatmul.mubr.msk.f32.vlgmr.msra.gmra.mrb[142].mxu1 %vm4870_vm4, %v16415_v42 }
0x3603   :  { %13265 = vmatprep.mubr.msk.f32.mxu1 %vm4870_vm4, %v16418_v19 }
0x3606   :  { %13266 = vmatmul.mubr.msk.f32.gmra.mrb[144].mxu1 %vm4870_vm4, %v16429_v48 }
0x3607   :  { %13268 = vmatprep.mubr.msk.f32.mxu1 %vm4870_vm4, %v16432_v36 }
0x360a   :  { %13269 = vmatmul.mubr.msk.f32.gmra.mrb[146].mxu1 %vm4870_vm4, %v16439_v37 }
0x360b   :  { %13271 = vmatprep.mubr.msk.f32.mxu1 %vm4870_vm4, %v16442_v32 }
0x360e   :  { %13272 = vmatmul.mubr.msk.f32.gmra.mrb[148].mxu1 %vm4870_vm4, %v16448_v45 }
0x360f   :  { %13318 = vmatprep.mubr.msk.f32.mxu1 %vm4870_vm4, %v16413_v25 }
0x36d5   :  { %v13264_v20 = vpop.f32.mrb[142].mxu1 }
0x36d6   :  { %v7679_v4 = vadd.f32 %v17064_v24, %v13264_v20  ;;  %v7673_v63 = vpop.f32.mrb[143].mxu1 }
0x36d7   :  { %v7674_v43 = vadd.f32 %v17067_v8, %v7673_v63 }
0x36d8   :  { %v7713_v34 = vmax.f32 %v7679_v4, 0.0 }
0x36d9   :  { %v7712_v16 = vmax.f32 %v7674_v43, 0.0  ;;  %v13267_v17 = vpop.f32.mrb[144].mxu1 }
0x36da   :  { %v7689_v29 = vadd.f32 %v17070_v27, %v13267_v17  ;;  %v7683_v46 = vpop.f32.mrb[145].mxu1 }
0x36db   :  { %v14520_v51 = vpack.c.bf16 %v7713_v34, %v7712_v16  ;;  %v7684_v53 = vadd.f32 %v17073_v47, %v7683_v46 }
0x36dc   :  { %v7715_v58 = vmax.f32 %v7689_v29, 0.0 }
0x36dd   :  { %v7714_v59 = vmax.f32 %v7684_v53, 0.0  ;;  %v13270_v60 = vpop.f32.mrb[146].mxu1  ;;  %14521 = vmatprep.subr.bf16.mxu0 %v14520_v51 }
0x36de   :  { %v7699_v5 = vadd.f32 %v17076_v62, %v13270_v60  ;;  %v7693_v6 = vpop.f32.mrb[147].mxu1  ;;  %14523 = vmatpush3.bf16.msra.mxu0 %v14520_v51 }
0x36df   :  { %v14524_v7 = vpack.c.bf16 %v7715_v58, %v7714_v59  ;;  %v7694_v13 = vadd.f32 %v17079_v12, %v7693_v6 }
0x36e0   :  { %v7717_v14 = vmax.f32 %v7699_v5, 0.0 }
0x36e1   :  { %v7716_v15 = vmax.f32 %v7694_v13, 0.0  ;;  %v13273_v21 = vpop.f32.mrb[148].mxu1  ;;  %14525 = vmatprep.subr.bf16.mxu0 %v14524_v7 }
0x36e2   :  { %v7709_v23 = vadd.f32 %v17082_v22, %v13273_v21  ;;  %v7703_v26 = vpop.f32.mrb[149].mxu1  ;;  %14527 = vmatpush3.bf16.msra.mxu0 %v14524_v7 }
0x36e3   :  { %v14528_v28 = vpack.c.bf16 %v7717_v14, %v7716_v15  ;;  %v7704_v1 = vadd.f32 %v17085_v3, %v7703_v26 }
0x36e4   :  { %v7719_v11 = vmax.f32 %v7709_v23, 0.0 }
0x36e5   :  { %v7718_v30 = vmax.f32 %v7704_v1, 0.0  ;;  %14529 = vmatprep.subr.bf16.mxu0 %v14528_v28 }
0x36e6   :  { %14531 = vmatpush3.bf16.msra.mxu0 %v14528_v28 }
0x36e7   :  { %v14532_v49 = vpack.c.bf16 %v7719_v11, %v7718_v30 }
0x36e9   :  { %14533 = vmatprep.subr.bf16.mxu0 %v14532_v49 }
0x36ea   :  { %14535 = vmatpush3.bf16.msra.mxu0 %v14532_v49 }
0x36ed   :  { %13291 = vmatmul.mubr.msk.f32.vlgmr.msra.gmra.mrb[128].mxu0 %vm4870_vm4, %v16415_v42 }
0x36ee   :  { %13293 = vmatprep.mubr.msk.f32.mxu0 %vm4870_vm4, %v16418_v19 }
0x36f1   :  { %13294 = vmatmul.mubr.msk.f32.gmra.mrb[130].mxu0 %vm4870_vm4, %v16429_v48 }
0x36f2   :  { %13296 = vmatprep.mubr.msk.f32.mxu0 %vm4870_vm4, %v16432_v36 }
0x36f5   :  { %13297 = vmatmul.mubr.msk.f32.gmra.mrb[132].mxu0 %vm4870_vm4, %v16439_v37 }
0x36f6   :  { %13299 = vmatprep.mubr.msk.f32.mxu0 %vm4870_vm4, %v16442_v32 }
0x36f9   :  { %13300 = vmatmul.mubr.msk.f32.gmra.mrb[134].mxu0 %vm4870_vm4, %v16448_v45 }
0x36fa   :  { %13346 = vmatprep.mubr.msk.f32.mxu0 %vm4870_vm4, %v16413_v25 }
0x37c0   :  { %v13292_v55 = vpop.f32.mrb[128].mxu0 }
0x37c1   :  { %v7792_v2 = vadd.f32 %v17064_v24, %v13292_v55  ;;  %v7786_v57 = vpop.f32.mrb[129].mxu0 }
0x37c2   :  { %v7787_v31 = vadd.f32 %v17067_v8, %v7786_v57 }
0x37c3   :  { %v7826_v33 = vmax.f32 %v7792_v2, 0.0 }
0x37c4   :  { %v7825_v35 = vmax.f32 %v7787_v31, 0.0  ;;  %v13295_v10 = vpop.f32.mrb[130].mxu0 }
0x37c5   :  { %v7802_v38 = vadd.f32 %v17070_v27, %v13295_v10  ;;  %v7796_v18 = vpop.f32.mrb[131].mxu0 }
0x37c6   :  { %v14536_v44 = vpack.c.bf16 %v7826_v33, %v7825_v35  ;;  %v7797_v52 = vadd.f32 %v17073_v47, %v7796_v18 }
0x37c7   :  { %v7828_v54 = vmax.f32 %v7802_v38, 0.0 }
0x37c8   :  { %v7827_v39 = vmax.f32 %v7797_v52, 0.0  ;;  %v13298_v56 = vpop.f32.mrb[132].mxu0  ;;  %14537 = vmatprep.subr.bf16.mxu1 %v14536_v44 }
0x37c9   :  { %v7812_v0 = vadd.f32 %v17076_v62, %v13298_v56  ;;  %v7806_v61 = vpop.f32.mrb[133].mxu0  ;;  %14539 = vmatpush3.bf16.msra.mxu1 %v14536_v44 }
0x37ca   :  { %v14540_v40 = vpack.c.bf16 %v7828_v54, %v7827_v39  ;;  %v7807_v50 = vadd.f32 %v17079_v12, %v7806_v61 }
0x37cb   :  { %v7830_v41 = vmax.f32 %v7812_v0, 0.0 }
0x37cc   :  { %v7829_v9 = vmax.f32 %v7807_v50, 0.0  ;;  %v13301_v20 = vpop.f32.mrb[134].mxu0  ;;  %14541 = vmatprep.subr.bf16.mxu1 %v14540_v40 }
0x37cd   :  { %v7822_v4 = vadd.f32 %v17082_v22, %v13301_v20  ;;  %v7816_v63 = vpop.f32.mrb[135].mxu0  ;;  %14543 = vmatpush3.bf16.msra.mxu1 %v14540_v40 }
0x37ce   :  { %v14544_v43 = vpack.c.bf16 %v7830_v41, %v7829_v9  ;;  %v7817_v34 = vadd.f32 %v17085_v3, %v7816_v63 }
0x37cf   :  { %v7832_v16 = vmax.f32 %v7822_v4, 0.0 }
0x37d0   :  { %v7831_v17 = vmax.f32 %v7817_v34, 0.0  ;;  %14545 = vmatprep.subr.bf16.mxu1 %v14544_v43 }
0x37d1   :  { %14547 = vmatpush3.bf16.msra.mxu1 %v14544_v43 }
0x37d2   :  { %v14548_v29 = vpack.c.bf16 %v7832_v16, %v7831_v17 }
0x37d4   :  { %14549 = vmatprep.subr.bf16.mxu1 %v14548_v29 }
0x37d5   :  { %14551 = vmatpush3.bf16.msra.mxu1 %v14548_v29 }
0x37d8   :  { %13319 = vmatmul.mubr.msk.f32.vlgmr.msra.gmra.mrb[150].mxu1 %vm4870_vm4, %v16415_v42 }
0x37d9   :  { %13321 = vmatprep.mubr.msk.f32.mxu1 %vm4870_vm4, %v16418_v19 }
0x37dc   :  { %13322 = vmatmul.mubr.msk.f32.gmra.mrb[152].mxu1 %vm4870_vm4, %v16429_v48 }
0x37dd   :  { %13324 = vmatprep.mubr.msk.f32.mxu1 %vm4870_vm4, %v16432_v36 }
0x37e0   :  { %13325 = vmatmul.mubr.msk.f32.gmra.mrb[154].mxu1 %vm4870_vm4, %v16439_v37 }
0x37e1   :  { %13327 = vmatprep.mubr.msk.f32.mxu1 %vm4870_vm4, %v16442_v32 }
0x37e4   :  { %13328 = vmatmul.mubr.msk.f32.gmra.mrb[156].mxu1 %vm4870_vm4, %v16448_v45 }
0x37e5   :  { %13374 = vmatprep.mubr.msk.f32.mxu1 %vm4870_vm4, %v16413_v25 }
0x38ab   :  { %v13320_v46 = vpop.f32.mrb[150].mxu1 }
0x38ac   :  { %v7905_v51 = vadd.f32 %v17064_v24, %v13320_v46  ;;  %v7899_v53 = vpop.f32.mrb[151].mxu1 }
0x38ad   :  { %v7900_v58 = vadd.f32 %v17067_v8, %v7899_v53 }
0x38ae   :  { %v7939_v59 = vmax.f32 %v7905_v51, 0.0 }
0x38af   :  { %v7938_v60 = vmax.f32 %v7900_v58, 0.0  ;;  %v13323_v5 = vpop.f32.mrb[152].mxu1 }
0x38b0   :  { %v7915_v6 = vadd.f32 %v17070_v27, %v13323_v5  ;;  %v7909_v7 = vpop.f32.mrb[153].mxu1 }
0x38b1   :  { %v14552_v13 = vpack.c.bf16 %v7939_v59, %v7938_v60  ;;  %v7910_v14 = vadd.f32 %v17073_v47, %v7909_v7 }
0x38b2   :  { %v7941_v15 = vmax.f32 %v7915_v6, 0.0 }
0x38b3   :  { %v7940_v21 = vmax.f32 %v7910_v14, 0.0  ;;  %v13326_v23 = vpop.f32.mrb[154].mxu1  ;;  %14553 = vmatprep.subr.bf16.mxu0 %v14552_v13 }
0x38b4   :  { %v7925_v26 = vadd.f32 %v17076_v62, %v13326_v23  ;;  %v7919_v28 = vpop.f32.mrb[155].mxu1  ;;  %14555 = vmatpush3.bf16.msra.mxu0 %v14552_v13 }
0x38b5   :  { %v14556_v1 = vpack.c.bf16 %v7941_v15, %v7940_v21  ;;  %v7920_v11 = vadd.f32 %v17079_v12, %v7919_v28 }
0x38b6   :  { %v7943_v30 = vmax.f32 %v7925_v26, 0.0 }
0x38b7   :  { %v7942_v49 = vmax.f32 %v7920_v11, 0.0  ;;  %v13329_v55 = vpop.f32.mrb[156].mxu1  ;;  %14557 = vmatprep.subr.bf16.mxu0 %v14556_v1 }
0x38b8   :  { %v7935_v2 = vadd.f32 %v17082_v22, %v13329_v55  ;;  %v7929_v57 = vpop.f32.mrb[157].mxu1  ;;  %14559 = vmatpush3.bf16.msra.mxu0 %v14556_v1 }
0x38b9   :  { %v14560_v31 = vpack.c.bf16 %v7943_v30, %v7942_v49  ;;  %v7930_v33 = vadd.f32 %v17085_v3, %v7929_v57 }
0x38ba   :  { %v7945_v35 = vmax.f32 %v7935_v2, 0.0 }
0x38bb   :  { %v7944_v10 = vmax.f32 %v7930_v33, 0.0  ;;  %14561 = vmatprep.subr.bf16.mxu0 %v14560_v31 }
0x38bc   :  { %14563 = vmatpush3.bf16.msra.mxu0 %v14560_v31 }
0x38bd   :  { %v14564_v38 = vpack.c.bf16 %v7945_v35, %v7944_v10 }
0x38bf   :  { %14565 = vmatprep.subr.bf16.mxu0 %v14564_v38 }
0x38c0   :  { %14567 = vmatpush3.bf16.msra.mxu0 %v14564_v38 }
0x38c3   :  { %13347 = vmatmul.mubr.msk.f32.vlgmr.msra.gmra.mrb[136].mxu0 %vm4870_vm4, %v16415_v42 }
0x38c4   :  { %13349 = vmatprep.mubr.msk.f32.mxu0 %vm4870_vm4, %v16418_v19 }
0x38c7   :  { %13350 = vmatmul.mubr.msk.f32.gmra.mrb[138].mxu0 %vm4870_vm4, %v16429_v48 }
0x38c8   :  { %13352 = vmatprep.mubr.msk.f32.mxu0 %vm4870_vm4, %v16432_v36 }
0x38cb   :  { %13353 = vmatmul.mubr.msk.f32.gmra.mrb[140].mxu0 %vm4870_vm4, %v16439_v37 }
0x38cc   :  { %13355 = vmatprep.mubr.msk.f32.mxu0 %vm4870_vm4, %v16442_v32 }
0x38cf   :  { %13356 = vmatmul.mubr.msk.f32.gmra.mrb[142].mxu0 %vm4870_vm4, %v16448_v45 }
0x38d0   :  { %13402 = vmatprep.mubr.msk.f32.mxu0 %vm4870_vm4, %v16413_v25 }
0x3996   :  { %v13348_v18 = vpop.f32.mrb[136].mxu0 }
0x3997   :  { %v8018_v44 = vadd.f32 %v17064_v24, %v13348_v18  ;;  %v8012_v52 = vpop.f32.mrb[137].mxu0 }
0x3998   :  { %v8013_v54 = vadd.f32 %v17067_v8, %v8012_v52 }
0x3999   :  { %v8052_v39 = vmax.f32 %v8018_v44, 0.0 }
0x399a   :  { %v8051_v56 = vmax.f32 %v8013_v54, 0.0  ;;  %v13351_v0 = vpop.f32.mrb[138].mxu0 }
0x399b   :  { %v8028_v61 = vadd.f32 %v17070_v27, %v13351_v0  ;;  %v8022_v40 = vpop.f32.mrb[139].mxu0 }
0x399c   :  { %v14568_v50 = vpack.c.bf16 %v8052_v39, %v8051_v56  ;;  %v8023_v41 = vadd.f32 %v17073_v47, %v8022_v40 }
0x399d   :  { %v8054_v9 = vmax.f32 %v8028_v61, 0.0 }
0x399e   :  { %v8053_v20 = vmax.f32 %v8023_v41, 0.0  ;;  %v13354_v4 = vpop.f32.mrb[140].mxu0  ;;  %14569 = vmatprep.subr.bf16.mxu1 %v14568_v50 }
0x399f   :  { %v8038_v63 = vadd.f32 %v17076_v62, %v13354_v4  ;;  %v8032_v43 = vpop.f32.mrb[141].mxu0  ;;  %14571 = vmatpush3.bf16.msra.mxu1 %v14568_v50 }
0x39a0   :  { %v14572_v34 = vpack.c.bf16 %v8054_v9, %v8053_v20  ;;  %v8033_v16 = vadd.f32 %v17079_v12, %v8032_v43 }
0x39a1   :  { %v8056_v17 = vmax.f32 %v8038_v63, 0.0 }
0x39a2   :  { %v8055_v29 = vmax.f32 %v8033_v16, 0.0  ;;  %v13357_v46 = vpop.f32.mrb[142].mxu0  ;;  %14573 = vmatprep.subr.bf16.mxu1 %v14572_v34 }
0x39a3   :  { %v8048_v51 = vadd.f32 %v17082_v22, %v13357_v46  ;;  %v8042_v53 = vpop.f32.mrb[143].mxu0  ;;  %14575 = vmatpush3.bf16.msra.mxu1 %v14572_v34 }
0x39a4   :  { %v14576_v58 = vpack.c.bf16 %v8056_v17, %v8055_v29  ;;  %v8043_v59 = vadd.f32 %v17085_v3, %v8042_v53 }
0x39a5   :  { %v8058_v60 = vmax.f32 %v8048_v51, 0.0 }
0x39a6   :  { %v8057_v5 = vmax.f32 %v8043_v59, 0.0  ;;  %14577 = vmatprep.subr.bf16.mxu1 %v14576_v58 }
0x39a7   :  { %14579 = vmatpush3.bf16.msra.mxu1 %v14576_v58 }
0x39a8   :  { %v14580_v6 = vpack.c.bf16 %v8058_v60, %v8057_v5 }
0x39aa   :  { %14581 = vmatprep.subr.bf16.mxu1 %v14580_v6 }
0x39ab   :  { %14583 = vmatpush3.bf16.msra.mxu1 %v14580_v6 }
0x39ae   :  { %13375 = vmatmul.mubr.msk.f32.vlgmr.msra.gmra.mrb[158].mxu1 %vm4870_vm4, %v16415_v42 }
0x39af   :  { %13377 = vmatprep.mubr.msk.f32.mxu1 %vm4870_vm4, %v16418_v19 }
0x39b2   :  { %13378 = vmatmul.mubr.msk.f32.gmra.mrb[160].mxu1 %vm4870_vm4, %v16429_v48 }
0x39b3   :  { %13380 = vmatprep.mubr.msk.f32.mxu1 %vm4870_vm4, %v16432_v36 }
0x39b6   :  { %13381 = vmatmul.mubr.msk.f32.gmra.mrb[162].mxu1 %vm4870_vm4, %v16439_v37 }
0x39b7   :  { %13383 = vmatprep.mubr.msk.f32.mxu1 %vm4870_vm4, %v16442_v32 }
0x39ba   :  { %13384 = vmatmul.mubr.msk.f32.gmra.mrb[164].mxu1 %vm4870_vm4, %v16448_v45 }
0x39bb   :  { %13430 = vmatprep.mubr.msk.f32.mxu1 %vm4870_vm4, %v16413_v25 }
0x3a81   :  { %v13376_v7 = vpop.f32.mrb[158].mxu1 }
0x3a82   :  { %v8131_v13 = vadd.f32 %v17064_v24, %v13376_v7  ;;  %v8125_v14 = vpop.f32.mrb[159].mxu1 }
0x3a83   :  { %v8126_v15 = vadd.f32 %v17067_v8, %v8125_v14 }
0x3a84   :  { %v8165_v21 = vmax.f32 %v8131_v13, 0.0 }
0x3a85   :  { %v8164_v23 = vmax.f32 %v8126_v15, 0.0  ;;  %v13379_v26 = vpop.f32.mrb[160].mxu1 }
0x3a86   :  { %v8141_v28 = vadd.f32 %v17070_v27, %v13379_v26  ;;  %v8135_v1 = vpop.f32.mrb[161].mxu1 }
0x3a87   :  { %v14584_v11 = vpack.c.bf16 %v8165_v21, %v8164_v23  ;;  %v8136_v30 = vadd.f32 %v17073_v47, %v8135_v1 }
0x3a88   :  { %v8167_v49 = vmax.f32 %v8141_v28, 0.0 }
0x3a89   :  { %v8166_v55 = vmax.f32 %v8136_v30, 0.0  ;;  %v13382_v2 = vpop.f32.mrb[162].mxu1  ;;  %14585 = vmatprep.subr.bf16.mxu0 %v14584_v11 }
0x3a8a   :  { %v8151_v57 = vadd.f32 %v17076_v62, %v13382_v2  ;;  %v8145_v31 = vpop.f32.mrb[163].mxu1  ;;  %14587 = vmatpush3.bf16.msra.mxu0 %v14584_v11 }
0x3a8b   :  { %v14588_v33 = vpack.c.bf16 %v8167_v49, %v8166_v55  ;;  %v8146_v35 = vadd.f32 %v17079_v12, %v8145_v31 }
0x3a8c   :  { %v8169_v10 = vmax.f32 %v8151_v57, 0.0 }
0x3a8d   :  { %v8168_v38 = vmax.f32 %v8146_v35, 0.0  ;;  %v13385_v18 = vpop.f32.mrb[164].mxu1  ;;  %14589 = vmatprep.subr.bf16.mxu0 %v14588_v33 }
0x3a8e   :  { %v8161_v44 = vadd.f32 %v17082_v22, %v13385_v18  ;;  %v8155_v52 = vpop.f32.mrb[165].mxu1  ;;  %14591 = vmatpush3.bf16.msra.mxu0 %v14588_v33 }
0x3a8f   :  { %v14592_v54 = vpack.c.bf16 %v8169_v10, %v8168_v38  ;;  %v8156_v39 = vadd.f32 %v17085_v3, %v8155_v52 }
0x3a90   :  { %v8171_v56 = vmax.f32 %v8161_v44, 0.0 }
0x3a91   :  { %v8170_v0 = vmax.f32 %v8156_v39, 0.0  ;;  %14593 = vmatprep.subr.bf16.mxu0 %v14592_v54 }
0x3a92   :  { %14595 = vmatpush3.bf16.msra.mxu0 %v14592_v54 }
0x3a93   :  { %v14596_v61 = vpack.c.bf16 %v8171_v56, %v8170_v0 }
0x3a95   :  { %14597 = vmatprep.subr.bf16.mxu0 %v14596_v61 }
0x3a96   :  { %14599 = vmatpush3.bf16.msra.mxu0 %v14596_v61 }
0x3a99   :  { %13403 = vmatmul.mubr.msk.f32.vlgmr.msra.gmra.mrb[144].mxu0 %vm4870_vm4, %v16415_v42 }
0x3a9a   :  { %13405 = vmatprep.mubr.msk.f32.mxu0 %vm4870_vm4, %v16418_v19 }
0x3a9d   :  { %13406 = vmatmul.mubr.msk.f32.gmra.mrb[146].mxu0 %vm4870_vm4, %v16429_v48 }
0x3a9e   :  { %13408 = vmatprep.mubr.msk.f32.mxu0 %vm4870_vm4, %v16432_v36 }
0x3aa1   :  { %13409 = vmatmul.mubr.msk.f32.gmra.mrb[148].mxu0 %vm4870_vm4, %v16439_v37 }
0x3aa2   :  { %13411 = vmatprep.mubr.msk.f32.mxu0 %vm4870_vm4, %v16442_v32 }
0x3aa5   :  { %13412 = vmatmul.mubr.msk.f32.gmra.mrb[150].mxu0 %vm4870_vm4, %v16448_v45 }
0x3aa6   :  { %13458 = vmatprep.mubr.msk.f32.mxu0 %vm4870_vm4, %v16413_v25 }
0x3b6c   :  { %v13404_v40 = vpop.f32.mrb[144].mxu0 }
0x3b6d   :  { %v8244_v50 = vadd.f32 %v17064_v24, %v13404_v40  ;;  %v8238_v41 = vpop.f32.mrb[145].mxu0 }
0x3b6e   :  { %v8239_v9 = vadd.f32 %v17067_v8, %v8238_v41 }
0x3b6f   :  { %v8278_v20 = vmax.f32 %v8244_v50, 0.0 }
0x3b70   :  { %v8277_v4 = vmax.f32 %v8239_v9, 0.0  ;;  %v13407_v63 = vpop.f32.mrb[146].mxu0 }
0x3b71   :  { %v8254_v43 = vadd.f32 %v17070_v27, %v13407_v63  ;;  %v8248_v34 = vpop.f32.mrb[147].mxu0 }
0x3b72   :  { %v14600_v16 = vpack.c.bf16 %v8278_v20, %v8277_v4  ;;  %v8249_v17 = vadd.f32 %v17073_v47, %v8248_v34 }
0x3b73   :  { %v8280_v29 = vmax.f32 %v8254_v43, 0.0 }
0x3b74   :  { %v8279_v46 = vmax.f32 %v8249_v17, 0.0  ;;  %v13410_v51 = vpop.f32.mrb[148].mxu0  ;;  %14601 = vmatprep.subr.bf16.mxu1 %v14600_v16 }
0x3b75   :  { %v8264_v53 = vadd.f32 %v17076_v62, %v13410_v51  ;;  %v8258_v58 = vpop.f32.mrb[149].mxu0  ;;  %14603 = vmatpush3.bf16.msra.mxu1 %v14600_v16 }
0x3b76   :  { %v14604_v59 = vpack.c.bf16 %v8280_v29, %v8279_v46  ;;  %v8259_v60 = vadd.f32 %v17079_v12, %v8258_v58 }
0x3b77   :  { %v8282_v5 = vmax.f32 %v8264_v53, 0.0 }
0x3b78   :  { %v8281_v6 = vmax.f32 %v8259_v60, 0.0  ;;  %v13413_v7 = vpop.f32.mrb[150].mxu0  ;;  %14605 = vmatprep.subr.bf16.mxu1 %v14604_v59 }
0x3b79   :  { %v8274_v13 = vadd.f32 %v17082_v22, %v13413_v7  ;;  %v8268_v14 = vpop.f32.mrb[151].mxu0  ;;  %14607 = vmatpush3.bf16.msra.mxu1 %v14604_v59 }
0x3b7a   :  { %v14608_v15 = vpack.c.bf16 %v8282_v5, %v8281_v6  ;;  %v8269_v21 = vadd.f32 %v17085_v3, %v8268_v14 }
0x3b7b   :  { %v8284_v23 = vmax.f32 %v8274_v13, 0.0 }
0x3b7c   :  { %v8283_v26 = vmax.f32 %v8269_v21, 0.0  ;;  %14609 = vmatprep.subr.bf16.mxu1 %v14608_v15 }
0x3b7d   :  { %14611 = vmatpush3.bf16.msra.mxu1 %v14608_v15 }
0x3b7e   :  { %v14612_v28 = vpack.c.bf16 %v8284_v23, %v8283_v26 }
0x3b80   :  { %14613 = vmatprep.subr.bf16.mxu1 %v14612_v28 }
0x3b81   :  { %14615 = vmatpush3.bf16.msra.mxu1 %v14612_v28 }
0x3b84   :  { %13431 = vmatmul.mubr.msk.f32.vlgmr.msra.gmra.mrb[166].mxu1 %vm4870_vm4, %v16415_v42 }
0x3b85   :  { %13433 = vmatprep.mubr.msk.f32.mxu1 %vm4870_vm4, %v16418_v19 }
0x3b88   :  { %13434 = vmatmul.mubr.msk.f32.gmra.mrb[168].mxu1 %vm4870_vm4, %v16429_v48 }
0x3b89   :  { %13436 = vmatprep.mubr.msk.f32.mxu1 %vm4870_vm4, %v16432_v36 }
0x3b8c   :  { %13437 = vmatmul.mubr.msk.f32.gmra.mrb[170].mxu1 %vm4870_vm4, %v16439_v37 }
0x3b8d   :  { %13439 = vmatprep.mubr.msk.f32.mxu1 %vm4870_vm4, %v16442_v32 }
0x3b90   :  { %13440 = vmatmul.mubr.msk.f32.gmra.mrb[172].mxu1 %vm4870_vm4, %v16448_v45 }
0x3b91   :  { %13486 = vmatprep.mubr.msk.f32.mxu1 %vm4870_vm4, %v16413_v25 }
0x3c57   :  { %v13432_v1 = vpop.f32.mrb[166].mxu1 }
0x3c58   :  { %v8357_v11 = vadd.f32 %v17064_v24, %v13432_v1  ;;  %v8351_v30 = vpop.f32.mrb[167].mxu1 }
0x3c59   :  { %v8352_v49 = vadd.f32 %v17067_v8, %v8351_v30 }
0x3c5a   :  { %v8391_v55 = vmax.f32 %v8357_v11, 0.0 }
0x3c5b   :  { %v8390_v2 = vmax.f32 %v8352_v49, 0.0  ;;  %v13435_v57 = vpop.f32.mrb[168].mxu1 }
0x3c5c   :  { %v8367_v31 = vadd.f32 %v17070_v27, %v13435_v57  ;;  %v8361_v33 = vpop.f32.mrb[169].mxu1 }
0x3c5d   :  { %v14616_v35 = vpack.c.bf16 %v8391_v55, %v8390_v2  ;;  %v8362_v10 = vadd.f32 %v17073_v47, %v8361_v33 }
0x3c5e   :  { %v8393_v38 = vmax.f32 %v8367_v31, 0.0 }
0x3c5f   :  { %v8392_v18 = vmax.f32 %v8362_v10, 0.0  ;;  %v13438_v44 = vpop.f32.mrb[170].mxu1  ;;  %14617 = vmatprep.subr.bf16.mxu0 %v14616_v35 }
0x3c60   :  { %v8377_v52 = vadd.f32 %v17076_v62, %v13438_v44  ;;  %v8371_v54 = vpop.f32.mrb[171].mxu1  ;;  %14619 = vmatpush3.bf16.msra.mxu0 %v14616_v35 }
0x3c61   :  { %v14620_v39 = vpack.c.bf16 %v8393_v38, %v8392_v18  ;;  %v8372_v56 = vadd.f32 %v17079_v12, %v8371_v54 }
0x3c62   :  { %v8395_v0 = vmax.f32 %v8377_v52, 0.0 }
0x3c63   :  { %v8394_v61 = vmax.f32 %v8372_v56, 0.0  ;;  %v13441_v40 = vpop.f32.mrb[172].mxu1  ;;  %14621 = vmatprep.subr.bf16.mxu0 %v14620_v39 }
0x3c64   :  { %v8387_v50 = vadd.f32 %v17082_v22, %v13441_v40  ;;  %v8381_v41 = vpop.f32.mrb[173].mxu1  ;;  %14623 = vmatpush3.bf16.msra.mxu0 %v14620_v39 }
0x3c65   :  { %v14624_v9 = vpack.c.bf16 %v8395_v0, %v8394_v61  ;;  %v8382_v20 = vadd.f32 %v17085_v3, %v8381_v41 }
0x3c66   :  { %v8397_v4 = vmax.f32 %v8387_v50, 0.0 }
0x3c67   :  { %v8396_v63 = vmax.f32 %v8382_v20, 0.0  ;;  %14625 = vmatprep.subr.bf16.mxu0 %v14624_v9 }
0x3c68   :  { %14627 = vmatpush3.bf16.msra.mxu0 %v14624_v9 }
0x3c69   :  { %v14628_v43 = vpack.c.bf16 %v8397_v4, %v8396_v63 }
0x3c6b   :  { %14629 = vmatprep.subr.bf16.mxu0 %v14628_v43 }
0x3c6c   :  { %14631 = vmatpush3.bf16.msra.mxu0 %v14628_v43 }
0x3c6f   :  { %13459 = vmatmul.mubr.msk.f32.vlgmr.msra.gmra.mrb[152].mxu0 %vm4870_vm4, %v16415_v42 }
0x3c70   :  { %13461 = vmatprep.mubr.msk.f32.mxu0 %vm4870_vm4, %v16418_v19 }
0x3c73   :  { %13462 = vmatmul.mubr.msk.f32.gmra.mrb[154].mxu0 %vm4870_vm4, %v16429_v48 }
0x3c74   :  { %13464 = vmatprep.mubr.msk.f32.mxu0 %vm4870_vm4, %v16432_v36 }
0x3c77   :  { %13465 = vmatmul.mubr.msk.f32.gmra.mrb[156].mxu0 %vm4870_vm4, %v16439_v37 }
0x3c78   :  { %13467 = vmatprep.mubr.msk.f32.mxu0 %vm4870_vm4, %v16442_v32 }
0x3c7b   :  { %13468 = vmatmul.mubr.msk.f32.gmra.mrb[158].mxu0 %vm4870_vm4, %v16448_v45 }
0x3c7c   :  { %13514 = vmatprep.mubr.msk.f32.mxu0 %vm4870_vm4, %v16413_v25 }
0x3d42   :  { %v13460_v34 = vpop.f32.mrb[152].mxu0 }
0x3d43   :  { %v8470_v16 = vadd.f32 %v17064_v24, %v13460_v34  ;;  %v8464_v17 = vpop.f32.mrb[153].mxu0 }
0x3d44   :  { %v8465_v29 = vadd.f32 %v17067_v8, %v8464_v17 }
0x3d45   :  { %v8504_v46 = vmax.f32 %v8470_v16, 0.0 }
0x3d46   :  { %v8503_v51 = vmax.f32 %v8465_v29, 0.0  ;;  %v13463_v53 = vpop.f32.mrb[154].mxu0 }
0x3d47   :  { %v8480_v58 = vadd.f32 %v17070_v27, %v13463_v53  ;;  %v8474_v59 = vpop.f32.mrb[155].mxu0 }
0x3d48   :  { %v14632_v60 = vpack.c.bf16 %v8504_v46, %v8503_v51  ;;  %v8475_v5 = vadd.f32 %v17073_v47, %v8474_v59 }
0x3d49   :  { %v8506_v6 = vmax.f32 %v8480_v58, 0.0 }
0x3d4a   :  { %v8505_v7 = vmax.f32 %v8475_v5, 0.0  ;;  %v13466_v13 = vpop.f32.mrb[156].mxu0  ;;  %14633 = vmatprep.subr.bf16.mxu1 %v14632_v60 }
0x3d4b   :  { %v8490_v14 = vadd.f32 %v17076_v62, %v13466_v13  ;;  %v8484_v15 = vpop.f32.mrb[157].mxu0  ;;  %14635 = vmatpush3.bf16.msra.mxu1 %v14632_v60 }
0x3d4c   :  { %v14636_v21 = vpack.c.bf16 %v8506_v6, %v8505_v7  ;;  %v8485_v23 = vadd.f32 %v17079_v12, %v8484_v15 }
0x3d4d   :  { %v8508_v26 = vmax.f32 %v8490_v14, 0.0 }
0x3d4e   :  { %v8507_v28 = vmax.f32 %v8485_v23, 0.0  ;;  %v13469_v1 = vpop.f32.mrb[158].mxu0  ;;  %14637 = vmatprep.subr.bf16.mxu1 %v14636_v21 }
0x3d4f   :  { %v8500_v11 = vadd.f32 %v17082_v22, %v13469_v1  ;;  %v8494_v30 = vpop.f32.mrb[159].mxu0  ;;  %14639 = vmatpush3.bf16.msra.mxu1 %v14636_v21 }
0x3d50   :  { %v14640_v49 = vpack.c.bf16 %v8508_v26, %v8507_v28  ;;  %v8495_v55 = vadd.f32 %v17085_v3, %v8494_v30 }
0x3d51   :  { %v8510_v2 = vmax.f32 %v8500_v11, 0.0 }
0x3d52   :  { %v8509_v57 = vmax.f32 %v8495_v55, 0.0  ;;  %14641 = vmatprep.subr.bf16.mxu1 %v14640_v49 }
0x3d53   :  { %14643 = vmatpush3.bf16.msra.mxu1 %v14640_v49 }
0x3d54   :  { %v14644_v31 = vpack.c.bf16 %v8510_v2, %v8509_v57 }
0x3d56   :  { %14645 = vmatprep.subr.bf16.mxu1 %v14644_v31 }
0x3d57   :  { %14647 = vmatpush3.bf16.msra.mxu1 %v14644_v31 }
0x3d5a   :  { %13487 = vmatmul.mubr.msk.f32.vlgmr.msra.gmra.mrb[174].mxu1 %vm4870_vm4, %v16415_v42 }
0x3d5b   :  { %13489 = vmatprep.mubr.msk.f32.mxu1 %vm4870_vm4, %v16418_v19 }
0x3d5e   :  { %13490 = vmatmul.mubr.msk.f32.gmra.mrb[176].mxu1 %vm4870_vm4, %v16429_v48 }
0x3d5f   :  { %13492 = vmatprep.mubr.msk.f32.mxu1 %vm4870_vm4, %v16432_v36 }
0x3d62   :  { %13493 = vmatmul.mubr.msk.f32.gmra.mrb[178].mxu1 %vm4870_vm4, %v16439_v37 }
0x3d63   :  { %13495 = vmatprep.mubr.msk.f32.mxu1 %vm4870_vm4, %v16442_v32 }
0x3d66   :  { %13496 = vmatmul.mubr.msk.f32.gmra.mrb[180].mxu1 %vm4870_vm4, %v16448_v45 }
0x3d67   :  { %13542 = vmatprep.mubr.msk.f32.mxu1 %vm4870_vm4, %v16413_v25 }
0x3e2d   :  { %v13488_v33 = vpop.f32.mrb[174].mxu1 }
0x3e2e   :  { %v8583_v35 = vadd.f32 %v17064_v24, %v13488_v33  ;;  %v8577_v10 = vpop.f32.mrb[175].mxu1 }
0x3e2f   :  { %v8578_v38 = vadd.f32 %v17067_v8, %v8577_v10 }
0x3e30   :  { %v8617_v18 = vmax.f32 %v8583_v35, 0.0 }
0x3e31   :  { %v8616_v44 = vmax.f32 %v8578_v38, 0.0  ;;  %v13491_v52 = vpop.f32.mrb[176].mxu1 }
0x3e32   :  { %v8593_v54 = vadd.f32 %v17070_v27, %v13491_v52  ;;  %v8587_v39 = vpop.f32.mrb[177].mxu1 }
0x3e33   :  { %v14648_v56 = vpack.c.bf16 %v8617_v18, %v8616_v44  ;;  %v8588_v0 = vadd.f32 %v17073_v47, %v8587_v39 }
0x3e34   :  { %v8619_v61 = vmax.f32 %v8593_v54, 0.0 }
0x3e35   :  { %v8618_v40 = vmax.f32 %v8588_v0, 0.0  ;;  %v13494_v50 = vpop.f32.mrb[178].mxu1  ;;  %14649 = vmatprep.subr.bf16.mxu0 %v14648_v56 }
0x3e36   :  { %v8603_v41 = vadd.f32 %v17076_v62, %v13494_v50  ;;  %v8597_v9 = vpop.f32.mrb[179].mxu1  ;;  %14651 = vmatpush3.bf16.msra.mxu0 %v14648_v56 }
0x3e37   :  { %v14652_v20 = vpack.c.bf16 %v8619_v61, %v8618_v40  ;;  %v8598_v4 = vadd.f32 %v17079_v12, %v8597_v9 }
0x3e38   :  { %v8621_v63 = vmax.f32 %v8603_v41, 0.0 }
0x3e39   :  { %v8620_v43 = vmax.f32 %v8598_v4, 0.0  ;;  %v13497_v34 = vpop.f32.mrb[180].mxu1  ;;  %14653 = vmatprep.subr.bf16.mxu0 %v14652_v20 }
0x3e3a   :  { %v8613_v16 = vadd.f32 %v17082_v22, %v13497_v34  ;;  %v8607_v17 = vpop.f32.mrb[181].mxu1  ;;  %14655 = vmatpush3.bf16.msra.mxu0 %v14652_v20 }
0x3e3b   :  { %v14656_v29 = vpack.c.bf16 %v8621_v63, %v8620_v43  ;;  %v8608_v46 = vadd.f32 %v17085_v3, %v8607_v17 }
0x3e3c   :  { %v8623_v51 = vmax.f32 %v8613_v16, 0.0 }
0x3e3d   :  { %v8622_v53 = vmax.f32 %v8608_v46, 0.0  ;;  %14657 = vmatprep.subr.bf16.mxu0 %v14656_v29 }
0x3e3e   :  { %14659 = vmatpush3.bf16.msra.mxu0 %v14656_v29 }
0x3e3f   :  { %v14660_v58 = vpack.c.bf16 %v8623_v51, %v8622_v53 }
0x3e41   :  { %14661 = vmatprep.subr.bf16.mxu0 %v14660_v58 }
0x3e42   :  { %14663 = vmatpush3.bf16.msra.mxu0 %v14660_v58 }
0x3e45   :  { %13515 = vmatmul.mubr.msk.f32.vlgmr.msra.gmra.mrb[160].mxu0 %vm4870_vm4, %v16415_v42 }
0x3e46   :  { %13517 = vmatprep.mubr.msk.f32.mxu0 %vm4870_vm4, %v16418_v19 }
0x3e49   :  { %13518 = vmatmul.mubr.msk.f32.gmra.mrb[162].mxu0 %vm4870_vm4, %v16429_v48 }
0x3e4a   :  { %13520 = vmatprep.mubr.msk.f32.mxu0 %vm4870_vm4, %v16432_v36 }
0x3e4d   :  { %13521 = vmatmul.mubr.msk.f32.gmra.mrb[164].mxu0 %vm4870_vm4, %v16439_v37 }
0x3e4e   :  { %13523 = vmatprep.mubr.msk.f32.mxu0 %vm4870_vm4, %v16442_v32 }
0x3e51   :  { %13524 = vmatmul.mubr.msk.f32.gmra.mrb[166].mxu0 %vm4870_vm4, %v16448_v45 }
0x3e52   :  { %13570 = vmatprep.mubr.msk.f32.mxu0 %vm4870_vm4, %v16413_v25 }
0x3f18   :  { %v13516_v59 = vpop.f32.mrb[160].mxu0 }
0x3f19   :  { %v8696_v60 = vadd.f32 %v17064_v24, %v13516_v59  ;;  %v8690_v5 = vpop.f32.mrb[161].mxu0 }
0x3f1a   :  { %v8691_v6 = vadd.f32 %v17067_v8, %v8690_v5 }
0x3f1b   :  { %v8730_v7 = vmax.f32 %v8696_v60, 0.0 }
0x3f1c   :  { %v8729_v13 = vmax.f32 %v8691_v6, 0.0  ;;  %v13519_v14 = vpop.f32.mrb[162].mxu0 }
0x3f1d   :  { %v8706_v15 = vadd.f32 %v17070_v27, %v13519_v14  ;;  %v8700_v21 = vpop.f32.mrb[163].mxu0 }
0x3f1e   :  { %v14664_v23 = vpack.c.bf16 %v8730_v7, %v8729_v13  ;;  %v8701_v26 = vadd.f32 %v17073_v47, %v8700_v21 }
0x3f1f   :  { %v8732_v28 = vmax.f32 %v8706_v15, 0.0 }
0x3f20   :  { %v8731_v1 = vmax.f32 %v8701_v26, 0.0  ;;  %v13522_v11 = vpop.f32.mrb[164].mxu0  ;;  %14665 = vmatprep.subr.bf16.mxu1 %v14664_v23 }
0x3f21   :  { %v8716_v30 = vadd.f32 %v17076_v62, %v13522_v11  ;;  %v8710_v49 = vpop.f32.mrb[165].mxu0  ;;  %14667 = vmatpush3.bf16.msra.mxu1 %v14664_v23 }
0x3f22   :  { %v14668_v55 = vpack.c.bf16 %v8732_v28, %v8731_v1  ;;  %v8711_v2 = vadd.f32 %v17079_v12, %v8710_v49 }
0x3f23   :  { %v8734_v57 = vmax.f32 %v8716_v30, 0.0 }
0x3f24   :  { %v8733_v31 = vmax.f32 %v8711_v2, 0.0  ;;  %v13525_v33 = vpop.f32.mrb[166].mxu0  ;;  %14669 = vmatprep.subr.bf16.mxu1 %v14668_v55 }
0x3f25   :  { %v8726_v35 = vadd.f32 %v17082_v22, %v13525_v33  ;;  %v8720_v10 = vpop.f32.mrb[167].mxu0  ;;  %14671 = vmatpush3.bf16.msra.mxu1 %v14668_v55 }
0x3f26   :  { %v14672_v38 = vpack.c.bf16 %v8734_v57, %v8733_v31  ;;  %v8721_v18 = vadd.f32 %v17085_v3, %v8720_v10 }
0x3f27   :  { %v8736_v44 = vmax.f32 %v8726_v35, 0.0 }
0x3f28   :  { %v8735_v52 = vmax.f32 %v8721_v18, 0.0  ;;  %14673 = vmatprep.subr.bf16.mxu1 %v14672_v38 }
0x3f29   :  { %14675 = vmatpush3.bf16.msra.mxu1 %v14672_v38 }
0x3f2a   :  { %v14676_v54 = vpack.c.bf16 %v8736_v44, %v8735_v52 }
0x3f2c   :  { %14677 = vmatprep.subr.bf16.mxu1 %v14676_v54 }
0x3f2d   :  { %14679 = vmatpush3.bf16.msra.mxu1 %v14676_v54 }
0x3f30   :  { %13543 = vmatmul.mubr.msk.f32.vlgmr.msra.gmra.mrb[182].mxu1 %vm4870_vm4, %v16415_v42 }
0x3f31   :  { %13545 = vmatprep.mubr.msk.f32.mxu1 %vm4870_vm4, %v16418_v19 }
0x3f34   :  { %13546 = vmatmul.mubr.msk.f32.gmra.mrb[184].mxu1 %vm4870_vm4, %v16429_v48 }
0x3f35   :  { %13548 = vmatprep.mubr.msk.f32.mxu1 %vm4870_vm4, %v16432_v36 }
0x3f38   :  { %13549 = vmatmul.mubr.msk.f32.gmra.mrb[186].mxu1 %vm4870_vm4, %v16439_v37 }
0x3f39   :  { %13551 = vmatprep.mubr.msk.f32.mxu1 %vm4870_vm4, %v16442_v32 }
0x3f3c   :  { %13552 = vmatmul.mubr.msk.f32.gmra.mrb[188].mxu1 %vm4870_vm4, %v16448_v45 }
0x3f3d   :  { %13598 = vmatprep.mubr.msk.f32.mxu1 %vm4870_vm4, %v16413_v25 }
0x4003   :  { %v13544_v39 = vpop.f32.mrb[182].mxu1 }
0x4004   :  { %v8809_v56 = vadd.f32 %v17064_v24, %v13544_v39  ;;  %v8803_v0 = vpop.f32.mrb[183].mxu1 }
0x4005   :  { %v8804_v61 = vadd.f32 %v17067_v8, %v8803_v0 }
0x4006   :  { %v8843_v40 = vmax.f32 %v8809_v56, 0.0 }
0x4007   :  { %v8842_v50 = vmax.f32 %v8804_v61, 0.0  ;;  %v13547_v41 = vpop.f32.mrb[184].mxu1 }
0x4008   :  { %v8819_v9 = vadd.f32 %v17070_v27, %v13547_v41  ;;  %v8813_v20 = vpop.f32.mrb[185].mxu1 }
0x4009   :  { %v14680_v4 = vpack.c.bf16 %v8843_v40, %v8842_v50  ;;  %v8814_v63 = vadd.f32 %v17073_v47, %v8813_v20  ;;  %v17371_v40 = vld [vmem:[#allocation2] sm:$0xff] }
0x400a   :  { %v8845_v43 = vmax.f32 %v8819_v9, 0.0 }
0x400b   :  { %v8844_v34 = vmax.f32 %v8814_v63, 0.0  ;;  %v13550_v16 = vpop.f32.mrb[186].mxu1  ;;  %14681 = vmatprep.subr.bf16.mxu0 %v14680_v4 }
0x400c   :  { %v8829_v17 = vadd.f32 %v17076_v62, %v13550_v16  ;;  %v8823_v29 = vpop.f32.mrb[187].mxu1  ;;  %14683 = vmatpush3.bf16.msra.mxu0 %v14680_v4  ;;  %v17374_v4 = vld [vmem:[#allocation2 + $0x18] sm:$0xff]  ;;  %v17377_v16 = vld [vmem:[#allocation2 + $0x10] sm:$0xff] }
0x400d   :  { %v14684_v46 = vpack.c.bf16 %v8845_v43, %v8844_v34  ;;  %v8824_v51 = vadd.f32 %v17079_v12, %v8823_v29 }
0x400e   :  { %v8847_v53 = vmax.f32 %v8829_v17, 0.0 }
0x400f   :  { %v8846_v58 = vmax.f32 %v8824_v51, 0.0  ;;  %v13553_v59 = vpop.f32.mrb[188].mxu1  ;;  %14685 = vmatprep.subr.bf16.mxu0 %v14684_v46 }
0x4010   :  { %v8839_v60 = vadd.f32 %v17082_v22, %v13553_v59  ;;  %v8833_v5 = vpop.f32.mrb[189].mxu1  ;;  %14687 = vmatpush3.bf16.msra.mxu0 %v14684_v46 }
0x4011   :  { %v14688_v6 = vpack.c.bf16 %v8847_v53, %v8846_v58  ;;  %v8834_v7 = vadd.f32 %v17085_v3, %v8833_v5  ;;  %v17380_v53 = vld [vmem:[#allocation2 + $0x28] sm:$0xff]  ;;  %v17383_v5 = vld [vmem:[#allocation2 + $0x20] sm:$0xff] }
0x4012   :  { %v8849_v13 = vmax.f32 %v8839_v60, 0.0 }
0x4013   :  { %v8848_v14 = vmax.f32 %v8834_v7, 0.0  ;;  %14689 = vmatprep.subr.bf16.mxu0 %v14688_v6 }
0x4014   :  { %14691 = vmatpush3.bf16.msra.mxu0 %v14688_v6 }
0x4015   :  { %v14692_v15 = vpack.c.bf16 %v8849_v13, %v8848_v14 }
0x4017   :  { %14693 = vmatprep.subr.bf16.mxu0 %v14692_v15 }
0x4018   :  { %14695 = vmatpush3.bf16.msra.mxu0 %v14692_v15  ;;  %v17386_v15 = vld [vmem:[#allocation2 + $0x38] sm:$0xff] }
0x401b   :  { %13571 = vmatmul.mubr.msk.f32.vlgmr.msra.gmra.mrb[168].mxu0 %vm4870_vm4, %v16415_v42 }
0x401c   :  { %13573 = vmatprep.mubr.msk.f32.mxu0 %vm4870_vm4, %v16418_v19 }
0x401f   :  { %13574 = vmatmul.mubr.msk.f32.gmra.mrb[170].mxu0 %vm4870_vm4, %v16429_v48 }
0x4020   :  { %13576 = vmatprep.mubr.msk.f32.mxu0 %vm4870_vm4, %v16432_v36 }
0x4023   :  { %13577 = vmatmul.mubr.msk.f32.gmra.mrb[172].mxu0 %vm4870_vm4, %v16439_v37 }
0x4024   :  { %13579 = vmatprep.mubr.msk.f32.mxu0 %vm4870_vm4, %v16442_v32 }
0x4027   :  { %13580 = vmatmul.mubr.msk.f32.gmra.mrb[174].mxu0 %vm4870_vm4, %v16448_v45 }
0x4028   :  { %13626 = vmatprep.mubr.msk.f32.mxu0 %vm4870_vm4, %v16413_v25 }
0x40ee   :  { %v13572_v21 = vpop.f32.mrb[168].mxu0 }
0x40ef   :  { %v8922_v23 = vadd.f32 %v17064_v24, %v13572_v21  ;;  %v8916_v26 = vpop.f32.mrb[169].mxu0 }
0x40f0   :  { %v8917_v28 = vadd.f32 %v17067_v8, %v8916_v26 }
0x40f1   :  { %v8956_v1 = vmax.f32 %v8922_v23, 0.0 }
0x40f2   :  { %v8955_v11 = vmax.f32 %v8917_v28, 0.0  ;;  %v13575_v30 = vpop.f32.mrb[170].mxu0  ;;  %v17389_v28 = vld [vmem:[#allocation2 + $0x30] sm:$0xff] }
0x40f3   :  { %v8932_v49 = vadd.f32 %v17070_v27, %v13575_v30  ;;  %v8926_v55 = vpop.f32.mrb[171].mxu0 }
0x40f4   :  { %v14696_v2 = vpack.c.bf16 %v8956_v1, %v8955_v11  ;;  %v8927_v57 = vadd.f32 %v17073_v47, %v8926_v55 }
0x40f5   :  { %v8958_v31 = vmax.f32 %v8932_v49, 0.0 }
0x40f6   :  { %v8957_v33 = vmax.f32 %v8927_v57, 0.0  ;;  %v13578_v35 = vpop.f32.mrb[172].mxu0  ;;  %14697 = vmatprep.subr.bf16.mxu1 %v14696_v2 }
0x40f7   :  { %v8942_v10 = vadd.f32 %v17076_v62, %v13578_v35  ;;  %v8936_v38 = vpop.f32.mrb[173].mxu0  ;;  %14699 = vmatpush3.bf16.msra.mxu1 %v14696_v2 }
0x40f8   :  { %v14700_v24 = vpack.c.bf16 %v8958_v31, %v8957_v33  ;;  %v8937_v8 = vadd.f32 %v17079_v12, %v8936_v38 }
0x40f9   :  { %v8960_v18 = vmax.f32 %v8942_v10, 0.0 }
0x40fa   :  { %v8959_v44 = vmax.f32 %v8937_v8, 0.0  ;;  %v13581_v52 = vpop.f32.mrb[174].mxu0  ;;  %14701 = vmatprep.subr.bf16.mxu1 %v14700_v24 }
0x40fb   :  { %v8952_v27 = vadd.f32 %v17082_v22, %v13581_v52  ;;  %v8946_v54 = vpop.f32.mrb[175].mxu0  ;;  %14703 = vmatpush3.bf16.msra.mxu1 %v14700_v24  ;;  %v17368_v22 = vld [vmem:[#allocation2 + $0x8] sm:$0xff] }
0x40fc   :  { %v14704_v47 = vpack.c.bf16 %v8960_v18, %v8959_v44  ;;  %v8947_v39 = vadd.f32 %v17085_v3, %v8946_v54 }
0x40fd   :  { %v8962_v56 = vmax.f32 %v8952_v27, 0.0 }
0x40fe   :  { %v8961_v0 = vmax.f32 %v8947_v39, 0.0  ;;  %14705 = vmatprep.subr.bf16.mxu1 %v14704_v47 }
0x40ff   :  { %14707 = vmatpush3.bf16.msra.mxu1 %v14704_v47 }
0x4100   :  { %v14708_v62 = vpack.c.bf16 %v8962_v56, %v8961_v0 }
0x4102   :  { %14709 = vmatprep.subr.bf16.mxu1 %v14708_v62 }
0x4103   :  { %14711 = vmatpush3.bf16.msra.mxu1 %v14708_v62 }
0x4106   :  { %13599 = vmatmul.mubr.msk.f32.vlgmr.msra.gmra.mrb[190].mxu1 %vm4870_vm4, %v16415_v42 }
0x4107   :  { %13601 = vmatprep.mubr.msk.f32.mxu1 %vm4870_vm4, %v16418_v19 }
0x410a   :  { %13602 = vmatmul.mubr.msk.f32.gmra.mrb[192].mxu1 %vm4870_vm4, %v16429_v48 }
0x410b   :  { %13604 = vmatprep.mubr.msk.f32.mxu1 %vm4870_vm4, %v16432_v36 }
0x410e   :  { %13605 = vmatmul.mubr.msk.f32.gmra.mrb[194].mxu1 %vm4870_vm4, %v16439_v37 }
0x410f   :  { %13607 = vmatprep.mubr.msk.f32.mxu1 %vm4870_vm4, %v16442_v32 }
0x4112   :  { %13608 = vmatmul.mubr.msk.f32.gmra.mrb[196].mxu1 %vm4870_vm4, %v16448_v45 }
0x4113   :  { %13654 = vmatprep.mubr.msk.f32.mxu1 %vm4870_vm4, %v16413_v25 }
0x41d9   :  { %v13600_v12 = vpop.f32.mrb[190].mxu1 }
0x41da   :  { %v9035_v3 = vadd.f32 %v17368_v22, %v13600_v12  ;;  %v9029_v61 = vpop.f32.mrb[191].mxu1 }
0x41db   :  { %v9030_v50 = vadd.f32 %v17371_v40, %v9029_v61 }
0x41dc   :  { %v9069_v41 = vmax.f32 %v9035_v3, 0.0 }
0x41dd   :  { %v9068_v9 = vmax.f32 %v9030_v50, 0.0  ;;  %v13603_v20 = vpop.f32.mrb[192].mxu1 }
0x41de   :  { %v9045_v63 = vadd.f32 %v17374_v4, %v13603_v20  ;;  %v9039_v43 = vpop.f32.mrb[193].mxu1 }
0x41df   :  { %v14712_v34 = vpack.c.bf16 %v9069_v41, %v9068_v9  ;;  %v9040_v17 = vadd.f32 %v17377_v16, %v9039_v43 }
0x41e0   :  { %v9071_v29 = vmax.f32 %v9045_v63, 0.0 }
0x41e1   :  { %v9070_v46 = vmax.f32 %v9040_v17, 0.0  ;;  %v13606_v51 = vpop.f32.mrb[194].mxu1  ;;  %14713 = vmatprep.subr.bf16.mxu0 %v14712_v34 }
0x41e2   :  { %v9055_v58 = vadd.f32 %v17380_v53, %v13606_v51  ;;  %v9049_v59 = vpop.f32.mrb[195].mxu1  ;;  %14715 = vmatpush3.bf16.msra.mxu0 %v14712_v34 }
0x41e3   :  { %v14716_v60 = vpack.c.bf16 %v9071_v29, %v9070_v46  ;;  %v9050_v6 = vadd.f32 %v17383_v5, %v9049_v59 }
0x41e4   :  { %v9073_v7 = vmax.f32 %v9055_v58, 0.0 }
0x41e5   :  { %v9072_v13 = vmax.f32 %v9050_v6, 0.0  ;;  %v13609_v14 = vpop.f32.mrb[196].mxu1  ;;  %14717 = vmatprep.subr.bf16.mxu0 %v14716_v60 }
0x41e6   :  { %v9065_v21 = vadd.f32 %v17386_v15, %v13609_v14  ;;  %v9059_v23 = vpop.f32.mrb[197].mxu1  ;;  %14719 = vmatpush3.bf16.msra.mxu0 %v14716_v60 }
0x41e7   :  { %v14720_v26 = vpack.c.bf16 %v9073_v7, %v9072_v13  ;;  %v9060_v1 = vadd.f32 %v17389_v28, %v9059_v23 }
0x41e8   :  { %v9075_v11 = vmax.f32 %v9065_v21, 0.0 }
0x41e9   :  { %v9074_v30 = vmax.f32 %v9060_v1, 0.0  ;;  %14721 = vmatprep.subr.bf16.mxu0 %v14720_v26 }
0x41ea   :  { %14723 = vmatpush3.bf16.msra.mxu0 %v14720_v26 }
0x41eb   :  { %v14724_v49 = vpack.c.bf16 %v9075_v11, %v9074_v30 }
0x41ed   :  { %14725 = vmatprep.subr.bf16.mxu0 %v14724_v49 }
0x41ee   :  { %14727 = vmatpush3.bf16.msra.mxu0 %v14724_v49 }
0x41f1   :  { %13627 = vmatmul.mubr.msk.f32.vlgmr.msra.gmra.mrb[176].mxu0 %vm4870_vm4, %v16415_v42 }
0x41f2   :  { %13629 = vmatprep.mubr.msk.f32.mxu0 %vm4870_vm4, %v16418_v19 }
0x41f5   :  { %13630 = vmatmul.mubr.msk.f32.gmra.mrb[178].mxu0 %vm4870_vm4, %v16429_v48 }
0x41f6   :  { %13632 = vmatprep.mubr.msk.f32.mxu0 %vm4870_vm4, %v16432_v36 }
0x41f9   :  { %13633 = vmatmul.mubr.msk.f32.gmra.mrb[180].mxu0 %vm4870_vm4, %v16439_v37 }
0x41fa   :  { %13635 = vmatprep.mubr.msk.f32.mxu0 %vm4870_vm4, %v16442_v32 }
0x41fd   :  { %13636 = vmatmul.mubr.msk.f32.gmra.mrb[182].mxu0 %vm4870_vm4, %v16448_v45 }
0x41fe   :  { %13682 = vmatprep.mubr.msk.f32.mxu0 %vm4870_vm4, %v16413_v25 }
0x42c4   :  { %v13628_v55 = vpop.f32.mrb[176].mxu0 }
0x42c5   :  { %v9148_v2 = vadd.f32 %v17368_v22, %v13628_v55  ;;  %v9142_v57 = vpop.f32.mrb[177].mxu0 }
0x42c6   :  { %v9143_v31 = vadd.f32 %v17371_v40, %v9142_v57 }
0x42c7   :  { %v9182_v33 = vmax.f32 %v9148_v2, 0.0 }
0x42c8   :  { %v9181_v35 = vmax.f32 %v9143_v31, 0.0  ;;  %v13631_v10 = vpop.f32.mrb[178].mxu0 }
0x42c9   :  { %v9158_v38 = vadd.f32 %v17374_v4, %v13631_v10  ;;  %v9152_v24 = vpop.f32.mrb[179].mxu0 }
0x42ca   :  { %v14728_v8 = vpack.c.bf16 %v9182_v33, %v9181_v35  ;;  %v9153_v18 = vadd.f32 %v17377_v16, %v9152_v24 }
0x42cb   :  { %v9184_v44 = vmax.f32 %v9158_v38, 0.0 }
0x42cc   :  { %v9183_v52 = vmax.f32 %v9153_v18, 0.0  ;;  %v13634_v27 = vpop.f32.mrb[180].mxu0  ;;  %14729 = vmatprep.subr.bf16.mxu1 %v14728_v8 }
0x42cd   :  { %v9168_v54 = vadd.f32 %v17380_v53, %v13634_v27  ;;  %v9162_v47 = vpop.f32.mrb[181].mxu0  ;;  %14731 = vmatpush3.bf16.msra.mxu1 %v14728_v8 }
0x42ce   :  { %v14732_v39 = vpack.c.bf16 %v9184_v44, %v9183_v52  ;;  %v9163_v56 = vadd.f32 %v17383_v5, %v9162_v47 }
0x42cf   :  { %v9186_v0 = vmax.f32 %v9168_v54, 0.0 }
0x42d0   :  { %v9185_v62 = vmax.f32 %v9163_v56, 0.0  ;;  %v13637_v12 = vpop.f32.mrb[182].mxu0  ;;  %14733 = vmatprep.subr.bf16.mxu1 %v14732_v39 }
0x42d1   :  { %v9178_v3 = vadd.f32 %v17386_v15, %v13637_v12  ;;  %v9172_v61 = vpop.f32.mrb[183].mxu0  ;;  %14735 = vmatpush3.bf16.msra.mxu1 %v14732_v39 }
0x42d2   :  { %v14736_v50 = vpack.c.bf16 %v9186_v0, %v9185_v62  ;;  %v9173_v41 = vadd.f32 %v17389_v28, %v9172_v61 }
0x42d3   :  { %v9188_v9 = vmax.f32 %v9178_v3, 0.0 }
0x42d4   :  { %v9187_v20 = vmax.f32 %v9173_v41, 0.0  ;;  %14737 = vmatprep.subr.bf16.mxu1 %v14736_v50 }
0x42d5   :  { %14739 = vmatpush3.bf16.msra.mxu1 %v14736_v50 }
0x42d6   :  { %v14740_v63 = vpack.c.bf16 %v9188_v9, %v9187_v20 }
0x42d8   :  { %14741 = vmatprep.subr.bf16.mxu1 %v14740_v63 }
0x42d9   :  { %14743 = vmatpush3.bf16.msra.mxu1 %v14740_v63 }
0x42dc   :  { %13655 = vmatmul.mubr.msk.f32.vlgmr.msra.gmra.mrb[198].mxu1 %vm4870_vm4, %v16415_v42 }
0x42dd   :  { %13657 = vmatprep.mubr.msk.f32.mxu1 %vm4870_vm4, %v16418_v19 }
0x42e0   :  { %13658 = vmatmul.mubr.msk.f32.gmra.mrb[200].mxu1 %vm4870_vm4, %v16429_v48 }
0x42e1   :  { %13660 = vmatprep.mubr.msk.f32.mxu1 %vm4870_vm4, %v16432_v36 }
0x42e4   :  { %13661 = vmatmul.mubr.msk.f32.gmra.mrb[202].mxu1 %vm4870_vm4, %v16439_v37 }
0x42e5   :  { %13663 = vmatprep.mubr.msk.f32.mxu1 %vm4870_vm4, %v16442_v32 }
0x42e8   :  { %13664 = vmatmul.mubr.msk.f32.gmra.mrb[204].mxu1 %vm4870_vm4, %v16448_v45 }
0x42e9   :  { %13710 = vmatprep.mubr.msk.f32.mxu1 %vm4870_vm4, %v16413_v25 }
0x43af   :  { %v13656_v43 = vpop.f32.mrb[198].mxu1 }
0x43b0   :  { %v9261_v34 = vadd.f32 %v17368_v22, %v13656_v43  ;;  %v9255_v17 = vpop.f32.mrb[199].mxu1 }
0x43b1   :  { %v9256_v29 = vadd.f32 %v17371_v40, %v9255_v17 }
0x43b2   :  { %v9295_v46 = vmax.f32 %v9261_v34, 0.0 }
0x43b3   :  { %v9294_v51 = vmax.f32 %v9256_v29, 0.0  ;;  %v13659_v58 = vpop.f32.mrb[200].mxu1 }
0x43b4   :  { %v9271_v59 = vadd.f32 %v17374_v4, %v13659_v58  ;;  %v9265_v60 = vpop.f32.mrb[201].mxu1 }
0x43b5   :  { %v14744_v6 = vpack.c.bf16 %v9295_v46, %v9294_v51  ;;  %v9266_v7 = vadd.f32 %v17377_v16, %v9265_v60 }
0x43b6   :  { %v9297_v13 = vmax.f32 %v9271_v59, 0.0 }
0x43b7   :  { %v9296_v14 = vmax.f32 %v9266_v7, 0.0  ;;  %v13662_v21 = vpop.f32.mrb[202].mxu1  ;;  %14745 = vmatprep.subr.bf16.mxu0 %v14744_v6 }
0x43b8   :  { %v9281_v23 = vadd.f32 %v17380_v53, %v13662_v21  ;;  %v9275_v26 = vpop.f32.mrb[203].mxu1  ;;  %14747 = vmatpush3.bf16.msra.mxu0 %v14744_v6 }
0x43b9   :  { %v14748_v1 = vpack.c.bf16 %v9297_v13, %v9296_v14  ;;  %v9276_v11 = vadd.f32 %v17383_v5, %v9275_v26 }
0x43ba   :  { %v9299_v30 = vmax.f32 %v9281_v23, 0.0 }
0x43bb   :  { %v9298_v49 = vmax.f32 %v9276_v11, 0.0  ;;  %v13665_v55 = vpop.f32.mrb[204].mxu1  ;;  %14749 = vmatprep.subr.bf16.mxu0 %v14748_v1 }
0x43bc   :  { %v9291_v2 = vadd.f32 %v17386_v15, %v13665_v55  ;;  %v9285_v57 = vpop.f32.mrb[205].mxu1  ;;  %14751 = vmatpush3.bf16.msra.mxu0 %v14748_v1 }
0x43bd   :  { %v14752_v31 = vpack.c.bf16 %v9299_v30, %v9298_v49  ;;  %v9286_v33 = vadd.f32 %v17389_v28, %v9285_v57 }
0x43be   :  { %v9301_v35 = vmax.f32 %v9291_v2, 0.0 }
0x43bf   :  { %v9300_v10 = vmax.f32 %v9286_v33, 0.0  ;;  %14753 = vmatprep.subr.bf16.mxu0 %v14752_v31 }
0x43c0   :  { %14755 = vmatpush3.bf16.msra.mxu0 %v14752_v31 }
0x43c1   :  { %v14756_v38 = vpack.c.bf16 %v9301_v35, %v9300_v10 }
0x43c3   :  { %14757 = vmatprep.subr.bf16.mxu0 %v14756_v38 }
0x43c4   :  { %14759 = vmatpush3.bf16.msra.mxu0 %v14756_v38 }
0x43c7   :  { %13683 = vmatmul.mubr.msk.f32.vlgmr.msra.gmra.mrb[184].mxu0 %vm4870_vm4, %v16415_v42 }
0x43c8   :  { %13685 = vmatprep.mubr.msk.f32.mxu0 %vm4870_vm4, %v16418_v19 }
0x43cb   :  { %13686 = vmatmul.mubr.msk.f32.gmra.mrb[186].mxu0 %vm4870_vm4, %v16429_v48 }
0x43cc   :  { %13688 = vmatprep.mubr.msk.f32.mxu0 %vm4870_vm4, %v16432_v36 }
0x43cf   :  { %13689 = vmatmul.mubr.msk.f32.gmra.mrb[188].mxu0 %vm4870_vm4, %v16439_v37 }
0x43d0   :  { %13691 = vmatprep.mubr.msk.f32.mxu0 %vm4870_vm4, %v16442_v32 }
0x43d3   :  { %13692 = vmatmul.mubr.msk.f32.gmra.mrb[190].mxu0 %vm4870_vm4, %v16448_v45 }
0x43d4   :  { %13738 = vmatprep.mubr.msk.f32.mxu0 %vm4870_vm4, %v16413_v25 }
0x449a   :  { %v13684_v24 = vpop.f32.mrb[184].mxu0 }
0x449b   :  { %v9374_v8 = vadd.f32 %v17368_v22, %v13684_v24  ;;  %v9368_v18 = vpop.f32.mrb[185].mxu0 }
0x449c   :  { %v9369_v44 = vadd.f32 %v17371_v40, %v9368_v18 }
0x449d   :  { %v9408_v52 = vmax.f32 %v9374_v8, 0.0 }
0x449e   :  { %v9407_v27 = vmax.f32 %v9369_v44, 0.0  ;;  %v13687_v54 = vpop.f32.mrb[186].mxu0 }
0x449f   :  { %v9384_v47 = vadd.f32 %v17374_v4, %v13687_v54  ;;  %v9378_v39 = vpop.f32.mrb[187].mxu0 }
0x44a0   :  { %v14760_v56 = vpack.c.bf16 %v9408_v52, %v9407_v27  ;;  %v9379_v0 = vadd.f32 %v17377_v16, %v9378_v39 }
0x44a1   :  { %v9410_v62 = vmax.f32 %v9384_v47, 0.0 }
0x44a2   :  { %v9409_v12 = vmax.f32 %v9379_v0, 0.0  ;;  %v13690_v3 = vpop.f32.mrb[188].mxu0  ;;  %14761 = vmatprep.subr.bf16.mxu1 %v14760_v56 }
0x44a3   :  { %v9394_v61 = vadd.f32 %v17380_v53, %v13690_v3  ;;  %v9388_v50 = vpop.f32.mrb[189].mxu0  ;;  %14763 = vmatpush3.bf16.msra.mxu1 %v14760_v56 }
0x44a4   :  { %v14764_v41 = vpack.c.bf16 %v9410_v62, %v9409_v12  ;;  %v9389_v9 = vadd.f32 %v17383_v5, %v9388_v50 }
0x44a5   :  { %v9412_v20 = vmax.f32 %v9394_v61, 0.0 }
0x44a6   :  { %v9411_v63 = vmax.f32 %v9389_v9, 0.0  ;;  %v13693_v43 = vpop.f32.mrb[190].mxu0  ;;  %14765 = vmatprep.subr.bf16.mxu1 %v14764_v41 }
0x44a7   :  { %v9404_v34 = vadd.f32 %v17386_v15, %v13693_v43  ;;  %v9398_v17 = vpop.f32.mrb[191].mxu0  ;;  %14767 = vmatpush3.bf16.msra.mxu1 %v14764_v41 }
0x44a8   :  { %v14768_v29 = vpack.c.bf16 %v9412_v20, %v9411_v63  ;;  %v9399_v46 = vadd.f32 %v17389_v28, %v9398_v17 }
0x44a9   :  { %v9414_v51 = vmax.f32 %v9404_v34, 0.0 }
0x44aa   :  { %v9413_v58 = vmax.f32 %v9399_v46, 0.0  ;;  %14769 = vmatprep.subr.bf16.mxu1 %v14768_v29 }
0x44ab   :  { %14771 = vmatpush3.bf16.msra.mxu1 %v14768_v29 }
0x44ac   :  { %v14772_v59 = vpack.c.bf16 %v9414_v51, %v9413_v58 }
0x44ae   :  { %14773 = vmatprep.subr.bf16.mxu1 %v14772_v59 }
0x44af   :  { %14775 = vmatpush3.bf16.msra.mxu1 %v14772_v59 }
0x44b2   :  { %13711 = vmatmul.mubr.msk.f32.vlgmr.msra.gmra.mrb[206].mxu1 %vm4870_vm4, %v16415_v42 }
0x44b3   :  { %13713 = vmatprep.mubr.msk.f32.mxu1 %vm4870_vm4, %v16418_v19 }
0x44b6   :  { %13714 = vmatmul.mubr.msk.f32.gmra.mrb[208].mxu1 %vm4870_vm4, %v16429_v48 }
0x44b7   :  { %13716 = vmatprep.mubr.msk.f32.mxu1 %vm4870_vm4, %v16432_v36 }
0x44ba   :  { %13717 = vmatmul.mubr.msk.f32.gmra.mrb[210].mxu1 %vm4870_vm4, %v16439_v37 }
0x44bb   :  { %13719 = vmatprep.mubr.msk.f32.mxu1 %vm4870_vm4, %v16442_v32 }
0x44be   :  { %13720 = vmatmul.mubr.msk.f32.gmra.mrb[212].mxu1 %vm4870_vm4, %v16448_v45 }
0x44bf   :  { %13766 = vmatprep.mubr.msk.f32.mxu1 %vm4870_vm4, %v16413_v25 }
0x4585   :  { %v13712_v60 = vpop.f32.mrb[206].mxu1 }
0x4586   :  { %v9487_v6 = vadd.f32 %v17368_v22, %v13712_v60  ;;  %v9481_v7 = vpop.f32.mrb[207].mxu1 }
0x4587   :  { %v9482_v13 = vadd.f32 %v17371_v40, %v9481_v7 }
0x4588   :  { %v9521_v14 = vmax.f32 %v9487_v6, 0.0 }
0x4589   :  { %v9520_v21 = vmax.f32 %v9482_v13, 0.0  ;;  %v13715_v23 = vpop.f32.mrb[208].mxu1 }
0x458a   :  { %v9497_v26 = vadd.f32 %v17374_v4, %v13715_v23  ;;  %v9491_v1 = vpop.f32.mrb[209].mxu1 }
0x458b   :  { %v14776_v11 = vpack.c.bf16 %v9521_v14, %v9520_v21  ;;  %v9492_v30 = vadd.f32 %v17377_v16, %v9491_v1 }
0x458c   :  { %v9523_v49 = vmax.f32 %v9497_v26, 0.0 }
0x458d   :  { %v9522_v55 = vmax.f32 %v9492_v30, 0.0  ;;  %v13718_v2 = vpop.f32.mrb[210].mxu1  ;;  %14777 = vmatprep.subr.bf16.mxu0 %v14776_v11 }
0x458e   :  { %v9507_v57 = vadd.f32 %v17380_v53, %v13718_v2  ;;  %v9501_v31 = vpop.f32.mrb[211].mxu1  ;;  %14779 = vmatpush3.bf16.msra.mxu0 %v14776_v11 }
0x458f   :  { %v14780_v33 = vpack.c.bf16 %v9523_v49, %v9522_v55  ;;  %v9502_v35 = vadd.f32 %v17383_v5, %v9501_v31 }
0x4590   :  { %v9525_v10 = vmax.f32 %v9507_v57, 0.0 }
0x4591   :  { %v9524_v38 = vmax.f32 %v9502_v35, 0.0  ;;  %v13721_v24 = vpop.f32.mrb[212].mxu1  ;;  %14781 = vmatprep.subr.bf16.mxu0 %v14780_v33 }
0x4592   :  { %v9517_v8 = vadd.f32 %v17386_v15, %v13721_v24  ;;  %v9511_v18 = vpop.f32.mrb[213].mxu1  ;;  %14783 = vmatpush3.bf16.msra.mxu0 %v14780_v33 }
0x4593   :  { %v14784_v44 = vpack.c.bf16 %v9525_v10, %v9524_v38  ;;  %v9512_v52 = vadd.f32 %v17389_v28, %v9511_v18 }
0x4594   :  { %v9527_v27 = vmax.f32 %v9517_v8, 0.0 }
0x4595   :  { %v9526_v54 = vmax.f32 %v9512_v52, 0.0  ;;  %14785 = vmatprep.subr.bf16.mxu0 %v14784_v44 }
0x4596   :  { %14787 = vmatpush3.bf16.msra.mxu0 %v14784_v44 }
0x4597   :  { %v14788_v47 = vpack.c.bf16 %v9527_v27, %v9526_v54 }
0x4599   :  { %14789 = vmatprep.subr.bf16.mxu0 %v14788_v47 }
0x459a   :  { %14791 = vmatpush3.bf16.msra.mxu0 %v14788_v47 }
0x459d   :  { %13739 = vmatmul.mubr.msk.f32.vlgmr.msra.gmra.mrb[192].mxu0 %vm4870_vm4, %v16415_v42 }
0x459e   :  { %13741 = vmatprep.mubr.msk.f32.mxu0 %vm4870_vm4, %v16418_v19 }
0x45a1   :  { %13742 = vmatmul.mubr.msk.f32.gmra.mrb[194].mxu0 %vm4870_vm4, %v16429_v48 }
0x45a2   :  { %13744 = vmatprep.mubr.msk.f32.mxu0 %vm4870_vm4, %v16432_v36 }
0x45a5   :  { %13745 = vmatmul.mubr.msk.f32.gmra.mrb[196].mxu0 %vm4870_vm4, %v16439_v37 }
0x45a6   :  { %13747 = vmatprep.mubr.msk.f32.mxu0 %vm4870_vm4, %v16442_v32 }
0x45a9   :  { %13748 = vmatmul.mubr.msk.f32.gmra.mrb[198].mxu0 %vm4870_vm4, %v16448_v45 }
0x45aa   :  { %13794 = vmatprep.mubr.msk.f32.mxu0 %vm4870_vm4, %v16413_v25 }
0x4670   :  { %v13740_v39 = vpop.f32.mrb[192].mxu0 }
0x4671   :  { %v9600_v56 = vadd.f32 %v17368_v22, %v13740_v39  ;;  %v9594_v0 = vpop.f32.mrb[193].mxu0 }
0x4672   :  { %v9595_v62 = vadd.f32 %v17371_v40, %v9594_v0 }
0x4673   :  { %v9634_v12 = vmax.f32 %v9600_v56, 0.0 }
0x4674   :  { %v9633_v3 = vmax.f32 %v9595_v62, 0.0  ;;  %v13743_v61 = vpop.f32.mrb[194].mxu0 }
0x4675   :  { %v9610_v50 = vadd.f32 %v17374_v4, %v13743_v61  ;;  %v9604_v41 = vpop.f32.mrb[195].mxu0 }
0x4676   :  { %v14792_v9 = vpack.c.bf16 %v9634_v12, %v9633_v3  ;;  %v9605_v20 = vadd.f32 %v17377_v16, %v9604_v41 }
0x4677   :  { %v9636_v63 = vmax.f32 %v9610_v50, 0.0 }
0x4678   :  { %v9635_v43 = vmax.f32 %v9605_v20, 0.0  ;;  %v13746_v34 = vpop.f32.mrb[196].mxu0  ;;  %14793 = vmatprep.subr.bf16.mxu1 %v14792_v9 }
0x4679   :  { %v9620_v17 = vadd.f32 %v17380_v53, %v13746_v34  ;;  %v9614_v29 = vpop.f32.mrb[197].mxu0  ;;  %14795 = vmatpush3.bf16.msra.mxu1 %v14792_v9 }
0x467a   :  { %v14796_v46 = vpack.c.bf16 %v9636_v63, %v9635_v43  ;;  %v9615_v51 = vadd.f32 %v17383_v5, %v9614_v29 }
0x467b   :  { %v9638_v58 = vmax.f32 %v9620_v17, 0.0 }
0x467c   :  { %v9637_v59 = vmax.f32 %v9615_v51, 0.0  ;;  %v13749_v60 = vpop.f32.mrb[198].mxu0  ;;  %14797 = vmatprep.subr.bf16.mxu1 %v14796_v46 }
0x467d   :  { %v9630_v6 = vadd.f32 %v17386_v15, %v13749_v60  ;;  %v9624_v7 = vpop.f32.mrb[199].mxu0  ;;  %14799 = vmatpush3.bf16.msra.mxu1 %v14796_v46 }
0x467e   :  { %v14800_v13 = vpack.c.bf16 %v9638_v58, %v9637_v59  ;;  %v9625_v14 = vadd.f32 %v17389_v28, %v9624_v7 }
0x467f   :  { %v9640_v21 = vmax.f32 %v9630_v6, 0.0 }
0x4680   :  { %v9639_v23 = vmax.f32 %v9625_v14, 0.0  ;;  %14801 = vmatprep.subr.bf16.mxu1 %v14800_v13 }
0x4681   :  { %14803 = vmatpush3.bf16.msra.mxu1 %v14800_v13 }
0x4682   :  { %v14804_v26 = vpack.c.bf16 %v9640_v21, %v9639_v23 }
0x4684   :  { %14805 = vmatprep.subr.bf16.mxu1 %v14804_v26 }
0x4685   :  { %14807 = vmatpush3.bf16.msra.mxu1 %v14804_v26 }
0x4688   :  { %13767 = vmatmul.mubr.msk.f32.vlgmr.msra.gmra.mrb[214].mxu1 %vm4870_vm4, %v16415_v42 }
0x4689   :  { %13769 = vmatprep.mubr.msk.f32.mxu1 %vm4870_vm4, %v16418_v19 }
0x468c   :  { %13770 = vmatmul.mubr.msk.f32.gmra.mrb[216].mxu1 %vm4870_vm4, %v16429_v48 }
0x468d   :  { %13772 = vmatprep.mubr.msk.f32.mxu1 %vm4870_vm4, %v16432_v36 }
0x4690   :  { %13773 = vmatmul.mubr.msk.f32.gmra.mrb[218].mxu1 %vm4870_vm4, %v16439_v37 }
0x4691   :  { %13775 = vmatprep.mubr.msk.f32.mxu1 %vm4870_vm4, %v16442_v32 }
0x4694   :  { %13776 = vmatmul.mubr.msk.f32.gmra.mrb[220].mxu1 %vm4870_vm4, %v16448_v45 }
0x4695   :  { %13822 = vmatprep.mubr.msk.f32.mxu1 %vm4870_vm4, %v16413_v25 }
0x475b   :  { %v13768_v1 = vpop.f32.mrb[214].mxu1 }
0x475c   :  { %v9713_v11 = vadd.f32 %v17368_v22, %v13768_v1  ;;  %v9707_v30 = vpop.f32.mrb[215].mxu1 }
0x475d   :  { %v9708_v49 = vadd.f32 %v17371_v40, %v9707_v30 }
0x475e   :  { %v9747_v55 = vmax.f32 %v9713_v11, 0.0 }
0x475f   :  { %v9746_v2 = vmax.f32 %v9708_v49, 0.0  ;;  %v13771_v57 = vpop.f32.mrb[216].mxu1 }
0x4760   :  { %v9723_v31 = vadd.f32 %v17374_v4, %v13771_v57  ;;  %v9717_v33 = vpop.f32.mrb[217].mxu1 }
0x4761   :  { %v14808_v35 = vpack.c.bf16 %v9747_v55, %v9746_v2  ;;  %v9718_v10 = vadd.f32 %v17377_v16, %v9717_v33 }
0x4762   :  { %v9749_v38 = vmax.f32 %v9723_v31, 0.0 }
0x4763   :  { %v9748_v24 = vmax.f32 %v9718_v10, 0.0  ;;  %v13774_v8 = vpop.f32.mrb[218].mxu1  ;;  %14809 = vmatprep.subr.bf16.mxu0 %v14808_v35 }
0x4764   :  { %v9733_v18 = vadd.f32 %v17380_v53, %v13774_v8  ;;  %v9727_v44 = vpop.f32.mrb[219].mxu1  ;;  %14811 = vmatpush3.bf16.msra.mxu0 %v14808_v35 }
0x4765   :  { %v14812_v52 = vpack.c.bf16 %v9749_v38, %v9748_v24  ;;  %v9728_v27 = vadd.f32 %v17383_v5, %v9727_v44 }
0x4766   :  { %v9751_v54 = vmax.f32 %v9733_v18, 0.0 }
0x4767   :  { %v9750_v47 = vmax.f32 %v9728_v27, 0.0  ;;  %v13777_v39 = vpop.f32.mrb[220].mxu1  ;;  %14813 = vmatprep.subr.bf16.mxu0 %v14812_v52 }
0x4768   :  { %v9743_v56 = vadd.f32 %v17386_v15, %v13777_v39  ;;  %v9737_v0 = vpop.f32.mrb[221].mxu1  ;;  %14815 = vmatpush3.bf16.msra.mxu0 %v14812_v52 }
0x4769   :  { %v14816_v62 = vpack.c.bf16 %v9751_v54, %v9750_v47  ;;  %v9738_v12 = vadd.f32 %v17389_v28, %v9737_v0 }
0x476a   :  { %v9753_v3 = vmax.f32 %v9743_v56, 0.0 }
0x476b   :  { %v9752_v61 = vmax.f32 %v9738_v12, 0.0  ;;  %14817 = vmatprep.subr.bf16.mxu0 %v14816_v62 }
0x476c   :  { %14819 = vmatpush3.bf16.msra.mxu0 %v14816_v62 }
0x476d   :  { %v14820_v50 = vpack.c.bf16 %v9753_v3, %v9752_v61 }
0x476f   :  { %14821 = vmatprep.subr.bf16.mxu0 %v14820_v50 }
0x4770   :  { %14823 = vmatpush3.bf16.msra.mxu0 %v14820_v50 }
0x4773   :  { %13795 = vmatmul.mubr.msk.f32.vlgmr.msra.gmra.mrb[200].mxu0 %vm4870_vm4, %v16415_v42 }
0x4774   :  { %13797 = vmatprep.mubr.msk.f32.mxu0 %vm4870_vm4, %v16418_v19 }
0x4777   :  { %13798 = vmatmul.mubr.msk.f32.gmra.mrb[202].mxu0 %vm4870_vm4, %v16429_v48 }
0x4778   :  { %13800 = vmatprep.mubr.msk.f32.mxu0 %vm4870_vm4, %v16432_v36 }
0x477b   :  { %13801 = vmatmul.mubr.msk.f32.gmra.mrb[204].mxu0 %vm4870_vm4, %v16439_v37 }
0x477c   :  { %13803 = vmatprep.mubr.msk.f32.mxu0 %vm4870_vm4, %v16442_v32 }
0x477f   :  { %13804 = vmatmul.mubr.msk.f32.gmra.mrb[206].mxu0 %vm4870_vm4, %v16448_v45 }
0x4780   :  { %13850 = vmatprep.mubr.msk.f32.mxu0 %vm4870_vm4, %v16413_v25 }
0x4846   :  { %v13796_v41 = vpop.f32.mrb[200].mxu0 }
0x4847   :  { %v9826_v9 = vadd.f32 %v17368_v22, %v13796_v41  ;;  %v9820_v20 = vpop.f32.mrb[201].mxu0 }
0x4848   :  { %v9821_v63 = vadd.f32 %v17371_v40, %v9820_v20 }
0x4849   :  { %v9860_v43 = vmax.f32 %v9826_v9, 0.0 }
0x484a   :  { %v9859_v34 = vmax.f32 %v9821_v63, 0.0  ;;  %v13799_v17 = vpop.f32.mrb[202].mxu0 }
0x484b   :  { %v9836_v29 = vadd.f32 %v17374_v4, %v13799_v17  ;;  %v9830_v46 = vpop.f32.mrb[203].mxu0 }
0x484c   :  { %v14824_v51 = vpack.c.bf16 %v9860_v43, %v9859_v34  ;;  %v9831_v58 = vadd.f32 %v17377_v16, %v9830_v46 }
0x484d   :  { %v9862_v59 = vmax.f32 %v9836_v29, 0.0 }
0x484e   :  { %v9861_v60 = vmax.f32 %v9831_v58, 0.0  ;;  %v13802_v6 = vpop.f32.mrb[204].mxu0  ;;  %14825 = vmatprep.subr.bf16.mxu1 %v14824_v51 }
0x484f   :  { %v9846_v7 = vadd.f32 %v17380_v53, %v13802_v6  ;;  %v9840_v13 = vpop.f32.mrb[205].mxu0  ;;  %14827 = vmatpush3.bf16.msra.mxu1 %v14824_v51 }
0x4850   :  { %v14828_v14 = vpack.c.bf16 %v9862_v59, %v9861_v60  ;;  %v9841_v21 = vadd.f32 %v17383_v5, %v9840_v13 }
0x4851   :  { %v9864_v23 = vmax.f32 %v9846_v7, 0.0 }
0x4852   :  { %v9863_v26 = vmax.f32 %v9841_v21, 0.0  ;;  %v13805_v1 = vpop.f32.mrb[206].mxu0  ;;  %14829 = vmatprep.subr.bf16.mxu1 %v14828_v14 }
0x4853   :  { %v9856_v11 = vadd.f32 %v17386_v15, %v13805_v1  ;;  %v9850_v30 = vpop.f32.mrb[207].mxu0  ;;  %14831 = vmatpush3.bf16.msra.mxu1 %v14828_v14 }
0x4854   :  { %v14832_v49 = vpack.c.bf16 %v9864_v23, %v9863_v26  ;;  %v9851_v55 = vadd.f32 %v17389_v28, %v9850_v30 }
0x4855   :  { %v9866_v2 = vmax.f32 %v9856_v11, 0.0 }
0x4856   :  { %v9865_v57 = vmax.f32 %v9851_v55, 0.0  ;;  %14833 = vmatprep.subr.bf16.mxu1 %v14832_v49 }
0x4857   :  { %14835 = vmatpush3.bf16.msra.mxu1 %v14832_v49 }
0x4858   :  { %v14836_v31 = vpack.c.bf16 %v9866_v2, %v9865_v57 }
0x485a   :  { %14837 = vmatprep.subr.bf16.mxu1 %v14836_v31 }
0x485b   :  { %14839 = vmatpush3.bf16.msra.mxu1 %v14836_v31 }
0x485e   :  { %13823 = vmatmul.mubr.msk.f32.vlgmr.msra.gmra.mrb[222].mxu1 %vm4870_vm4, %v16415_v42 }
0x485f   :  { %13825 = vmatprep.mubr.msk.f32.mxu1 %vm4870_vm4, %v16418_v19 }
0x4862   :  { %13826 = vmatmul.mubr.msk.f32.gmra.mrb[224].mxu1 %vm4870_vm4, %v16429_v48 }
0x4863   :  { %13828 = vmatprep.mubr.msk.f32.mxu1 %vm4870_vm4, %v16432_v36 }
0x4866   :  { %13829 = vmatmul.mubr.msk.f32.gmra.mrb[226].mxu1 %vm4870_vm4, %v16439_v37 }
0x4867   :  { %13831 = vmatprep.mubr.msk.f32.mxu1 %vm4870_vm4, %v16442_v32 }
0x486a   :  { %13832 = vmatmul.mubr.msk.f32.gmra.mrb[228].mxu1 %vm4870_vm4, %v16448_v45 }
0x486b   :  { %13878 = vmatprep.mubr.msk.f32.mxu1 %vm4870_vm4, %v16413_v25 }
0x4931   :  { %v13824_v33 = vpop.f32.mrb[222].mxu1 }
0x4932   :  { %v9939_v35 = vadd.f32 %v17368_v22, %v13824_v33  ;;  %v9933_v10 = vpop.f32.mrb[223].mxu1 }
0x4933   :  { %v9934_v38 = vadd.f32 %v17371_v40, %v9933_v10 }
0x4934   :  { %v9973_v24 = vmax.f32 %v9939_v35, 0.0 }
0x4935   :  { %v9972_v8 = vmax.f32 %v9934_v38, 0.0  ;;  %v13827_v18 = vpop.f32.mrb[224].mxu1 }
0x4936   :  { %v9949_v44 = vadd.f32 %v17374_v4, %v13827_v18  ;;  %v9943_v52 = vpop.f32.mrb[225].mxu1 }
0x4937   :  { %v14840_v27 = vpack.c.bf16 %v9973_v24, %v9972_v8  ;;  %v9944_v54 = vadd.f32 %v17377_v16, %v9943_v52 }
0x4938   :  { %v9975_v47 = vmax.f32 %v9949_v44, 0.0 }
0x4939   :  { %v9974_v39 = vmax.f32 %v9944_v54, 0.0  ;;  %v13830_v56 = vpop.f32.mrb[226].mxu1  ;;  %14841 = vmatprep.subr.bf16.mxu0 %v14840_v27 }
0x493a   :  { %v9959_v0 = vadd.f32 %v17380_v53, %v13830_v56  ;;  %v9953_v62 = vpop.f32.mrb[227].mxu1  ;;  %14843 = vmatpush3.bf16.msra.mxu0 %v14840_v27 }
0x493b   :  { %v14844_v12 = vpack.c.bf16 %v9975_v47, %v9974_v39  ;;  %v9954_v3 = vadd.f32 %v17383_v5, %v9953_v62 }
0x493c   :  { %v9977_v61 = vmax.f32 %v9959_v0, 0.0 }
0x493d   :  { %v9976_v50 = vmax.f32 %v9954_v3, 0.0  ;;  %v13833_v41 = vpop.f32.mrb[228].mxu1  ;;  %14845 = vmatprep.subr.bf16.mxu0 %v14844_v12 }
0x493e   :  { %v9969_v9 = vadd.f32 %v17386_v15, %v13833_v41  ;;  %v9963_v20 = vpop.f32.mrb[229].mxu1  ;;  %14847 = vmatpush3.bf16.msra.mxu0 %v14844_v12 }
0x493f   :  { %v14848_v63 = vpack.c.bf16 %v9977_v61, %v9976_v50  ;;  %v9964_v43 = vadd.f32 %v17389_v28, %v9963_v20 }
0x4940   :  { %v9979_v34 = vmax.f32 %v9969_v9, 0.0 }
0x4941   :  { %v9978_v17 = vmax.f32 %v9964_v43, 0.0  ;;  %14849 = vmatprep.subr.bf16.mxu0 %v14848_v63 }
0x4942   :  { %14851 = vmatpush3.bf16.msra.mxu0 %v14848_v63 }
0x4943   :  { %v14852_v29 = vpack.c.bf16 %v9979_v34, %v9978_v17 }
0x4945   :  { %14853 = vmatprep.subr.bf16.mxu0 %v14852_v29 }
0x4946   :  { %14855 = vmatpush3.bf16.msra.mxu0 %v14852_v29 }
0x4949   :  { %13851 = vmatmul.mubr.msk.f32.vlgmr.msra.gmra.mrb[208].mxu0 %vm4870_vm4, %v16415_v42 }
0x494a   :  { %13853 = vmatprep.mubr.msk.f32.mxu0 %vm4870_vm4, %v16418_v19 }
0x494d   :  { %13854 = vmatmul.mubr.msk.f32.gmra.mrb[210].mxu0 %vm4870_vm4, %v16429_v48 }
0x494e   :  { %13856 = vmatprep.mubr.msk.f32.mxu0 %vm4870_vm4, %v16432_v36 }
0x4951   :  { %13857 = vmatmul.mubr.msk.f32.gmra.mrb[212].mxu0 %vm4870_vm4, %v16439_v37 }
0x4952   :  { %13859 = vmatprep.mubr.msk.f32.mxu0 %vm4870_vm4, %v16442_v32 }
0x4955   :  { %13860 = vmatmul.mubr.msk.f32.gmra.mrb[214].mxu0 %vm4870_vm4, %v16448_v45 }
0x4956   :  { %13906 = vmatprep.mubr.msk.f32.mxu0 %vm4870_vm4, %v16413_v25 }
0x4a1c   :  { %v13852_v46 = vpop.f32.mrb[208].mxu0 }
0x4a1d   :  { %v10052_v51 = vadd.f32 %v17368_v22, %v13852_v46  ;;  %v10046_v58 = vpop.f32.mrb[209].mxu0 }
0x4a1e   :  { %v10047_v59 = vadd.f32 %v17371_v40, %v10046_v58 }
0x4a1f   :  { %v10086_v60 = vmax.f32 %v10052_v51, 0.0 }
0x4a20   :  { %v10085_v6 = vmax.f32 %v10047_v59, 0.0  ;;  %v13855_v7 = vpop.f32.mrb[210].mxu0 }
0x4a21   :  { %v10062_v13 = vadd.f32 %v17374_v4, %v13855_v7  ;;  %v10056_v14 = vpop.f32.mrb[211].mxu0 }
0x4a22   :  { %v14856_v21 = vpack.c.bf16 %v10086_v60, %v10085_v6  ;;  %v10057_v23 = vadd.f32 %v17377_v16, %v10056_v14 }
0x4a23   :  { %v10088_v26 = vmax.f32 %v10062_v13, 0.0 }
0x4a24   :  { %v10087_v1 = vmax.f32 %v10057_v23, 0.0  ;;  %v13858_v11 = vpop.f32.mrb[212].mxu0  ;;  %14857 = vmatprep.subr.bf16.mxu1 %v14856_v21 }
0x4a25   :  { %v10072_v30 = vadd.f32 %v17380_v53, %v13858_v11  ;;  %v10066_v49 = vpop.f32.mrb[213].mxu0  ;;  %14859 = vmatpush3.bf16.msra.mxu1 %v14856_v21 }
0x4a26   :  { %v14860_v55 = vpack.c.bf16 %v10088_v26, %v10087_v1  ;;  %v10067_v2 = vadd.f32 %v17383_v5, %v10066_v49 }
0x4a27   :  { %v10090_v57 = vmax.f32 %v10072_v30, 0.0 }
0x4a28   :  { %v10089_v31 = vmax.f32 %v10067_v2, 0.0  ;;  %v13861_v33 = vpop.f32.mrb[214].mxu0  ;;  %14861 = vmatprep.subr.bf16.mxu1 %v14860_v55 }
0x4a29   :  { %v10082_v35 = vadd.f32 %v17386_v15, %v13861_v33  ;;  %v10076_v10 = vpop.f32.mrb[215].mxu0  ;;  %14863 = vmatpush3.bf16.msra.mxu1 %v14860_v55 }
0x4a2a   :  { %v14864_v38 = vpack.c.bf16 %v10090_v57, %v10089_v31  ;;  %v10077_v24 = vadd.f32 %v17389_v28, %v10076_v10 }
0x4a2b   :  { %v10092_v8 = vmax.f32 %v10082_v35, 0.0 }
0x4a2c   :  { %v10091_v18 = vmax.f32 %v10077_v24, 0.0  ;;  %14865 = vmatprep.subr.bf16.mxu1 %v14864_v38 }
0x4a2d   :  { %14867 = vmatpush3.bf16.msra.mxu1 %v14864_v38 }
0x4a2e   :  { %v14868_v44 = vpack.c.bf16 %v10092_v8, %v10091_v18 }
0x4a30   :  { %14869 = vmatprep.subr.bf16.mxu1 %v14868_v44 }
0x4a31   :  { %14871 = vmatpush3.bf16.msra.mxu1 %v14868_v44 }
0x4a34   :  { %13879 = vmatmul.mubr.msk.f32.vlgmr.msra.gmra.mrb[230].mxu1 %vm4870_vm4, %v16415_v42 }
0x4a35   :  { %13881 = vmatprep.mubr.msk.f32.mxu1 %vm4870_vm4, %v16418_v19 }
0x4a38   :  { %13882 = vmatmul.mubr.msk.f32.gmra.mrb[232].mxu1 %vm4870_vm4, %v16429_v48 }
0x4a39   :  { %13884 = vmatprep.mubr.msk.f32.mxu1 %vm4870_vm4, %v16432_v36 }
0x4a3c   :  { %13885 = vmatmul.mubr.msk.f32.gmra.mrb[234].mxu1 %vm4870_vm4, %v16439_v37 }
0x4a3d   :  { %13887 = vmatprep.mubr.msk.f32.mxu1 %vm4870_vm4, %v16442_v32 }
0x4a40   :  { %13888 = vmatmul.mubr.msk.f32.gmra.mrb[236].mxu1 %vm4870_vm4, %v16448_v45 }
0x4a41   :  { %13934 = vmatprep.mubr.msk.f32.mxu1 %vm4870_vm4, %v16413_v25 }
0x4b07   :  { %v13880_v52 = vpop.f32.mrb[230].mxu1 }
0x4b08   :  { %v10165_v27 = vadd.f32 %v17368_v22, %v13880_v52  ;;  %v10159_v54 = vpop.f32.mrb[231].mxu1 }
0x4b09   :  { %v10160_v47 = vadd.f32 %v17371_v40, %v10159_v54 }
0x4b0a   :  { %v10199_v39 = vmax.f32 %v10165_v27, 0.0 }
0x4b0b   :  { %v10198_v56 = vmax.f32 %v10160_v47, 0.0  ;;  %v13883_v0 = vpop.f32.mrb[232].mxu1  ;;  %v15082_v47 = vld [vmem:[#allocation2] sm:$0xff] }
0x4b0c   :  { %v10175_v62 = vadd.f32 %v17374_v4, %v13883_v0  ;;  %v10169_v12 = vpop.f32.mrb[233].mxu1 }
0x4b0d   :  { %v14872_v3 = vpack.c.bf16 %v10199_v39, %v10198_v56  ;;  %v10170_v61 = vadd.f32 %v17377_v16, %v10169_v12  ;;  %v15083_v12 = vld [vmem:[#allocation2 + $0x18] sm:$0xff] }
0x4b0e   :  { %v10201_v50 = vmax.f32 %v10175_v62, 0.0 }
0x4b0f   :  { %v10200_v41 = vmax.f32 %v10170_v61, 0.0  ;;  %v13886_v9 = vpop.f32.mrb[234].mxu1  ;;  %14873 = vmatprep.subr.bf16.mxu0 %v14872_v3 }
0x4b10   :  { %v10185_v20 = vadd.f32 %v17380_v53, %v13886_v9  ;;  %v10179_v63 = vpop.f32.mrb[235].mxu1  ;;  %14875 = vmatpush3.bf16.msra.mxu0 %v14872_v3 }
0x4b11   :  { %v14876_v43 = vpack.c.bf16 %v10201_v50, %v10200_v41  ;;  %v10180_v34 = vadd.f32 %v17383_v5, %v10179_v63  ;;  %v15084_v41 = vld [vmem:[#allocation2 + $0x10] sm:$0xff] }
0x4b12   :  { %v10203_v17 = vmax.f32 %v10185_v20, 0.0 }
0x4b13   :  { %v10202_v29 = vmax.f32 %v10180_v34, 0.0  ;;  %v13889_v46 = vpop.f32.mrb[236].mxu1  ;;  %14877 = vmatprep.subr.bf16.mxu0 %v14876_v43  ;;  %v15085_v34 = vld [vmem:[#allocation2 + $0x28] sm:$0xff] }
0x4b14   :  { %v10195_v51 = vadd.f32 %v17386_v15, %v13889_v46  ;;  %v10189_v58 = vpop.f32.mrb[237].mxu1  ;;  %14879 = vmatpush3.bf16.msra.mxu0 %v14876_v43 }
0x4b15   :  { %v14880_v59 = vpack.c.bf16 %v10203_v17, %v10202_v29  ;;  %v10190_v60 = vadd.f32 %v17389_v28, %v10189_v58 }
0x4b16   :  { %v10205_v6 = vmax.f32 %v10195_v51, 0.0  ;;  %v15086_v51 = vld [vmem:[#allocation2 + $0x20] sm:$0xff] }
0x4b17   :  { %v10204_v7 = vmax.f32 %v10190_v60, 0.0  ;;  %14881 = vmatprep.subr.bf16.mxu0 %v14880_v59 }
0x4b18   :  { %14883 = vmatpush3.bf16.msra.mxu0 %v14880_v59 }
0x4b19   :  { %v14884_v13 = vpack.c.bf16 %v10205_v6, %v10204_v7  ;;  %v15087_v7 = vld [vmem:[#allocation2 + $0x38] sm:$0xff] }
0x4b1b   :  { %14885 = vmatprep.subr.bf16.mxu0 %v14884_v13 }
0x4b1c   :  { %14887 = vmatpush3.bf16.msra.mxu0 %v14884_v13 }
0x4b1f   :  { %13907 = vmatmul.mubr.msk.f32.vlgmr.msra.gmra.mrb[216].mxu0 %vm4870_vm4, %v16415_v42 }
0x4b20   :  { %13909 = vmatprep.mubr.msk.f32.mxu0 %vm4870_vm4, %v16418_v19 }
0x4b23   :  { %13910 = vmatmul.mubr.msk.f32.gmra.mrb[218].mxu0 %vm4870_vm4, %v16429_v48 }
0x4b24   :  { %13912 = vmatprep.mubr.msk.f32.mxu0 %vm4870_vm4, %v16432_v36 }
0x4b27   :  { %13913 = vmatmul.mubr.msk.f32.gmra.mrb[220].mxu0 %vm4870_vm4, %v16439_v37 }
0x4b28   :  { %13915 = vmatprep.mubr.msk.f32.mxu0 %vm4870_vm4, %v16442_v32 }
0x4b2b   :  { %13916 = vmatmul.mubr.msk.f32.gmra.mrb[222].mxu0 %vm4870_vm4, %v16448_v45 }
0x4b2c   :  { %13962 = vmatprep.mubr.msk.f32.mxu0 %vm4870_vm4, %v16413_v25 }
0x4bf2   :  { %v13908_v14 = vpop.f32.mrb[216].mxu0 }
0x4bf3   :  { %v10278_v21 = vadd.f32 %v17368_v22, %v13908_v14  ;;  %v10272_v23 = vpop.f32.mrb[217].mxu0 }
0x4bf4   :  { %v10273_v26 = vadd.f32 %v17371_v40, %v10272_v23  ;;  %v15088_v23 = vld [vmem:[#allocation2 + $0x30] sm:$0xff] }
0x4bf5   :  { %v10312_v1 = vmax.f32 %v10278_v21, 0.0 }
0x4bf6   :  { %v10311_v11 = vmax.f32 %v10273_v26, 0.0  ;;  %v13911_v30 = vpop.f32.mrb[218].mxu0 }
0x4bf7   :  { %v10288_v49 = vadd.f32 %v17374_v4, %v13911_v30  ;;  %v10282_v55 = vpop.f32.mrb[219].mxu0 }
0x4bf8   :  { %v14888_v2 = vpack.c.bf16 %v10312_v1, %v10311_v11  ;;  %v10283_v57 = vadd.f32 %v17377_v16, %v10282_v55 }
0x4bf9   :  { %v10314_v31 = vmax.f32 %v10288_v49, 0.0 }
0x4bfa   :  { %v10313_v33 = vmax.f32 %v10283_v57, 0.0  ;;  %v13914_v35 = vpop.f32.mrb[220].mxu0  ;;  %14889 = vmatprep.subr.bf16.mxu1 %v14888_v2 }
0x4bfb   :  { %v10298_v25 = vadd.f32 %v17380_v53, %v13914_v35  ;;  %v10292_v10 = vpop.f32.mrb[221].mxu0  ;;  %14891 = vmatpush3.bf16.msra.mxu1 %v14888_v2 }
0x4bfc   :  { %v14892_v22 = vpack.c.bf16 %v10314_v31, %v10313_v33  ;;  %v10293_v40 = vadd.f32 %v17383_v5, %v10292_v10 }
0x4bfd   :  { %v10316_v38 = vmax.f32 %v10298_v25, 0.0 }
0x4bfe   :  { %v10315_v24 = vmax.f32 %v10293_v40, 0.0  ;;  %v13917_v8 = vpop.f32.mrb[222].mxu0  ;;  %14893 = vmatprep.subr.bf16.mxu1 %v14892_v22 }
0x4bff   :  { %v10308_v4 = vadd.f32 %v17386_v15, %v13917_v8  ;;  %v10302_v18 = vpop.f32.mrb[223].mxu0  ;;  %14895 = vmatpush3.bf16.msra.mxu1 %v14892_v22  ;;  %v15081_v15 = vld [vmem:[#allocation2 + $0x8] sm:$0xff] }
0x4c00   :  { %v14896_v16 = vpack.c.bf16 %v10316_v38, %v10315_v24  ;;  %v10303_v44 = vadd.f32 %v17389_v28, %v10302_v18 }
0x4c01   :  { %v10318_v52 = vmax.f32 %v10308_v4, 0.0 }
0x4c02   :  { %v10317_v27 = vmax.f32 %v10303_v44, 0.0  ;;  %14897 = vmatprep.subr.bf16.mxu1 %v14896_v16 }
0x4c03   :  { %14899 = vmatpush3.bf16.msra.mxu1 %v14896_v16 }
0x4c04   :  { %v14900_v53 = vpack.c.bf16 %v10318_v52, %v10317_v27 }
0x4c06   :  { %14901 = vmatprep.subr.bf16.mxu1 %v14900_v53 }
0x4c07   :  { %14903 = vmatpush3.bf16.msra.mxu1 %v14900_v53 }
0x4c0a   :  { %13935 = vmatmul.mubr.msk.f32.vlgmr.msra.gmra.mrb[238].mxu1 %vm4870_vm4, %v16415_v42 }
0x4c0b   :  { %13937 = vmatprep.mubr.msk.f32.mxu1 %vm4870_vm4, %v16418_v19 }
0x4c0e   :  { %13938 = vmatmul.mubr.msk.f32.gmra.mrb[240].mxu1 %vm4870_vm4, %v16429_v48 }
0x4c0f   :  { %13940 = vmatprep.mubr.msk.f32.mxu1 %vm4870_vm4, %v16432_v36 }
0x4c12   :  { %13941 = vmatmul.mubr.msk.f32.gmra.mrb[242].mxu1 %vm4870_vm4, %v16439_v37 }
0x4c13   :  { %13943 = vmatprep.mubr.msk.f32.mxu1 %vm4870_vm4, %v16442_v32 }
0x4c16   :  { %13944 = vmatmul.mubr.msk.f32.gmra.mrb[244].mxu1 %vm4870_vm4, %v16448_v45 }
0x4cdd   :  { %v13936_v5 = vpop.f32.mrb[238].mxu1 }
0x4cde   :  { %v10391_v28 = vadd.f32 %v15081_v15, %v13936_v5  ;;  %v10385_v54 = vpop.f32.mrb[239].mxu1 }
0x4cdf   :  { %v10386_v39 = vadd.f32 %v15082_v47, %v10385_v54 }
0x4ce0   :  { %v10425_v56 = vmax.f32 %v10391_v28, 0.0 }
0x4ce1   :  { %v10424_v0 = vmax.f32 %v10386_v39, 0.0  ;;  %v13939_v62 = vpop.f32.mrb[240].mxu1 }
0x4ce2   :  { %v10401_v3 = vadd.f32 %v15083_v12, %v13939_v62  ;;  %v10395_v61 = vpop.f32.mrb[241].mxu1 }
0x4ce3   :  { %v14904_v50 = vpack.c.bf16 %v10425_v56, %v10424_v0  ;;  %v10396_v9 = vadd.f32 %v15084_v41, %v10395_v61 }
0x4ce4   :  { %v10427_v20 = vmax.f32 %v10401_v3, 0.0 }
0x4ce5   :  { %v10426_v63 = vmax.f32 %v10396_v9, 0.0  ;;  %v13942_v43 = vpop.f32.mrb[242].mxu1  ;;  %14905 = vmatprep.subr.bf16.mxu0 %v14904_v50 }
0x4ce6   :  { %v10411_v17 = vadd.f32 %v15085_v34, %v13942_v43  ;;  %v10405_v29 = vpop.f32.mrb[243].mxu1  ;;  %14907 = vmatpush3.bf16.msra.mxu0 %v14904_v50 }
0x4ce7   :  { %v14908_v46 = vpack.c.bf16 %v10427_v20, %v10426_v63  ;;  %v10406_v58 = vadd.f32 %v15086_v51, %v10405_v29 }
0x4ce8   :  { %v10429_v59 = vmax.f32 %v10411_v17, 0.0 }
0x4ce9   :  { %v10428_v60 = vmax.f32 %v10406_v58, 0.0  ;;  %v13945_v6 = vpop.f32.mrb[244].mxu1  ;;  %14909 = vmatprep.subr.bf16.mxu0 %v14908_v46 }
0x4cea   :  { %v10421_v13 = vadd.f32 %v15087_v7, %v13945_v6  ;;  %v10415_v14 = vpop.f32.mrb[245].mxu1  ;;  %14911 = vmatpush3.bf16.msra.mxu0 %v14908_v46 }
0x4ceb   :  { %v14912_v21 = vpack.c.bf16 %v10429_v59, %v10428_v60  ;;  %v10416_v26 = vadd.f32 %v15088_v23, %v10415_v14 }
0x4cec   :  { %v10431_v1 = vmax.f32 %v10421_v13, 0.0 }
0x4ced   :  { %v10430_v11 = vmax.f32 %v10416_v26, 0.0  ;;  %14913 = vmatprep.subr.bf16.mxu0 %v14912_v21 }
0x4cee   :  { %14915 = vmatpush3.bf16.msra.mxu0 %v14912_v21 }
0x4cef   :  { %v14916_v30 = vpack.c.bf16 %v10431_v1, %v10430_v11 }
0x4cf1   :  { %14917 = vmatprep.subr.bf16.mxu0 %v14916_v30 }
0x4cf2   :  { %14919 = vmatpush3.bf16.msra.mxu0 %v14916_v30 }
0x4cf5   :  { %13963 = vmatmul.mubr.msk.f32.vlgmr.msra.gmra.mrb[224].mxu0 %vm4870_vm4, %v16415_v42 }
0x4cf6   :  { %13965 = vmatprep.mubr.msk.f32.mxu0 %vm4870_vm4, %v16418_v19 }
0x4cf9   :  { %13966 = vmatmul.mubr.msk.f32.gmra.mrb[226].mxu0 %vm4870_vm4, %v16429_v48 }
0x4cfa   :  { %13968 = vmatprep.mubr.msk.f32.mxu0 %vm4870_vm4, %v16432_v36 }
0x4cfd   :  { %13969 = vmatmul.mubr.msk.f32.gmra.mrb[228].mxu0 %vm4870_vm4, %v16439_v37 }
0x4cfe   :  { %13971 = vmatprep.mubr.msk.f32.mxu0 %vm4870_vm4, %v16442_v32 }
0x4d01   :  { %13972 = vmatmul.mubr.msk.f32.gmra.mrb[230].mxu0 %vm4870_vm4, %v16448_v45 }
0x4dc8   :  { %v13964_v42 = vpop.f32.mrb[224].mxu0 }
0x4dc9   :  { %v10504_v49 = vadd.f32 %v15081_v15, %v13964_v42  ;;  %v10498_v19 = vpop.f32.mrb[225].mxu0 }
0x4dca   :  { %v10499_v55 = vadd.f32 %v15082_v47, %v10498_v19 }
0x4dcb   :  { %v10538_v2 = vmax.f32 %v10504_v49, 0.0 }
0x4dcc   :  { %v10537_v48 = vmax.f32 %v10499_v55, 0.0  ;;  %v13967_v57 = vpop.f32.mrb[226].mxu0 }
0x4dcd   :  { %v10546_v36 = vadd.f32 %v15081_v15, %v10538_v2  ;;  %v10514_v31 = vadd.f32 %v15083_v12, %v13967_v57  ;;  %v10508_v33 = vpop.f32.mrb[227].mxu0 }
0x4dce   :  { %v10545_v37 = vadd.f32 %v15082_v47, %v10537_v48  ;;  %v10509_v35 = vadd.f32 %v15084_v41, %v10508_v33 }
0x4dcf   :  { %10554 = vst.msk [vmem:[%s15837_s5 + $0x8] sm:$0xff] %vm3828_vm9, %v10546_v36  ;;  %v10540_v32 = vmax.f32 %v10514_v31, 0.0 }
0x4dd0   :  { %10553 = vst.msk [vmem:[%s15837_s5] sm:$0xff] %vm3828_vm9, %v10545_v37  ;;  %v10539_v45 = vmax.f32 %v10509_v35, 0.0  ;;  %v13970_v25 = vpop.f32.mrb[228].mxu0 }
0x4dd1   :  { %v10548_v10 = vadd.f32 %v15083_v12, %v10540_v32  ;;  %v10524_v22 = vadd.f32 %v15085_v34, %v13970_v25  ;;  %v10518_v40 = vpop.f32.mrb[229].mxu0 }
0x4dd2   :  { %v10547_v38 = vadd.f32 %v15084_v41, %v10539_v45  ;;  %v10519_v24 = vadd.f32 %v15086_v51, %v10518_v40 }
0x4dd3   :  { %10556 = vst.msk [vmem:[%s15837_s5 + $0x18] sm:$0xff] %vm3828_vm9, %v10548_v10  ;;  %v10542_v8 = vmax.f32 %v10524_v22, 0.0 }
0x4dd4   :  { %10555 = vst.msk [vmem:[%s15837_s5 + $0x10] sm:$0xff] %vm3828_vm9, %v10547_v38  ;;  %v10541_v4 = vmax.f32 %v10519_v24, 0.0  ;;  %v13973_v18 = vpop.f32.mrb[230].mxu0 }
0x4dd5   :  { %v10550_v16 = vadd.f32 %v15085_v34, %v10542_v8  ;;  %v10534_v44 = vadd.f32 %v15087_v7, %v13973_v18  ;;  %v10528_v52 = vpop.f32.mrb[231].mxu0 }
0x4dd6   :  { %v10549_v27 = vadd.f32 %v15086_v51, %v10541_v4  ;;  %v10529_v53 = vadd.f32 %v15088_v23, %v10528_v52 }
0x4dd7   :  { %10558 = vst.msk [vmem:[%s15837_s5 + $0x28] sm:$0xff] %vm3828_vm9, %v10550_v16  ;;  %v10544_v5 = vmax.f32 %v10534_v44, 0.0 }
0x4dd8   :  { %10557 = vst.msk [vmem:[%s15837_s5 + $0x20] sm:$0xff] %vm3828_vm9, %v10549_v27  ;;  %v10543_v15 = vmax.f32 %v10529_v53, 0.0 }
0x4dd9   :  { %v10552_v28 = vadd.f32 %v15087_v7, %v10544_v5 }
0x4dda   :  { %v10551_v54 = vadd.f32 %v15088_v23, %v10543_v15 }
0x4ddb   :  { %10560 = vst.msk [vmem:[%s15837_s5 + $0x38] sm:$0xff] %vm3828_vm9, %v10552_v28 }
0x4ddc   :  { %10559 = vst.msk [vmem:[%s15837_s5 + $0x30] sm:$0xff] %vm3828_vm9, %v10551_v54 }
0x4ddd   :  { %10573 = vsyncpa [#allocation5], 1 }
0x4dde   :  { %10574 = vsyncpa [#allocation7], 1 }
0x4ddf   :  { %10575 = vsyncpa [#allocation10], 1 }
0x4de0   :  { %10576 = vsyncpa [#allocation13], 1 }
0x4de1   :  { %10577 = vsyncpa [#allocation16], 1 }
0x4de2   :  { %10578 = vsyncpa [#allocation19], 1 }
0x4de3   :  { %10579 = vsyncpa [#allocation22], 1 }
0x4de4   :  { %10580 = vsyncpa [#allocation25], 1 }

</bundles_post_ra>
